<compile_context>
chip_gen: v5e
topology: v5e:2x2
jax: 0.10.0
libtpu: 0.0.40
codegen_flags: <defaults>
</compile_context>

<pallas_src>
import jax
import jax.numpy as jnp
from jax.experimental import pallas as pl
from jax.experimental.pallas import tpu as pltpu

LEAKY_SLOPE = 0.2
BN_EPS = 1e-5

# Tiling targets (all multiples of the (8, 128) vreg tile).
TM = 512                         # rows per matmul M-tile
TK = 1024                        # contraction chunk per K grid step
TP = 1024                        # rows per elementwise tile
FC_TK = 2048                     # contraction chunk for the FC-head GEMV
VMEM_LIMIT = 48 * 1024 * 1024    # leaves headroom inside v7x's 64 MiB VMEM


# ---------------------------------------------------------------------------
# Small shape helpers
# ---------------------------------------------------------------------------
def _round_up(x, m):
    return ((x + m - 1) // m) * m


def _pick_tile(dim, target):
    """Return (tile, padded_dim): whole dim as one block if it fits,
    otherwise `target`-sized tiles over a zero-padded dim."""
    if dim <= target:
        return dim, dim
    return target, _round_up(dim, target)


def _pad2(x, rows, cols):
    r, c = x.shape
    if r == rows and c == cols:
        return x
    return jnp.pad(x, ((0, rows - r), (0, cols - c)))


# ---------------------------------------------------------------------------
# Pallas kernels
# ---------------------------------------------------------------------------
def _mm_bias_leaky_kernel(a_ref, b_ref, bias_ref, o_ref, acc_ref):
    """Tiled bf16 matmul (grid = (M, K), K last) + bias + LeakyReLU(0.2)."""
    @pl.when(pl.program_id(1) == 0)
    def _():
        acc_ref[...] = jnp.zeros_like(acc_ref)

    acc_ref[...] += jnp.dot(a_ref[...], b_ref[...],
                            preferred_element_type=jnp.float32)

    @pl.when(pl.program_id(1) == pl.num_programs(1) - 1)
    def _():
        y = acc_ref[...] + bias_ref[...]
        o_ref[...] = jnp.where(y > 0, y, LEAKY_SLOPE * y).astype(o_ref.dtype)


def _mm_stats_kernel(a_ref, b_ref, o_ref, stats_ref, acc_ref):
    """Tiled bf16 matmul; final-K epilogue also emits per-channel partial
    sum / sum-of-squares for the fused BatchNorm that follows."""
    @pl.when(pl.program_id(1) == 0)
    def _():
        acc_ref[...] = jnp.zeros_like(acc_ref)

    acc_ref[...] += jnp.dot(a_ref[...], b_ref[...],
                            preferred_element_type=jnp.float32)

    @pl.when(pl.program_id(1) == pl.num_programs(1) - 1)
    def _():
        y = acc_ref[...]
        o_ref[...] = y.astype(o_ref.dtype)
        st = jnp.concatenate(
            [jnp.sum(y, axis=0, keepdims=True),
             jnp.sum(y * y, axis=0, keepdims=True)], axis=0)     # (2, N) f32
        stats_ref[...] = st.reshape(stats_ref.shape)


def _scale_shift_lrelu_kernel(x_ref, scale_ref, shift_ref, o_ref):
    """Row-tiled fused BatchNorm (precomputed scale/shift) + LeakyReLU."""
    y = x_ref[...].astype(jnp.float32) * scale_ref[...] + shift_ref[...]
    o_ref[...] = jnp.where(y > 0, y, LEAKY_SLOPE * y).astype(o_ref.dtype)


def _fc_head_kernel(x_ref, w1_ref, b1_ref, w2_ref, b2_ref, o_ref, acc_ref):
    """Fused Linear(feat,128pad) -> Linear(128pad,128pad) -> Sigmoid GEMV.
    fc1 is K-tiled (grid over K); fc2 + sigmoid run in the final-K epilogue.
    Real outputs live in column 0 / the first 100 hidden lanes."""
    @pl.when(pl.program_id(0) == 0)
    def _():
        acc_ref[...] = jnp.zeros_like(acc_ref)

    acc_ref[...] += jnp.dot(x_ref[...], w1_ref[...],
                            preferred_element_type=jnp.float32)

    @pl.when(pl.program_id(0) == pl.num_programs(0) - 1)
    def _():
        y1 = acc_ref[...] + b1_ref[...]                       # (1,128) f32
        y2 = jnp.dot(y1, w2_ref[...],
                     preferred_element_type=jnp.float32) + b2_ref[...]
        o_ref[...] = jax.nn.sigmoid(y2).astype(o_ref.dtype)


# ---------------------------------------------------------------------------
# pallas_call wrappers
# ---------------------------------------------------------------------------
def matmul_bias_leaky(a, b, bias):
    """(M,K)bf16 @ (K,N)bf16 + bias(N,) -> LeakyReLU(0.2), bf16 output."""
    M, K = a.shape
    _, N = b.shape
    tm, Mp = _pick_tile(M, TM)
    tk, Kp = _pick_tile(K, TK)
    a = _pad2(a, Mp, Kp)
    b = _pad2(b, Kp, N)
    out = pl.pallas_call(
        _mm_bias_leaky_kernel,
        out_shape=jax.ShapeDtypeStruct((Mp, N), jnp.bfloat16),
        grid_spec=pltpu.PrefetchScalarGridSpec(
            num_scalar_prefetch=0,
            grid=(Mp // tm, Kp // tk),
            in_specs=[pl.BlockSpec((tm, tk), lambda i, k: (i, k)),
                      pl.BlockSpec((tk, N), lambda i, k: (k, 0)),
                      pl.BlockSpec((1, N), lambda i, k: (0, 0))],
            out_specs=pl.BlockSpec((tm, N), lambda i, k: (i, 0)),
            scratch_shapes=[pltpu.VMEM((tm, N), jnp.float32)],
        ),
        compiler_params=pltpu.CompilerParams(
            dimension_semantics=("parallel", "arbitrary"),
            vmem_limit_bytes=VMEM_LIMIT),
    )(a, b, bias.reshape(1, N).astype(jnp.float32))
    return out[:M] if Mp != M else out


def matmul_stats(a, b):
    """Conv matmul for the BN layers: returns (h bf16, col_sum, col_sumsq)."""
    M, K = a.shape
    _, N = b.shape
    tm, Mp = _pick_tile(M, TM)
    tk, Kp = _pick_tile(K, TK)
    a = _pad2(a, Mp, Kp)
    b = _pad2(b, Kp, N)
    nm = Mp // tm
    h, stats = pl.pallas_call(
        _mm_stats_kernel,
        out_shape=(jax.ShapeDtypeStruct((Mp, N), jnp.bfloat16),
                   jax.ShapeDtypeStruct((nm, 2, N), jnp.float32)),
        grid_spec=pltpu.PrefetchScalarGridSpec(
            num_scalar_prefetch=0,
            grid=(nm, Kp // tk),
            in_specs=[pl.BlockSpec((tm, tk), lambda i, k: (i, k)),
                      pl.BlockSpec((tk, N), lambda i, k: (k, 0))],
            out_specs=[pl.BlockSpec((tm, N), lambda i, k: (i, 0)),
                       pl.BlockSpec((1, 2, N), lambda i, k: (i, 0, 0))],
            scratch_shapes=[pltpu.VMEM((tm, N), jnp.float32)],
        ),
        compiler_params=pltpu.CompilerParams(
            dimension_semantics=("parallel", "arbitrary"),
            vmem_limit_bytes=VMEM_LIMIT),
    )(a, b)
    if Mp != M:                       # zero pad rows contribute 0 to the sums
        h = h[:M]
    col_sum = jnp.sum(stats[:, 0, :], axis=0)       # (N,)
    col_sumsq = jnp.sum(stats[:, 1, :], axis=0)     # (N,)
    return h, col_sum, col_sumsq


def scale_shift_lrelu(h, scale, shift):
    """y = h*scale + shift (per channel, f32 math) then LeakyReLU(0.2)."""
    P, C = h.shape
    tp, Pp = _pick_tile(P, TP)
    hp = h if Pp == P else jnp.pad(h, ((0, Pp - P), (0, 0)))
    out = pl.pallas_call(
        _scale_shift_lrelu_kernel,
        out_shape=jax.ShapeDtypeStruct((Pp, C), jnp.bfloat16),
        grid_spec=pltpu.PrefetchScalarGridSpec(
            num_scalar_prefetch=0,
            grid=(Pp // tp,),
            in_specs=[pl.BlockSpec((tp, C), lambda i: (i, 0)),
                      pl.BlockSpec((1, C), lambda i: (0, 0)),
                      pl.BlockSpec((1, C), lambda i: (0, 0))],
            out_specs=pl.BlockSpec((tp, C), lambda i: (i, 0)),
        ),
        compiler_params=pltpu.CompilerParams(
            dimension_semantics=("parallel",),
            vmem_limit_bytes=VMEM_LIMIT),
    )(hp, scale.reshape(1, C).astype(jnp.float32),
      shift.reshape(1, C).astype(jnp.float32))
    return out[:P] if Pp != P else out


def fc_head(flat, w1p, b1p, w2p, b2p):
    """Fused Linear(feat,100) -> Linear(100,1) -> Sigmoid (lane-dense 128)."""
    K = w1p.shape[0]
    tk, Kp = _pick_tile(K, FC_TK)
    w1 = _pad2(w1p, Kp, 128)
    x = _pad2(flat.astype(jnp.bfloat16), 1, Kp)
    out = pl.pallas_call(
        _fc_head_kernel,
        out_shape=jax.ShapeDtypeStruct((1, 128), jnp.float32),
        grid_spec=pltpu.PrefetchScalarGridSpec(
            num_scalar_prefetch=0,
            grid=(Kp // tk,),
            in_specs=[pl.BlockSpec((1, tk), lambda k: (0, k)),
                      pl.BlockSpec((tk, 128), lambda k: (k, 0)),
                      pl.BlockSpec((1, 128), lambda k: (0, 0)),
                      pl.BlockSpec((128, 128), lambda k: (0, 0)),
                      pl.BlockSpec((1, 128), lambda k: (0, 0))],
            out_specs=pl.BlockSpec((1, 128), lambda k: (0, 0)),
            scratch_shapes=[pltpu.VMEM((1, 128), jnp.float32)],
        ),
        compiler_params=pltpu.CompilerParams(
            dimension_semantics=("arbitrary",),
            vmem_limit_bytes=VMEM_LIMIT),
    )(x, w1, b1p, w2p, b2p)
    return out[0, 0:1]


# ---------------------------------------------------------------------------
# Glue: NHWC im2col for Conv2d(k=4, s=2, p=1)  (no NCHW transposes per layer)
# ---------------------------------------------------------------------------
def im2col_nhwc(x, kh=4, kw=4, stride=2, pad=1):
    """x: (N, H, W, C) -> (patches (N*Ho*Wo, kh*kw*C), Ho, Wo)."""
    N, H, W, C = x.shape
    Ho = (H + 2 * pad - kh) // stride + 1
    Wo = (W + 2 * pad - kw) // stride + 1
    xp = jnp.pad(x, ((0, 0), (pad, pad), (pad, pad), (0, 0)))
    cols = []
    for i in range(kh):
        for j in range(kw):
            cols.append(xp[:, i:i + stride * (Ho - 1) + 1:stride,
                              j:j + stride * (Wo - 1) + 1:stride, :])
    col = jnp.stack(cols, axis=3)                  # (N, Ho, Wo, kh*kw, C)
    return col.reshape(N * Ho * Wo, kh * kw * C), Ho, Wo


# ---------------------------------------------------------------------------
# Discriminator forward (batch=1: torch's x.view(-1) folds batch into the FC)
# ---------------------------------------------------------------------------
def discriminator_forward(params, x_nchw):
    n = x_nchw.shape[0]
    # torch's x.view(-1) + Linear(64*32*512, 100) only makes sense for N == 1.
    assert n == 1, "Discriminator.forward requires batch size 1"
    x = jnp.transpose(x_nchw, (0, 2, 3, 1)).astype(jnp.bfloat16)   # NHWC bf16

    # In: Conv2d(4->64, k4 s2 p1) + LeakyReLU(0.2)
    p, ho, wo = im2col_nhwc(x)
    h = matmul_bias_leaky(p, params["w1"], params["b1"])
    x = h.reshape(n, ho, wo, -1)

    # main: 3 x (Conv2d k4 s2 p1 + BatchNorm2d(batch stats) + LeakyReLU(0.2))
    for i in (2, 3, 4):
        p, ho, wo = im2col_nhwc(x)
        P = p.shape[0]
        h, s, ss = matmul_stats(p, params[f"w{i}"])
        mean = s / P
        var = jnp.maximum(ss / P - mean * mean, 0.0)   # biased var (train mode)
        scale = params[f"gamma{i}"] * jax.lax.rsqrt(var + BN_EPS)
        # NOTE: the conv bias b{i} cancels exactly under batch-stat BatchNorm.
        shift = params[f"beta{i}"] - mean * scale
        h = scale_shift_lrelu(h, scale, shift)
        x = h.reshape(n, ho, wo, -1)

    # Out: view(-1) (NCHW order, done once) -> Linear -> Linear -> Sigmoid
    flat = jnp.transpose(x, (0, 3, 1, 2)).reshape(1, -1)
    return fc_head(flat, params["wfc1p"], params["bfc1p"],
                   params["wfc2p"], params["bfc2p"])


# ---------------------------------------------------------------------------
# Deterministic parameter init.  Conv weights are created in PyTorch
# (Cout, Cin, 4, 4) layout, then re-laid-out once to the NHWC im2col order
# (kh*kw*Cin, Cout) and stored bf16.  The FC head is padded lane-dense.
# ---------------------------------------------------------------------------
def init_params(key, h=64, w=32):
    chans = [4, 64, 128, 256, 512]
    params = {}
    keys = jax.random.split(key, 24)
    ki = 0
    for i in range(1, 5):
        cin, cout = chans[i - 1], chans[i]
        fan_in = cin * 16
        wt = jax.random.normal(keys[ki], (cout, cin, 4, 4), jnp.float32); ki += 1
        wt = wt / jnp.sqrt(jnp.float32(fan_in))
        # (Cout,Cin,kh,kw) -> (kh,kw,Cin,Cout) -> (kh*kw*Cin, Cout)
        params[f"w{i}"] = (wt.transpose(2, 3, 1, 0)
                           .reshape(fan_in, cout).astype(jnp.bfloat16))
        params[f"b{i}"] = 0.01 * jax.random.normal(keys[ki], (cout,), jnp.float32)
        ki += 1
        if i >= 2:
            params[f"gamma{i}"] = 1.0 + 0.1 * jax.random.normal(
                keys[ki], (cout,), jnp.float32); ki += 1
            params[f"beta{i}"] = 0.1 * jax.random.normal(
                keys[ki], (cout,), jnp.float32); ki += 1
    feat = 512 * (h // 16) * (w // 16)
    wfc1 = jax.random.normal(
        keys[ki], (feat, 100), jnp.float32) / jnp.sqrt(jnp.float32(feat)); ki += 1
    bfc1 = 0.01 * jax.random.normal(keys[ki], (100,), jnp.float32); ki += 1
    wfc2 = jax.random.normal(keys[ki], (100, 1), jnp.float32) / 10.0; ki += 1
    bfc2 = 0.01 * jax.random.normal(keys[ki], (1,), jnp.float32); ki += 1
    # Lane-dense FC head: hidden 100 -> 128 (zero pad), fc2 -> (128, 128) with
    # the real column at index 0.
    params["wfc1p"] = jnp.pad(wfc1, ((0, 0), (0, 28))).astype(jnp.bfloat16)
    params["bfc1p"] = jnp.pad(bfc1, (0, 28)).reshape(1, 128)
    params["wfc2p"] = jnp.pad(wfc2, ((0, 28), (0, 127)))
    params["bfc2p"] = jnp.pad(bfc2, (0, 127)).reshape(1, 128)
    return params


if __name__ == "__main__":
    key = jax.random.PRNGKey(0)
    pkey, xkey = jax.random.split(key)
    H, W = 64, 32            # small analogue of the original 1024x512 input
    params = init_params(pkey, H, W)
    x = jax.random.normal(xkey, (1, 4, H, W), jnp.float32)

    fwd = jax.jit(discriminator_forward)
    out = jax.block_until_ready(fwd(params, x))

    assert out.shape == (1,), out.shape
    assert bool(jnp.isfinite(out).all())
    assert 0.0 <= float(out[0]) <= 1.0
    print("KERNEL_OK")
</pallas_src>

<mosaic_0001>
module attributes {stable_mosaic.version = 11 : i64} {
  func.func @_mm_bias_leaky_kernel(%arg0: i32, %arg1: i32, %arg2: memref<512x64xbf16, #tpu.memory_space<vmem>>, %arg3: memref<64x64xbf16, #tpu.memory_space<vmem>>, %arg4: memref<1x64xf32, #tpu.memory_space<vmem>>, %arg5: memref<512x64xbf16, #tpu.memory_space<vmem>>, %arg6: memref<512x64xf32, #tpu.memory_space<vmem>>) attributes {dimension_semantics = [#tpu.dimension_semantics<parallel>, #tpu.dimension_semantics<arbitrary>], iteration_bounds = array<i64: 1, 1>, scalar_prefetch = 0 : i64, scratch_operands = 1 : i64, tpu.core_type = #tpu.core_type<tc>, window_params = [{transform_indices = @transform_0, window_bounds = array<i64: 512, 64>}, {transform_indices = @transform_1, window_bounds = array<i64: 64, 64>}, {pipeline_mode = #tpu.pipeline_mode<synchronous>, transform_indices = @transform_2, window_bounds = array<i64: 1, 64>}, {transform_indices = @transform_3, window_bounds = array<i64: 512, 64>}]} {
    %c0_i32 = arith.constant 0 : i32
    %0 = arith.cmpi eq, %arg1, %c0_i32 : i32
    %1 = arith.extui %0 : i1 to i32
    %c0_i32_0 = arith.constant 0 : i32
    %2 = arith.cmpi ne, %1, %c0_i32_0 : i32
    scf.if %2 {
      %cst_10 = arith.constant 0.000000e+00 : f32
      %12 = vector.broadcast %cst_10 : f32 to vector<512x64xf32>
      %c0_11 = arith.constant 0 : index
      %c0_12 = arith.constant 0 : index
      %13 = vector.load %arg6[%c0_11, %c0_12] : memref<512x64xf32, #tpu.memory_space<vmem>>, vector<512x64xf32>
      tpu.vector_store %arg6[%c0_11, %c0_12], %12 {strides = array<i32>} : memref<512x64xf32, #tpu.memory_space<vmem>>, vector<512x64xf32>,
    } else {
    }
    %c0 = arith.constant 0 : index
    %c0_1 = arith.constant 0 : index
    %3 = vector.load %arg6[%c0, %c0_1] : memref<512x64xf32, #tpu.memory_space<vmem>>, vector<512x64xf32>
    %c0_2 = arith.constant 0 : index
    %c0_3 = arith.constant 0 : index
    %4 = vector.load %arg2[%c0_2, %c0_3] : memref<512x64xbf16, #tpu.memory_space<vmem>>, vector<512x64xbf16>
    %c0_4 = arith.constant 0 : index
    %c0_5 = arith.constant 0 : index
    %5 = vector.load %arg3[%c0_4, %c0_5] : memref<64x64xbf16, #tpu.memory_space<vmem>>, vector<64x64xbf16>
    %cst = arith.constant dense<0.000000e+00> : vector<512x64xf32>
    %6 = tpu.matmul %4, %5, %cst {dimension_numbers = #tpu.dot_dimension_numbers<[1], [0], [0], [1], [0, 0, 1, 1], [], []>} : vector<512x64xbf16>, vector<64x64xbf16>, vector<512x64xf32> -> vector<512x64xf32>
    %7 = arith.addf %3, %6 : vector<512x64xf32>
    %c0_6 = arith.constant 0 : index
    %c0_7 = arith.constant 0 : index
    %8 = vector.load %arg6[%c0_6, %c0_7] : memref<512x64xf32, #tpu.memory_space<vmem>>, vector<512x64xf32>
    tpu.vector_store %arg6[%c0_6, %c0_7], %7 {strides = array<i32>} : memref<512x64xf32, #tpu.memory_space<vmem>>, vector<512x64xf32>,
    %c0_i32_8 = arith.constant 0 : i32
    %9 = arith.cmpi eq, %arg1, %c0_i32_8 : i32
    %10 = arith.extui %9 : i1 to i32
    %c0_i32_9 = arith.constant 0 : i32
    %11 = arith.cmpi ne, %10, %c0_i32_9 : i32
    scf.if %11 {
      %c0_10 = arith.constant 0 : index
      %c0_11 = arith.constant 0 : index
      %12 = vector.load %arg6[%c0_10, %c0_11] : memref<512x64xf32, #tpu.memory_space<vmem>>, vector<512x64xf32>
      %c0_12 = arith.constant 0 : index
      %c0_13 = arith.constant 0 : index
      %13 = vector.load %arg4[%c0_12, %c0_13] : memref<1x64xf32, #tpu.memory_space<vmem>>, vector<1x64xf32>
      %14 = vector.broadcast %13 : vector<1x64xf32> to vector<512x64xf32>
      %15 = arith.addf %12, %14 : vector<512x64xf32>
      %cst_14 = arith.constant 0.000000e+00 : f32
      %16 = vector.broadcast %cst_14 : f32 to vector<512x64xf32>
      %17 = arith.cmpf ogt, %15, %16 : vector<512x64xf32>
      %cst_15 = arith.constant 2.000000e-01 : f32
      %18 = vector.broadcast %cst_15 : f32 to vector<512x64xf32>
      %19 = arith.mulf %18, %15 : vector<512x64xf32>
      %20 = arith.select %17, %15, %19 : vector<512x64xi1>, vector<512x64xf32>
      %21 = arith.truncf %20 : vector<512x64xf32> to vector<512x64xbf16>
      %c0_16 = arith.constant 0 : index
      %c0_17 = arith.constant 0 : index
      %22 = vector.load %arg5[%c0_16, %c0_17] : memref<512x64xbf16, #tpu.memory_space<vmem>>, vector<512x64xbf16>
      tpu.vector_store %arg5[%c0_16, %c0_17], %21 {strides = array<i32>} : memref<512x64xbf16, #tpu.memory_space<vmem>>, vector<512x64xbf16>,
    } else {
    }
    return
  }
  func.func @transform_0(%arg0: i32, %arg1: i32) -> (i32, i32) {
    %c0_i32 = arith.constant 0 : i32
    return %arg0, %arg1 : i32, i32
  }
  func.func @transform_1(%arg0: i32, %arg1: i32) -> (i32, i32) {
    %c0_i32 = arith.constant 0 : i32
    %c0_i32_0 = arith.constant 0 : i32
    return %arg1, %c0_i32 : i32, i32
  }
  func.func @transform_2(%arg0: i32, %arg1: i32) -> (i32, i32) {
    %c0_i32 = arith.constant 0 : i32
    %c0_i32_0 = arith.constant 0 : i32
    %c0_i32_1 = arith.constant 0 : i32
    return %c0_i32, %c0_i32_0 : i32, i32
  }
  func.func @transform_3(%arg0: i32, %arg1: i32) -> (i32, i32) {
    %c0_i32 = arith.constant 0 : i32
    %c0_i32_0 = arith.constant 0 : i32
    return %arg0, %c0_i32 : i32, i32
  }
}

module attributes {stable_mosaic.version = 11 : i64} {
  func.func @_mm_stats_kernel(%arg0: i32, %arg1: i32, %arg2: memref<128x1024xbf16, #tpu.memory_space<vmem>>, %arg3: memref<1024x128xbf16, #tpu.memory_space<vmem>>, %arg4: memref<128x128xbf16, #tpu.memory_space<vmem>>, %arg5: memref<1x2x128xf32, #tpu.memory_space<vmem>>, %arg6: memref<128x128xf32, #tpu.memory_space<vmem>>) attributes {dimension_semantics = [#tpu.dimension_semantics<parallel>, #tpu.dimension_semantics<arbitrary>], iteration_bounds = array<i64: 1, 1>, scalar_prefetch = 0 : i64, scratch_operands = 1 : i64, tpu.core_type = #tpu.core_type<tc>, window_params = [{transform_indices = @transform_0, window_bounds = array<i64: 128, 1024>}, {transform_indices = @transform_1, window_bounds = array<i64: 1024, 128>}, {transform_indices = @transform_2, window_bounds = array<i64: 128, 128>}, {transform_indices = @transform_3, window_bounds = array<i64: 1, 2, 128>}]} {
    %c0_i32 = arith.constant 0 : i32
    %0 = arith.cmpi eq, %arg1, %c0_i32 : i32
    %1 = arith.extui %0 : i1 to i32
    %c0_i32_0 = arith.constant 0 : i32
    %2 = arith.cmpi ne, %1, %c0_i32_0 : i32
    scf.if %2 {
      %cst_10 = arith.constant 0.000000e+00 : f32
      %12 = vector.broadcast %cst_10 : f32 to vector<128x128xf32>
      %c0_11 = arith.constant 0 : index
      %c0_12 = arith.constant 0 : index
      %13 = vector.load %arg6[%c0_11, %c0_12] : memref<128x128xf32, #tpu.memory_space<vmem>>, vector<128x128xf32>
      tpu.vector_store %arg6[%c0_11, %c0_12], %12 {strides = array<i32>} : memref<128x128xf32, #tpu.memory_space<vmem>>, vector<128x128xf32>,
    } else {
    }
    %c0 = arith.constant 0 : index
    %c0_1 = arith.constant 0 : index
    %3 = vector.load %arg6[%c0, %c0_1] : memref<128x128xf32, #tpu.memory_space<vmem>>, vector<128x128xf32>
    %c0_2 = arith.constant 0 : index
    %c0_3 = arith.constant 0 : index
    %4 = vector.load %arg2[%c0_2, %c0_3] : memref<128x1024xbf16, #tpu.memory_space<vmem>>, vector<128x1024xbf16>
    %c0_4 = arith.constant 0 : index
    %c0_5 = arith.constant 0 : index
    %5 = vector.load %arg3[%c0_4, %c0_5] : memref<1024x128xbf16, #tpu.memory_space<vmem>>, vector<1024x128xbf16>
    %cst = arith.constant dense<0.000000e+00> : vector<128x128xf32>
    %6 = tpu.matmul %4, %5, %cst {dimension_numbers = #tpu.dot_dimension_numbers<[1], [0], [0], [1], [0, 0, 1, 1], [], []>} : vector<128x1024xbf16>, vector<1024x128xbf16>, vector<128x128xf32> -> vector<128x128xf32>
    %7 = arith.addf %3, %6 : vector<128x128xf32>
    %c0_6 = arith.constant 0 : index
    %c0_7 = arith.constant 0 : index
    %8 = vector.load %arg6[%c0_6, %c0_7] : memref<128x128xf32, #tpu.memory_space<vmem>>, vector<128x128xf32>
    tpu.vector_store %arg6[%c0_6, %c0_7], %7 {strides = array<i32>} : memref<128x128xf32, #tpu.memory_space<vmem>>, vector<128x128xf32>,
    %c0_i32_8 = arith.constant 0 : i32
    %9 = arith.cmpi eq, %arg1, %c0_i32_8 : i32
    %10 = arith.extui %9 : i1 to i32
    %c0_i32_9 = arith.constant 0 : i32
    %11 = arith.cmpi ne, %10, %c0_i32_9 : i32
    scf.if %11 {
      %c0_10 = arith.constant 0 : index
      %c0_11 = arith.constant 0 : index
      %12 = vector.load %arg6[%c0_10, %c0_11] : memref<128x128xf32, #tpu.memory_space<vmem>>, vector<128x128xf32>
      %13 = arith.truncf %12 : vector<128x128xf32> to vector<128x128xbf16>
      %c0_12 = arith.constant 0 : index
      %c0_13 = arith.constant 0 : index
      %14 = vector.load %arg4[%c0_12, %c0_13] : memref<128x128xbf16, #tpu.memory_space<vmem>>, vector<128x128xbf16>
      tpu.vector_store %arg4[%c0_12, %c0_13], %13 {strides = array<i32>} : memref<128x128xbf16, #tpu.memory_space<vmem>>, vector<128x128xbf16>,
      %cst_14 = arith.constant dense<0.000000e+00> : vector<128xf32>
      %15 = vector.multi_reduction <add>, %12, %cst_14 [0] : vector<128x128xf32> to vector<128xf32>
      %16 = vector.shape_cast %15 : vector<128xf32> to vector<1x128xf32>
      %17 = arith.mulf %12, %12 : vector<128x128xf32>
      %cst_15 = arith.constant dense<0.000000e+00> : vector<128xf32>
      %18 = vector.multi_reduction <add>, %17, %cst_15 [0] : vector<128x128xf32> to vector<128xf32>
      %19 = vector.shape_cast %18 : vector<128xf32> to vector<1x128xf32>
      %20 = tpu.concatenate %16, %19 in 0 : vector<1x128xf32>, vector<1x128xf32> -> vector<2x128xf32>
      %21 = vector.shape_cast %20 : vector<2x128xf32> to vector<1x2x128xf32>
      %c0_16 = arith.constant 0 : index
      %c0_17 = arith.constant 0 : index
      %c0_18 = arith.constant 0 : index
      %22 = vector.load %arg5[%c0_16, %c0_17, %c0_18] : memref<1x2x128xf32, #tpu.memory_space<vmem>>, vector<1x2x128xf32>
      tpu.vector_store %arg5[%c0_16, %c0_17, %c0_18], %21 {strides = array<i32>} : memref<1x2x128xf32, #tpu.memory_space<vmem>>, vector<1x2x128xf32>,
    } else {
    }
    return
  }
  func.func @transform_0(%arg0: i32, %arg1: i32) -> (i32, i32) {
    %c0_i32 = arith.constant 0 : i32
    return %arg0, %arg1 : i32, i32
  }
  func.func @transform_1(%arg0: i32, %arg1: i32) -> (i32, i32) {
    %c0_i32 = arith.constant 0 : i32
    %c0_i32_0 = arith.constant 0 : i32
    return %arg1, %c0_i32 : i32, i32
  }
  func.func @transform_2(%arg0: i32, %arg1: i32) -> (i32, i32) {
    %c0_i32 = arith.constant 0 : i32
    %c0_i32_0 = arith.constant 0 : i32
    return %arg0, %c0_i32 : i32, i32
  }
  func.func @transform_3(%arg0: i32, %arg1: i32) -> (i32, i32, i32) {
    %c0_i32 = arith.constant 0 : i32
    %c0_i32_0 = arith.constant 0 : i32
    %c0_i32_1 = arith.constant 0 : i32
    return %arg0, %c0_i32, %c0_i32_0 : i32, i32, i32
  }
}

module attributes {stable_mosaic.version = 11 : i64} {
  func.func @_scale_shift_lrelu_kernel(%arg0: i32, %arg1: memref<128x128xbf16, #tpu.memory_space<vmem>>, %arg2: memref<1x128xf32, #tpu.memory_space<vmem>>, %arg3: memref<1x128xf32, #tpu.memory_space<vmem>>, %arg4: memref<128x128xbf16, #tpu.memory_space<vmem>>) attributes {dimension_semantics = [#tpu.dimension_semantics<parallel>], iteration_bounds = array<i64: 1>, scalar_prefetch = 0 : i64, scratch_operands = 0 : i64, tpu.core_type = #tpu.core_type<tc>, window_params = [{transform_indices = @transform_0, window_bounds = array<i64: 128, 128>}, {pipeline_mode = #tpu.pipeline_mode<synchronous>, transform_indices = @transform_1, window_bounds = array<i64: 1, 128>}, {pipeline_mode = #tpu.pipeline_mode<synchronous>, transform_indices = @transform_2, window_bounds = array<i64: 1, 128>}, {transform_indices = @transform_3, window_bounds = array<i64: 128, 128>}]} {
    %c0 = arith.constant 0 : index
    %c0_0 = arith.constant 0 : index
    %0 = vector.load %arg1[%c0, %c0_0] : memref<128x128xbf16, #tpu.memory_space<vmem>>, vector<128x128xbf16>
    %1 = arith.extf %0 : vector<128x128xbf16> to vector<128x128xf32>
    %c0_1 = arith.constant 0 : index
    %c0_2 = arith.constant 0 : index
    %2 = vector.load %arg2[%c0_1, %c0_2] : memref<1x128xf32, #tpu.memory_space<vmem>>, vector<1x128xf32>
    %3 = vector.broadcast %2 : vector<1x128xf32> to vector<128x128xf32>
    %4 = arith.mulf %1, %3 : vector<128x128xf32>
    %c0_3 = arith.constant 0 : index
    %c0_4 = arith.constant 0 : index
    %5 = vector.load %arg3[%c0_3, %c0_4] : memref<1x128xf32, #tpu.memory_space<vmem>>, vector<1x128xf32>
    %6 = vector.broadcast %5 : vector<1x128xf32> to vector<128x128xf32>
    %7 = arith.addf %4, %6 : vector<128x128xf32>
    %cst = arith.constant 0.000000e+00 : f32
    %8 = vector.broadcast %cst : f32 to vector<128x128xf32>
    %9 = arith.cmpf ogt, %7, %8 : vector<128x128xf32>
    %cst_5 = arith.constant 2.000000e-01 : f32
    %10 = vector.broadcast %cst_5 : f32 to vector<128x128xf32>
    %11 = arith.mulf %10, %7 : vector<128x128xf32>
    %12 = arith.select %9, %7, %11 : vector<128x128xi1>, vector<128x128xf32>
    %13 = arith.truncf %12 : vector<128x128xf32> to vector<128x128xbf16>
    %c0_6 = arith.constant 0 : index
    %c0_7 = arith.constant 0 : index
    %14 = vector.load %arg4[%c0_6, %c0_7] : memref<128x128xbf16, #tpu.memory_space<vmem>>, vector<128x128xbf16>
    tpu.vector_store %arg4[%c0_6, %c0_7], %13 {strides = array<i32>} : memref<128x128xbf16, #tpu.memory_space<vmem>>, vector<128x128xbf16>,
    return
  }
  func.func @transform_0(%arg0: i32) -> (i32, i32) {
    %c0_i32 = arith.constant 0 : i32
    %c0_i32_0 = arith.constant 0 : i32
    return %arg0, %c0_i32 : i32, i32
  }
  func.func @transform_1(%arg0: i32) -> (i32, i32) {
    %c0_i32 = arith.constant 0 : i32
    %c0_i32_0 = arith.constant 0 : i32
    %c0_i32_1 = arith.constant 0 : i32
    return %c0_i32, %c0_i32_0 : i32, i32
  }
  func.func @transform_2(%arg0: i32) -> (i32, i32) {
    %c0_i32 = arith.constant 0 : i32
    %c0_i32_0 = arith.constant 0 : i32
    %c0_i32_1 = arith.constant 0 : i32
    return %c0_i32, %c0_i32_0 : i32, i32
  }
  func.func @transform_3(%arg0: i32) -> (i32, i32) {
    %c0_i32 = arith.constant 0 : i32
    %c0_i32_0 = arith.constant 0 : i32
    return %arg0, %c0_i32 : i32, i32
  }
}

module attributes {stable_mosaic.version = 11 : i64} {
  func.func @_scale_shift_lrelu_kernel(%arg0: i32, %arg1: memref<32x256xbf16, #tpu.memory_space<vmem>>, %arg2: memref<1x256xf32, #tpu.memory_space<vmem>>, %arg3: memref<1x256xf32, #tpu.memory_space<vmem>>, %arg4: memref<32x256xbf16, #tpu.memory_space<vmem>>) attributes {dimension_semantics = [#tpu.dimension_semantics<parallel>], iteration_bounds = array<i64: 1>, scalar_prefetch = 0 : i64, scratch_operands = 0 : i64, tpu.core_type = #tpu.core_type<tc>, window_params = [{transform_indices = @transform_0, window_bounds = array<i64: 32, 256>}, {pipeline_mode = #tpu.pipeline_mode<synchronous>, transform_indices = @transform_1, window_bounds = array<i64: 1, 256>}, {pipeline_mode = #tpu.pipeline_mode<synchronous>, transform_indices = @transform_2, window_bounds = array<i64: 1, 256>}, {transform_indices = @transform_3, window_bounds = array<i64: 32, 256>}]} {
    %c0 = arith.constant 0 : index
    %c0_0 = arith.constant 0 : index
    %0 = vector.load %arg1[%c0, %c0_0] : memref<32x256xbf16, #tpu.memory_space<vmem>>, vector<32x256xbf16>
    %1 = arith.extf %0 : vector<32x256xbf16> to vector<32x256xf32>
    %c0_1 = arith.constant 0 : index
    %c0_2 = arith.constant 0 : index
    %2 = vector.load %arg2[%c0_1, %c0_2] : memref<1x256xf32, #tpu.memory_space<vmem>>, vector<1x256xf32>
    %3 = vector.broadcast %2 : vector<1x256xf32> to vector<32x256xf32>
    %4 = arith.mulf %1, %3 : vector<32x256xf32>
    %c0_3 = arith.constant 0 : index
    %c0_4 = arith.constant 0 : index
    %5 = vector.load %arg3[%c0_3, %c0_4] : memref<1x256xf32, #tpu.memory_space<vmem>>, vector<1x256xf32>
    %6 = vector.broadcast %5 : vector<1x256xf32> to vector<32x256xf32>
    %7 = arith.addf %4, %6 : vector<32x256xf32>
    %cst = arith.constant 0.000000e+00 : f32
    %8 = vector.broadcast %cst : f32 to vector<32x256xf32>
    %9 = arith.cmpf ogt, %7, %8 : vector<32x256xf32>
    %cst_5 = arith.constant 2.000000e-01 : f32
    %10 = vector.broadcast %cst_5 : f32 to vector<32x256xf32>
    %11 = arith.mulf %10, %7 : vector<32x256xf32>
    %12 = arith.select %9, %7, %11 : vector<32x256xi1>, vector<32x256xf32>
    %13 = arith.truncf %12 : vector<32x256xf32> to vector<32x256xbf16>
    %c0_6 = arith.constant 0 : index
    %c0_7 = arith.constant 0 : index
    %14 = vector.load %arg4[%c0_6, %c0_7] : memref<32x256xbf16, #tpu.memory_space<vmem>>, vector<32x256xbf16>
    tpu.vector_store %arg4[%c0_6, %c0_7], %13 {strides = array<i32>} : memref<32x256xbf16, #tpu.memory_space<vmem>>, vector<32x256xbf16>,
    return
  }
  func.func @transform_0(%arg0: i32) -> (i32, i32) {
    %c0_i32 = arith.constant 0 : i32
    %c0_i32_0 = arith.constant 0 : i32
    return %arg0, %c0_i32 : i32, i32
  }
  func.func @transform_1(%arg0: i32) -> (i32, i32) {
    %c0_i32 = arith.constant 0 : i32
    %c0_i32_0 = arith.constant 0 : i32
    %c0_i32_1 = arith.constant 0 : i32
    return %c0_i32, %c0_i32_0 : i32, i32
  }
  func.func @transform_2(%arg0: i32) -> (i32, i32) {
    %c0_i32 = arith.constant 0 : i32
    %c0_i32_0 = arith.constant 0 : i32
    %c0_i32_1 = arith.constant 0 : i32
    return %c0_i32, %c0_i32_0 : i32, i32
  }
  func.func @transform_3(%arg0: i32) -> (i32, i32) {
    %c0_i32 = arith.constant 0 : i32
    %c0_i32_0 = arith.constant 0 : i32
    return %arg0, %c0_i32 : i32, i32
  }
}

module attributes {stable_mosaic.version = 11 : i64} {
  func.func @_mm_stats_kernel(%arg0: i32, %arg1: i32, %arg2: memref<32x1024xbf16, #tpu.memory_space<vmem>>, %arg3: memref<1024x256xbf16, #tpu.memory_space<vmem>>, %arg4: memref<32x256xbf16, #tpu.memory_space<vmem>>, %arg5: memref<1x2x256xf32, #tpu.memory_space<vmem>>, %arg6: memref<32x256xf32, #tpu.memory_space<vmem>>) attributes {dimension_semantics = [#tpu.dimension_semantics<parallel>, #tpu.dimension_semantics<arbitrary>], iteration_bounds = array<i64: 1, 2>, scalar_prefetch = 0 : i64, scratch_operands = 1 : i64, tpu.core_type = #tpu.core_type<tc>, window_params = [{transform_indices = @transform_0, window_bounds = array<i64: 32, 1024>}, {transform_indices = @transform_1, window_bounds = array<i64: 1024, 256>}, {transform_indices = @transform_2, window_bounds = array<i64: 32, 256>}, {transform_indices = @transform_3, window_bounds = array<i64: 1, 2, 256>}]} {
    %c0_i32 = arith.constant 0 : i32
    %0 = arith.cmpi eq, %arg1, %c0_i32 : i32
    %1 = arith.extui %0 : i1 to i32
    %c0_i32_0 = arith.constant 0 : i32
    %2 = arith.cmpi ne, %1, %c0_i32_0 : i32
    scf.if %2 {
      %cst_9 = arith.constant 0.000000e+00 : f32
      %12 = vector.broadcast %cst_9 : f32 to vector<32x256xf32>
      %c0_10 = arith.constant 0 : index
      %c0_11 = arith.constant 0 : index
      %13 = vector.load %arg6[%c0_10, %c0_11] : memref<32x256xf32, #tpu.memory_space<vmem>>, vector<32x256xf32>
      tpu.vector_store %arg6[%c0_10, %c0_11], %12 {strides = array<i32>} : memref<32x256xf32, #tpu.memory_space<vmem>>, vector<32x256xf32>,
    } else {
    }
    %c0 = arith.constant 0 : index
    %c0_1 = arith.constant 0 : index
    %3 = vector.load %arg6[%c0, %c0_1] : memref<32x256xf32, #tpu.memory_space<vmem>>, vector<32x256xf32>
    %c0_2 = arith.constant 0 : index
    %c0_3 = arith.constant 0 : index
    %4 = vector.load %arg2[%c0_2, %c0_3] : memref<32x1024xbf16, #tpu.memory_space<vmem>>, vector<32x1024xbf16>
    %c0_4 = arith.constant 0 : index
    %c0_5 = arith.constant 0 : index
    %5 = vector.load %arg3[%c0_4, %c0_5] : memref<1024x256xbf16, #tpu.memory_space<vmem>>, vector<1024x256xbf16>
    %cst = arith.constant dense<0.000000e+00> : vector<32x256xf32>
    %6 = tpu.matmul %4, %5, %cst {dimension_numbers = #tpu.dot_dimension_numbers<[1], [0], [0], [1], [0, 0, 1, 1], [], []>} : vector<32x1024xbf16>, vector<1024x256xbf16>, vector<32x256xf32> -> vector<32x256xf32>
    %7 = arith.addf %3, %6 : vector<32x256xf32>
    %c0_6 = arith.constant 0 : index
    %c0_7 = arith.constant 0 : index
    %8 = vector.load %arg6[%c0_6, %c0_7] : memref<32x256xf32, #tpu.memory_space<vmem>>, vector<32x256xf32>
    tpu.vector_store %arg6[%c0_6, %c0_7], %7 {strides = array<i32>} : memref<32x256xf32, #tpu.memory_space<vmem>>, vector<32x256xf32>,
    %c1_i32 = arith.constant 1 : i32
    %9 = arith.cmpi eq, %arg1, %c1_i32 : i32
    %10 = arith.extui %9 : i1 to i32
    %c0_i32_8 = arith.constant 0 : i32
    %11 = arith.cmpi ne, %10, %c0_i32_8 : i32
    scf.if %11 {
      %c0_9 = arith.constant 0 : index
      %c0_10 = arith.constant 0 : index
      %12 = vector.load %arg6[%c0_9, %c0_10] : memref<32x256xf32, #tpu.memory_space<vmem>>, vector<32x256xf32>
      %13 = arith.truncf %12 : vector<32x256xf32> to vector<32x256xbf16>
      %c0_11 = arith.constant 0 : index
      %c0_12 = arith.constant 0 : index
      %14 = vector.load %arg4[%c0_11, %c0_12] : memref<32x256xbf16, #tpu.memory_space<vmem>>, vector<32x256xbf16>
      tpu.vector_store %arg4[%c0_11, %c0_12], %13 {strides = array<i32>} : memref<32x256xbf16, #tpu.memory_space<vmem>>, vector<32x256xbf16>,
      %cst_13 = arith.constant dense<0.000000e+00> : vector<256xf32>
      %15 = vector.multi_reduction <add>, %12, %cst_13 [0] : vector<32x256xf32> to vector<256xf32>
      %16 = vector.shape_cast %15 : vector<256xf32> to vector<1x256xf32>
      %17 = arith.mulf %12, %12 : vector<32x256xf32>
      %cst_14 = arith.constant dense<0.000000e+00> : vector<256xf32>
      %18 = vector.multi_reduction <add>, %17, %cst_14 [0] : vector<32x256xf32> to vector<256xf32>
      %19 = vector.shape_cast %18 : vector<256xf32> to vector<1x256xf32>
      %20 = tpu.concatenate %16, %19 in 0 : vector<1x256xf32>, vector<1x256xf32> -> vector<2x256xf32>
      %21 = vector.shape_cast %20 : vector<2x256xf32> to vector<1x2x256xf32>
      %c0_15 = arith.constant 0 : index
      %c0_16 = arith.constant 0 : index
      %c0_17 = arith.constant 0 : index
      %22 = vector.load %arg5[%c0_15, %c0_16, %c0_17] : memref<1x2x256xf32, #tpu.memory_space<vmem>>, vector<1x2x256xf32>
      tpu.vector_store %arg5[%c0_15, %c0_16, %c0_17], %21 {strides = array<i32>} : memref<1x2x256xf32, #tpu.memory_space<vmem>>, vector<1x2x256xf32>,
    } else {
    }
    return
  }
  func.func @transform_0(%arg0: i32, %arg1: i32) -> (i32, i32) {
    %c0_i32 = arith.constant 0 : i32
    return %arg0, %arg1 : i32, i32
  }
  func.func @transform_1(%arg0: i32, %arg1: i32) -> (i32, i32) {
    %c0_i32 = arith.constant 0 : i32
    %c0_i32_0 = arith.constant 0 : i32
    return %arg1, %c0_i32 : i32, i32
  }
  func.func @transform_2(%arg0: i32, %arg1: i32) -> (i32, i32) {
    %c0_i32 = arith.constant 0 : i32
    %c0_i32_0 = arith.constant 0 : i32
    return %arg0, %c0_i32 : i32, i32
  }
  func.func @transform_3(%arg0: i32, %arg1: i32) -> (i32, i32, i32) {
    %c0_i32 = arith.constant 0 : i32
    %c0_i32_0 = arith.constant 0 : i32
    %c0_i32_1 = arith.constant 0 : i32
    return %arg0, %c0_i32, %c0_i32_0 : i32, i32, i32
  }
}

module attributes {stable_mosaic.version = 11 : i64} {
  func.func @_mm_stats_kernel(%arg0: i32, %arg1: i32, %arg2: memref<8x1024xbf16, #tpu.memory_space<vmem>>, %arg3: memref<1024x512xbf16, #tpu.memory_space<vmem>>, %arg4: memref<8x512xbf16, #tpu.memory_space<vmem>>, %arg5: memref<1x2x512xf32, #tpu.memory_space<vmem>>, %arg6: memref<8x512xf32, #tpu.memory_space<vmem>>) attributes {dimension_semantics = [#tpu.dimension_semantics<parallel>, #tpu.dimension_semantics<arbitrary>], iteration_bounds = array<i64: 1, 4>, scalar_prefetch = 0 : i64, scratch_operands = 1 : i64, tpu.core_type = #tpu.core_type<tc>, window_params = [{transform_indices = @transform_0, window_bounds = array<i64: 8, 1024>}, {transform_indices = @transform_1, window_bounds = array<i64: 1024, 512>}, {transform_indices = @transform_2, window_bounds = array<i64: 8, 512>}, {transform_indices = @transform_3, window_bounds = array<i64: 1, 2, 512>}]} {
    %c0_i32 = arith.constant 0 : i32
    %0 = arith.cmpi eq, %arg1, %c0_i32 : i32
    %1 = arith.extui %0 : i1 to i32
    %c0_i32_0 = arith.constant 0 : i32
    %2 = arith.cmpi ne, %1, %c0_i32_0 : i32
    scf.if %2 {
      %cst_9 = arith.constant 0.000000e+00 : f32
      %12 = vector.broadcast %cst_9 : f32 to vector<8x512xf32>
      %c0_10 = arith.constant 0 : index
      %c0_11 = arith.constant 0 : index
      %13 = vector.load %arg6[%c0_10, %c0_11] : memref<8x512xf32, #tpu.memory_space<vmem>>, vector<8x512xf32>
      tpu.vector_store %arg6[%c0_10, %c0_11], %12 {strides = array<i32>} : memref<8x512xf32, #tpu.memory_space<vmem>>, vector<8x512xf32>,
    } else {
    }
    %c0 = arith.constant 0 : index
    %c0_1 = arith.constant 0 : index
    %3 = vector.load %arg6[%c0, %c0_1] : memref<8x512xf32, #tpu.memory_space<vmem>>, vector<8x512xf32>
    %c0_2 = arith.constant 0 : index
    %c0_3 = arith.constant 0 : index
    %4 = vector.load %arg2[%c0_2, %c0_3] : memref<8x1024xbf16, #tpu.memory_space<vmem>>, vector<8x1024xbf16>
    %c0_4 = arith.constant 0 : index
    %c0_5 = arith.constant 0 : index
    %5 = vector.load %arg3[%c0_4, %c0_5] : memref<1024x512xbf16, #tpu.memory_space<vmem>>, vector<1024x512xbf16>
    %cst = arith.constant dense<0.000000e+00> : vector<8x512xf32>
    %6 = tpu.matmul %4, %5, %cst {dimension_numbers = #tpu.dot_dimension_numbers<[1], [0], [0], [1], [0, 0, 1, 1], [], []>} : vector<8x1024xbf16>, vector<1024x512xbf16>, vector<8x512xf32> -> vector<8x512xf32>
    %7 = arith.addf %3, %6 : vector<8x512xf32>
    %c0_6 = arith.constant 0 : index
    %c0_7 = arith.constant 0 : index
    %8 = vector.load %arg6[%c0_6, %c0_7] : memref<8x512xf32, #tpu.memory_space<vmem>>, vector<8x512xf32>
    tpu.vector_store %arg6[%c0_6, %c0_7], %7 {strides = array<i32>} : memref<8x512xf32, #tpu.memory_space<vmem>>, vector<8x512xf32>,
    %c3_i32 = arith.constant 3 : i32
    %9 = arith.cmpi eq, %arg1, %c3_i32 : i32
    %10 = arith.extui %9 : i1 to i32
    %c0_i32_8 = arith.constant 0 : i32
    %11 = arith.cmpi ne, %10, %c0_i32_8 : i32
    scf.if %11 {
      %c0_9 = arith.constant 0 : index
      %c0_10 = arith.constant 0 : index
      %12 = vector.load %arg6[%c0_9, %c0_10] : memref<8x512xf32, #tpu.memory_space<vmem>>, vector<8x512xf32>
      %13 = arith.truncf %12 : vector<8x512xf32> to vector<8x512xbf16>
      %c0_11 = arith.constant 0 : index
      %c0_12 = arith.constant 0 : index
      %14 = vector.load %arg4[%c0_11, %c0_12] : memref<8x512xbf16, #tpu.memory_space<vmem>>, vector<8x512xbf16>
      tpu.vector_store %arg4[%c0_11, %c0_12], %13 {strides = array<i32>} : memref<8x512xbf16, #tpu.memory_space<vmem>>, vector<8x512xbf16>,
      %cst_13 = arith.constant dense<0.000000e+00> : vector<512xf32>
      %15 = vector.multi_reduction <add>, %12, %cst_13 [0] : vector<8x512xf32> to vector<512xf32>
      %16 = vector.shape_cast %15 : vector<512xf32> to vector<1x512xf32>
      %17 = arith.mulf %12, %12 : vector<8x512xf32>
      %cst_14 = arith.constant dense<0.000000e+00> : vector<512xf32>
      %18 = vector.multi_reduction <add>, %17, %cst_14 [0] : vector<8x512xf32> to vector<512xf32>
      %19 = vector.shape_cast %18 : vector<512xf32> to vector<1x512xf32>
      %20 = tpu.concatenate %16, %19 in 0 : vector<1x512xf32>, vector<1x512xf32> -> vector<2x512xf32>
      %21 = vector.shape_cast %20 : vector<2x512xf32> to vector<1x2x512xf32>
      %c0_15 = arith.constant 0 : index
      %c0_16 = arith.constant 0 : index
      %c0_17 = arith.constant 0 : index
      %22 = vector.load %arg5[%c0_15, %c0_16, %c0_17] : memref<1x2x512xf32, #tpu.memory_space<vmem>>, vector<1x2x512xf32>
      tpu.vector_store %arg5[%c0_15, %c0_16, %c0_17], %21 {strides = array<i32>} : memref<1x2x512xf32, #tpu.memory_space<vmem>>, vector<1x2x512xf32>,
    } else {
    }
    return
  }
  func.func @transform_0(%arg0: i32, %arg1: i32) -> (i32, i32) {
    %c0_i32 = arith.constant 0 : i32
    return %arg0, %arg1 : i32, i32
  }
  func.func @transform_1(%arg0: i32, %arg1: i32) -> (i32, i32) {
    %c0_i32 = arith.constant 0 : i32
    %c0_i32_0 = arith.constant 0 : i32
    return %arg1, %c0_i32 : i32, i32
  }
  func.func @transform_2(%arg0: i32, %arg1: i32) -> (i32, i32) {
    %c0_i32 = arith.constant 0 : i32
    %c0_i32_0 = arith.constant 0 : i32
    return %arg0, %c0_i32 : i32, i32
  }
  func.func @transform_3(%arg0: i32, %arg1: i32) -> (i32, i32, i32) {
    %c0_i32 = arith.constant 0 : i32
    %c0_i32_0 = arith.constant 0 : i32
    %c0_i32_1 = arith.constant 0 : i32
    return %arg0, %c0_i32, %c0_i32_0 : i32, i32, i32
  }
}

module attributes {stable_mosaic.version = 11 : i64} {
  func.func @_scale_shift_lrelu_kernel(%arg0: i32, %arg1: memref<8x512xbf16, #tpu.memory_space<vmem>>, %arg2: memref<1x512xf32, #tpu.memory_space<vmem>>, %arg3: memref<1x512xf32, #tpu.memory_space<vmem>>, %arg4: memref<8x512xbf16, #tpu.memory_space<vmem>>) attributes {dimension_semantics = [#tpu.dimension_semantics<parallel>], iteration_bounds = array<i64: 1>, scalar_prefetch = 0 : i64, scratch_operands = 0 : i64, tpu.core_type = #tpu.core_type<tc>, window_params = [{transform_indices = @transform_0, window_bounds = array<i64: 8, 512>}, {pipeline_mode = #tpu.pipeline_mode<synchronous>, transform_indices = @transform_1, window_bounds = array<i64: 1, 512>}, {pipeline_mode = #tpu.pipeline_mode<synchronous>, transform_indices = @transform_2, window_bounds = array<i64: 1, 512>}, {transform_indices = @transform_3, window_bounds = array<i64: 8, 512>}]} {
    %c0 = arith.constant 0 : index
    %c0_0 = arith.constant 0 : index
    %0 = vector.load %arg1[%c0, %c0_0] : memref<8x512xbf16, #tpu.memory_space<vmem>>, vector<8x512xbf16>
    %1 = arith.extf %0 : vector<8x512xbf16> to vector<8x512xf32>
    %c0_1 = arith.constant 0 : index
    %c0_2 = arith.constant 0 : index
    %2 = vector.load %arg2[%c0_1, %c0_2] : memref<1x512xf32, #tpu.memory_space<vmem>>, vector<1x512xf32>
    %3 = vector.broadcast %2 : vector<1x512xf32> to vector<8x512xf32>
    %4 = arith.mulf %1, %3 : vector<8x512xf32>
    %c0_3 = arith.constant 0 : index
    %c0_4 = arith.constant 0 : index
    %5 = vector.load %arg3[%c0_3, %c0_4] : memref<1x512xf32, #tpu.memory_space<vmem>>, vector<1x512xf32>
    %6 = vector.broadcast %5 : vector<1x512xf32> to vector<8x512xf32>
    %7 = arith.addf %4, %6 : vector<8x512xf32>
    %cst = arith.constant 0.000000e+00 : f32
    %8 = vector.broadcast %cst : f32 to vector<8x512xf32>
    %9 = arith.cmpf ogt, %7, %8 : vector<8x512xf32>
    %cst_5 = arith.constant 2.000000e-01 : f32
    %10 = vector.broadcast %cst_5 : f32 to vector<8x512xf32>
    %11 = arith.mulf %10, %7 : vector<8x512xf32>
    %12 = arith.select %9, %7, %11 : vector<8x512xi1>, vector<8x512xf32>
    %13 = arith.truncf %12 : vector<8x512xf32> to vector<8x512xbf16>
    %c0_6 = arith.constant 0 : index
    %c0_7 = arith.constant 0 : index
    %14 = vector.load %arg4[%c0_6, %c0_7] : memref<8x512xbf16, #tpu.memory_space<vmem>>, vector<8x512xbf16>
    tpu.vector_store %arg4[%c0_6, %c0_7], %13 {strides = array<i32>} : memref<8x512xbf16, #tpu.memory_space<vmem>>, vector<8x512xbf16>,
    return
  }
  func.func @transform_0(%arg0: i32) -> (i32, i32) {
    %c0_i32 = arith.constant 0 : i32
    %c0_i32_0 = arith.constant 0 : i32
    return %arg0, %c0_i32 : i32, i32
  }
  func.func @transform_1(%arg0: i32) -> (i32, i32) {
    %c0_i32 = arith.constant 0 : i32
    %c0_i32_0 = arith.constant 0 : i32
    %c0_i32_1 = arith.constant 0 : i32
    return %c0_i32, %c0_i32_0 : i32, i32
  }
  func.func @transform_2(%arg0: i32) -> (i32, i32) {
    %c0_i32 = arith.constant 0 : i32
    %c0_i32_0 = arith.constant 0 : i32
    %c0_i32_1 = arith.constant 0 : i32
    return %c0_i32, %c0_i32_0 : i32, i32
  }
  func.func @transform_3(%arg0: i32) -> (i32, i32) {
    %c0_i32 = arith.constant 0 : i32
    %c0_i32_0 = arith.constant 0 : i32
    return %arg0, %c0_i32 : i32, i32
  }
}

module attributes {stable_mosaic.version = 11 : i64} {
  func.func @_fc_head_kernel(%arg0: i32, %arg1: memref<1x2048xbf16, #tpu.memory_space<vmem>>, %arg2: memref<2048x128xbf16, #tpu.memory_space<vmem>>, %arg3: memref<1x128xf32, #tpu.memory_space<vmem>>, %arg4: memref<128x128xf32, #tpu.memory_space<vmem>>, %arg5: memref<1x128xf32, #tpu.memory_space<vmem>>, %arg6: memref<1x128xf32, #tpu.memory_space<vmem>>, %arg7: memref<1x128xf32, #tpu.memory_space<vmem>>) attributes {dimension_semantics = [#tpu.dimension_semantics<arbitrary>], iteration_bounds = array<i64: 2>, scalar_prefetch = 0 : i64, scratch_operands = 1 : i64, tpu.core_type = #tpu.core_type<tc>, window_params = [{transform_indices = @transform_0, window_bounds = array<i64: 1, 2048>}, {transform_indices = @transform_1, window_bounds = array<i64: 2048, 128>}, {pipeline_mode = #tpu.pipeline_mode<synchronous>, transform_indices = @transform_2, window_bounds = array<i64: 1, 128>}, {pipeline_mode = #tpu.pipeline_mode<synchronous>, transform_indices = @transform_3, window_bounds = array<i64: 128, 128>}, {pipeline_mode = #tpu.pipeline_mode<synchronous>, transform_indices = @transform_4, window_bounds = array<i64: 1, 128>}, {pipeline_mode = #tpu.pipeline_mode<synchronous>, transform_indices = @transform_5, window_bounds = array<i64: 1, 128>}]} {
    %c0_i32 = arith.constant 0 : i32
    %0 = arith.cmpi eq, %arg0, %c0_i32 : i32
    %1 = arith.extui %0 : i1 to i32
    %c0_i32_0 = arith.constant 0 : i32
    %2 = arith.cmpi ne, %1, %c0_i32_0 : i32
    scf.if %2 {
      %cst_9 = arith.constant 0.000000e+00 : f32
      %12 = vector.broadcast %cst_9 : f32 to vector<1x128xf32>
      %c0_10 = arith.constant 0 : index
      %c0_11 = arith.constant 0 : index
      %13 = vector.load %arg7[%c0_10, %c0_11] : memref<1x128xf32, #tpu.memory_space<vmem>>, vector<1x128xf32>
      tpu.vector_store %arg7[%c0_10, %c0_11], %12 {strides = array<i32>} : memref<1x128xf32, #tpu.memory_space<vmem>>, vector<1x128xf32>,
    } else {
    }
    %c0 = arith.constant 0 : index
    %c0_1 = arith.constant 0 : index
    %3 = vector.load %arg7[%c0, %c0_1] : memref<1x128xf32, #tpu.memory_space<vmem>>, vector<1x128xf32>
    %c0_2 = arith.constant 0 : index
    %c0_3 = arith.constant 0 : index
    %4 = vector.load %arg1[%c0_2, %c0_3] : memref<1x2048xbf16, #tpu.memory_space<vmem>>, vector<1x2048xbf16>
    %c0_4 = arith.constant 0 : index
    %c0_5 = arith.constant 0 : index
    %5 = vector.load %arg2[%c0_4, %c0_5] : memref<2048x128xbf16, #tpu.memory_space<vmem>>, vector<2048x128xbf16>
    %cst = arith.constant dense<0.000000e+00> : vector<1x128xf32>
    %6 = tpu.matmul %4, %5, %cst {dimension_numbers = #tpu.dot_dimension_numbers<[1], [0], [0], [1], [0, 0, 1, 1], [], []>} : vector<1x2048xbf16>, vector<2048x128xbf16>, vector<1x128xf32> -> vector<1x128xf32>
    %7 = arith.addf %3, %6 : vector<1x128xf32>
    %c0_6 = arith.constant 0 : index
    %c0_7 = arith.constant 0 : index
    %8 = vector.load %arg7[%c0_6, %c0_7] : memref<1x128xf32, #tpu.memory_space<vmem>>, vector<1x128xf32>
    tpu.vector_store %arg7[%c0_6, %c0_7], %7 {strides = array<i32>} : memref<1x128xf32, #tpu.memory_space<vmem>>, vector<1x128xf32>,
    %c1_i32 = arith.constant 1 : i32
    %9 = arith.cmpi eq, %arg0, %c1_i32 : i32
    %10 = arith.extui %9 : i1 to i32
    %c0_i32_8 = arith.constant 0 : i32
    %11 = arith.cmpi ne, %10, %c0_i32_8 : i32
    scf.if %11 {
      %c0_9 = arith.constant 0 : index
      %c0_10 = arith.constant 0 : index
      %12 = vector.load %arg7[%c0_9, %c0_10] : memref<1x128xf32, #tpu.memory_space<vmem>>, vector<1x128xf32>
      %c0_11 = arith.constant 0 : index
      %c0_12 = arith.constant 0 : index
      %13 = vector.load %arg3[%c0_11, %c0_12] : memref<1x128xf32, #tpu.memory_space<vmem>>, vector<1x128xf32>
      %14 = arith.addf %12, %13 : vector<1x128xf32>
      %c0_13 = arith.constant 0 : index
      %c0_14 = arith.constant 0 : index
      %15 = vector.load %arg4[%c0_13, %c0_14] : memref<128x128xf32, #tpu.memory_space<vmem>>, vector<128x128xf32>
      %cst_15 = arith.constant dense<0.000000e+00> : vector<1x128xf32>
      %16 = tpu.matmul %14, %15, %cst_15 {dimension_numbers = #tpu.dot_dimension_numbers<[1], [0], [0], [1], [0, 0, 1, 1], [], []>} : vector<1x128xf32>, vector<128x128xf32>, vector<1x128xf32> -> vector<1x128xf32>
      %c0_16 = arith.constant 0 : index
      %c0_17 = arith.constant 0 : index
      %17 = vector.load %arg5[%c0_16, %c0_17] : memref<1x128xf32, #tpu.memory_space<vmem>>, vector<1x128xf32>
      %18 = arith.addf %16, %17 : vector<1x128xf32>
      %19 = arith.negf %18 : vector<1x128xf32>
      %20 = math.exp %19 : vector<1x128xf32>
      %cst_18 = arith.constant 1.000000e+00 : f32
      %21 = vector.broadcast %cst_18 : f32 to vector<1x128xf32>
      %22 = arith.addf %21, %20 : vector<1x128xf32>
      %23 = arith.divf %21, %22 : vector<1x128xf32>
      %c0_19 = arith.constant 0 : index
      %c0_20 = arith.constant 0 : index
      %24 = vector.load %arg6[%c0_19, %c0_20] : memref<1x128xf32, #tpu.memory_space<vmem>>, vector<1x128xf32>
      tpu.vector_store %arg6[%c0_19, %c0_20], %23 {strides = array<i32>} : memref<1x128xf32, #tpu.memory_space<vmem>>, vector<1x128xf32>,
    } else {
    }
    return
  }
  func.func @transform_0(%arg0: i32) -> (i32, i32) {
    %c0_i32 = arith.constant 0 : i32
    %c0_i32_0 = arith.constant 0 : i32
    return %c0_i32, %arg0 : i32, i32
  }
  func.func @transform_1(%arg0: i32) -> (i32, i32) {
    %c0_i32 = arith.constant 0 : i32
    %c0_i32_0 = arith.constant 0 : i32
    return %arg0, %c0_i32 : i32, i32
  }
  func.func @transform_2(%arg0: i32) -> (i32, i32) {
    %c0_i32 = arith.constant 0 : i32
    %c0_i32_0 = arith.constant 0 : i32
    %c0_i32_1 = arith.constant 0 : i32
    return %c0_i32, %c0_i32_0 : i32, i32
  }
  func.func @transform_3(%arg0: i32) -> (i32, i32) {
    %c0_i32 = arith.constant 0 : i32
    %c0_i32_0 = arith.constant 0 : i32
    %c0_i32_1 = arith.constant 0 : i32
    return %c0_i32, %c0_i32_0 : i32, i32
  }
  func.func @transform_4(%arg0: i32) -> (i32, i32) {
    %c0_i32 = arith.constant 0 : i32
    %c0_i32_0 = arith.constant 0 : i32
    %c0_i32_1 = arith.constant 0 : i32
    return %c0_i32, %c0_i32_0 : i32, i32
  }
  func.func @transform_5(%arg0: i32) -> (i32, i32) {
    %c0_i32 = arith.constant 0 : i32
    %c0_i32_0 = arith.constant 0 : i32
    %c0_i32_1 = arith.constant 0 : i32
    return %c0_i32, %c0_i32_0 : i32, i32
  }
}

</mosaic_0001>

<bundles_post_ra>
// kernel: discriminator_forward.8
= control target key start
LH: loop header
LB: loop body
LE: loop exit
PB: predicated region body
PF: predicated region fallthrough
CT: control target
= control target key end

     0   :  { %8 = vsyncpa [#allocation4], 0  ;;  %s2286_s0 = inlined_call_operand.vmem [shape: bf16[512,64], index: 0, kind: input, shape index: {}]   ;;  %s2287_s1 = inlined_call_operand.hbm [shape: bf16[64,64], index: 1, kind: input, shape index: {}]   ;;  %s2288_s2 = inlined_call_operand.hbm [shape: f32[1,64], index: 2, kind: input, shape index: {}]   ;;  %s2289_s3 = inlined_call_operand.vmem [shape: bf16[512,64], index: 3, kind: output, shape index: {}]  }
   0x1   :  { %s16_s14 = sshll.u32 %s2287_s1, 4  ;;  %s17_s14 = int_to_ptr.hbm [resolvable:$true] %s16_s14 }
   0x2   :  { %9 = vsyncpa [#allocation6], 0  ;;  %s1573_s15 = smov [#allocation3]   ;;  %s30_s19 = sshll.u32 %s2288_s2, 4  ;;  %s31_s19 = int_to_ptr.hbm [resolvable:$true] %s30_s19 }
   0x3   :  { %s18_s16 = sshll.u32 %s1573_s15, 4  ;;  %s1574_s20 = smov 64   ;;  %s19_s16 = int_to_ptr.vmem [resolvable:$true] %s18_s16 }
   0x4   :  { %s1575_s21 = smov 4   ;;  %s1576_s22 = smov [#allocation5]  }
   0x5   :  { %24 = dma.hbm_to_vmem [thread:$0]  %s17_s14, 512, %s19_s16, [#allocation4], %s1574_s20, %s1574_s20, %s1575_s21  }
   0x6   :  { %s32_s23 = sshll.u32 %s1576_s22, 4  ;;  %s33_s23 = int_to_ptr.vmem [resolvable:$true] %s32_s23 }
   0x7   :  { %35 = dma.hbm_to_vmem [thread:$0]  %s31_s19, 16, %s33_s23, [#allocation6]  }
   0x8   :  { %1569 = dma.done.wait [#allocation4], 512  }
   0x9   :  { %1570 = vsyncadd [#allocation4], 4294966784 }
   0xa   :  { %1571 = dma.done.wait [#allocation6], 16  }
   0xb   :  { %1572 = vsyncadd [#allocation6], 4294967280  ;;  %v1501_v0 = vld [vmem:[#allocation3 + $0x18] sm:$0xff]  ;;  %v1500_v1 = vld [vmem:[#allocation3 + $0x10] sm:$0xff]  ;;  %vm49_vm0 = vcmask 523264   ;;  %v1577_v28 = vmov 0.0  }
   0xc   :  { %535 = vmatpush.bf16.msra.mxu0 %v1501_v0  ;;  %1502 = vmatpush.bf16.msra.mxu1 %v1501_v0  ;;  %v1499_v2 = vld [vmem:[#allocation3 + $0x8] sm:$0xff]  ;;  %v1498_v3 = vld [vmem:[#allocation3] sm:$0xff]  ;;  %v1468_v12 = vld [vmem:[%s2286_s0 + $0x10] sm:$0xff]  ;;  %50 = vst.msk [vmem:[#allocation2] sm:$0xff] %vm49_vm0, %v1577_v28  ;;  %vm1219_vm2 = vcmask 519168  }
   0xd   :  { %1503 = vmatpush.bf16.msra.mxu2 %v1501_v0  ;;  %1504 = vmatpush.bf16.msra.mxu3 %v1501_v0  ;;  %v1466_v4 = vld [vmem:[%s2286_s0] sm:$0xff]  ;;  %v1467_v8 = vld [vmem:[%s2286_s0 + $0x8] sm:$0xff]  ;;  %v1476_v13 = vld [vmem:[%s2286_s0 + $0x50] sm:$0xff]  ;;  %51 = vst.msk [vmem:[#allocation2 + $0x8] sm:$0xff] %vm49_vm0, %v1577_v28 }
   0xe   :  { %v1474_v5 = vld [vmem:[%s2286_s0 + $0x40] sm:$0xff]  ;;  %v1475_v9 = vld [vmem:[%s2286_s0 + $0x48] sm:$0xff]  ;;  %v1484_v14 = vld [vmem:[%s2286_s0 + $0x90] sm:$0xff]  ;;  %52 = vst.msk [vmem:[#allocation2 + $0x10] sm:$0xff] %vm49_vm0, %v1577_v28 }
   0xf   :  { %v1482_v6 = vld [vmem:[%s2286_s0 + $0x80] sm:$0xff]  ;;  %v1483_v10 = vld [vmem:[%s2286_s0 + $0x88] sm:$0xff]  ;;  %v1492_v15 = vld [vmem:[%s2286_s0 + $0xd0] sm:$0xff]  ;;  %53 = vst.msk [vmem:[#allocation2 + $0x18] sm:$0xff] %vm49_vm0, %v1577_v28 }
  0x10   :  { %536 = vmatpush.bf16.msra.mxu0 %v1500_v1  ;;  %1505 = vmatpush.bf16.msra.mxu1 %v1500_v1  ;;  %v1490_v7 = vld [vmem:[%s2286_s0 + $0xc0] sm:$0xff]  ;;  %v1491_v11 = vld [vmem:[%s2286_s0 + $0xc8] sm:$0xff]  ;;  %v1469_v16 = vld [vmem:[%s2286_s0 + $0x18] sm:$0xff]  ;;  %54 = vst.msk [vmem:[#allocation2 + $0x20] sm:$0xff] %vm49_vm0, %v1577_v28 }
  0x11   :  { %1506 = vmatpush.bf16.msra.mxu2 %v1500_v1  ;;  %1507 = vmatpush.bf16.msra.mxu3 %v1500_v1  ;;  %v1477_v17 = vld [vmem:[%s2286_s0 + $0x58] sm:$0xff]  ;;  %v1470_v20 = vld [vmem:[%s2286_s0 + $0x20] sm:$0xff]  ;;  %v1471_v24 = vld [vmem:[%s2286_s0 + $0x28] sm:$0xff]  ;;  %55 = vst.msk [vmem:[#allocation2 + $0x28] sm:$0xff] %vm49_vm0, %v1577_v28 }
  0x12   :  { %v1485_v18 = vld [vmem:[%s2286_s0 + $0x98] sm:$0xff]  ;;  %v1478_v21 = vld [vmem:[%s2286_s0 + $0x60] sm:$0xff]  ;;  %v1479_v25 = vld [vmem:[%s2286_s0 + $0x68] sm:$0xff]  ;;  %56 = vst.msk [vmem:[#allocation2 + $0x30] sm:$0xff] %vm49_vm0, %v1577_v28 }
  0x13   :  { %v1493_v19 = vld [vmem:[%s2286_s0 + $0xd8] sm:$0xff]  ;;  %v1486_v22 = vld [vmem:[%s2286_s0 + $0xa0] sm:$0xff]  ;;  %v1487_v26 = vld [vmem:[%s2286_s0 + $0xa8] sm:$0xff]  ;;  %57 = vst.msk [vmem:[#allocation2 + $0x38] sm:$0xff] %vm49_vm0, %v1577_v28 }
  0x14   :  { %537 = vmatpush.bf16.msra.mxu0 %v1499_v2  ;;  %1508 = vmatpush.bf16.msra.mxu1 %v1499_v2  ;;  %v1494_v23 = vld [vmem:[%s2286_s0 + $0xe0] sm:$0xff]  ;;  %v1495_v27 = vld [vmem:[%s2286_s0 + $0xe8] sm:$0xff]  ;;  %58 = vst.msk [vmem:[#allocation2 + $0x40] sm:$0xff] %vm49_vm0, %v1577_v28  ;;  %v1472_v29 = vld [vmem:[%s2286_s0 + $0x30] sm:$0xff] }
  0x15   :  { %1509 = vmatpush.bf16.msra.mxu2 %v1499_v2  ;;  %1510 = vmatpush.bf16.msra.mxu3 %v1499_v2  ;;  %59 = vst.msk [vmem:[#allocation2 + $0x48] sm:$0xff] %vm49_vm0, %v1577_v28  ;;  %v1480_v30 = vld [vmem:[%s2286_s0 + $0x70] sm:$0xff]  ;;  %v1473_v33 = vld [vmem:[%s2286_s0 + $0x38] sm:$0xff]  ;;  %v114_v37 = vld [vmem:[#allocation2] sm:$0xff] }
  0x16   :  { %60 = vst.msk [vmem:[#allocation2 + $0x50] sm:$0xff] %vm49_vm0, %v1577_v28  ;;  %v1488_v31 = vld [vmem:[%s2286_s0 + $0xb0] sm:$0xff]  ;;  %v1481_v34 = vld [vmem:[%s2286_s0 + $0x78] sm:$0xff]  ;;  %v1831_v41 = vld [vmem:[#allocation5] ss:$0 sm:$0xff] }
  0x17   :  { %v1496_v32 = vld [vmem:[%s2286_s0 + $0xf0] sm:$0xff]  ;;  %61 = vst.msk [vmem:[#allocation2 + $0x58] sm:$0xff] %vm49_vm0, %v1577_v28  ;;  %v1489_v35 = vld [vmem:[%s2286_s0 + $0xb8] sm:$0xff]  ;;  %v115_v59 = vld [vmem:[#allocation2 + $0x8] sm:$0xff] }
  0x18   :  { %538 = vmatpush.bf16.msra.mxu0 %v1498_v3  ;;  %1511 = vmatpush.bf16.msra.mxu1 %v1498_v3  ;;  %62 = vst.msk [vmem:[#allocation2 + $0x60] sm:$0xff] %vm49_vm0, %v1577_v28  ;;  %v1497_v36 = vld [vmem:[%s2286_s0 + $0xf8] sm:$0xff] }
  0x19   :  { %1512 = vmatpush.bf16.msra.mxu2 %v1498_v3  ;;  %1513 = vmatpush.bf16.msra.mxu3 %v1498_v3  ;;  %63 = vst.msk [vmem:[#allocation2 + $0x68] sm:$0xff] %vm49_vm0, %v1577_v28  ;;  %v116_v3 = vld [vmem:[#allocation2 + $0x10] sm:$0xff] }
  0x1a   :  { %64 = vst.msk [vmem:[#allocation2 + $0x70] sm:$0xff] %vm49_vm0, %v1577_v28 }
  0x1b   :  { %1434 = vmatmul.msk.bf16.vlgmr.msra.gmra.mxu0 %vm49_vm0, %v1466_v4  ;;  %1442 = vmatmul.msk.bf16.vlgmr.msra.gmra.mxu1 %vm49_vm0, %v1474_v5  ;;  %65 = vst.msk [vmem:[#allocation2 + $0x78] sm:$0xff] %vm49_vm0, %v1577_v28 }
  0x1c   :  { %1450 = vmatmul.msk.bf16.vlgmr.msra.gmra.mxu2 %vm49_vm0, %v1482_v6  ;;  %1458 = vmatmul.msk.bf16.vlgmr.msra.gmra.mxu3 %vm49_vm0, %v1490_v7  ;;  %66 = vst.msk [vmem:[#allocation2 + $0x80] sm:$0xff] %vm49_vm0, %v1577_v28 }
  0x1d   :  { %67 = vst.msk [vmem:[#allocation2 + $0x88] sm:$0xff] %vm49_vm0, %v1577_v28 }
  0x1e   :  { %68 = vst.msk [vmem:[#allocation2 + $0x90] sm:$0xff] %vm49_vm0, %v1577_v28 }
  0x1f   :  { %69 = vst.msk [vmem:[#allocation2 + $0x98] sm:$0xff] %vm49_vm0, %v1577_v28 }
  0x20   :  { %70 = vst.msk [vmem:[#allocation2 + $0xa0] sm:$0xff] %vm49_vm0, %v1577_v28 }
  0x21   :  { %71 = vst.msk [vmem:[#allocation2 + $0xa8] sm:$0xff] %vm49_vm0, %v1577_v28 }
  0x22   :  { %72 = vst.msk [vmem:[#allocation2 + $0xb0] sm:$0xff] %vm49_vm0, %v1577_v28 }
  0x23   :  { %73 = vst.msk [vmem:[#allocation2 + $0xb8] sm:$0xff] %vm49_vm0, %v1577_v28  ;;  %v130_v53 = vld [vmem:[#allocation2 + $0x80] sm:$0xff] }
  0x24   :  { %74 = vst.msk [vmem:[#allocation2 + $0xc0] sm:$0xff] %vm49_vm0, %v1577_v28  ;;  %v131_v61 = vld [vmem:[#allocation2 + $0x88] sm:$0xff] }
  0x25   :  { %75 = vst.msk [vmem:[#allocation2 + $0xc8] sm:$0xff] %vm49_vm0, %v1577_v28  ;;  %v132_v7 = vld [vmem:[#allocation2 + $0x90] sm:$0xff] }
  0x26   :  { %76 = vst.msk [vmem:[#allocation2 + $0xd0] sm:$0xff] %vm49_vm0, %v1577_v28 }
  0x27   :  { %77 = vst.msk [vmem:[#allocation2 + $0xd8] sm:$0xff] %vm49_vm0, %v1577_v28 }
  0x28   :  { %78 = vst.msk [vmem:[#allocation2 + $0xe0] sm:$0xff] %vm49_vm0, %v1577_v28 }
  0x29   :  { %79 = vst.msk [vmem:[#allocation2 + $0xe8] sm:$0xff] %vm49_vm0, %v1577_v28 }
  0x2a   :  { %80 = vst.msk [vmem:[#allocation2 + $0xf0] sm:$0xff] %vm49_vm0, %v1577_v28 }
  0x2b   :  { %1435 = vmatmul.msk.bf16.gmra.mxu0 %vm49_vm0, %v1467_v8  ;;  %1443 = vmatmul.msk.bf16.gmra.mxu1 %vm49_vm0, %v1475_v9  ;;  %81 = vst.msk [vmem:[#allocation2 + $0xf8] sm:$0xff] %vm49_vm0, %v1577_v28 }
  0x2c   :  { %1451 = vmatmul.msk.bf16.gmra.mxu2 %vm49_vm0, %v1483_v10  ;;  %1459 = vmatmul.msk.bf16.gmra.mxu3 %vm49_vm0, %v1491_v11  ;;  %82 = vst.msk [vmem:[#allocation2 + $0x100] sm:$0xff] %vm49_vm0, %v1577_v28 }
  0x2d   :  { %83 = vst.msk [vmem:[#allocation2 + $0x108] sm:$0xff] %vm49_vm0, %v1577_v28 }
  0x2e   :  { %84 = vst.msk [vmem:[#allocation2 + $0x110] sm:$0xff] %vm49_vm0, %v1577_v28 }
  0x2f   :  { %85 = vst.msk [vmem:[#allocation2 + $0x118] sm:$0xff] %vm49_vm0, %v1577_v28 }
  0x30   :  { %86 = vst.msk [vmem:[#allocation2 + $0x120] sm:$0xff] %vm49_vm0, %v1577_v28 }
  0x31   :  { %87 = vst.msk [vmem:[#allocation2 + $0x128] sm:$0xff] %vm49_vm0, %v1577_v28 }
  0x32   :  { %88 = vst.msk [vmem:[#allocation2 + $0x130] sm:$0xff] %vm49_vm0, %v1577_v28 }
  0x33   :  { %89 = vst.msk [vmem:[#allocation2 + $0x138] sm:$0xff] %vm49_vm0, %v1577_v28  ;;  %v146_v56 = vld [vmem:[#allocation2 + $0x100] sm:$0xff] }
  0x34   :  { %90 = vst.msk [vmem:[#allocation2 + $0x140] sm:$0xff] %vm49_vm0, %v1577_v28  ;;  %v147_v63 = vld [vmem:[#allocation2 + $0x108] sm:$0xff] }
  0x35   :  { %91 = vst.msk [vmem:[#allocation2 + $0x148] sm:$0xff] %vm49_vm0, %v1577_v28  ;;  %v148_v11 = vld [vmem:[#allocation2 + $0x110] sm:$0xff] }
  0x36   :  { %92 = vst.msk [vmem:[#allocation2 + $0x150] sm:$0xff] %vm49_vm0, %v1577_v28 }
  0x37   :  { %93 = vst.msk [vmem:[#allocation2 + $0x158] sm:$0xff] %vm49_vm0, %v1577_v28 }
  0x38   :  { %94 = vst.msk [vmem:[#allocation2 + $0x160] sm:$0xff] %vm49_vm0, %v1577_v28 }
  0x39   :  { %95 = vst.msk [vmem:[#allocation2 + $0x168] sm:$0xff] %vm49_vm0, %v1577_v28 }
  0x3a   :  { %96 = vst.msk [vmem:[#allocation2 + $0x170] sm:$0xff] %vm49_vm0, %v1577_v28 }
  0x3b   :  { %1436 = vmatmul.msk.bf16.gmra.mxu0 %vm49_vm0, %v1468_v12  ;;  %1444 = vmatmul.msk.bf16.gmra.mxu1 %vm49_vm0, %v1476_v13  ;;  %97 = vst.msk [vmem:[#allocation2 + $0x178] sm:$0xff] %vm49_vm0, %v1577_v28 }
  0x3c   :  { %1452 = vmatmul.msk.bf16.gmra.mxu2 %vm49_vm0, %v1484_v14  ;;  %1460 = vmatmul.msk.bf16.gmra.mxu3 %vm49_vm0, %v1492_v15  ;;  %98 = vst.msk [vmem:[#allocation2 + $0x180] sm:$0xff] %vm49_vm0, %v1577_v28  ;;  %v117_v15 = vld [vmem:[#allocation2 + $0x18] sm:$0xff] }
  0x3d   :  { %99 = vst.msk [vmem:[#allocation2 + $0x188] sm:$0xff] %vm49_vm0, %v1577_v28 }
  0x3e   :  { %100 = vst.msk [vmem:[#allocation2 + $0x190] sm:$0xff] %vm49_vm0, %v1577_v28 }
  0x3f   :  { %101 = vst.msk [vmem:[#allocation2 + $0x198] sm:$0xff] %vm49_vm0, %v1577_v28 }
  0x40   :  { %102 = vst.msk [vmem:[#allocation2 + $0x1a0] sm:$0xff] %vm49_vm0, %v1577_v28 }
  0x41   :  { %103 = vst.msk [vmem:[#allocation2 + $0x1a8] sm:$0xff] %vm49_vm0, %v1577_v28 }
  0x42   :  { %104 = vst.msk [vmem:[#allocation2 + $0x1b0] sm:$0xff] %vm49_vm0, %v1577_v28 }
  0x43   :  { %105 = vst.msk [vmem:[#allocation2 + $0x1b8] sm:$0xff] %vm49_vm0, %v1577_v28  ;;  %v162_v57 = vld [vmem:[#allocation2 + $0x180] sm:$0xff] }
  0x44   :  { %106 = vst.msk [vmem:[#allocation2 + $0x1c0] sm:$0xff] %vm49_vm0, %v1577_v28  ;;  %v163_v1 = vld [vmem:[#allocation2 + $0x188] sm:$0xff] }
  0x45   :  { %107 = vst.msk [vmem:[#allocation2 + $0x1c8] sm:$0xff] %vm49_vm0, %v1577_v28  ;;  %v164_v13 = vld [vmem:[#allocation2 + $0x190] sm:$0xff] }
  0x46   :  { %108 = vst.msk [vmem:[#allocation2 + $0x1d0] sm:$0xff] %vm49_vm0, %v1577_v28 }
  0x47   :  { %109 = vst.msk [vmem:[#allocation2 + $0x1d8] sm:$0xff] %vm49_vm0, %v1577_v28 }
  0x48   :  { %110 = vst.msk [vmem:[#allocation2 + $0x1e0] sm:$0xff] %vm49_vm0, %v1577_v28 }
  0x49   :  { %111 = vst.msk [vmem:[#allocation2 + $0x1e8] sm:$0xff] %vm49_vm0, %v1577_v28 }
  0x4a   :  { %112 = vst.msk [vmem:[#allocation2 + $0x1f0] sm:$0xff] %vm49_vm0, %v1577_v28 }
  0x4b   :  { %1437 = vmatmul.msk.bf16.gmra.mxu0 %vm49_vm0, %v1469_v16  ;;  %1445 = vmatmul.msk.bf16.gmra.mxu1 %vm49_vm0, %v1477_v17  ;;  %113 = vst.msk [vmem:[#allocation2 + $0x1f8] sm:$0xff] %vm49_vm0, %v1577_v28  ;;  %v133_v17 = vld [vmem:[#allocation2 + $0x98] sm:$0xff]  ;;  %v118_v28 = vld [vmem:[#allocation2 + $0x20] sm:$0xff] }
  0x4c   :  { %1453 = vmatmul.msk.bf16.gmra.mxu2 %vm49_vm0, %v1485_v18  ;;  %1461 = vmatmul.msk.bf16.gmra.mxu3 %vm49_vm0, %v1493_v19  ;;  %v149_v19 = vld [vmem:[#allocation2 + $0x118] sm:$0xff] }
  0x5b   :  { %1438 = vmatmul.msk.bf16.gmra.mxu0 %vm49_vm0, %v1470_v20  ;;  %1446 = vmatmul.msk.bf16.gmra.mxu1 %vm49_vm0, %v1478_v21 }
  0x5c   :  { %1454 = vmatmul.msk.bf16.gmra.mxu2 %vm49_vm0, %v1486_v22  ;;  %1462 = vmatmul.msk.bf16.gmra.mxu3 %vm49_vm0, %v1494_v23  ;;  %v165_v22 = vld [vmem:[#allocation2 + $0x198] sm:$0xff] }
  0x6b   :  { %1439 = vmatmul.msk.bf16.gmra.mxu0 %vm49_vm0, %v1471_v24  ;;  %1447 = vmatmul.msk.bf16.gmra.mxu1 %vm49_vm0, %v1479_v25 }
  0x6c   :  { %1455 = vmatmul.msk.bf16.gmra.mxu2 %vm49_vm0, %v1487_v26  ;;  %1463 = vmatmul.msk.bf16.gmra.mxu3 %vm49_vm0, %v1495_v27 }
  0x7b   :  { %1440 = vmatmul.msk.bf16.gmra.mxu0 %vm49_vm0, %v1472_v29  ;;  %1448 = vmatmul.msk.bf16.gmra.mxu1 %vm49_vm0, %v1480_v30 }
  0x7c   :  { %1456 = vmatmul.msk.bf16.gmra.mxu2 %vm49_vm0, %v1488_v31  ;;  %1464 = vmatmul.msk.bf16.gmra.mxu3 %vm49_vm0, %v1496_v32 }
  0x8b   :  { %1441 = vmatmul.msk.bf16.gmra.mxu0 %vm49_vm0, %v1473_v33  ;;  %1449 = vmatmul.msk.bf16.gmra.mxu1 %vm49_vm0, %v1481_v34 }
  0x8c   :  { %1457 = vmatmul.msk.bf16.gmra.mxu2 %vm49_vm0, %v1489_v35  ;;  %1465 = vmatmul.msk.bf16.gmra.mxu3 %vm49_vm0, %v1497_v36 }
  0x98   :  { %v540_v38 = vpop.f32.mrf.mxu0  ;;  %v580_v39 = vpop.f32.mrf.mxu1 }
  0x99   :  { %v700_v40 = vadd.f32 %v540_v38, %v114_v37  ;;  %v716_v58 = vadd.f32 %v580_v39, %v130_v53 }
  0x9b   :  { %764 = vst.msk [vmem:[#allocation2] sm:$0xff] %vm49_vm0, %v700_v40 }
  0x9c   :  { %780 = vst.msk [vmem:[#allocation2 + $0x80] sm:$0xff] %vm49_vm0, %v716_v58 }
  0x9f   :  { %v620_v42 = vpop.f32.mrf.mxu2  ;;  %v660_v43 = vpop.f32.mrf.mxu3 }
  0xa0   :  { %v542_v44 = vpop.f32.mrf.mxu0  ;;  %v582_v45 = vpop.f32.mrf.mxu1  ;;  %v732_v60 = vadd.f32 %v620_v42, %v146_v56  ;;  %v748_v62 = vadd.f32 %v660_v43, %v162_v57 }
  0xa1   :  { %v701_v0 = vadd.f32 %v542_v44, %v115_v59  ;;  %v717_v2 = vadd.f32 %v582_v45, %v131_v61 }
  0xa2   :  { %v831_v46 = vld [vmem:[#allocation2] sm:$0xff]  ;;  %796 = vst.msk [vmem:[#allocation2 + $0x100] sm:$0xff] %vm49_vm0, %v732_v60 }
  0xa3   :  { %v899_v47 = vadd.f32 %v1831_v41, %v831_v46  ;;  %812 = vst.msk [vmem:[#allocation2 + $0x180] sm:$0xff] %vm49_vm0, %v748_v62  ;;  %v847_v20 = vld [vmem:[#allocation2 + $0x80] sm:$0xff] }
  0xa4   :  { %765 = vst.msk [vmem:[#allocation2 + $0x8] sm:$0xff] %vm49_vm0, %v701_v0  ;;  %v915_v23 = vadd.f32 %v1831_v41, %v847_v20 }
  0xa5   :  { %vm963_vm1 = vcmp.gt.f32.partialorder %v899_v47, 0.0  ;;  %v1027_v48 = vmul.f32 0.2, %v899_v47  ;;  %781 = vst.msk [vmem:[#allocation2 + $0x88] sm:$0xff] %vm49_vm0, %v717_v2 }
  0xa6   :  { %vm979_vm3 = vcmp.gt.f32.partialorder %v915_v23, 0.0  ;;  %v1043_v34 = vmul.f32 0.2, %v915_v23 }
  0xa7   :  { %v1091_v49 = vsel %vm963_vm1, %v899_v47, %v1027_v48  ;;  %v622_v50 = vpop.f32.mrf.mxu2  ;;  %v662_v51 = vpop.f32.mrf.mxu3 }
  0xa8   :  { %v1155_v52 = vpack.c.bf16 %v1091_v49, %v1091_v49  ;;  %v545_v54 = vpop.f32.mrf.mxu0  ;;  %v585_v55 = vpop.f32.mrf.mxu1  ;;  %v733_v6 = vadd.f32 %v622_v50, %v147_v63  ;;  %v749_v10 = vadd.f32 %v662_v51, %v163_v1  ;;  %v1107_v43 = vsel %vm979_vm3, %v915_v23, %v1043_v34  ;;  %v134_v1 = vld [vmem:[#allocation2 + $0xa0] sm:$0xff] }
  0xa9   :  { %v702_v12 = vadd.f32 %v545_v54, %v116_v3  ;;  %v718_v14 = vadd.f32 %v585_v55, %v132_v7  ;;  %v863_v24 = vld [vmem:[#allocation2 + $0x100] sm:$0xff]  ;;  %v1171_v47 = vpack.c.bf16 %v1107_v43, %v1107_v43 }
  0xaa   :  { %1220 = vst.msk [vmem:[%s2289_s3] sm:$0xf] %vm1219_vm2, %v1155_v52  ;;  %v931_v29 = vadd.f32 %v1831_v41, %v863_v24  ;;  %v879_v30 = vld [vmem:[#allocation2 + $0x180] sm:$0xff] }
  0xab   :  { %797 = vst.msk [vmem:[#allocation2 + $0x108] sm:$0xff] %vm49_vm0, %v733_v6  ;;  %v947_v35 = vadd.f32 %v1831_v41, %v879_v30  ;;  %v832_v36 = vld [vmem:[#allocation2 + $0x8] sm:$0xff] }
  0xac   :  { %813 = vst.msk [vmem:[#allocation2 + $0x188] sm:$0xff] %vm49_vm0, %v749_v10  ;;  %vm995_vm4 = vcmp.gt.f32.partialorder %v931_v29, 0.0  ;;  %v1059_v38 = vmul.f32 0.2, %v931_v29  ;;  %v900_v39 = vadd.f32 %v1831_v41, %v832_v36  ;;  %v848_v40 = vld [vmem:[#allocation2 + $0x88] sm:$0xff] }
  0xad   :  { %766 = vst.msk [vmem:[#allocation2 + $0x10] sm:$0xff] %vm49_vm0, %v702_v12  ;;  %vm1011_vm5 = vcmp.gt.f32.partialorder %v947_v35, 0.0  ;;  %v1075_v44 = vmul.f32 0.2, %v947_v35  ;;  %v916_v45 = vadd.f32 %v1831_v41, %v848_v40 }
  0xae   :  { %782 = vst.msk [vmem:[#allocation2 + $0x90] sm:$0xff] %vm49_vm0, %v718_v14  ;;  %v1123_v48 = vsel %vm995_vm4, %v931_v29, %v1059_v38  ;;  %vm964_vm6 = vcmp.gt.f32.partialorder %v900_v39, 0.0  ;;  %v1028_v49 = vmul.f32 0.2, %v900_v39 }
  0xaf   :  { %v625_v4 = vpop.f32.mrf.mxu2  ;;  %v665_v5 = vpop.f32.mrf.mxu3  ;;  %v1187_v51 = vpack.c.bf16 %v1123_v48, %v1123_v48  ;;  %v1139_v52 = vsel %vm1011_vm5, %v947_v35, %v1075_v44  ;;  %vm980_vm7 = vcmp.gt.f32.partialorder %v916_v45, 0.0  ;;  %v1044_v53 = vmul.f32 0.2, %v916_v45  ;;  %1236 = vst.msk [vmem:[%s2289_s3 + $0x40] sm:$0xf] %vm1219_vm2, %v1171_v47 }
  0xb0   :  { %v547_v8 = vpop.f32.mrf.mxu0  ;;  %v587_v9 = vpop.f32.mrf.mxu1  ;;  %v734_v16 = vadd.f32 %v625_v4, %v148_v11  ;;  %v750_v18 = vadd.f32 %v665_v5, %v164_v13  ;;  %v1203_v55 = vpack.c.bf16 %v1139_v52, %v1139_v52  ;;  %v1092_v56 = vsel %vm964_vm6, %v900_v39, %v1028_v49 }
  0xb1   :  { %v703_v21 = vadd.f32 %v547_v8, %v117_v15  ;;  %v719_v25 = vadd.f32 %v587_v9, %v133_v17  ;;  %1252 = vst.msk [vmem:[%s2289_s3 + $0x80] sm:$0xf] %vm1219_vm2, %v1187_v51  ;;  %v1156_v60 = vpack.c.bf16 %v1092_v56, %v1092_v56  ;;  %v1108_v61 = vsel %vm980_vm7, %v916_v45, %v1044_v53 }
  0xb2   :  { %798 = vst.msk [vmem:[#allocation2 + $0x110] sm:$0xff] %vm49_vm0, %v734_v16  ;;  %v864_v46 = vld [vmem:[#allocation2 + $0x108] sm:$0xff]  ;;  %v1172_v4 = vpack.c.bf16 %v1108_v61, %v1108_v61 }
  0xb3   :  { %814 = vst.msk [vmem:[#allocation2 + $0x190] sm:$0xff] %vm49_vm0, %v750_v18  ;;  %v880_v50 = vld [vmem:[#allocation2 + $0x188] sm:$0xff]  ;;  %v932_v57 = vadd.f32 %v1831_v41, %v864_v46  ;;  %v150_v46 = vld [vmem:[#allocation2 + $0x120] sm:$0xff] }
  0xb4   :  { %767 = vst.msk [vmem:[#allocation2 + $0x18] sm:$0xff] %vm49_vm0, %v703_v21  ;;  %v833_v54 = vld [vmem:[#allocation2 + $0x10] sm:$0xff]  ;;  %v948_v58 = vadd.f32 %v1831_v41, %v880_v50  ;;  %v166_v50 = vld [vmem:[#allocation2 + $0x1a0] sm:$0xff]  ;;  %v135_v61 = vld [vmem:[#allocation2 + $0xa8] sm:$0xff] }
  0xb5   :  { %783 = vst.msk [vmem:[#allocation2 + $0x98] sm:$0xff] %vm49_vm0, %v719_v25  ;;  %v849_v59 = vld [vmem:[#allocation2 + $0x90] sm:$0xff]  ;;  %v901_v62 = vadd.f32 %v1831_v41, %v833_v54  ;;  %vm996_vm8 = vcmp.gt.f32.partialorder %v932_v57, 0.0  ;;  %v1060_v5 = vmul.f32 0.2, %v932_v57  ;;  %v119_v54 = vld [vmem:[#allocation2 + $0x28] sm:$0xff] }
  0xb6   :  { %v917_v63 = vadd.f32 %v1831_v41, %v849_v59  ;;  %1268 = vst.msk [vmem:[%s2289_s3 + $0xc0] sm:$0xf] %vm1219_vm2, %v1203_v55  ;;  %vm1012_vm9 = vcmp.gt.f32.partialorder %v948_v58, 0.0  ;;  %v1076_v8 = vmul.f32 0.2, %v948_v58 }
  0xb7   :  { %v627_v26 = vpop.f32.mrf.mxu2  ;;  %v667_v27 = vpop.f32.mrf.mxu3  ;;  %1221 = vst.msk [vmem:[%s2289_s3 + $0x4] sm:$0xf] %vm1219_vm2, %v1156_v60  ;;  %vm965_vm10 = vcmp.gt.f32.partialorder %v901_v62, 0.0  ;;  %v1124_v10 = vsel %vm996_vm8, %v932_v57, %v1060_v5  ;;  %v1029_v11 = vmul.f32 0.2, %v901_v62 }
  0xb8   :  { %v735_v31 = vadd.f32 %v627_v26, %v149_v19  ;;  %v550_v32 = vpop.f32.mrf.mxu0  ;;  %v590_v33 = vpop.f32.mrf.mxu1  ;;  %v751_v37 = vadd.f32 %v667_v27, %v165_v22  ;;  %vm981_vm11 = vcmp.gt.f32.partialorder %v917_v63, 0.0  ;;  %1237 = vst.msk [vmem:[%s2289_s3 + $0x44] sm:$0xf] %vm1219_vm2, %v1172_v4  ;;  %v1045_v12 = vmul.f32 0.2, %v917_v63 }
  0xb9   :  { %v1884_v42 = vadd.f32 %v550_v32, %v118_v28  ;;  %v865_v0 = vld [vmem:[#allocation2 + $0x110] sm:$0xff]  ;;  %v720_v13 = vadd.f32 %v590_v33, %v134_v1  ;;  %v1188_v14 = vpack.c.bf16 %v1124_v10, %v1124_v10  ;;  %v1140_v15 = vsel %vm1012_vm9, %v948_v58, %v1076_v8  ;;  %v167_v1 = vld [vmem:[#allocation2 + $0x1a8] sm:$0xff] }
  0xba   :  { %799 = vst.msk [vmem:[#allocation2 + $0x118] sm:$0xff] %vm49_vm0, %v735_v31  ;;  %v933_v9 = vadd.f32 %v1831_v41, %v865_v0  ;;  %v881_v17 = vld [vmem:[#allocation2 + $0x190] sm:$0xff]  ;;  %v1204_v20 = vpack.c.bf16 %v1140_v15, %v1140_v15  ;;  %v1093_v21 = vsel %vm965_vm10, %v901_v62, %v1029_v11  ;;  %v1109_v22 = vsel %vm981_vm11, %v917_v63, %v1045_v12  ;;  %v151_v0 = vld [vmem:[#allocation2 + $0x128] sm:$0xff] }
  0xbb   :  { %815 = vst.msk [vmem:[#allocation2 + $0x198] sm:$0xff] %vm49_vm0, %v751_v37  ;;  %v834_v18 = vld [vmem:[#allocation2 + $0x18] sm:$0xff]  ;;  %v949_v23 = vadd.f32 %v1831_v41, %v881_v17  ;;  %v1157_v26 = vpack.c.bf16 %v1093_v21, %v1093_v21  ;;  %v1173_v27 = vpack.c.bf16 %v1109_v22, %v1109_v22  ;;  %v120_v8 = vld [vmem:[#allocation2 + $0x30] sm:$0xff] }
  0xbc   :  { %vm997_vm12 = vcmp.gt.f32.partialorder %v933_v9, 0.0  ;;  %v1061_v16 = vmul.f32 0.2, %v933_v9  ;;  %v850_v19 = vld [vmem:[#allocation2 + $0x98] sm:$0xff]  ;;  %768 = vst.msk [vmem:[#allocation2 + $0x20] sm:$0xff] %vm49_vm0, %v1884_v42  ;;  %v902_v29 = vadd.f32 %v1831_v41, %v834_v18 }
  0xbd   :  { %1253 = vst.msk [vmem:[%s2289_s3 + $0x84] sm:$0xf] %vm1219_vm2, %v1188_v14  ;;  %vm1013_vm13 = vcmp.gt.f32.partialorder %v949_v23, 0.0  ;;  %v1077_v31 = vmul.f32 0.2, %v949_v23  ;;  %v918_v32 = vadd.f32 %v1831_v41, %v850_v19  ;;  %v168_v19 = vld [vmem:[#allocation2 + $0x1b0] sm:$0xff] }
  0xbe   :  { %v1125_v28 = vsel %vm997_vm12, %v933_v9, %v1061_v16  ;;  %1269 = vst.msk [vmem:[%s2289_s3 + $0xc4] sm:$0xf] %vm1219_vm2, %v1204_v20  ;;  %vm966_vm14 = vcmp.gt.f32.partialorder %v902_v29, 0.0  ;;  %v1030_v33 = vmul.f32 0.2, %v902_v29  ;;  %v152_v16 = vld [vmem:[#allocation2 + $0x130] sm:$0xff] }
  0xbf   :  { %v1902_v2 = vpop.f32.mrf.mxu2  ;;  %v1904_v3 = vpop.f32.mrf.mxu3  ;;  %v1189_v30 = vpack.c.bf16 %v1125_v28, %v1125_v28  ;;  %1222 = vst.msk [vmem:[%s2289_s3 + $0x8] sm:$0xf] %vm1219_vm2, %v1157_v26  ;;  %v1141_v38 = vsel %vm1013_vm13, %v949_v23, %v1077_v31  ;;  %vm982_vm15 = vcmp.gt.f32.partialorder %v918_v32, 0.0  ;;  %v1046_v39 = vmul.f32 0.2, %v918_v32  ;;  %v121_v20 = vld [vmem:[#allocation2 + $0x38] sm:$0xff] }
  0xc0   :  { %v1910_v6 = vpop.f32.mrf.mxu0  ;;  %v1912_v7 = vpop.f32.mrf.mxu1  ;;  %1238 = vst.msk [vmem:[%s2289_s3 + $0x48] sm:$0xf] %vm1219_vm2, %v1173_v27  ;;  %v1205_v43 = vpack.c.bf16 %v1141_v38, %v1141_v38  ;;  %v1094_v44 = vsel %vm966_vm14, %v902_v29, %v1030_v33  ;;  %v736_v58 = vadd.f32 %v1902_v2, %v150_v46  ;;  %v752_v60 = vadd.f32 %v1904_v3, %v166_v50  ;;  %v137_v23 = vld [vmem:[#allocation2 + $0xb8] sm:$0xff] }
  0xc1   :  { %v866_v24 = vld [vmem:[#allocation2 + $0x118] sm:$0xff]  ;;  %1254 = vst.msk [vmem:[%s2289_s3 + $0x88] sm:$0xf] %vm1219_vm2, %v1189_v30  ;;  %v1158_v47 = vpack.c.bf16 %v1094_v44, %v1094_v44  ;;  %v1110_v48 = vsel %vm982_vm15, %v918_v32, %v1046_v39  ;;  %v705_v63 = vadd.f32 %v1910_v6, %v119_v54  ;;  %v721_v5 = vadd.f32 %v1912_v7, %v135_v61  ;;  %v122_v54 = vld [vmem:[#allocation2 + $0x40] sm:$0xff] }
  0xc2   :  { %v882_v25 = vld [vmem:[#allocation2 + $0x198] sm:$0xff]  ;;  %v934_v34 = vadd.f32 %v1831_v41, %v866_v24  ;;  %784 = vst.msk [vmem:[#allocation2 + $0xa0] sm:$0xff] %vm49_vm0, %v720_v13  ;;  %v1174_v51 = vpack.c.bf16 %v1110_v48, %v1110_v48  ;;  %v136_v13 = vld [vmem:[#allocation2 + $0xb0] sm:$0xff] }
  0xc3   :  { %v950_v35 = vadd.f32 %v1831_v41, %v882_v25  ;;  %1270 = vst.msk [vmem:[%s2289_s3 + $0xc8] sm:$0xf] %vm1219_vm2, %v1205_v43  ;;  %v835_v53 = vld [vmem:[#allocation2 + $0x20] sm:$0xff]  ;;  %v153_v27 = vld [vmem:[#allocation2 + $0x138] sm:$0xff] }
  0xc4   :  { %vm998_vm1 = vcmp.gt.f32.partialorder %v934_v34, 0.0  ;;  %v1062_v45 = vmul.f32 0.2, %v934_v34  ;;  %1223 = vst.msk [vmem:[%s2289_s3 + $0xc] sm:$0xf] %vm1219_vm2, %v1158_v47  ;;  %v903_v57 = vadd.f32 %v1831_v41, %v835_v53 }
  0xc5   :  { %vm1014_vm3 = vcmp.gt.f32.partialorder %v950_v35, 0.0  ;;  %v1078_v49 = vmul.f32 0.2, %v950_v35  ;;  %1239 = vst.msk [vmem:[%s2289_s3 + $0x4c] sm:$0xf] %vm1219_vm2, %v1174_v51 }
  0xc6   :  { %v1126_v52 = vsel %vm998_vm1, %v934_v34, %v1062_v45  ;;  %vm967_vm4 = vcmp.gt.f32.partialorder %v903_v57, 0.0  ;;  %v1031_v62 = vmul.f32 0.2, %v903_v57  ;;  %800 = vst.msk [vmem:[#allocation2 + $0x120] sm:$0xff] %vm49_vm0, %v736_v58 }
  0xc7   :  { %v632_v36 = vpop.f32.mrf.mxu2  ;;  %v672_v37 = vpop.f32.mrf.mxu3  ;;  %v1190_v55 = vpack.c.bf16 %v1126_v52, %v1126_v52  ;;  %v1142_v56 = vsel %vm1014_vm3, %v950_v35, %v1078_v49  ;;  %816 = vst.msk [vmem:[#allocation2 + $0x1a0] sm:$0xff] %vm49_vm0, %v752_v60 }
  0xc8   :  { %v555_v40 = vpop.f32.mrf.mxu0  ;;  %v595_v42 = vpop.f32.mrf.mxu1  ;;  %v1206_v59 = vpack.c.bf16 %v1142_v56, %v1142_v56  ;;  %v1095_v3 = vsel %vm967_vm4, %v903_v57, %v1031_v62  ;;  %v737_v6 = vadd.f32 %v632_v36, %v151_v0  ;;  %769 = vst.msk [vmem:[#allocation2 + $0x28] sm:$0xff] %vm49_vm0, %v705_v63  ;;  %v753_v15 = vadd.f32 %v672_v37, %v167_v1 }
  0xc9   :  { %1255 = vst.msk [vmem:[%s2289_s3 + $0x8c] sm:$0xf] %vm1219_vm2, %v1190_v55  ;;  %v1159_v11 = vpack.c.bf16 %v1095_v3, %v1095_v3  ;;  %v851_v12 = vld [vmem:[#allocation2 + $0xa0] sm:$0xff]  ;;  %v706_v7 = vadd.f32 %v555_v40, %v120_v8  ;;  %v722_v18 = vadd.f32 %v595_v42, %v136_v13  ;;  %v169_v42 = vld [vmem:[#allocation2 + $0x1b8] sm:$0xff] }
  0xca   :  { %1271 = vst.msk [vmem:[%s2289_s3 + $0xcc] sm:$0xf] %vm1219_vm2, %v1206_v59  ;;  %v919_v14 = vadd.f32 %v1831_v41, %v851_v12 }
  0xcb   :  { %1224 = vst.msk [vmem:[%s2289_s3 + $0x10] sm:$0xf] %vm1219_vm2, %v1159_v11 }
  0xcc   :  { %vm983_vm5 = vcmp.gt.f32.partialorder %v919_v14, 0.0  ;;  %v1047_v17 = vmul.f32 0.2, %v919_v14  ;;  %785 = vst.msk [vmem:[#allocation2 + $0xa8] sm:$0xff] %vm49_vm0, %v721_v5  ;;  %v138_v5 = vld [vmem:[#allocation2 + $0xc0] sm:$0xff] }
  0xcd   :  { %801 = vst.msk [vmem:[#allocation2 + $0x128] sm:$0xff] %vm49_vm0, %v737_v6  ;;  %v867_v25 = vld [vmem:[#allocation2 + $0x120] sm:$0xff] }
  0xce   :  { %v1111_v21 = vsel %vm983_vm5, %v919_v14, %v1047_v17  ;;  %817 = vst.msk [vmem:[#allocation2 + $0x1a8] sm:$0xff] %vm49_vm0, %v753_v15  ;;  %v935_v30 = vadd.f32 %v1831_v41, %v867_v25  ;;  %v883_v31 = vld [vmem:[#allocation2 + $0x1a0] sm:$0xff] }
  0xcf   :  { %v635_v2 = vpop.f32.mrf.mxu2  ;;  %v675_v4 = vpop.f32.mrf.mxu3  ;;  %v1175_v24 = vpack.c.bf16 %v1111_v21, %v1111_v21  ;;  %770 = vst.msk [vmem:[#allocation2 + $0x30] sm:$0xff] %vm49_vm0, %v706_v7  ;;  %v951_v35 = vadd.f32 %v1831_v41, %v883_v31  ;;  %v836_v36 = vld [vmem:[#allocation2 + $0x28] sm:$0xff] }
  0xd0   :  { %v557_v9 = vpop.f32.mrf.mxu0  ;;  %v597_v10 = vpop.f32.mrf.mxu1  ;;  %v738_v22 = vadd.f32 %v635_v2, %v152_v16  ;;  %v754_v26 = vadd.f32 %v675_v4, %v168_v19  ;;  %786 = vst.msk [vmem:[#allocation2 + $0xb0] sm:$0xff] %vm49_vm0, %v722_v18  ;;  %vm999_vm6 = vcmp.gt.f32.partialorder %v935_v30, 0.0  ;;  %v1063_v38 = vmul.f32 0.2, %v935_v30 }
  0xd1   :  { %v707_v32 = vadd.f32 %v557_v9, %v121_v20  ;;  %1240 = vst.msk [vmem:[%s2289_s3 + $0x50] sm:$0xf] %vm1219_vm2, %v1175_v24  ;;  %v723_v37 = vadd.f32 %v597_v10, %v137_v23  ;;  %v904_v39 = vadd.f32 %v1831_v41, %v836_v36  ;;  %vm1015_vm7 = vcmp.gt.f32.partialorder %v951_v35, 0.0 }
  0xd2   :  { %802 = vst.msk [vmem:[#allocation2 + $0x130] sm:$0xff] %vm49_vm0, %v738_v22  ;;  %v1079_v43 = vmul.f32 0.2, %v951_v35  ;;  %v1127_v45 = vsel %vm999_vm6, %v935_v30, %v1063_v38 }
  0xd3   :  { %v852_v44 = vld [vmem:[#allocation2 + $0xa8] sm:$0xff]  ;;  %818 = vst.msk [vmem:[#allocation2 + $0x1b0] sm:$0xff] %vm49_vm0, %v754_v26  ;;  %vm968_vm8 = vcmp.gt.f32.partialorder %v904_v39, 0.0  ;;  %v1032_v46 = vmul.f32 0.2, %v904_v39  ;;  %v1191_v49 = vpack.c.bf16 %v1127_v45, %v1127_v45 }
  0xd4   :  { %v920_v47 = vadd.f32 %v1831_v41, %v852_v44  ;;  %v868_v48 = vld [vmem:[#allocation2 + $0x128] sm:$0xff]  ;;  %771 = vst.msk [vmem:[#allocation2 + $0x38] sm:$0xff] %vm49_vm0, %v707_v32  ;;  %v1143_v50 = vsel %vm1015_vm7, %v951_v35, %v1079_v43 }
  0xd5   :  { %v936_v51 = vadd.f32 %v1831_v41, %v868_v48  ;;  %v884_v52 = vld [vmem:[#allocation2 + $0x1a8] sm:$0xff]  ;;  %787 = vst.msk [vmem:[#allocation2 + $0xb8] sm:$0xff] %vm49_vm0, %v723_v37  ;;  %v1207_v55 = vpack.c.bf16 %v1143_v50, %v1143_v50  ;;  %v1096_v56 = vsel %vm968_vm8, %v904_v39, %v1032_v46 }
  0xd6   :  { %vm984_vm9 = vcmp.gt.f32.partialorder %v920_v47, 0.0  ;;  %v1048_v57 = vmul.f32 0.2, %v920_v47  ;;  %v837_v58 = vld [vmem:[#allocation2 + $0x30] sm:$0xff]  ;;  %1256 = vst.msk [vmem:[%s2289_s3 + $0x90] sm:$0xf] %vm1219_vm2, %v1191_v49  ;;  %v1160_v59 = vpack.c.bf16 %v1096_v56, %v1096_v56  ;;  %v952_v61 = vadd.f32 %v1831_v41, %v884_v52 }
  0xd7   :  { %v637_v28 = vpop.f32.mrf.mxu2  ;;  %v677_v29 = vpop.f32.mrf.mxu3  ;;  %vm1000_vm10 = vcmp.gt.f32.partialorder %v936_v51, 0.0  ;;  %v1064_v60 = vmul.f32 0.2, %v936_v51  ;;  %v853_v62 = vld [vmem:[#allocation2 + $0xb0] sm:$0xff]  ;;  %1272 = vst.msk [vmem:[%s2289_s3 + $0xd0] sm:$0xf] %vm1219_vm2, %v1207_v55  ;;  %v905_v2 = vadd.f32 %v1831_v41, %v837_v58 }
  0xd8   :  { %v560_v33 = vpop.f32.mrf.mxu0  ;;  %v1992_v34 = vpop.f32.mrf.mxu1  ;;  %v739_v40 = vadd.f32 %v637_v28, %v153_v27  ;;  %v755_v53 = vadd.f32 %v677_v29, %v169_v42  ;;  %v1112_v1 = vsel %vm984_vm9, %v920_v47, %v1048_v57  ;;  %v921_v4 = vadd.f32 %v1831_v41, %v853_v62  ;;  %1225 = vst.msk [vmem:[%s2289_s3 + $0x14] sm:$0xf] %vm1219_vm2, %v1160_v59  ;;  %v154_v29 = vld [vmem:[#allocation2 + $0x140] sm:$0xff]  ;;  %v139_v55 = vld [vmem:[#allocation2 + $0xc8] sm:$0xff] }
  0xd9   :  { %v708_v3 = vadd.f32 %v560_v33, %v122_v54  ;;  %v1176_v10 = vpack.c.bf16 %v1112_v1, %v1112_v1  ;;  %v1128_v11 = vsel %vm1000_vm10, %v936_v51, %v1064_v60  ;;  %vm1016_vm11 = vcmp.gt.f32.partialorder %v952_v61, 0.0  ;;  %v869_v6 = vld [vmem:[#allocation2 + $0x130] sm:$0xff]  ;;  %v170_v42 = vld [vmem:[#allocation2 + $0x1c0] sm:$0xff]  ;;  %v123_v54 = vld [vmem:[#allocation2 + $0x48] sm:$0xff] }
  0xda   :  { %803 = vst.msk [vmem:[#allocation2 + $0x138] sm:$0xff] %vm49_vm0, %v739_v40  ;;  %v1080_v12 = vmul.f32 0.2, %v952_v61  ;;  %v1192_v13 = vpack.c.bf16 %v1128_v11, %v1128_v11  ;;  %vm969_vm12 = vcmp.gt.f32.partialorder %v905_v2, 0.0  ;;  %v1033_v14 = vmul.f32 0.2, %v905_v2 }
  0xdb   :  { %vm985_vm13 = vcmp.gt.f32.partialorder %v921_v4, 0.0  ;;  %v885_v15 = vld [vmem:[#allocation2 + $0x1b0] sm:$0xff]  ;;  %819 = vst.msk [vmem:[#allocation2 + $0x1b8] sm:$0xff] %vm49_vm0, %v755_v53  ;;  %v1049_v16 = vmul.f32 0.2, %v921_v4  ;;  %v937_v17 = vadd.f32 %v1831_v41, %v869_v6  ;;  %v838_v19 = vld [vmem:[#allocation2 + $0x38] sm:$0xff]  ;;  %v724_v24 = vadd.f32 %v1992_v34, %v138_v5 }
  0xdc   :  { %1241 = vst.msk [vmem:[%s2289_s3 + $0x54] sm:$0xf] %vm1219_vm2, %v1176_v10  ;;  %v1144_v7 = vsel %vm1016_vm11, %v952_v61, %v1080_v12  ;;  %v953_v18 = vadd.f32 %v1831_v41, %v885_v15  ;;  %v1097_v21 = vsel %vm969_vm12, %v905_v2, %v1033_v14  ;;  %v906_v22 = vadd.f32 %v1831_v41, %v838_v19  ;;  %v854_v23 = vld [vmem:[#allocation2 + $0xb8] sm:$0xff]  ;;  %v124_v12 = vld [vmem:[#allocation2 + $0x50] sm:$0xff] }
  0xdd   :  { %1257 = vst.msk [vmem:[%s2289_s3 + $0x94] sm:$0xf] %vm1219_vm2, %v1192_v13  ;;  %v1208_v20 = vpack.c.bf16 %v1144_v7, %v1144_v7  ;;  %v1161_v25 = vpack.c.bf16 %v1097_v21, %v1097_v21  ;;  %v1113_v26 = vsel %vm985_vm13, %v921_v4, %v1049_v16  ;;  %vm1001_vm14 = vcmp.gt.f32.partialorder %v937_v17, 0.0  ;;  %v140_v16 = vld [vmem:[#allocation2 + $0xd0] sm:$0xff] }
  0xde   :  { %v1065_v27 = vmul.f32 0.2, %v937_v17  ;;  %772 = vst.msk [vmem:[#allocation2 + $0x40] sm:$0xff] %vm49_vm0, %v708_v3  ;;  %v1177_v30 = vpack.c.bf16 %v1113_v26, %v1113_v26  ;;  %vm1017_vm15 = vcmp.gt.f32.partialorder %v953_v18, 0.0  ;;  %v1081_v31 = vmul.f32 0.2, %v953_v18 }
  0xdf   :  { %v640_v63 = vpop.f32.mrf.mxu2  ;;  %v2012_v0 = vpop.f32.mrf.mxu3  ;;  %1273 = vst.msk [vmem:[%s2289_s3 + $0xd4] sm:$0xf] %vm1219_vm2, %v1208_v20  ;;  %vm970_vm1 = vcmp.gt.f32.partialorder %v906_v22, 0.0  ;;  %v1034_v33 = vmul.f32 0.2, %v906_v22  ;;  %v922_v34 = vadd.f32 %v1831_v41, %v854_v23  ;;  %v171_v3 = vld [vmem:[#allocation2 + $0x1c8] sm:$0xff] }
  0xe0   :  { %v2020_v8 = vpop.f32.mrf.mxu0  ;;  %v2022_v9 = vpop.f32.mrf.mxu1  ;;  %1226 = vst.msk [vmem:[%s2289_s3 + $0x18] sm:$0xf] %vm1219_vm2, %v1161_v25  ;;  %v1129_v32 = vsel %vm1001_vm14, %v937_v17, %v1065_v27  ;;  %v1145_v39 = vsel %vm1017_vm15, %v953_v18, %v1081_v31  ;;  %v740_v40 = vadd.f32 %v640_v63, %v154_v29  ;;  %v756_v53 = vadd.f32 %v2012_v0, %v170_v42  ;;  %v155_v0 = vld [vmem:[#allocation2 + $0x148] sm:$0xff]  ;;  %v156_v19 = vld [vmem:[#allocation2 + $0x150] sm:$0xff]  ;;  %v125_v27 = vld [vmem:[#allocation2 + $0x58] sm:$0xff] }
  0xe1   :  { %v870_v28 = vld [vmem:[#allocation2 + $0x138] sm:$0xff]  ;;  %1242 = vst.msk [vmem:[%s2289_s3 + $0x58] sm:$0xf] %vm1219_vm2, %v1177_v30  ;;  %v1193_v38 = vpack.c.bf16 %v1129_v32, %v1129_v32  ;;  %v1209_v45 = vpack.c.bf16 %v1145_v39, %v1145_v39  ;;  %v1098_v46 = vsel %vm970_vm1, %v906_v22, %v1034_v33  ;;  %vm986_vm3 = vcmp.gt.f32.partialorder %v922_v34, 0.0  ;;  %v172_v21 = vld [vmem:[#allocation2 + $0x1d0] sm:$0xff] }
  0xe2   :  { %v938_v35 = vadd.f32 %v1831_v41, %v870_v28  ;;  %v1050_v47 = vmul.f32 0.2, %v922_v34  ;;  %v886_v48 = vld [vmem:[#allocation2 + $0x1b8] sm:$0xff]  ;;  %788 = vst.msk [vmem:[#allocation2 + $0xc0] sm:$0xff] %vm49_vm0, %v724_v24  ;;  %v1162_v49 = vpack.c.bf16 %v1098_v46, %v1098_v46  ;;  %v709_v63 = vadd.f32 %v2020_v8, %v123_v54 }
  0xe3   :  { %1258 = vst.msk [vmem:[%s2289_s3 + $0x98] sm:$0xf] %vm1219_vm2, %v1193_v38  ;;  %v954_v51 = vadd.f32 %v1831_v41, %v886_v48  ;;  %v725_v4 = vadd.f32 %v2022_v9, %v139_v55  ;;  %v141_v28 = vld [vmem:[#allocation2 + $0xd8] sm:$0xff] }
  0xe4   :  { %vm1002_vm4 = vcmp.gt.f32.partialorder %v938_v35, 0.0  ;;  %v1066_v50 = vmul.f32 0.2, %v938_v35  ;;  %1274 = vst.msk [vmem:[%s2289_s3 + $0xd8] sm:$0xf] %vm1219_vm2, %v1209_v45  ;;  %v1114_v52 = vsel %vm986_vm3, %v922_v34, %v1050_v47  ;;  %v173_v48 = vld [vmem:[#allocation2 + $0x1d8] sm:$0xff] }
  0xe5   :  { %1227 = vst.msk [vmem:[%s2289_s3 + $0x1c] sm:$0xf] %vm1219_vm2, %v1162_v49  ;;  %v1178_v56 = vpack.c.bf16 %v1114_v52, %v1114_v52  ;;  %vm1018_vm5 = vcmp.gt.f32.partialorder %v954_v51, 0.0  ;;  %v1082_v58 = vmul.f32 0.2, %v954_v51  ;;  %v839_v59 = vld [vmem:[#allocation2 + $0x40] sm:$0xff] }
  0xe6   :  { %v1130_v57 = vsel %vm1002_vm4, %v938_v35, %v1066_v50  ;;  %v907_v61 = vadd.f32 %v1831_v41, %v839_v59  ;;  %804 = vst.msk [vmem:[#allocation2 + $0x140] sm:$0xff] %vm49_vm0, %v740_v40  ;;  %v157_v40 = vld [vmem:[#allocation2 + $0x158] sm:$0xff] }
  0xe7   :  { %v642_v36 = vpop.f32.mrf.mxu2  ;;  %v682_v37 = vpop.f32.mrf.mxu3  ;;  %v1194_v60 = vpack.c.bf16 %v1130_v57, %v1130_v57  ;;  %1243 = vst.msk [vmem:[%s2289_s3 + $0x5c] sm:$0xf] %vm1219_vm2, %v1178_v56  ;;  %v1146_v62 = vsel %vm1018_vm5, %v954_v51, %v1082_v58 }
  0xe8   :  { %v565_v43 = vpop.f32.mrf.mxu0  ;;  %v605_v44 = vpop.f32.mrf.mxu1  ;;  %v1210_v1 = vpack.c.bf16 %v1146_v62, %v1146_v62  ;;  %vm971_vm6 = vcmp.gt.f32.partialorder %v907_v61, 0.0  ;;  %v1035_v2 = vmul.f32 0.2, %v907_v61  ;;  %820 = vst.msk [vmem:[#allocation2 + $0x1c0] sm:$0xff] %vm49_vm0, %v756_v53  ;;  %v741_v15 = vadd.f32 %v642_v36, %v155_v0 }
  0xe9   :  { %1259 = vst.msk [vmem:[%s2289_s3 + $0x9c] sm:$0xf] %vm1219_vm2, %v1194_v60  ;;  %v855_v11 = vld [vmem:[#allocation2 + $0xc0] sm:$0xff]  ;;  %v757_v9 = vadd.f32 %v682_v37, %v171_v3  ;;  %v710_v18 = vadd.f32 %v565_v43, %v124_v12  ;;  %v726_v24 = vadd.f32 %v605_v44, %v140_v16 }
  0xea   :  { %1275 = vst.msk [vmem:[%s2289_s3 + $0xdc] sm:$0xf] %vm1219_vm2, %v1210_v1  ;;  %v1099_v13 = vsel %vm971_vm6, %v907_v61, %v1035_v2  ;;  %v923_v14 = vadd.f32 %v1831_v41, %v855_v11  ;;  %v126_v61 = vld [vmem:[#allocation2 + $0x60] sm:$0xff] }
  0xeb   :  { %v1163_v7 = vpack.c.bf16 %v1099_v13, %v1099_v13  ;;  %773 = vst.msk [vmem:[#allocation2 + $0x48] sm:$0xff] %vm49_vm0, %v709_v63  ;;  %v142_v13 = vld [vmem:[#allocation2 + $0xe0] sm:$0xff] }
  0xec   :  { %vm987_vm7 = vcmp.gt.f32.partialorder %v923_v14, 0.0  ;;  %v1051_v17 = vmul.f32 0.2, %v923_v14  ;;  %789 = vst.msk [vmem:[#allocation2 + $0xc8] sm:$0xff] %vm49_vm0, %v725_v4 }
  0xed   :  { %1228 = vst.msk [vmem:[%s2289_s3 + $0x20] sm:$0xf] %vm1219_vm2, %v1163_v7  ;;  %v871_v20 = vld [vmem:[#allocation2 + $0x140] sm:$0xff] }
  0xee   :  { %v1115_v22 = vsel %vm987_vm7, %v923_v14, %v1051_v17  ;;  %v939_v23 = vadd.f32 %v1831_v41, %v871_v20  ;;  %805 = vst.msk [vmem:[#allocation2 + $0x148] sm:$0xff] %vm49_vm0, %v741_v15 }
  0xef   :  { %v645_v5 = vpop.f32.mrf.mxu2  ;;  %v685_v10 = vpop.f32.mrf.mxu3  ;;  %v1179_v25 = vpack.c.bf16 %v1115_v22, %v1115_v22  ;;  %821 = vst.msk [vmem:[#allocation2 + $0x1c8] sm:$0xff] %vm49_vm0, %v757_v9  ;;  %v887_v30 = vld [vmem:[#allocation2 + $0x1c0] sm:$0xff] }
  0xf0   :  { %v567_v6 = vpop.f32.mrf.mxu0  ;;  %v607_v8 = vpop.f32.mrf.mxu1  ;;  %v742_v26 = vadd.f32 %v645_v5, %v156_v19  ;;  %vm1003_vm8 = vcmp.gt.f32.partialorder %v939_v23, 0.0  ;;  %v1067_v29 = vmul.f32 0.2, %v939_v23  ;;  %774 = vst.msk [vmem:[#allocation2 + $0x50] sm:$0xff] %vm49_vm0, %v710_v18  ;;  %v758_v31 = vadd.f32 %v685_v10, %v172_v21 }
  0xf1   :  { %1244 = vst.msk [vmem:[%s2289_s3 + $0x60] sm:$0xf] %vm1219_vm2, %v1179_v25  ;;  %v955_v34 = vadd.f32 %v1831_v41, %v887_v30  ;;  %v711_v38 = vadd.f32 %v567_v6, %v125_v27  ;;  %v727_v39 = vadd.f32 %v607_v8, %v141_v28 }
  0xf2   :  { %v1131_v36 = vsel %vm1003_vm8, %v939_v23, %v1067_v29  ;;  %v840_v37 = vld [vmem:[#allocation2 + $0x48] sm:$0xff]  ;;  %790 = vst.msk [vmem:[#allocation2 + $0xd0] sm:$0xff] %vm49_vm0, %v726_v24  ;;  %v158_v24 = vld [vmem:[#allocation2 + $0x160] sm:$0xff] }
  0xf3   :  { %v1195_v42 = vpack.c.bf16 %v1131_v36, %v1131_v36  ;;  %vm1019_vm9 = vcmp.gt.f32.partialorder %v955_v34, 0.0  ;;  %v1083_v43 = vmul.f32 0.2, %v955_v34  ;;  %v908_v44 = vadd.f32 %v1831_v41, %v840_v37  ;;  %v856_v45 = vld [vmem:[#allocation2 + $0xc8] sm:$0xff]  ;;  %806 = vst.msk [vmem:[#allocation2 + $0x150] sm:$0xff] %vm49_vm0, %v742_v26  ;;  %v174_v37 = vld [vmem:[#allocation2 + $0x1e0] sm:$0xff] }
  0xf4   :  { %v924_v47 = vadd.f32 %v1831_v41, %v856_v45  ;;  %822 = vst.msk [vmem:[#allocation2 + $0x1d0] sm:$0xff] %vm49_vm0, %v758_v31 }
  0xf5   :  { %1260 = vst.msk [vmem:[%s2289_s3 + $0xa0] sm:$0xf] %vm1219_vm2, %v1195_v42  ;;  %v1147_v49 = vsel %vm1019_vm9, %v955_v34, %v1083_v43  ;;  %vm972_vm10 = vcmp.gt.f32.partialorder %v908_v44, 0.0  ;;  %v1036_v50 = vmul.f32 0.2, %v908_v44  ;;  %v872_v51 = vld [vmem:[#allocation2 + $0x148] sm:$0xff] }
  0xf6   :  { %v1211_v53 = vpack.c.bf16 %v1147_v49, %v1147_v49  ;;  %vm988_vm11 = vcmp.gt.f32.partialorder %v924_v47, 0.0  ;;  %v1052_v54 = vmul.f32 0.2, %v924_v47  ;;  %v940_v55 = vadd.f32 %v1831_v41, %v872_v51  ;;  %v888_v56 = vld [vmem:[#allocation2 + $0x1c8] sm:$0xff]  ;;  %775 = vst.msk [vmem:[#allocation2 + $0x58] sm:$0xff] %vm49_vm0, %v711_v38 }
  0xf7   :  { %v647_v32 = vpop.f32.mrf.mxu2  ;;  %v687_v33 = vpop.f32.mrf.mxu3  ;;  %v1100_v57 = vsel %vm972_vm10, %v908_v44, %v1036_v50  ;;  %v956_v58 = vadd.f32 %v1831_v41, %v888_v56  ;;  %v841_v59 = vld [vmem:[#allocation2 + $0x50] sm:$0xff]  ;;  %791 = vst.msk [vmem:[#allocation2 + $0xd8] sm:$0xff] %vm49_vm0, %v727_v39  ;;  %v127_v50 = vld [vmem:[#allocation2 + $0x68] sm:$0xff] }
  0xf8   :  { %v570_v35 = vpop.f32.mrf.mxu0  ;;  %v610_v46 = vpop.f32.mrf.mxu1  ;;  %v743_v52 = vadd.f32 %v647_v32, %v157_v40  ;;  %v759_v60 = vadd.f32 %v687_v33, %v173_v48  ;;  %1276 = vst.msk [vmem:[%s2289_s3 + $0xe0] sm:$0xf] %vm1219_vm2, %v1211_v53  ;;  %v1164_v62 = vpack.c.bf16 %v1100_v57, %v1100_v57  ;;  %v1116_v63 = vsel %vm988_vm11, %v924_v47, %v1052_v54  ;;  %v2150_v32 = vld [vmem:[#allocation5] ss:$0 sm:$0xff]  ;;  %v143_v51 = vld [vmem:[#allocation2 + $0xe8] sm:$0xff] }
  0xf9   :  { %vm1004_vm12 = vcmp.gt.f32.partialorder %v940_v55, 0.0  ;;  %v1068_v0 = vmul.f32 0.2, %v940_v55  ;;  %v1180_v4 = vpack.c.bf16 %v1116_v63, %v1116_v63  ;;  %vm1020_vm13 = vcmp.gt.f32.partialorder %v956_v58, 0.0  ;;  %v857_v10 = vld [vmem:[#allocation2 + $0xd0] sm:$0xff] }
  0xfa   :  { %v1084_v3 = vmul.f32 0.2, %v956_v58  ;;  %v909_v5 = vadd.f32 %v1831_v41, %v841_v59  ;;  %807 = vst.msk [vmem:[#allocation2 + $0x158] sm:$0xff] %vm49_vm0, %v743_v52  ;;  %v925_v12 = vadd.f32 %v1831_v41, %v857_v10  ;;  %v873_v6 = vld [vmem:[#allocation2 + $0x150] sm:$0xff]  ;;  %v712_v8 = vadd.f32 %v570_v35, %v126_v61 }
  0xfb   :  { %1229 = vst.msk [vmem:[%s2289_s3 + $0x24] sm:$0xf] %vm1219_vm2, %v1164_v62  ;;  %v1132_v11 = vsel %vm1004_vm12, %v940_v55, %v1068_v0  ;;  %v889_v16 = vld [vmem:[#allocation2 + $0x1d0] sm:$0xff]  ;;  %v941_v19 = vadd.f32 %v1831_v41, %v873_v6  ;;  %v728_v23 = vadd.f32 %v610_v46, %v142_v13  ;;  %v159_v62 = vld [vmem:[#allocation2 + $0x168] sm:$0xff] }
  0xfc   :  { %1245 = vst.msk [vmem:[%s2289_s3 + $0x64] sm:$0xf] %vm1219_vm2, %v1180_v4  ;;  %v1196_v15 = vpack.c.bf16 %v1132_v11, %v1132_v11  ;;  %v1148_v7 = vsel %vm1020_vm13, %v956_v58, %v1084_v3  ;;  %vm973_vm14 = vcmp.gt.f32.partialorder %v909_v5, 0.0  ;;  %v1037_v9 = vmul.f32 0.2, %v909_v5  ;;  %v175_v4 = vld [vmem:[#allocation2 + $0x1e8] sm:$0xff] }
  0xfd   :  { %v1212_v17 = vpack.c.bf16 %v1148_v7, %v1148_v7  ;;  %vm989_vm15 = vcmp.gt.f32.partialorder %v925_v12, 0.0  ;;  %v1053_v18 = vmul.f32 0.2, %v925_v12  ;;  %823 = vst.msk [vmem:[#allocation2 + $0x1d8] sm:$0xff] %vm49_vm0, %v759_v60  ;;  %v957_v21 = vadd.f32 %v1831_v41, %v889_v16  ;;  %v842_v22 = vld [vmem:[#allocation2 + $0x58] sm:$0xff]  ;;  %v128_v3 = vld [vmem:[#allocation2 + $0x70] sm:$0xff] }
  0xfe   :  { %1261 = vst.msk [vmem:[%s2289_s3 + $0xa4] sm:$0xf] %vm1219_vm2, %v1196_v15  ;;  %v1101_v20 = vsel %vm973_vm14, %v909_v5, %v1037_v9  ;;  %vm1005_vm1 = vcmp.gt.f32.partialorder %v941_v19, 0.0  ;;  %v1069_v28 = vmul.f32 0.2, %v941_v19  ;;  %v858_v29 = vld [vmem:[#allocation2 + $0xd8] sm:$0xff]  ;;  %v910_v41 = vadd.f32 %v2150_v32, %v842_v22 }
  0xff   :  { %v650_v1 = vpop.f32.mrf.mxu2  ;;  %v2124_v2 = vpop.f32.mrf.mxu3  ;;  %1277 = vst.msk [vmem:[%s2289_s3 + $0xe4] sm:$0xf] %vm1219_vm2, %v1212_v17  ;;  %v1165_v26 = vpack.c.bf16 %v1101_v20, %v1101_v20  ;;  %v1117_v27 = vsel %vm989_vm15, %v925_v12, %v1053_v18  ;;  %vm1021_vm3 = vcmp.gt.f32.partialorder %v957_v21, 0.0  ;;  %v1085_v31 = vmul.f32 0.2, %v957_v21  ;;  %v144_v7 = vld [vmem:[#allocation2 + $0xf0] sm:$0xff] }
 0x100   :  { %v2133_v14 = vpop.f32.mrf.mxu0  ;;  %v612_v25 = vpop.f32.mrf.mxu1  ;;  %v1181_v30 = vpack.c.bf16 %v1117_v27, %v1117_v27  ;;  %776 = vst.msk [vmem:[#allocation2 + $0x60] sm:$0xff] %vm49_vm0, %v712_v8  ;;  %v1133_v33 = vsel %vm1005_vm1, %v941_v19, %v1069_v28  ;;  %v926_v34 = vadd.f32 %v2150_v32, %v858_v29  ;;  %v744_v36 = vadd.f32 %v650_v1, %v158_v24  ;;  %v160_v9 = vld [vmem:[#allocation2 + $0x170] sm:$0xff] }
 0x101   :  { %1230 = vst.msk [vmem:[%s2289_s3 + $0x28] sm:$0xf] %vm1219_vm2, %v1165_v26  ;;  %v874_v35 = vld [vmem:[#allocation2 + $0x158] sm:$0xff]  ;;  %v1197_v39 = vpack.c.bf16 %v1133_v33, %v1133_v33  ;;  %v1149_v40 = vsel %vm1021_vm3, %v957_v21, %v1085_v31  ;;  %vm974_vm4 = vcmp.gt.f32.partialorder %v910_v41, 0.0  ;;  %v1038_v42 = vmul.f32 0.2, %v910_v41 }
 0x102   :  { %1246 = vst.msk [vmem:[%s2289_s3 + $0x68] sm:$0xf] %vm1219_vm2, %v1181_v30  ;;  %v1213_v43 = vpack.c.bf16 %v1149_v40, %v1149_v40  ;;  %vm990_vm5 = vcmp.gt.f32.partialorder %v926_v34, 0.0  ;;  %v1054_v44 = vmul.f32 0.2, %v926_v34  ;;  %v942_v45 = vadd.f32 %v2150_v32, %v874_v35  ;;  %v176_v24 = vld [vmem:[#allocation2 + $0x1f0] sm:$0xff] }
 0x103   :  { %792 = vst.msk [vmem:[#allocation2 + $0xe0] sm:$0xff] %vm49_vm0, %v728_v23  ;;  %v1102_v47 = vsel %vm974_vm4, %v910_v41, %v1038_v42  ;;  %v760_v49 = vadd.f32 %v2124_v2, %v174_v37  ;;  %v713_v60 = vadd.f32 %v2133_v14, %v127_v50  ;;  %v729_v61 = vadd.f32 %v612_v25, %v143_v51  ;;  %v129_v25 = vld [vmem:[#allocation2 + $0x78] sm:$0xff] }
 0x104   :  { %1262 = vst.msk [vmem:[%s2289_s3 + $0xa8] sm:$0xf] %vm1219_vm2, %v1197_v39  ;;  %v890_v48 = vld [vmem:[#allocation2 + $0x1d8] sm:$0xff]  ;;  %v1166_v52 = vpack.c.bf16 %v1102_v47, %v1102_v47  ;;  %v1118_v53 = vsel %vm990_vm5, %v926_v34, %v1054_v44  ;;  %vm1006_vm6 = vcmp.gt.f32.partialorder %v942_v45, 0.0  ;;  %v1070_v54 = vmul.f32 0.2, %v942_v45 }
 0x105   :  { %1278 = vst.msk [vmem:[%s2289_s3 + $0xe8] sm:$0xf] %vm1219_vm2, %v1213_v43  ;;  %v1182_v56 = vpack.c.bf16 %v1118_v53, %v1118_v53  ;;  %v958_v57 = vadd.f32 %v2150_v32, %v890_v48  ;;  %v161_v44 = vld [vmem:[#allocation2 + $0x178] sm:$0xff] }
 0x106   :  { %808 = vst.msk [vmem:[#allocation2 + $0x160] sm:$0xff] %vm49_vm0, %v744_v36  ;;  %v1134_v58 = vsel %vm1006_vm6, %v942_v45, %v1070_v54  ;;  %v145_v36 = vld [vmem:[#allocation2 + $0xf8] sm:$0xff] }
 0x107   :  { %v652_v38 = vpop.f32.mrf.mxu2  ;;  %v692_v46 = vpop.f32.mrf.mxu3  ;;  %1231 = vst.msk [vmem:[%s2289_s3 + $0x2c] sm:$0xf] %vm1219_vm2, %v1166_v52  ;;  %v843_v59 = vld [vmem:[#allocation2 + $0x60] sm:$0xff]  ;;  %v1198_v63 = vpack.c.bf16 %v1134_v58, %v1134_v58  ;;  %vm1022_vm7 = vcmp.gt.f32.partialorder %v958_v57, 0.0  ;;  %v1086_v0 = vmul.f32 0.2, %v958_v57 }
 0x108   :  { %v575_v55 = vpop.f32.mrf.mxu0  ;;  %1247 = vst.msk [vmem:[%s2289_s3 + $0x6c] sm:$0xf] %vm1219_vm2, %v1182_v56  ;;  %v911_v1 = vadd.f32 %v2150_v32, %v843_v59  ;;  %v615_v2 = vpop.f32.mrf.mxu1  ;;  %v745_v12 = vadd.f32 %v652_v38, %v159_v62  ;;  %v761_v15 = vadd.f32 %v692_v46, %v175_v4  ;;  %v177_v56 = vld [vmem:[#allocation2 + $0x1f8] sm:$0xff] }
 0x109   :  { %824 = vst.msk [vmem:[#allocation2 + $0x1e0] sm:$0xff] %vm49_vm0, %v760_v49  ;;  %v1150_v5 = vsel %vm1022_vm7, %v958_v57, %v1086_v0  ;;  %v714_v19 = vadd.f32 %v575_v55, %v128_v3  ;;  %v730_v23 = vadd.f32 %v615_v2, %v144_v7 }
 0x10a   :  { %1263 = vst.msk [vmem:[%s2289_s3 + $0xac] sm:$0xf] %vm1219_vm2, %v1198_v63  ;;  %vm975_vm8 = vcmp.gt.f32.partialorder %v911_v1, 0.0  ;;  %v1039_v10 = vmul.f32 0.2, %v911_v1  ;;  %v859_v11 = vld [vmem:[#allocation2 + $0xe0] sm:$0xff]  ;;  %v1214_v8 = vpack.c.bf16 %v1150_v5, %v1150_v5 }
 0x10b   :  { %v927_v13 = vadd.f32 %v2150_v32, %v859_v11  ;;  %777 = vst.msk [vmem:[#allocation2 + $0x68] sm:$0xff] %vm49_vm0, %v713_v60 }
 0x10c   :  { %v1103_v14 = vsel %vm975_vm8, %v911_v1, %v1039_v10  ;;  %793 = vst.msk [vmem:[#allocation2 + $0xe8] sm:$0xff] %vm49_vm0, %v729_v61 }
 0x10d   :  { %1279 = vst.msk [vmem:[%s2289_s3 + $0xec] sm:$0xf] %vm1219_vm2, %v1214_v8  ;;  %v1167_v16 = vpack.c.bf16 %v1103_v14, %v1103_v14  ;;  %vm991_vm9 = vcmp.gt.f32.partialorder %v927_v13, 0.0  ;;  %v1055_v17 = vmul.f32 0.2, %v927_v13  ;;  %v875_v18 = vld [vmem:[#allocation2 + $0x160] sm:$0xff] }
 0x10e   :  { %v943_v21 = vadd.f32 %v2150_v32, %v875_v18  ;;  %809 = vst.msk [vmem:[#allocation2 + $0x168] sm:$0xff] %vm49_vm0, %v745_v12 }
 0x10f   :  { %v655_v6 = vpop.f32.mrf.mxu2  ;;  %v695_v20 = vpop.f32.mrf.mxu3  ;;  %1232 = vst.msk [vmem:[%s2289_s3 + $0x30] sm:$0xf] %vm1219_vm2, %v1167_v16  ;;  %v1119_v22 = vsel %vm991_vm9, %v927_v13, %v1055_v17 }
 0x110   :  { %v577_v26 = vpop.f32.mrf.mxu0  ;;  %v1183_v27 = vpack.c.bf16 %v1119_v22, %v1119_v22  ;;  %vm1007_vm10 = vcmp.gt.f32.partialorder %v943_v21, 0.0  ;;  %v1071_v28 = vmul.f32 0.2, %v943_v21  ;;  %v891_v29 = vld [vmem:[#allocation2 + $0x1e0] sm:$0xff]  ;;  %825 = vst.msk [vmem:[#allocation2 + $0x1e8] sm:$0xff] %vm49_vm0, %v761_v15  ;;  %v746_v30 = vadd.f32 %v655_v6, %v160_v9  ;;  %v617_v37 = vpop.f32.mrf.mxu1 }
 0x111   :  { %v959_v31 = vadd.f32 %v2150_v32, %v891_v29  ;;  %778 = vst.msk [vmem:[#allocation2 + $0x70] sm:$0xff] %vm49_vm0, %v714_v19  ;;  %v762_v34 = vadd.f32 %v695_v20, %v176_v24  ;;  %v715_v35 = vadd.f32 %v577_v26, %v129_v25  ;;  %v731_v49 = vadd.f32 %v617_v37, %v145_v36 }
 0x112   :  { %1248 = vst.msk [vmem:[%s2289_s3 + $0x70] sm:$0xf] %vm1219_vm2, %v1183_v27  ;;  %v1135_v41 = vsel %vm1007_vm10, %v943_v21, %v1071_v28  ;;  %v844_v33 = vld [vmem:[#allocation2 + $0x68] sm:$0xff] }
 0x113   :  { %v1199_v38 = vpack.c.bf16 %v1135_v41, %v1135_v41  ;;  %vm1023_vm11 = vcmp.gt.f32.partialorder %v959_v31, 0.0  ;;  %v1087_v39 = vmul.f32 0.2, %v959_v31  ;;  %v912_v40 = vadd.f32 %v2150_v32, %v844_v33  ;;  %v860_v42 = vld [vmem:[#allocation2 + $0xe8] sm:$0xff]  ;;  %794 = vst.msk [vmem:[#allocation2 + $0xf0] sm:$0xff] %vm49_vm0, %v730_v23 }
 0x114   :  { %v928_v43 = vadd.f32 %v2150_v32, %v860_v42  ;;  %810 = vst.msk [vmem:[#allocation2 + $0x170] sm:$0xff] %vm49_vm0, %v746_v30 }
 0x115   :  { %1264 = vst.msk [vmem:[%s2289_s3 + $0xb0] sm:$0xf] %vm1219_vm2, %v1199_v38  ;;  %v1151_v46 = vsel %vm1023_vm11, %v959_v31, %v1087_v39  ;;  %vm976_vm12 = vcmp.gt.f32.partialorder %v912_v40, 0.0  ;;  %v1040_v47 = vmul.f32 0.2, %v912_v40  ;;  %v876_v48 = vld [vmem:[#allocation2 + $0x168] sm:$0xff] }
 0x116   :  { %v1215_v50 = vpack.c.bf16 %v1151_v46, %v1151_v46  ;;  %vm992_vm13 = vcmp.gt.f32.partialorder %v928_v43, 0.0  ;;  %v1056_v51 = vmul.f32 0.2, %v928_v43  ;;  %v944_v52 = vadd.f32 %v2150_v32, %v876_v48  ;;  %826 = vst.msk [vmem:[#allocation2 + $0x1f0] sm:$0xff] %vm49_vm0, %v762_v34 }
 0x117   :  { %v657_v45 = vpop.f32.mrf.mxu2  ;;  %v1104_v53 = vsel %vm976_vm12, %v912_v40, %v1040_v47  ;;  %v892_v54 = vld [vmem:[#allocation2 + $0x1e8] sm:$0xff]  ;;  %779 = vst.msk [vmem:[#allocation2 + $0x78] sm:$0xff] %vm49_vm0, %v715_v35  ;;  %v697_v57 = vpop.f32.mrf.mxu3 }
 0x118   :  { %v747_v55 = vadd.f32 %v657_v45, %v161_v44  ;;  %1280 = vst.msk [vmem:[%s2289_s3 + $0xf0] sm:$0xf] %vm1219_vm2, %v1215_v50  ;;  %v1168_v58 = vpack.c.bf16 %v1104_v53, %v1104_v53  ;;  %v1120_v59 = vsel %vm992_vm13, %v928_v43, %v1056_v51  ;;  %vm1008_vm14 = vcmp.gt.f32.partialorder %v944_v52, 0.0  ;;  %v845_v61 = vld [vmem:[#allocation2 + $0x70] sm:$0xff] }
 0x119   :  { %v1072_v60 = vmul.f32 0.2, %v944_v52  ;;  %v1184_v62 = vpack.c.bf16 %v1120_v59, %v1120_v59  ;;  %v960_v63 = vadd.f32 %v2150_v32, %v892_v54  ;;  %v913_v0 = vadd.f32 %v2150_v32, %v845_v61  ;;  %795 = vst.msk [vmem:[#allocation2 + $0xf8] sm:$0xff] %vm49_vm0, %v731_v49 }
 0x11a   :  { %1233 = vst.msk [vmem:[%s2289_s3 + $0x34] sm:$0xf] %vm1219_vm2, %v1168_v58  ;;  %v861_v2 = vld [vmem:[#allocation2 + $0xf0] sm:$0xff]  ;;  %v763_v4 = vadd.f32 %v697_v57, %v177_v56 }
 0x11b   :  { %v1136_v1 = vsel %vm1008_vm14, %v944_v52, %v1072_v60  ;;  %1249 = vst.msk [vmem:[%s2289_s3 + $0x74] sm:$0xf] %vm1219_vm2, %v1184_v62  ;;  %vm1024_vm15 = vcmp.gt.f32.partialorder %v960_v63, 0.0  ;;  %v1088_v5 = vmul.f32 0.2, %v960_v63  ;;  %vm977_vm1 = vcmp.gt.f32.partialorder %v913_v0, 0.0 }
 0x11c   :  { %v1200_v3 = vpack.c.bf16 %v1136_v1, %v1136_v1  ;;  %v1041_v10 = vmul.f32 0.2, %v913_v0  ;;  %v929_v11 = vadd.f32 %v2150_v32, %v861_v2  ;;  %v877_v12 = vld [vmem:[#allocation2 + $0x170] sm:$0xff]  ;;  %811 = vst.msk [vmem:[#allocation2 + $0x178] sm:$0xff] %vm49_vm0, %v747_v55 }
 0x11d   :  { %v1152_v6 = vsel %vm1024_vm15, %v960_v63, %v1088_v5  ;;  %v945_v8 = vadd.f32 %v2150_v32, %v877_v12  ;;  %v893_v13 = vld [vmem:[#allocation2 + $0x1f0] sm:$0xff]  ;;  %827 = vst.msk [vmem:[#allocation2 + $0x1f8] sm:$0xff] %vm49_vm0, %v763_v4 }
 0x11e   :  { %1265 = vst.msk [vmem:[%s2289_s3 + $0xb4] sm:$0xf] %vm1219_vm2, %v1200_v3  ;;  %v1216_v14 = vpack.c.bf16 %v1152_v6, %v1152_v6  ;;  %v1105_v15 = vsel %vm977_vm1, %v913_v0, %v1041_v10  ;;  %vm993_vm3 = vcmp.gt.f32.partialorder %v929_v11, 0.0  ;;  %v1057_v7 = vmul.f32 0.2, %v929_v11  ;;  %v846_v9 = vld [vmem:[#allocation2 + $0x78] sm:$0xff] }
 0x11f   :  { %v1169_v16 = vpack.c.bf16 %v1105_v15, %v1105_v15  ;;  %vm1009_vm4 = vcmp.gt.f32.partialorder %v945_v8, 0.0  ;;  %v1073_v17 = vmul.f32 0.2, %v945_v8  ;;  %v961_v18 = vadd.f32 %v2150_v32, %v893_v13 }
 0x120   :  { %1281 = vst.msk [vmem:[%s2289_s3 + $0xf4] sm:$0xf] %vm1219_vm2, %v1216_v14  ;;  %v1121_v19 = vsel %vm993_vm3, %v929_v11, %v1057_v7  ;;  %v914_v20 = vadd.f32 %v2150_v32, %v846_v9  ;;  %v862_v21 = vld [vmem:[#allocation2 + $0xf8] sm:$0xff] }
 0x121   :  { %1234 = vst.msk [vmem:[%s2289_s3 + $0x38] sm:$0xf] %vm1219_vm2, %v1169_v16  ;;  %v1185_v22 = vpack.c.bf16 %v1121_v19, %v1121_v19  ;;  %v1137_v23 = vsel %vm1009_vm4, %v945_v8, %v1073_v17  ;;  %vm1025_vm0 = vcmp.gt.f32.partialorder %v961_v18, 0.0  ;;  %v1089_v24 = vmul.f32 0.2, %v961_v18 }
 0x122   :  { %v1201_v25 = vpack.c.bf16 %v1137_v23, %v1137_v23  ;;  %vm978_vm5 = vcmp.gt.f32.partialorder %v914_v20, 0.0  ;;  %v1042_v26 = vmul.f32 0.2, %v914_v20  ;;  %v930_v27 = vadd.f32 %v2150_v32, %v862_v21 }
 0x123   :  { %1250 = vst.msk [vmem:[%s2289_s3 + $0x78] sm:$0xf] %vm1219_vm2, %v1185_v22  ;;  %v1153_v28 = vsel %vm1025_vm0, %v961_v18, %v1089_v24  ;;  %v878_v29 = vld [vmem:[#allocation2 + $0x178] sm:$0xff] }
 0x124   :  { %1266 = vst.msk [vmem:[%s2289_s3 + $0xb8] sm:$0xf] %vm1219_vm2, %v1201_v25  ;;  %v1217_v30 = vpack.c.bf16 %v1153_v28, %v1153_v28  ;;  %v1106_v31 = vsel %vm978_vm5, %v914_v20, %v1042_v26  ;;  %vm994_vm6 = vcmp.gt.f32.partialorder %v930_v27, 0.0  ;;  %v1058_v41 = vmul.f32 0.2, %v930_v27  ;;  %v894_v35 = vld [vmem:[#allocation2 + $0x1f8] sm:$0xff] }
 0x125   :  { %v1170_v33 = vpack.c.bf16 %v1106_v31, %v1106_v31  ;;  %v946_v34 = vadd.f32 %v2150_v32, %v878_v29  ;;  %v962_v37 = vadd.f32 %v2150_v32, %v894_v35 }
 0x126   :  { %1282 = vst.msk [vmem:[%s2289_s3 + $0xf8] sm:$0xf] %vm1219_vm2, %v1217_v30  ;;  %v1122_v36 = vsel %vm994_vm6, %v930_v27, %v1058_v41 }
 0x127   :  { %1235 = vst.msk [vmem:[%s2289_s3 + $0x3c] sm:$0xf] %vm1219_vm2, %v1170_v33  ;;  %v1186_v38 = vpack.c.bf16 %v1122_v36, %v1122_v36  ;;  %vm1010_vm7 = vcmp.gt.f32.partialorder %v946_v34, 0.0  ;;  %v1074_v39 = vmul.f32 0.2, %v946_v34  ;;  %vm1026_vm8 = vcmp.gt.f32.partialorder %v962_v37, 0.0 }
 0x128   :  { %v1090_v40 = vmul.f32 0.2, %v962_v37 }
 0x129   :  { %1251 = vst.msk [vmem:[%s2289_s3 + $0x7c] sm:$0xf] %vm1219_vm2, %v1186_v38  ;;  %v1138_v42 = vsel %vm1010_vm7, %v946_v34, %v1074_v39 }
 0x12a   :  { %v1202_v43 = vpack.c.bf16 %v1138_v42, %v1138_v42  ;;  %v1154_v44 = vsel %vm1026_vm8, %v962_v37, %v1090_v40 }
 0x12b   :  { %v1218_v45 = vpack.c.bf16 %v1154_v44, %v1154_v44 }
 0x12c   :  { %1267 = vst.msk [vmem:[%s2289_s3 + $0xbc] sm:$0xf] %vm1219_vm2, %v1202_v43 }
 0x12d   :  { %1283 = vst.msk [vmem:[%s2289_s3 + $0xfc] sm:$0xf] %vm1219_vm2, %v1218_v45 }
 0x12e   :  { %1288 = vsyncpa [#allocation4], 1 }
 0x12f   :  { %1289 = vsyncpa [#allocation6], 1 }

// kernel: discriminator_forward.9
= control target key start
LH: loop header
LB: loop body
LE: loop exit
PB: predicated region body
PF: predicated region fallthrough
CT: control target
= control target key end

     0   :  { %vm1478_vm0 = vcmask 1040384   ;;  %s2847_s1 = inlined_call_operand.vmem [shape: bf16[1024,128], index: 1, kind: input, shape index: {}]   ;;  %s2848_s0 = inlined_call_operand.vmem [shape: bf16[128,1024], index: 0, kind: input, shape index: {}]   ;;  %s2849_s2 = inlined_call_operand.vmem [shape: bf16[128,128], index: 2, kind: output, shape index: {0}]   ;;  %s2850_s3 = inlined_call_operand.vmem [shape: f32[1,2,128], index: 3, kind: output, shape index: {1}]  }
   0x1   :  { %v2072_v0 = vld [vmem:[%s2847_s1 + $0x38] sm:$0xff]  ;;  %v2071_v4 = vld [vmem:[%s2847_s1 + $0x30] sm:$0xff]  ;;  %v2070_v8 = vld [vmem:[%s2847_s1 + $0x28] sm:$0xff] }
   0x2   :  { %v2080_v1 = vld [vmem:[%s2847_s1 + $0x78] sm:$0xff]  ;;  %945 = vmatpush.bf16.msra.mxu0 %v2072_v0  ;;  %v2079_v5 = vld [vmem:[%s2847_s1 + $0x70] sm:$0xff]  ;;  %v2078_v9 = vld [vmem:[%s2847_s1 + $0x68] sm:$0xff] }
   0x3   :  { %v2088_v2 = vld [vmem:[%s2847_s1 + $0xb8] sm:$0xff]  ;;  %994 = vmatpush.bf16.msra.mxu1 %v2080_v1  ;;  %v2087_v6 = vld [vmem:[%s2847_s1 + $0xb0] sm:$0xff]  ;;  %v2086_v10 = vld [vmem:[%s2847_s1 + $0xa8] sm:$0xff] }
   0x4   :  { %v2096_v3 = vld [vmem:[%s2847_s1 + $0xf8] sm:$0xff]  ;;  %1043 = vmatpush.bf16.msra.mxu2 %v2088_v2  ;;  %v2095_v7 = vld [vmem:[%s2847_s1 + $0xf0] sm:$0xff]  ;;  %v2094_v11 = vld [vmem:[%s2847_s1 + $0xe8] sm:$0xff] }
   0x5   :  { %1092 = vmatpush.bf16.msra.mxu3 %v2096_v3  ;;  %v2069_v12 = vld [vmem:[%s2847_s1 + $0x20] sm:$0xff]  ;;  %v2068_v16 = vld [vmem:[%s2847_s1 + $0x18] sm:$0xff]  ;;  %v2067_v20 = vld [vmem:[%s2847_s1 + $0x10] sm:$0xff] }
   0x6   :  { %946 = vmatpush.bf16.msra.mxu0 %v2071_v4  ;;  %v2077_v13 = vld [vmem:[%s2847_s1 + $0x60] sm:$0xff]  ;;  %v2076_v17 = vld [vmem:[%s2847_s1 + $0x58] sm:$0xff]  ;;  %v2075_v21 = vld [vmem:[%s2847_s1 + $0x50] sm:$0xff] }
   0x7   :  { %995 = vmatpush.bf16.msra.mxu1 %v2079_v5  ;;  %v2085_v14 = vld [vmem:[%s2847_s1 + $0xa0] sm:$0xff]  ;;  %v2084_v18 = vld [vmem:[%s2847_s1 + $0x98] sm:$0xff]  ;;  %v2083_v22 = vld [vmem:[%s2847_s1 + $0x90] sm:$0xff] }
   0x8   :  { %1044 = vmatpush.bf16.msra.mxu2 %v2087_v6  ;;  %v2093_v15 = vld [vmem:[%s2847_s1 + $0xe0] sm:$0xff]  ;;  %v2092_v19 = vld [vmem:[%s2847_s1 + $0xd8] sm:$0xff]  ;;  %v2091_v23 = vld [vmem:[%s2847_s1 + $0xd0] sm:$0xff] }
   0x9   :  { %1093 = vmatpush.bf16.msra.mxu3 %v2095_v7  ;;  %v2066_v24 = vld [vmem:[%s2847_s1 + $0x8] sm:$0xff]  ;;  %v2065_v28 = vld [vmem:[%s2847_s1] sm:$0xff]  ;;  %v2120_v40 = vld [vmem:[%s2847_s1 + $0x1b8] sm:$0xff] }
   0xa   :  { %947 = vmatpush.bf16.msra.mxu0 %v2070_v8  ;;  %v2074_v25 = vld [vmem:[%s2847_s1 + $0x48] sm:$0xff]  ;;  %v2073_v29 = vld [vmem:[%s2847_s1 + $0x40] sm:$0xff]  ;;  %v2104_v41 = vld [vmem:[%s2847_s1 + $0x138] sm:$0xff] }
   0xb   :  { %996 = vmatpush.bf16.msra.mxu1 %v2078_v9  ;;  %v2082_v26 = vld [vmem:[%s2847_s1 + $0x88] sm:$0xff]  ;;  %v2081_v30 = vld [vmem:[%s2847_s1 + $0x80] sm:$0xff]  ;;  %v2128_v46 = vld [vmem:[%s2847_s1 + $0x1f8] sm:$0xff] }
   0xc   :  { %1045 = vmatpush.bf16.msra.mxu2 %v2086_v10  ;;  %v2090_v27 = vld [vmem:[%s2847_s1 + $0xc8] sm:$0xff]  ;;  %v2089_v31 = vld [vmem:[%s2847_s1 + $0xc0] sm:$0xff]  ;;  %v2112_v47 = vld [vmem:[%s2847_s1 + $0x178] sm:$0xff] }
   0xd   :  { %1094 = vmatpush.bf16.msra.mxu3 %v2094_v11  ;;  %v1491_v32 = vld [vmem:[%s2848_s0] sm:$0xf]  ;;  %v2001_v34 = vld [vmem:[%s2848_s0 + $0x4] sm:$0xf]  ;;  %v1499_v36 = vld [vmem:[%s2848_s0 + $0x8] sm:$0xf] }
   0xe   :  { %948 = vmatpush.bf16.msra.mxu0 %v2069_v12  ;;  %v2005_v33 = vld [vmem:[%s2848_s0 + $0x1c] sm:$0xf0]  ;;  %v1493_v35 = vld [vmem:[%s2848_s0 + $0x20] sm:$0xf0]  ;;  %v2006_v37 = vld [vmem:[%s2848_s0 + $0x24] sm:$0xf0] }
   0xf   :  { %997 = vmatpush.bf16.msra.mxu1 %v2077_v13  ;;  %v2002_v38 = vld [vmem:[%s2848_s0 + $0xc] sm:$0xf]  ;;  %v1492_v42 = vor.u32 %v2005_v33, %v1491_v32  ;;  %v1496_v43 = vor.u32 %v2001_v34, %v1493_v35  ;;  %v1500_v44 = vor.u32 %v2006_v37, %v1499_v36  ;;  %v2119_v48 = vld [vmem:[%s2847_s1 + $0x1b0] sm:$0xff]  ;;  %v1523_v56 = vld [vmem:[%s2848_s0 + $0x40] sm:$0xf] }
  0x10   :  { %1046 = vmatpush.bf16.msra.mxu2 %v2085_v14  ;;  %v1501_v39 = vld [vmem:[%s2848_s0 + $0x28] sm:$0xf0]  ;;  %v2103_v49 = vld [vmem:[%s2847_s1 + $0x130] sm:$0xff]  ;;  %v2013_v57 = vld [vmem:[%s2848_s0 + $0x5c] sm:$0xf0] }
  0x11   :  { %1095 = vmatpush.bf16.msra.mxu3 %v2093_v15  ;;  %v1504_v45 = vor.u32 %v2002_v38, %v1501_v39  ;;  %v2127_v50 = vld [vmem:[%s2847_s1 + $0x1f0] sm:$0xff]  ;;  %v2118_v52 = vld [vmem:[%s2847_s1 + $0x1a8] sm:$0xff]  ;;  %v2009_v58 = vld [vmem:[%s2848_s0 + $0x44] sm:$0xf]  ;;  %v1524_v0 = vor.u32 %v2013_v57, %v1523_v56 }
  0x12   :  { %949 = vmatpush.bf16.msra.mxu0 %v2068_v16  ;;  %v2111_v51 = vld [vmem:[%s2847_s1 + $0x170] sm:$0xff]  ;;  %v2102_v53 = vld [vmem:[%s2847_s1 + $0x128] sm:$0xff]  ;;  %v1525_v59 = vld [vmem:[%s2848_s0 + $0x60] sm:$0xf0] }
  0x13   :  { %998 = vmatpush.bf16.msra.mxu1 %v2076_v17  ;;  %v2126_v54 = vld [vmem:[%s2847_s1 + $0x1e8] sm:$0xff]  ;;  %v1528_v1 = vor.u32 %v2009_v58, %v1525_v59  ;;  %v2117_v4 = vld [vmem:[%s2847_s1 + $0x1a0] sm:$0xff]  ;;  %v2115_v36 = vld [vmem:[%s2847_s1 + $0x190] sm:$0xff] }
  0x14   :  { %1047 = vmatpush.bf16.msra.mxu2 %v2084_v18  ;;  %v2110_v55 = vld [vmem:[%s2847_s1 + $0x168] sm:$0xff]  ;;  %v2101_v5 = vld [vmem:[%s2847_s1 + $0x120] sm:$0xff]  ;;  %v2099_v37 = vld [vmem:[%s2847_s1 + $0x110] sm:$0xff] }
  0x15   :  { %1096 = vmatpush.bf16.msra.mxu3 %v2092_v19  ;;  %v1531_v60 = vld [vmem:[%s2848_s0 + $0x48] sm:$0xf]  ;;  %v2010_v62 = vld [vmem:[%s2848_s0 + $0x4c] sm:$0xf]  ;;  %v2125_v6 = vld [vmem:[%s2847_s1 + $0x1e0] sm:$0xff] }
  0x16   :  { %950 = vmatpush.bf16.msra.mxu0 %v2067_v20  ;;  %v2014_v61 = vld [vmem:[%s2848_s0 + $0x64] sm:$0xf0]  ;;  %v1533_v63 = vld [vmem:[%s2848_s0 + $0x68] sm:$0xf0]  ;;  %v2109_v7 = vld [vmem:[%s2847_s1 + $0x160] sm:$0xff] }
  0x17   :  { %999 = vmatpush.bf16.msra.mxu1 %v2075_v21  ;;  %v1532_v2 = vor.u32 %v2014_v61, %v1531_v60  ;;  %v1536_v3 = vor.u32 %v2010_v62, %v1533_v63  ;;  %v1555_v8 = vld [vmem:[%s2848_s0 + $0x80] sm:$0xf]  ;;  %v2017_v10 = vld [vmem:[%s2848_s0 + $0x84] sm:$0xf]  ;;  %v1563_v12 = vld [vmem:[%s2848_s0 + $0x88] sm:$0xf] }
  0x18   :  { %1048 = vmatpush.bf16.msra.mxu2 %v2083_v22  ;;  %v2021_v9 = vld [vmem:[%s2848_s0 + $0x9c] sm:$0xf0]  ;;  %v1557_v11 = vld [vmem:[%s2848_s0 + $0xa0] sm:$0xf0]  ;;  %v2022_v13 = vld [vmem:[%s2848_s0 + $0xa4] sm:$0xf0] }
  0x19   :  { %1097 = vmatpush.bf16.msra.mxu3 %v2091_v23  ;;  %v2018_v14 = vld [vmem:[%s2848_s0 + $0x8c] sm:$0xf]  ;;  %v1556_v16 = vor.u32 %v2021_v9, %v1555_v8  ;;  %v1560_v17 = vor.u32 %v2017_v10, %v1557_v11  ;;  %v1564_v18 = vor.u32 %v2022_v13, %v1563_v12  ;;  %v2116_v20 = vld [vmem:[%s2847_s1 + $0x198] sm:$0xff]  ;;  %v2123_v38 = vld [vmem:[%s2847_s1 + $0x1d0] sm:$0xff] }
  0x1a   :  { %951 = vmatpush.bf16.msra.mxu0 %v2066_v24  ;;  %v1565_v15 = vld [vmem:[%s2848_s0 + $0xa8] sm:$0xf0]  ;;  %v2100_v21 = vld [vmem:[%s2847_s1 + $0x118] sm:$0xff]  ;;  %v1587_v24 = vld [vmem:[%s2848_s0 + $0xc0] sm:$0xf] }
  0x1b   :  { %1000 = vmatpush.bf16.msra.mxu1 %v2074_v25  ;;  %v1568_v19 = vor.u32 %v2018_v14, %v1565_v15  ;;  %v2124_v22 = vld [vmem:[%s2847_s1 + $0x1d8] sm:$0xff]  ;;  %v2029_v25 = vld [vmem:[%s2848_s0 + $0xdc] sm:$0xf0]  ;;  %v2107_v39 = vld [vmem:[%s2847_s1 + $0x150] sm:$0xff] }
  0x1c   :  { %1049 = vmatpush.bf16.msra.mxu2 %v2082_v26  ;;  %v2108_v23 = vld [vmem:[%s2847_s1 + $0x158] sm:$0xff]  ;;  %v2025_v26 = vld [vmem:[%s2848_s0 + $0xc4] sm:$0xf]  ;;  %v1588_v32 = vor.u32 %v2029_v25, %v1587_v24  ;;  %v1651_v56 = vld [vmem:[%s2848_s0 + $0x140] sm:$0xf] }
  0x1d   :  { %1098 = vmatpush.bf16.msra.mxu3 %v2090_v27  ;;  %v1589_v27 = vld [vmem:[%s2848_s0 + $0xe0] sm:$0xf0]  ;;  %v2045_v57 = vld [vmem:[%s2848_s0 + $0x15c] sm:$0xf0]  ;;  %v1659_v60 = vld [vmem:[%s2848_s0 + $0x148] sm:$0xf] }
  0x1e   :  { %952 = vmatpush.bf16.msra.mxu0 %v2065_v28  ;;  %v1595_v28 = vld [vmem:[%s2848_s0 + $0xc8] sm:$0xf]  ;;  %v1592_v33 = vor.u32 %v2025_v26, %v1589_v27  ;;  %v2041_v58 = vld [vmem:[%s2848_s0 + $0x144] sm:$0xf]  ;;  %v2042_v62 = vld [vmem:[%s2848_s0 + $0x14c] sm:$0xf] }
  0x1f   :  { %1001 = vmatpush.bf16.msra.mxu1 %v2073_v29  ;;  %v2030_v29 = vld [vmem:[%s2848_s0 + $0xe4] sm:$0xf0]  ;;  %v1653_v59 = vld [vmem:[%s2848_s0 + $0x160] sm:$0xf0]  ;;  %v1661_v63 = vld [vmem:[%s2848_s0 + $0x168] sm:$0xf0] }
  0x20   :  { %1050 = vmatpush.bf16.msra.mxu2 %v2081_v30  ;;  %v2026_v30 = vld [vmem:[%s2848_s0 + $0xcc] sm:$0xf]  ;;  %v1596_v34 = vor.u32 %v2030_v29, %v1595_v28  ;;  %v2046_v61 = vld [vmem:[%s2848_s0 + $0x164] sm:$0xf0]  ;;  %v1683_v8 = vld [vmem:[%s2848_s0 + $0x180] sm:$0xf] }
  0x21   :  { %1099 = vmatpush.bf16.msra.mxu3 %v2089_v31  ;;  %953 = vmatmul.bf16.vlgmr.msra.gmra.mxu0 %v1492_v42  ;;  %v1597_v31 = vld [vmem:[%s2848_s0 + $0xe8] sm:$0xf0]  ;;  %v2033_v42 = vld [vmem:[%s2848_s0 + $0x104] sm:$0xf]  ;;  %v2053_v9 = vld [vmem:[%s2848_s0 + $0x19c] sm:$0xf0] }
  0x22   :  { %1141 = vmatpush.bf16.msrb.mxu0 %v2104_v41  ;;  %1002 = vmatmul.bf16.vlgmr.msra.gmra.mxu1 %v1496_v43  ;;  %v1600_v35 = vor.u32 %v2026_v30, %v1597_v31  ;;  %v2037_v41 = vld [vmem:[%s2848_s0 + $0x11c] sm:$0xf0]  ;;  %v1621_v43 = vld [vmem:[%s2848_s0 + $0x120] sm:$0xf0]  ;;  %v1691_v12 = vld [vmem:[%s2848_s0 + $0x188] sm:$0xf] }
  0x23   :  { %1051 = vmatmul.bf16.vlgmr.msra.gmra.mxu2 %v1500_v44  ;;  %1190 = vmatpush.bf16.msrb.mxu1 %v2112_v47  ;;  %v1627_v44 = vld [vmem:[%s2848_s0 + $0x108] sm:$0xf]  ;;  %v1629_v47 = vld [vmem:[%s2848_s0 + $0x128] sm:$0xf0]  ;;  %v2049_v10 = vld [vmem:[%s2848_s0 + $0x184] sm:$0xf] }
  0x24   :  { %1239 = vmatpush.bf16.msrb.mxu2 %v2120_v40  ;;  %1100 = vmatmul.bf16.vlgmr.msra.gmra.mxu3 %v1504_v45  ;;  %v1619_v40 = vld [vmem:[%s2848_s0 + $0x100] sm:$0xf]  ;;  %v2038_v45 = vld [vmem:[%s2848_s0 + $0x124] sm:$0xf0]  ;;  %v1685_v11 = vld [vmem:[%s2848_s0 + $0x1a0] sm:$0xf0] }
  0x25   :  { %1288 = vmatpush.bf16.msrb.mxu3 %v2128_v46  ;;  %v2034_v46 = vld [vmem:[%s2848_s0 + $0x10c] sm:$0xf]  ;;  %v2054_v13 = vld [vmem:[%s2848_s0 + $0x1a4] sm:$0xf0] }
  0x26   :  { %1142 = vmatpush.bf16.msrb.mxu0 %v2103_v49  ;;  %v1624_v49 = vor.u32 %v2033_v42, %v1621_v43  ;;  %v2050_v14 = vld [vmem:[%s2848_s0 + $0x18c] sm:$0xf]  ;;  %v1723_v24 = vld [vmem:[%s2848_s0 + $0x1c8] sm:$0xf] }
  0x27   :  { %1191 = vmatpush.bf16.msrb.mxu1 %v2111_v51  ;;  %v1632_v51 = vor.u32 %v2034_v46, %v1629_v47  ;;  %v1693_v15 = vld [vmem:[%s2848_s0 + $0x1a8] sm:$0xf0]  ;;  %v2062_v25 = vld [vmem:[%s2848_s0 + $0x1e4] sm:$0xf0] }
  0x28   :  { %1240 = vmatpush.bf16.msrb.mxu2 %v2119_v48  ;;  %v1620_v48 = vor.u32 %v2037_v41, %v1619_v40  ;;  %v2058_v26 = vld [vmem:[%s2848_s0 + $0x1cc] sm:$0xf]  ;;  %v1724_v30 = vor.u32 %v2062_v25, %v1723_v24 }
  0x29   :  { %1289 = vmatpush.bf16.msrb.mxu3 %v2127_v50  ;;  %v1628_v50 = vor.u32 %v2038_v45, %v1627_v44  ;;  %v1725_v27 = vld [vmem:[%s2848_s0 + $0x1e8] sm:$0xf0] }
  0x2a   :  { %1143 = vmatpush.bf16.msrb.mxu0 %v2102_v53  ;;  %v2098_v53 = vld [vmem:[%s2847_s1 + $0x108] sm:$0xff]  ;;  %v1728_v31 = vor.u32 %v2058_v26, %v1725_v27 }
  0x2b   :  { %1192 = vmatpush.bf16.msrb.mxu1 %v2110_v55  ;;  %v2106_v55 = vld [vmem:[%s2847_s1 + $0x148] sm:$0xff] }
  0x2c   :  { %1241 = vmatpush.bf16.msrb.mxu2 %v2118_v52  ;;  %v2114_v52 = vld [vmem:[%s2847_s1 + $0x188] sm:$0xff] }
  0x2d   :  { %1290 = vmatpush.bf16.msrb.mxu3 %v2126_v54  ;;  %v2122_v54 = vld [vmem:[%s2847_s1 + $0x1c8] sm:$0xff] }
  0x2e   :  { %1144 = vmatpush.bf16.msrb.mxu0 %v2101_v5  ;;  %v2097_v5 = vld [vmem:[%s2847_s1 + $0x100] sm:$0xff] }
  0x2f   :  { %1193 = vmatpush.bf16.msrb.mxu1 %v2109_v7  ;;  %v2105_v7 = vld [vmem:[%s2847_s1 + $0x140] sm:$0xff] }
  0x30   :  { %1242 = vmatpush.bf16.msrb.mxu2 %v2117_v4  ;;  %v2113_v4 = vld [vmem:[%s2847_s1 + $0x180] sm:$0xff] }
  0x31   :  { %958 = vmatmul.bf16.gmra.mxu0 %v1524_v0  ;;  %1291 = vmatpush.bf16.msrb.mxu3 %v2125_v6  ;;  %v1652_v0 = vor.u32 %v2045_v57, %v1651_v56  ;;  %v2121_v6 = vld [vmem:[%s2847_s1 + $0x1c0] sm:$0xff]  ;;  %v2011_v56 = vld [vmem:[%s2848_s0 + $0x54] sm:$0xf] }
  0x32   :  { %1007 = vmatmul.bf16.gmra.mxu1 %v1528_v1  ;;  %1145 = vmatpush.bf16.msrb.mxu0 %v2100_v21  ;;  %v1656_v1 = vor.u32 %v2041_v58, %v1653_v59  ;;  %v2061_v21 = vld [vmem:[%s2848_s0 + $0x1dc] sm:$0xf0]  ;;  %v1541_v57 = vld [vmem:[%s2848_s0 + $0x70] sm:$0xf0]  ;;  %v1547_v58 = vld [vmem:[%s2848_s0 + $0x58] sm:$0xf] }
  0x33   :  { %1056 = vmatmul.bf16.gmra.mxu2 %v1532_v2  ;;  %1194 = vmatpush.bf16.msrb.mxu1 %v2108_v23  ;;  %v1660_v2 = vor.u32 %v2046_v61, %v1659_v60  ;;  %v1717_v23 = vld [vmem:[%s2848_s0 + $0x1e0] sm:$0xf0]  ;;  %v2016_v59 = vld [vmem:[%s2848_s0 + $0x74] sm:$0xf0]  ;;  %v2012_v60 = vld [vmem:[%s2848_s0 + $0x5c] sm:$0xf] }
  0x34   :  { %1105 = vmatmul.bf16.gmra.mxu3 %v1536_v3  ;;  %1243 = vmatpush.bf16.msrb.mxu2 %v2116_v20  ;;  %v1664_v3 = vor.u32 %v2042_v62, %v1661_v63  ;;  %v1715_v20 = vld [vmem:[%s2848_s0 + $0x1c0] sm:$0xf]  ;;  %v1549_v61 = vld [vmem:[%s2848_s0 + $0x78] sm:$0xf0] }
  0x35   :  { %1292 = vmatpush.bf16.msrb.mxu3 %v2124_v22  ;;  %v2057_v22 = vld [vmem:[%s2848_s0 + $0x1c4] sm:$0xf]  ;;  %v1716_v28 = vor.u32 %v2061_v21, %v1715_v20  ;;  %v1579_v20 = vld [vmem:[%s2848_s0 + $0x98] sm:$0xf] }
  0x36   :  { %1146 = vmatpush.bf16.msrb.mxu0 %v2099_v37  ;;  %v1720_v29 = vor.u32 %v2057_v22, %v1717_v23  ;;  %v2008_v37 = vld [vmem:[%s2848_s0 + $0x34] sm:$0xf0]  ;;  %v2020_v22 = vld [vmem:[%s2848_s0 + $0x9c] sm:$0xf] }
  0x37   :  { %1195 = vmatpush.bf16.msrb.mxu1 %v2107_v39  ;;  %v1517_v39 = vld [vmem:[%s2848_s0 + $0x38] sm:$0xf0]  ;;  %v2024_v21 = vld [vmem:[%s2848_s0 + $0xb4] sm:$0xf0] }
  0x38   :  { %1244 = vmatpush.bf16.msrb.mxu2 %v2115_v36  ;;  %v1515_v36 = vld [vmem:[%s2848_s0 + $0x18] sm:$0xf]  ;;  %v1581_v23 = vld [vmem:[%s2848_s0 + $0xb8] sm:$0xf0] }
  0x39   :  { %1293 = vmatpush.bf16.msrb.mxu3 %v2123_v38  ;;  %v2004_v38 = vld [vmem:[%s2848_s0 + $0x1c] sm:$0xf]  ;;  %v1516_v44 = vor.u32 %v2008_v37, %v1515_v36 }
  0x3a   :  { %1147 = vmatpush.bf16.msrb.mxu0 %v2098_v53  ;;  %v1520_v45 = vor.u32 %v2004_v38, %v1517_v39 }
  0x3b   :  { %1196 = vmatpush.bf16.msrb.mxu1 %v2106_v55  ;;  %v2015_v55 = vld [vmem:[%s2848_s0 + $0x6c] sm:$0xf0] }
  0x3c   :  { %1245 = vmatpush.bf16.msrb.mxu2 %v2114_v52 }
  0x3d   :  { %1294 = vmatpush.bf16.msrb.mxu3 %v2122_v54  ;;  %v1539_v54 = vld [vmem:[%s2848_s0 + $0x50] sm:$0xf] }
  0x3e   :  { %1148 = vmatpush.bf16.msrb.mxu0 %v2097_v5  ;;  %v1548_v5 = vor.u32 %v2016_v59, %v1547_v58 }
  0x3f   :  { %1197 = vmatpush.bf16.msrb.mxu1 %v2105_v7 }
  0x40   :  { %1246 = vmatpush.bf16.msrb.mxu2 %v2113_v4 }
  0x41   :  { %963 = vmatmul.bf16.gmra.mxu0 %v1556_v16  ;;  %1295 = vmatpush.bf16.msrb.mxu3 %v2121_v6  ;;  %v1684_v16 = vor.u32 %v2053_v9, %v1683_v8  ;;  %v1552_v6 = vor.u32 %v2012_v60, %v1549_v61 }
  0x42   :  { %1012 = vmatmul.bf16.gmra.mxu1 %v1560_v17  ;;  %v1688_v17 = vor.u32 %v2049_v10, %v1685_v11 }
  0x43   :  { %1061 = vmatmul.bf16.gmra.mxu2 %v1564_v18  ;;  %v1692_v18 = vor.u32 %v2054_v13, %v1691_v12 }
  0x44   :  { %1110 = vmatmul.bf16.gmra.mxu3 %v1568_v19  ;;  %v1696_v19 = vor.u32 %v2050_v14, %v1693_v15 }
  0x51   :  { %968 = vmatmul.bf16.gmra.mxu0 %v1588_v32  ;;  %v1507_v32 = vld [vmem:[%s2848_s0 + $0x10] sm:$0xf] }
  0x52   :  { %1017 = vmatmul.bf16.gmra.mxu1 %v1592_v33  ;;  %v2007_v33 = vld [vmem:[%s2848_s0 + $0x2c] sm:$0xf0] }
  0x53   :  { %1066 = vmatmul.bf16.gmra.mxu2 %v1596_v34  ;;  %v2003_v34 = vld [vmem:[%s2848_s0 + $0x14] sm:$0xf]  ;;  %v1508_v40 = vor.u32 %v2007_v33, %v1507_v32  ;;  %v1584_v32 = vor.u32 %v2020_v22, %v1581_v23 }
  0x54   :  { %1115 = vmatmul.bf16.gmra.mxu3 %v1600_v35  ;;  %v1509_v35 = vld [vmem:[%s2848_s0 + $0x30] sm:$0xf0] }
  0x55   :  { %v1512_v41 = vor.u32 %v2003_v34, %v1509_v35 }
  0x61   :  { %973 = vmatmul.bf16.gmra.mxu0 %v1620_v48 }
  0x62   :  { %1022 = vmatmul.bf16.gmra.mxu1 %v1624_v49 }
  0x63   :  { %1071 = vmatmul.bf16.gmra.mxu2 %v1628_v50 }
  0x64   :  { %1120 = vmatmul.bf16.gmra.mxu3 %v1632_v51 }
  0x71   :  { %978 = vmatmul.bf16.gmra.mxu0 %v1652_v0  ;;  %v1540_v0 = vor.u32 %v2015_v55, %v1539_v54 }
  0x72   :  { %1027 = vmatmul.bf16.gmra.mxu1 %v1656_v1  ;;  %v1544_v1 = vor.u32 %v2011_v56, %v1541_v57 }
  0x73   :  { %1076 = vmatmul.bf16.gmra.mxu2 %v1660_v2 }
  0x74   :  { %1125 = vmatmul.bf16.gmra.mxu3 %v1664_v3 }
  0x81   :  { %983 = vmatmul.bf16.gmra.mxu0 %v1684_v16  ;;  %v1571_v16 = vld [vmem:[%s2848_s0 + $0x90] sm:$0xf] }
  0x82   :  { %1032 = vmatmul.bf16.gmra.mxu1 %v1688_v17  ;;  %v2023_v17 = vld [vmem:[%s2848_s0 + $0xac] sm:$0xf0] }
  0x83   :  { %1081 = vmatmul.bf16.gmra.mxu2 %v1692_v18  ;;  %v2019_v18 = vld [vmem:[%s2848_s0 + $0x94] sm:$0xf]  ;;  %v1572_v26 = vor.u32 %v2023_v17, %v1571_v16 }
  0x84   :  { %1130 = vmatmul.bf16.gmra.mxu3 %v1696_v19  ;;  %v1573_v19 = vld [vmem:[%s2848_s0 + $0xb0] sm:$0xf0] }
  0x85   :  { %v1576_v27 = vor.u32 %v2019_v18, %v1573_v19 }
  0x91   :  { %988 = vmatmul.bf16.gmra.mxu0 %v1716_v28 }
  0x92   :  { %1037 = vmatmul.bf16.gmra.mxu1 %v1720_v29 }
  0x93   :  { %1086 = vmatmul.bf16.gmra.mxu2 %v1724_v30 }
  0x94   :  { %1135 = vmatmul.bf16.gmra.mxu3 %v1728_v31  ;;  %v1580_v31 = vor.u32 %v2024_v21, %v1579_v20 }
  0x9e   :  { %v954_v42 = vpop.f32.mrf.mxu0 }
  0x9f   :  { %v1003_v43 = vpop.f32.mrf.mxu1 }
  0xa0   :  { %v1004_v46 = vadd.f32 %v1003_v43, %v954_v42  ;;  %v1603_v42 = vld [vmem:[%s2848_s0 + $0xd0] sm:$0xf] }
  0xa1   :  { %1149 = vmatmul.bf16.vlgmr.msrb.gmra.mxu0 %v1508_v40  ;;  %v2031_v43 = vld [vmem:[%s2848_s0 + $0xec] sm:$0xf0] }
  0xa2   :  { %1198 = vmatmul.bf16.vlgmr.msrb.gmra.mxu1 %v1512_v41 }
  0xa3   :  { %1247 = vmatmul.bf16.vlgmr.msrb.gmra.mxu2 %v1516_v44  ;;  %v2027_v44 = vld [vmem:[%s2848_s0 + $0xd4] sm:$0xf] }
  0xa4   :  { %1296 = vmatmul.bf16.vlgmr.msrb.gmra.mxu3 %v1520_v45  ;;  %v1605_v45 = vld [vmem:[%s2848_s0 + $0xf0] sm:$0xf0] }
  0xa5   :  { %v1608_v54 = vor.u32 %v2027_v44, %v1605_v45 }
  0xa6   :  { %v1052_v47 = vpop.f32.mrf.mxu2  ;;  %v956_v50 = vpop.f32.mrf.mxu0 }
  0xa7   :  { %v1101_v48 = vpop.f32.mrf.mxu3  ;;  %v1053_v49 = vadd.f32 %v1052_v47, %v1004_v46  ;;  %v1005_v51 = vpop.f32.mrf.mxu1  ;;  %v1611_v46 = vld [vmem:[%s2848_s0 + $0xd8] sm:$0xf] }
  0xa8   :  { %v1006_v52 = vadd.f32 %v1005_v51, %v956_v50  ;;  %v2032_v47 = vld [vmem:[%s2848_s0 + $0xf4] sm:$0xf0] }
  0xa9   :  { %v2604_v53 = vadd.f32 %v1101_v48, %v1053_v49  ;;  %v2028_v48 = vld [vmem:[%s2848_s0 + $0xdc] sm:$0xf]  ;;  %v1612_v58 = vor.u32 %v2032_v47, %v1611_v46 }
  0xaa   :  { %v1613_v49 = vld [vmem:[%s2848_s0 + $0xf8] sm:$0xf0] }
  0xab   :  { %v1616_v59 = vor.u32 %v2028_v48, %v1613_v49 }
  0xae   :  { %v1054_v62 = vpop.f32.mrf.mxu2  ;;  %v959_v3 = vpop.f32.mrf.mxu0 }
  0xaf   :  { %v1103_v63 = vpop.f32.mrf.mxu3  ;;  %v1055_v2 = vadd.f32 %v1054_v62, %v1006_v52  ;;  %v1008_v4 = vpop.f32.mrf.mxu1  ;;  %v1604_v52 = vor.u32 %v2031_v43, %v1603_v42  ;;  %v1677_v42 = vld [vmem:[%s2848_s0 + $0x178] sm:$0xf0] }
  0xb0   :  { %v1009_v7 = vadd.f32 %v1008_v4, %v959_v3 }
  0xb1   :  { %v2630_v8 = vadd.f32 %v1103_v63, %v1055_v2  ;;  %1154 = vmatmul.bf16.gmra.mxu0 %v1540_v0 }
  0xb2   :  { %1203 = vmatmul.bf16.gmra.mxu1 %v1544_v1 }
  0xb3   :  { %1252 = vmatmul.bf16.gmra.mxu2 %v1548_v5  ;;  %v1635_v5 = vld [vmem:[%s2848_s0 + $0x110] sm:$0xf] }
  0xb4   :  { %1301 = vmatmul.bf16.gmra.mxu3 %v1552_v6  ;;  %v2039_v6 = vld [vmem:[%s2848_s0 + $0x12c] sm:$0xf0] }
  0xb5   :  { %v1636_v17 = vor.u32 %v2039_v6, %v1635_v5  ;;  %v2056_v5 = vld [vmem:[%s2848_s0 + $0x1b4] sm:$0xf0]  ;;  %v2052_v6 = vld [vmem:[%s2848_s0 + $0x19c] sm:$0xf] }
  0xb6   :  { %v1057_v9 = vpop.f32.mrf.mxu2  ;;  %v961_v12 = vpop.f32.mrf.mxu0 }
  0xb7   :  { %v1106_v10 = vpop.f32.mrf.mxu3  ;;  %v1058_v11 = vadd.f32 %v1057_v9, %v1009_v7  ;;  %v1010_v13 = vpop.f32.mrf.mxu1  ;;  %v2035_v7 = vld [vmem:[%s2848_s0 + $0x114] sm:$0xf] }
  0xb8   :  { %v1011_v14 = vadd.f32 %v1010_v13, %v961_v12  ;;  %v1637_v9 = vld [vmem:[%s2848_s0 + $0x130] sm:$0xf0]  ;;  %v2036_v12 = vld [vmem:[%s2848_s0 + $0x11c] sm:$0xf] }
  0xb9   :  { %v2632_v15 = vadd.f32 %v1106_v10, %v1058_v11  ;;  %v1643_v10 = vld [vmem:[%s2848_s0 + $0x118] sm:$0xf]  ;;  %v1645_v13 = vld [vmem:[%s2848_s0 + $0x138] sm:$0xf0]  ;;  %v1640_v18 = vor.u32 %v2035_v7, %v1637_v9 }
  0xba   :  { %v2040_v11 = vld [vmem:[%s2848_s0 + $0x134] sm:$0xf0]  ;;  %v1648_v23 = vor.u32 %v2036_v12, %v1645_v13  ;;  %v1709_v7 = vld [vmem:[%s2848_s0 + $0x1b8] sm:$0xf0] }
  0xbb   :  { %v1644_v22 = vor.u32 %v2040_v11, %v1643_v10 }
  0xbe   :  { %v1059_v24 = vpop.f32.mrf.mxu2  ;;  %v964_v29 = vpop.f32.mrf.mxu0 }
  0xbf   :  { %v1108_v25 = vpop.f32.mrf.mxu3  ;;  %v1060_v28 = vadd.f32 %v1059_v24, %v1011_v14  ;;  %v1013_v30 = vpop.f32.mrf.mxu1 }
  0xc0   :  { %v1014_v33 = vadd.f32 %v1013_v30, %v964_v29 }
  0xc1   :  { %v2658_v34 = vadd.f32 %v1108_v25, %v1060_v28  ;;  %1159 = vmatmul.bf16.gmra.mxu0 %v1572_v26 }
  0xc2   :  { %1208 = vmatmul.bf16.gmra.mxu1 %v1576_v27 }
  0xc3   :  { %1257 = vmatmul.bf16.gmra.mxu2 %v1580_v31 }
  0xc4   :  { %1306 = vmatmul.bf16.gmra.mxu3 %v1584_v32 }
  0xc6   :  { %v1062_v35 = vpop.f32.mrf.mxu2  ;;  %v966_v38 = vpop.f32.mrf.mxu0 }
  0xc7   :  { %v1111_v36 = vpop.f32.mrf.mxu3  ;;  %v1063_v37 = vadd.f32 %v1062_v35, %v1014_v33  ;;  %v1015_v39 = vpop.f32.mrf.mxu1  ;;  %v1667_v33 = vld [vmem:[%s2848_s0 + $0x150] sm:$0xf] }
  0xc8   :  { %v1016_v40 = vadd.f32 %v1015_v39, %v966_v38  ;;  %v2047_v35 = vld [vmem:[%s2848_s0 + $0x16c] sm:$0xf0]  ;;  %v1675_v38 = vld [vmem:[%s2848_s0 + $0x158] sm:$0xf] }
  0xc9   :  { %v2660_v41 = vadd.f32 %v1111_v36, %v1063_v37  ;;  %v2043_v36 = vld [vmem:[%s2848_s0 + $0x154] sm:$0xf]  ;;  %v2048_v39 = vld [vmem:[%s2848_s0 + $0x174] sm:$0xf0]  ;;  %v1668_v45 = vor.u32 %v2047_v35, %v1667_v33 }
  0xca   :  { %v1669_v37 = vld [vmem:[%s2848_s0 + $0x170] sm:$0xf0]  ;;  %v1739_v35 = vld [vmem:[%s2848_s0 + $0x1d8] sm:$0xf] }
  0xcb   :  { %v1672_v46 = vor.u32 %v2043_v36, %v1669_v37  ;;  %v1733_v33 = vld [vmem:[%s2848_s0 + $0x1f0] sm:$0xf0]  ;;  %v2064_v36 = vld [vmem:[%s2848_s0 + $0x1f4] sm:$0xf0]  ;;  %v2060_v37 = vld [vmem:[%s2848_s0 + $0x1dc] sm:$0xf] }
  0xce   :  { %v1064_v50 = vpop.f32.mrf.mxu2  ;;  %v969_v56 = vpop.f32.mrf.mxu0 }
  0xcf   :  { %v1113_v51 = vpop.f32.mrf.mxu3  ;;  %v1065_v55 = vadd.f32 %v1064_v50, %v1016_v40  ;;  %v1018_v57 = vpop.f32.mrf.mxu1  ;;  %v2044_v40 = vld [vmem:[%s2848_s0 + $0x15c] sm:$0xf]  ;;  %v1676_v50 = vor.u32 %v2048_v39, %v1675_v38 }
  0xd0   :  { %v1019_v60 = vadd.f32 %v1018_v57, %v969_v56  ;;  %v1741_v38 = vld [vmem:[%s2848_s0 + $0x1f8] sm:$0xf0] }
  0xd1   :  { %v2686_v61 = vadd.f32 %v1113_v51, %v1065_v55  ;;  %1164 = vmatmul.bf16.gmra.mxu0 %v1604_v52  ;;  %v1680_v51 = vor.u32 %v2044_v40, %v1677_v42 }
  0xd2   :  { %1213 = vmatmul.bf16.gmra.mxu1 %v1608_v54 }
  0xd3   :  { %1262 = vmatmul.bf16.gmra.mxu2 %v1612_v58 }
  0xd4   :  { %1311 = vmatmul.bf16.gmra.mxu3 %v1616_v59 }
  0xd6   :  { %v1067_v62 = vpop.f32.mrf.mxu2  ;;  %v971_v1 = vpop.f32.mrf.mxu0 }
  0xd7   :  { %v1116_v63 = vpop.f32.mrf.mxu3  ;;  %v1068_v0 = vadd.f32 %v1067_v62, %v1019_v60  ;;  %v1020_v2 = vpop.f32.mrf.mxu1 }
  0xd8   :  { %v1021_v3 = vadd.f32 %v1020_v2, %v971_v1  ;;  %v2051_v1 = vld [vmem:[%s2848_s0 + $0x194] sm:$0xf] }
  0xd9   :  { %v2688_v4 = vadd.f32 %v1116_v63, %v1068_v0  ;;  %v1699_v63 = vld [vmem:[%s2848_s0 + $0x190] sm:$0xf]  ;;  %v1701_v2 = vld [vmem:[%s2848_s0 + $0x1b0] sm:$0xf0] }
  0xda   :  { %v2055_v0 = vld [vmem:[%s2848_s0 + $0x1ac] sm:$0xf0]  ;;  %v1704_v12 = vor.u32 %v2051_v1, %v1701_v2 }
  0xdb   :  { %v1700_v11 = vor.u32 %v2055_v0, %v1699_v63 }
  0xde   :  { %v1069_v14 = vpop.f32.mrf.mxu2  ;;  %v974_v20 = vpop.f32.mrf.mxu0 }
  0xdf   :  { %v1118_v16 = vpop.f32.mrf.mxu3  ;;  %v1070_v19 = vadd.f32 %v1069_v14, %v1021_v3  ;;  %v1023_v21 = vpop.f32.mrf.mxu1  ;;  %v1707_v3 = vld [vmem:[%s2848_s0 + $0x198] sm:$0xf] }
  0xe0   :  { %v1024_v24 = vadd.f32 %v1023_v21, %v974_v20 }
  0xe1   :  { %v2714_v25 = vadd.f32 %v1118_v16, %v1070_v19  ;;  %1169 = vmatmul.bf16.gmra.mxu0 %v1636_v17  ;;  %v1708_v17 = vor.u32 %v2056_v5, %v1707_v3 }
  0xe2   :  { %1218 = vmatmul.bf16.gmra.mxu1 %v1640_v18  ;;  %v1712_v18 = vor.u32 %v2052_v6, %v1709_v7 }
  0xe3   :  { %1267 = vmatmul.bf16.gmra.mxu2 %v1644_v22 }
  0xe4   :  { %1316 = vmatmul.bf16.gmra.mxu3 %v1648_v23 }
  0xe6   :  { %v1072_v26 = vpop.f32.mrf.mxu2  ;;  %v976_v29 = vpop.f32.mrf.mxu0 }
  0xe7   :  { %v1121_v27 = vpop.f32.mrf.mxu3  ;;  %v1073_v28 = vadd.f32 %v1072_v26, %v1024_v24  ;;  %v1025_v30 = vpop.f32.mrf.mxu1 }
  0xe8   :  { %v1026_v31 = vadd.f32 %v1025_v30, %v976_v29  ;;  %v1731_v29 = vld [vmem:[%s2848_s0 + $0x1d0] sm:$0xf] }
  0xe9   :  { %v2716_v32 = vadd.f32 %v1121_v27, %v1073_v28  ;;  %v2063_v30 = vld [vmem:[%s2848_s0 + $0x1ec] sm:$0xf0] }
  0xea   :  { %v1732_v42 = vor.u32 %v2063_v30, %v1731_v29 }
  0xee   :  { %v1074_v43 = vpop.f32.mrf.mxu2  ;;  %v979_v48 = vpop.f32.mrf.mxu0 }
  0xef   :  { %v1123_v44 = vpop.f32.mrf.mxu3  ;;  %v1075_v47 = vadd.f32 %v1074_v43, %v1026_v31  ;;  %v1028_v49 = vpop.f32.mrf.mxu1  ;;  %v2059_v31 = vld [vmem:[%s2848_s0 + $0x1d4] sm:$0xf] }
  0xf0   :  { %v1029_v52 = vadd.f32 %v1028_v49, %v979_v48  ;;  %v1736_v43 = vor.u32 %v2059_v31, %v1733_v33  ;;  %v1744_v48 = vor.u32 %v2060_v37, %v1741_v38 }
  0xf1   :  { %v2742_v54 = vadd.f32 %v1123_v44, %v1075_v47  ;;  %1174 = vmatmul.bf16.gmra.mxu0 %v1668_v45  ;;  %v1740_v47 = vor.u32 %v2064_v36, %v1739_v35 }
  0xf2   :  { %1223 = vmatmul.bf16.gmra.mxu1 %v1672_v46 }
  0xf3   :  { %1272 = vmatmul.bf16.gmra.mxu2 %v1676_v50 }
  0xf4   :  { %1321 = vmatmul.bf16.gmra.mxu3 %v1680_v51 }
  0xf6   :  { %v1077_v55 = vpop.f32.mrf.mxu2  ;;  %v981_v58 = vpop.f32.mrf.mxu0 }
  0xf7   :  { %v1126_v56 = vpop.f32.mrf.mxu3  ;;  %v1078_v57 = vadd.f32 %v1077_v55, %v1029_v52  ;;  %v1030_v59 = vpop.f32.mrf.mxu1 }
  0xf8   :  { %v1031_v60 = vadd.f32 %v1030_v59, %v981_v58 }
  0xf9   :  { %v2744_v62 = vadd.f32 %v1126_v56, %v1078_v57 }
  0xfe   :  { %v1079_v9 = vpop.f32.mrf.mxu2  ;;  %v984_v14 = vpop.f32.mrf.mxu0 }
  0xff   :  { %v1128_v10 = vpop.f32.mrf.mxu3  ;;  %v1080_v13 = vadd.f32 %v1079_v9, %v1031_v60  ;;  %v1033_v16 = vpop.f32.mrf.mxu1 }
 0x100   :  { %v1034_v19 = vadd.f32 %v1033_v16, %v984_v14 }
 0x101   :  { %v2770_v20 = vadd.f32 %v1128_v10, %v1080_v13  ;;  %1179 = vmatmul.bf16.gmra.mxu0 %v1700_v11 }
 0x102   :  { %1228 = vmatmul.bf16.gmra.mxu1 %v1704_v12 }
 0x103   :  { %1277 = vmatmul.bf16.gmra.mxu2 %v1708_v17 }
 0x104   :  { %1326 = vmatmul.bf16.gmra.mxu3 %v1712_v18 }
 0x106   :  { %v1082_v21 = vpop.f32.mrf.mxu2  ;;  %v986_v24 = vpop.f32.mrf.mxu0 }
 0x107   :  { %v1131_v22 = vpop.f32.mrf.mxu3  ;;  %v1083_v23 = vadd.f32 %v1082_v21, %v1034_v19  ;;  %v1035_v26 = vpop.f32.mrf.mxu1 }
 0x108   :  { %v1036_v27 = vadd.f32 %v1035_v26, %v986_v24 }
 0x109   :  { %v2772_v28 = vadd.f32 %v1131_v22, %v1083_v23 }
 0x10e   :  { %v1084_v39 = vpop.f32.mrf.mxu2  ;;  %v989_v45 = vpop.f32.mrf.mxu0 }
 0x10f   :  { %v1133_v40 = vpop.f32.mrf.mxu3  ;;  %v1085_v44 = vadd.f32 %v1084_v39, %v1036_v27  ;;  %v1038_v46 = vpop.f32.mrf.mxu1 }
 0x110   :  { %v1039_v49 = vadd.f32 %v1038_v46, %v989_v45 }
 0x111   :  { %v2798_v50 = vadd.f32 %v1133_v40, %v1085_v44  ;;  %1184 = vmatmul.bf16.gmra.mxu0 %v1732_v42 }
 0x112   :  { %1233 = vmatmul.bf16.gmra.mxu1 %v1736_v43 }
 0x113   :  { %1282 = vmatmul.bf16.gmra.mxu2 %v1740_v47 }
 0x114   :  { %1331 = vmatmul.bf16.gmra.mxu3 %v1744_v48 }
 0x116   :  { %v1087_v51 = vpop.f32.mrf.mxu2  ;;  %v991_v56 = vpop.f32.mrf.mxu0 }
 0x117   :  { %v1136_v52 = vpop.f32.mrf.mxu3  ;;  %v1088_v55 = vadd.f32 %v1087_v51, %v1039_v49  ;;  %v1040_v57 = vpop.f32.mrf.mxu1 }
 0x118   :  { %v1041_v58 = vadd.f32 %v1040_v57, %v991_v56 }
 0x119   :  { %v2800_v59 = vadd.f32 %v1136_v52, %v1088_v55 }
 0x11e   :  { %v1089_v60 = vpop.f32.mrf.mxu2  ;;  %v1150_v1 = vpop.f32.mrf.mxu0 }
 0x11f   :  { %v1138_v63 = vpop.f32.mrf.mxu3  ;;  %v1090_v0 = vadd.f32 %v1089_v60, %v1041_v58  ;;  %v1199_v2 = vpop.f32.mrf.mxu1  ;;  %v1151_v5 = vadd.f32 %v1150_v1, %v2604_v53 }
 0x121   :  { %v2802_v3 = vadd.f32 %v1138_v63, %v1090_v0  ;;  %v1200_v11 = vadd.f32 %v1199_v2, %v1151_v5 }
 0x126   :  { %v1248_v6 = vpop.f32.mrf.mxu2  ;;  %v1152_v9 = vpop.f32.mrf.mxu0 }
 0x127   :  { %v1297_v7 = vpop.f32.mrf.mxu3  ;;  %v1201_v10 = vpop.f32.mrf.mxu1  ;;  %v1153_v12 = vadd.f32 %v1152_v9, %v2630_v8  ;;  %v1249_v13 = vadd.f32 %v1248_v6, %v1200_v11 }
 0x129   :  { %v1202_v14 = vadd.f32 %v1201_v10, %v1153_v12  ;;  %v1298_v18 = vadd.f32 %v1297_v7, %v1249_v13 }
 0x12b   :  { %v1441_v26 = vmul.f32 %v1298_v18, %v1298_v18 }
 0x12e   :  { %v1250_v16 = vpop.f32.mrf.mxu2  ;;  %v1155_v21 = vpop.f32.mrf.mxu0 }
 0x12f   :  { %v1299_v17 = vpop.f32.mrf.mxu3  ;;  %v1251_v19 = vadd.f32 %v1250_v16, %v1202_v14  ;;  %v1204_v22 = vpop.f32.mrf.mxu1  ;;  %v1156_v24 = vadd.f32 %v1155_v21, %v2632_v15 }
 0x131   :  { %v1300_v23 = vadd.f32 %v1299_v17, %v1251_v19  ;;  %v1205_v30 = vadd.f32 %v1204_v22, %v1156_v24 }
 0x133   :  { %v2132_v53 = vpack.c.bf16 %v1300_v23, %v1298_v18  ;;  %v1420_v27 = vadd.f32 %v1300_v23, %v1298_v18  ;;  %v1442_v29 = vmul.f32 %v1300_v23, %v1300_v23 }
 0x135   :  { %2133 = vst [vmem:[%s2849_s2] sm:$0xff] %v2132_v53   ;;  %v1457_v8 = vadd.f32 %v1442_v29, %v1441_v26 }
 0x136   :  { %v1253_v31 = vpop.f32.mrf.mxu2  ;;  %v1157_v36 = vpop.f32.mrf.mxu0 }
 0x137   :  { %v1302_v33 = vpop.f32.mrf.mxu3  ;;  %v1254_v35 = vadd.f32 %v1253_v31, %v1205_v30  ;;  %v1206_v37 = vpop.f32.mrf.mxu1  ;;  %v1158_v39 = vadd.f32 %v1157_v36, %v2658_v34 }
 0x139   :  { %v1303_v38 = vadd.f32 %v1302_v33, %v1254_v35  ;;  %v1207_v43 = vadd.f32 %v1206_v37, %v1158_v39 }
 0x13b   :  { %v1421_v40 = vadd.f32 %v1420_v27, %v1303_v38  ;;  %v1443_v15 = vmul.f32 %v1303_v38, %v1303_v38 }
 0x13d   :  { %v1458_v42 = vadd.f32 %v1457_v8, %v1443_v15 }
 0x13e   :  { %v1255_v44 = vpop.f32.mrf.mxu2  ;;  %v1160_v47 = vpop.f32.mrf.mxu0 }
 0x13f   :  { %v1304_v45 = vpop.f32.mrf.mxu3  ;;  %v1256_v46 = vadd.f32 %v1255_v44, %v1207_v43  ;;  %v1209_v48 = vpop.f32.mrf.mxu1  ;;  %v1161_v51 = vadd.f32 %v1160_v47, %v2660_v41 }
 0x141   :  { %v1305_v49 = vadd.f32 %v1304_v45, %v1256_v46  ;;  %v1210_v57 = vadd.f32 %v1209_v48, %v1161_v51 }
 0x143   :  { %v2137_v52 = vpack.c.bf16 %v1305_v49, %v1303_v38  ;;  %v1422_v55 = vadd.f32 %v1421_v40, %v1305_v49  ;;  %v1444_v56 = vmul.f32 %v1305_v49, %v1305_v49 }
 0x145   :  { %2169 = vst [vmem:[%s2849_s2 + $0x8] sm:$0xff] %v2137_v52   ;;  %v1459_v34 = vadd.f32 %v1458_v42, %v1444_v56 }
 0x146   :  { %v1258_v58 = vpop.f32.mrf.mxu2  ;;  %v1162_v0 = vpop.f32.mrf.mxu0 }
 0x147   :  { %v1307_v60 = vpop.f32.mrf.mxu3  ;;  %v1259_v63 = vadd.f32 %v1258_v58, %v1210_v57  ;;  %v1211_v1 = vpop.f32.mrf.mxu1  ;;  %v1163_v5 = vadd.f32 %v1162_v0, %v2686_v61 }
 0x149   :  { %v1308_v2 = vadd.f32 %v1307_v60, %v1259_v63  ;;  %v1212_v9 = vadd.f32 %v1211_v1, %v1163_v5 }
 0x14b   :  { %v1423_v6 = vadd.f32 %v1422_v55, %v1308_v2  ;;  %v1445_v7 = vmul.f32 %v1308_v2, %v1308_v2 }
 0x14d   :  { %v1460_v41 = vadd.f32 %v1459_v34, %v1445_v7 }
 0x14e   :  { %v1260_v10 = vpop.f32.mrf.mxu2  ;;  %v1165_v13 = vpop.f32.mrf.mxu0 }
 0x14f   :  { %v1309_v11 = vpop.f32.mrf.mxu3  ;;  %v1261_v12 = vadd.f32 %v1260_v10, %v1212_v9  ;;  %v1214_v14 = vpop.f32.mrf.mxu1  ;;  %v1166_v17 = vadd.f32 %v1165_v13, %v2688_v4 }
 0x151   :  { %v1310_v16 = vadd.f32 %v1309_v11, %v1261_v12  ;;  %v1215_v22 = vadd.f32 %v1214_v14, %v1166_v17 }
 0x153   :  { %v2142_v18 = vpack.c.bf16 %v1310_v16, %v1308_v2  ;;  %v1424_v19 = vadd.f32 %v1423_v6, %v1310_v16  ;;  %v1446_v21 = vmul.f32 %v1310_v16, %v1310_v16 }
 0x155   :  { %2170 = vst [vmem:[%s2849_s2 + $0x10] sm:$0xff] %v2142_v18   ;;  %v1461_v61 = vadd.f32 %v1460_v41, %v1446_v21 }
 0x156   :  { %v1263_v23 = vpop.f32.mrf.mxu2  ;;  %v1167_v53 = vpop.f32.mrf.mxu0 }
 0x157   :  { %v1312_v24 = vpop.f32.mrf.mxu3  ;;  %v1264_v26 = vadd.f32 %v1263_v23, %v1215_v22  ;;  %v1216_v27 = vpop.f32.mrf.mxu1  ;;  %v1168_v8 = vadd.f32 %v1167_v53, %v2714_v25 }
 0x159   :  { %v1313_v29 = vadd.f32 %v1312_v24, %v1264_v26  ;;  %v1217_v33 = vadd.f32 %v1216_v27, %v1168_v8 }
 0x15b   :  { %v1425_v30 = vadd.f32 %v1424_v19, %v1313_v29  ;;  %v1447_v31 = vmul.f32 %v1313_v29, %v1313_v29 }
 0x15d   :  { %v1462_v4 = vadd.f32 %v1461_v61, %v1447_v31 }
 0x15e   :  { %v1265_v35 = vpop.f32.mrf.mxu2  ;;  %v1170_v38 = vpop.f32.mrf.mxu0 }
 0x15f   :  { %v1314_v36 = vpop.f32.mrf.mxu3  ;;  %v1266_v37 = vadd.f32 %v1265_v35, %v1217_v33  ;;  %v1219_v39 = vpop.f32.mrf.mxu1  ;;  %v1171_v15 = vadd.f32 %v1170_v38, %v2716_v32 }
 0x161   :  { %v1315_v40 = vadd.f32 %v1314_v36, %v1266_v37  ;;  %v1220_v45 = vadd.f32 %v1219_v39, %v1171_v15 }
 0x163   :  { %v2147_v42 = vpack.c.bf16 %v1315_v40, %v1313_v29  ;;  %v1426_v43 = vadd.f32 %v1425_v30, %v1315_v40  ;;  %v1448_v44 = vmul.f32 %v1315_v40, %v1315_v40 }
 0x165   :  { %2171 = vst [vmem:[%s2849_s2 + $0x18] sm:$0xff] %v2147_v42   ;;  %v1463_v25 = vadd.f32 %v1462_v4, %v1448_v44 }
 0x166   :  { %v1268_v46 = vpop.f32.mrf.mxu2  ;;  %v1172_v49 = vpop.f32.mrf.mxu0 }
 0x167   :  { %v1317_v47 = vpop.f32.mrf.mxu3  ;;  %v1269_v48 = vadd.f32 %v1268_v46, %v1220_v45  ;;  %v1221_v51 = vpop.f32.mrf.mxu1  ;;  %v1173_v55 = vadd.f32 %v1172_v49, %v2742_v54 }
 0x169   :  { %v1318_v52 = vadd.f32 %v1317_v47, %v1269_v48  ;;  %v1222_v57 = vadd.f32 %v1221_v51, %v1173_v55 }
 0x16b   :  { %v1427_v56 = vadd.f32 %v1426_v43, %v1318_v52  ;;  %v1449_v34 = vmul.f32 %v1318_v52, %v1318_v52 }
 0x16d   :  { %v1464_v32 = vadd.f32 %v1463_v25, %v1449_v34 }
 0x16e   :  { %v1270_v58 = vpop.f32.mrf.mxu2  ;;  %v1175_v0 = vpop.f32.mrf.mxu0 }
 0x16f   :  { %v1319_v60 = vpop.f32.mrf.mxu3  ;;  %v1271_v63 = vadd.f32 %v1270_v58, %v1222_v57  ;;  %v1224_v1 = vpop.f32.mrf.mxu1  ;;  %v1176_v5 = vadd.f32 %v1175_v0, %v2744_v62 }
 0x171   :  { %v1320_v2 = vadd.f32 %v1319_v60, %v1271_v63  ;;  %v1225_v9 = vadd.f32 %v1224_v1, %v1176_v5 }
 0x173   :  { %v2152_v6 = vpack.c.bf16 %v1320_v2, %v1318_v52  ;;  %v1428_v7 = vadd.f32 %v1427_v56, %v1320_v2  ;;  %v1450_v41 = vmul.f32 %v1320_v2, %v1320_v2 }
 0x175   :  { %2172 = vst [vmem:[%s2849_s2 + $0x20] sm:$0xff] %v2152_v6   ;;  %v1465_v54 = vadd.f32 %v1464_v32, %v1450_v41 }
 0x176   :  { %v1273_v10 = vpop.f32.mrf.mxu2  ;;  %v1177_v13 = vpop.f32.mrf.mxu0 }
 0x177   :  { %v1322_v11 = vpop.f32.mrf.mxu3  ;;  %v1274_v12 = vadd.f32 %v1273_v10, %v1225_v9  ;;  %v1226_v14 = vpop.f32.mrf.mxu1  ;;  %v1178_v17 = vadd.f32 %v1177_v13, %v2770_v20 }
 0x179   :  { %v1323_v16 = vadd.f32 %v1322_v11, %v1274_v12  ;;  %v1227_v21 = vadd.f32 %v1226_v14, %v1178_v17 }
 0x17b   :  { %v1429_v18 = vadd.f32 %v1428_v7, %v1323_v16  ;;  %v1451_v19 = vmul.f32 %v1323_v16, %v1323_v16 }
 0x17d   :  { %v1466_v62 = vadd.f32 %v1465_v54, %v1451_v19 }
 0x17e   :  { %v1275_v61 = vpop.f32.mrf.mxu2  ;;  %v1180_v24 = vpop.f32.mrf.mxu0 }
 0x17f   :  { %v1324_v22 = vpop.f32.mrf.mxu3  ;;  %v1276_v23 = vadd.f32 %v1275_v61, %v1227_v21  ;;  %v1229_v26 = vpop.f32.mrf.mxu1  ;;  %v1181_v27 = vadd.f32 %v1180_v24, %v2772_v28 }
 0x181   :  { %v1325_v53 = vadd.f32 %v1324_v22, %v1276_v23  ;;  %v1230_v31 = vadd.f32 %v1229_v26, %v1181_v27 }
 0x183   :  { %v2157_v29 = vpack.c.bf16 %v1325_v53, %v1323_v16  ;;  %v1430_v8 = vadd.f32 %v1429_v18, %v1325_v53  ;;  %v1452_v30 = vmul.f32 %v1325_v53, %v1325_v53 }
 0x185   :  { %2173 = vst [vmem:[%s2849_s2 + $0x28] sm:$0xff] %v2157_v29   ;;  %v1467_v20 = vadd.f32 %v1466_v62, %v1452_v30 }
 0x186   :  { %v1278_v4 = vpop.f32.mrf.mxu2  ;;  %v1182_v36 = vpop.f32.mrf.mxu0 }
 0x187   :  { %v1327_v33 = vpop.f32.mrf.mxu3  ;;  %v1279_v35 = vadd.f32 %v1278_v4, %v1230_v31  ;;  %v1231_v37 = vpop.f32.mrf.mxu1  ;;  %v1183_v39 = vadd.f32 %v1182_v36, %v2798_v50 }
 0x189   :  { %v1328_v38 = vadd.f32 %v1327_v33, %v1279_v35  ;;  %v1232_v42 = vadd.f32 %v1231_v37, %v1183_v39 }
 0x18b   :  { %v1431_v40 = vadd.f32 %v1430_v8, %v1328_v38  ;;  %v1453_v15 = vmul.f32 %v1328_v38, %v1328_v38 }
 0x18d   :  { %v1468_v28 = vadd.f32 %v1467_v20, %v1453_v15 }
 0x18e   :  { %v1280_v43 = vpop.f32.mrf.mxu2  ;;  %v1185_v45 = vpop.f32.mrf.mxu0 }
 0x18f   :  { %v1329_v44 = vpop.f32.mrf.mxu3  ;;  %v1281_v25 = vadd.f32 %v1280_v43, %v1232_v42  ;;  %v1186_v47 = vadd.f32 %v1185_v45, %v2800_v59  ;;  %v1234_v48 = vpop.f32.mrf.mxu1 }
 0x191   :  { %v1330_v46 = vadd.f32 %v1329_v44, %v1281_v25  ;;  %v1235_v55 = vadd.f32 %v1234_v48, %v1186_v47 }
 0x193   :  { %v2162_v49 = vpack.c.bf16 %v1330_v46, %v1328_v38  ;;  %v1432_v51 = vadd.f32 %v1431_v40, %v1330_v46  ;;  %v1454_v52 = vmul.f32 %v1330_v46, %v1330_v46 }
 0x195   :  { %2174 = vst [vmem:[%s2849_s2 + $0x30] sm:$0xff] %v2162_v49   ;;  %v1469_v50 = vadd.f32 %v1468_v28, %v1454_v52 }
 0x196   :  { %v1283_v56 = vpop.f32.mrf.mxu2  ;;  %v1187_v57 = vpop.f32.mrf.mxu0 }
 0x197   :  { %v1332_v34 = vpop.f32.mrf.mxu3  ;;  %v1284_v32 = vadd.f32 %v1283_v56, %v1235_v55  ;;  %v1188_v60 = vadd.f32 %v1187_v57, %v2802_v3  ;;  %v1236_v59 = vpop.f32.mrf.mxu1 }
 0x199   :  { %v1333_v58 = vadd.f32 %v1332_v34, %v1284_v32  ;;  %v1237_v2 = vadd.f32 %v1236_v59, %v1188_v60 }
 0x19b   :  { %v1433_v63 = vadd.f32 %v1432_v51, %v1333_v58  ;;  %v1455_v0 = vmul.f32 %v1333_v58, %v1333_v58 }
 0x19d   :  { %v1470_v1 = vadd.f32 %v1469_v50, %v1455_v0 }
 0x19e   :  { %v1285_v5 = vpop.f32.mrf.mxu2 }
 0x19f   :  { %v1286_v6 = vadd.f32 %v1285_v5, %v1237_v2  ;;  %v1334_v7 = vpop.f32.mrf.mxu3 }
 0x1a1   :  { %v1335_v41 = vadd.f32 %v1334_v7, %v1286_v6 }
 0x1a3   :  { %v2167_v54 = vpack.c.bf16 %v1335_v41, %v1333_v58  ;;  %v1434_v9 = vadd.f32 %v1433_v63, %v1335_v41  ;;  %v1456_v10 = vmul.f32 %v1335_v41, %v1335_v41 }
 0x1a5   :  { %2175 = vst [vmem:[%s2849_s2 + $0x38] sm:$0xff] %v2167_v54   ;;  %v1435_v11 = vrot.slane %v1434_v9, 4  ;;  %v1471_v12 = vadd.f32 %v1470_v1, %v1456_v10 }
 0x1a7   :  { %v1436_v13 = vadd.f32 %v1435_v11, %v1434_v9  ;;  %v1472_v3 = vrot.slane %v1471_v12, 4 }
 0x1a9   :  { %v1437_v14 = vrot.slane %v1436_v13, 2  ;;  %v1473_v16 = vadd.f32 %v1472_v3, %v1471_v12 }
 0x1ab   :  { %v1438_v17 = vadd.f32 %v1437_v14, %v1436_v13  ;;  %v1474_v18 = vrot.slane %v1473_v16, 2 }
 0x1ad   :  { %v1439_v19 = vrot.slane %v1438_v17, 1  ;;  %v1475_v62 = vadd.f32 %v1474_v18, %v1473_v16 }
 0x1af   :  { %v1476_v21 = vrot.slane %v1475_v62, 1  ;;  %v1440_v61 = vadd.f32 %v1439_v19, %v1438_v17 }
 0x1b1   :  { %v1477_v22 = vadd.f32 %v1476_v21, %v1475_v62 }
 0x1b3   :  { %v1479_v23 = vsel %vm1478_vm0, %v1440_v61, %v1477_v22 }
 0x1b4   :  { %1480 = vst [vmem:[%s2850_s3] sm:$0x3] %v1479_v23 }

// kernel: discriminator_forward.10
= control target key start
LH: loop header
LB: loop body
LE: loop exit
PB: predicated region body
PF: predicated region fallthrough
CT: control target
= control target key end

     0   :  { %s368_s0 = inlined_call_operand.vmem [shape: bf16[128,128], index: 0, kind: input, shape index: {}]   ;;  %s369_s1 = inlined_call_operand.vmem [shape: f32[1,128], index: 1, kind: input, shape index: {}]   ;;  %s370_s2 = inlined_call_operand.vmem [shape: f32[1,128], index: 2, kind: input, shape index: {}]   ;;  %s371_s3 = inlined_call_operand.vmem [shape: bf16[128,128], index: 3, kind: output, shape index: {}]  }
   0x1   :  { %v171_v0 = vld [vmem:[%s368_s0] sm:$0xff]   ;;  %v242_v5 = vld [vmem:[%s368_s0 + $0x8] sm:$0xff]   ;;  %v243_v8 = vld [vmem:[%s368_s0 + $0x10] sm:$0xff]  }
   0x2   :  { %v284_v1 = vld [vmem:[%s369_s1] ss:$0 sm:$0xff]  ;;  %v172_v2 = vunpack.c.l.bf16 %v171_v0  ;;  %v173_v3 = vunpack.c.h.bf16 %v171_v0  ;;  %v176_v6 = vunpack.c.l.bf16 %v242_v5  ;;  %v177_v7 = vunpack.c.h.bf16 %v242_v5  ;;  %v244_v9 = vld [vmem:[%s368_s0 + $0x18] sm:$0xff]   ;;  %v246_v39 = vld [vmem:[%s368_s0 + $0x28] sm:$0xff]  }
   0x3   :  { %v289_v4 = vld [vmem:[%s370_s2] ss:$0 sm:$0xff]  ;;  %v180_v12 = vunpack.c.l.bf16 %v243_v8  ;;  %v181_v13 = vunpack.c.h.bf16 %v243_v8  ;;  %v184_v16 = vunpack.c.l.bf16 %v244_v9  ;;  %v185_v17 = vunpack.c.h.bf16 %v244_v9  ;;  %v247_v49 = vld [vmem:[%s368_s0 + $0x30] sm:$0xff]   ;;  %v248_v57 = vld [vmem:[%s368_s0 + $0x38] sm:$0xff]  }
   0x4   :  { %v50_v10 = vmul.f32 %v284_v1, %v172_v2  ;;  %v51_v11 = vmul.f32 %v284_v1, %v173_v3  ;;  %v52_v14 = vmul.f32 %v284_v1, %v176_v6  ;;  %v53_v15 = vmul.f32 %v284_v1, %v177_v7  ;;  %v245_v38 = vld [vmem:[%s368_s0 + $0x20] sm:$0xff]  }
   0x5   :  { %v54_v20 = vmul.f32 %v284_v1, %v180_v12  ;;  %v55_v21 = vmul.f32 %v284_v1, %v181_v13  ;;  %v56_v24 = vmul.f32 %v284_v1, %v184_v16  ;;  %v57_v25 = vmul.f32 %v284_v1, %v185_v17 }
   0x6   :  { %v70_v18 = vadd.f32 %v289_v4, %v50_v10  ;;  %v71_v19 = vadd.f32 %v289_v4, %v51_v11  ;;  %v72_v22 = vadd.f32 %v289_v4, %v52_v14  ;;  %v73_v23 = vadd.f32 %v289_v4, %v53_v15 }
   0x7   :  { %v74_v32 = vadd.f32 %v289_v4, %v54_v20  ;;  %v75_v33 = vadd.f32 %v289_v4, %v55_v21  ;;  %v76_v37 = vadd.f32 %v289_v4, %v56_v24  ;;  %v77_v43 = vadd.f32 %v289_v4, %v57_v25 }
   0x8   :  { %vm86_vm0 = vcmp.gt.f32.partialorder %v70_v18, 0.0  ;;  %vm87_vm1 = vcmp.gt.f32.partialorder %v71_v19, 0.0  ;;  %v102_v26 = vmul.f32 0.2, %v70_v18  ;;  %v103_v27 = vmul.f32 0.2, %v71_v19 }
   0x9   :  { %vm88_vm2 = vcmp.gt.f32.partialorder %v72_v22, 0.0  ;;  %vm89_vm3 = vcmp.gt.f32.partialorder %v73_v23, 0.0  ;;  %v104_v28 = vmul.f32 0.2, %v72_v22  ;;  %v105_v29 = vmul.f32 0.2, %v73_v23 }
   0xa   :  { %v118_v30 = vsel %vm86_vm0, %v70_v18, %v102_v26  ;;  %v119_v31 = vsel %vm87_vm1, %v71_v19, %v103_v27  ;;  %vm90_vm4 = vcmp.gt.f32.partialorder %v74_v32, 0.0  ;;  %vm91_vm5 = vcmp.gt.f32.partialorder %v75_v33, 0.0 }
   0xb   :  { %v205_v34 = vpack.c.bf16 %v119_v31, %v118_v30  ;;  %v120_v35 = vsel %vm88_vm2, %v72_v22, %v104_v28  ;;  %v121_v36 = vsel %vm89_vm3, %v73_v23, %v105_v29  ;;  %v106_v41 = vmul.f32 0.2, %v74_v32 }
   0xc   :  { %v210_v40 = vpack.c.bf16 %v121_v36, %v120_v35  ;;  %v107_v42 = vmul.f32 0.2, %v75_v33  ;;  %vm92_vm6 = vcmp.gt.f32.partialorder %v76_v37, 0.0  ;;  %v108_v44 = vmul.f32 0.2, %v76_v37 }
   0xd   :  { %206 = vst [vmem:[%s371_s3] sm:$0xff] %v205_v34   ;;  %v122_v45 = vsel %vm90_vm4, %v74_v32, %v106_v41  ;;  %v188_v46 = vunpack.c.l.bf16 %v245_v38  ;;  %v189_v47 = vunpack.c.h.bf16 %v245_v38  ;;  %v192_v48 = vunpack.c.l.bf16 %v246_v39 }
   0xe   :  { %249 = vst [vmem:[%s371_s3 + $0x8] sm:$0xff] %v210_v40   ;;  %v123_v50 = vsel %vm91_vm5, %v75_v33, %v107_v42  ;;  %vm93_vm7 = vcmp.gt.f32.partialorder %v77_v43, 0.0  ;;  %v109_v51 = vmul.f32 0.2, %v77_v43  ;;  %v124_v52 = vsel %vm92_vm6, %v76_v37, %v108_v44 }
   0xf   :  { %v215_v53 = vpack.c.bf16 %v123_v50, %v122_v45  ;;  %v58_v54 = vmul.f32 %v284_v1, %v188_v46  ;;  %v59_v55 = vmul.f32 %v284_v1, %v189_v47  ;;  %v193_v56 = vunpack.c.h.bf16 %v246_v39 }
  0x10   :  { %v125_v58 = vsel %vm93_vm7, %v77_v43, %v109_v51  ;;  %v60_v59 = vmul.f32 %v284_v1, %v192_v48  ;;  %v196_v60 = vunpack.c.l.bf16 %v247_v49  ;;  %v197_v61 = vunpack.c.h.bf16 %v247_v49 }
  0x11   :  { %250 = vst [vmem:[%s371_s3 + $0x10] sm:$0xff] %v215_v53   ;;  %v220_v62 = vpack.c.bf16 %v125_v58, %v124_v52  ;;  %v78_v63 = vadd.f32 %v289_v4, %v58_v54  ;;  %v79_v0 = vadd.f32 %v289_v4, %v59_v55  ;;  %v61_v2 = vmul.f32 %v284_v1, %v193_v56 }
  0x12   :  { %v80_v3 = vadd.f32 %v289_v4, %v60_v59  ;;  %v62_v5 = vmul.f32 %v284_v1, %v196_v60  ;;  %v63_v6 = vmul.f32 %v284_v1, %v197_v61  ;;  %v200_v7 = vunpack.c.l.bf16 %v248_v57 }
  0x13   :  { %251 = vst [vmem:[%s371_s3 + $0x18] sm:$0xff] %v220_v62   ;;  %vm94_vm8 = vcmp.gt.f32.partialorder %v78_v63, 0.0  ;;  %vm95_vm9 = vcmp.gt.f32.partialorder %v79_v0, 0.0  ;;  %v110_v8 = vmul.f32 0.2, %v78_v63  ;;  %v81_v9 = vadd.f32 %v289_v4, %v61_v2 }
  0x14   :  { %v111_v10 = vmul.f32 0.2, %v79_v0  ;;  %vm96_vm10 = vcmp.gt.f32.partialorder %v80_v3, 0.0  ;;  %v112_v11 = vmul.f32 0.2, %v80_v3  ;;  %v82_v12 = vadd.f32 %v289_v4, %v62_v5 }
  0x15   :  { %v126_v13 = vsel %vm94_vm8, %v78_v63, %v110_v8  ;;  %vm97_vm11 = vcmp.gt.f32.partialorder %v81_v9, 0.0  ;;  %v113_v14 = vmul.f32 0.2, %v81_v9  ;;  %v83_v15 = vadd.f32 %v289_v4, %v63_v6 }
  0x16   :  { %v127_v16 = vsel %vm95_vm9, %v79_v0, %v111_v10  ;;  %v128_v17 = vsel %vm96_vm10, %v80_v3, %v112_v11  ;;  %vm98_vm12 = vcmp.gt.f32.partialorder %v82_v12, 0.0  ;;  %v114_v18 = vmul.f32 0.2, %v82_v12 }
  0x17   :  { %v225_v19 = vpack.c.bf16 %v127_v16, %v126_v13  ;;  %v129_v20 = vsel %vm97_vm11, %v81_v9, %v113_v14  ;;  %vm99_vm13 = vcmp.gt.f32.partialorder %v83_v15, 0.0  ;;  %v115_v21 = vmul.f32 0.2, %v83_v15 }
  0x18   :  { %v230_v22 = vpack.c.bf16 %v129_v20, %v128_v17  ;;  %v130_v23 = vsel %vm98_vm12, %v82_v12, %v114_v18  ;;  %v201_v24 = vunpack.c.h.bf16 %v248_v57  ;;  %v64_v25 = vmul.f32 %v284_v1, %v200_v7 }
  0x19   :  { %252 = vst [vmem:[%s371_s3 + $0x20] sm:$0xff] %v225_v19   ;;  %v131_v26 = vsel %vm99_vm13, %v83_v15, %v115_v21 }
  0x1a   :  { %253 = vst [vmem:[%s371_s3 + $0x28] sm:$0xff] %v230_v22   ;;  %v235_v27 = vpack.c.bf16 %v131_v26, %v130_v23  ;;  %v65_v28 = vmul.f32 %v284_v1, %v201_v24  ;;  %v84_v29 = vadd.f32 %v289_v4, %v64_v25 }
  0x1c   :  { %254 = vst [vmem:[%s371_s3 + $0x30] sm:$0xff] %v235_v27   ;;  %v85_v30 = vadd.f32 %v289_v4, %v65_v28  ;;  %vm100_vm14 = vcmp.gt.f32.partialorder %v84_v29, 0.0  ;;  %v116_v31 = vmul.f32 0.2, %v84_v29 }
  0x1e   :  { %vm101_vm15 = vcmp.gt.f32.partialorder %v85_v30, 0.0  ;;  %v117_v32 = vmul.f32 0.2, %v85_v30  ;;  %v132_v33 = vsel %vm100_vm14, %v84_v29, %v116_v31 }
  0x20   :  { %v133_v34 = vsel %vm101_vm15, %v85_v30, %v117_v32 }
  0x21   :  { %v240_v35 = vpack.c.bf16 %v133_v34, %v132_v33 }
  0x23   :  { %255 = vst [vmem:[%s371_s3 + $0x38] sm:$0xff] %v240_v35  }

// kernel: discriminator_forward.12
= control target key start
LH: loop header
LB: loop body
LE: loop exit
PB: predicated region body
PF: predicated region fallthrough
CT: control target
= control target key end

     0   :  { %s140_s0 = inlined_call_operand.vmem [shape: bf16[32,256], index: 0, kind: input, shape index: {}]   ;;  %s141_s1 = inlined_call_operand.vmem [shape: f32[1,256], index: 1, kind: input, shape index: {}]   ;;  %s142_s2 = inlined_call_operand.vmem [shape: f32[1,256], index: 2, kind: input, shape index: {}]   ;;  %s143_s3 = inlined_call_operand.vmem [shape: bf16[32,256], index: 3, kind: output, shape index: {}]  }
   0x1   :  { %v14_v0 = vld [vmem:[%s140_s0] sm:$0xff]  ;;  %v15_v7 = vld [vmem:[%s140_s0 + $0x8] sm:$0xff]  ;;  %v16_v8 = vld [vmem:[%s140_s0 + $0x10] sm:$0xff] }
   0x2   :  { %v26_v1 = vld [vmem:[%s141_s1] sm:$0x3]  ;;  %v18_v3 = vunpack.c.l.bf16 %v14_v0  ;;  %v19_v4 = vunpack.c.h.bf16 %v14_v0  ;;  %v17_v9 = vld [vmem:[%s140_s0 + $0x18] sm:$0xff]  ;;  %v20_v12 = vunpack.c.l.bf16 %v15_v7  ;;  %v21_v13 = vunpack.c.h.bf16 %v15_v7 }
   0x3   :  { %v40_v2 = vld [vmem:[%s142_s2] sm:$0x3]  ;;  %v28_v5 = vperm.slane %v26_v1, 0  ;;  %v29_v6 = vperm.slane %v26_v1, 1  ;;  %v22_v16 = vunpack.c.l.bf16 %v16_v8  ;;  %v23_v17 = vunpack.c.h.bf16 %v16_v8 }
   0x4   :  { %v42_v10 = vperm.slane %v40_v2, 0  ;;  %v43_v11 = vperm.slane %v40_v2, 1  ;;  %v24_v20 = vunpack.c.l.bf16 %v17_v9  ;;  %v25_v21 = vunpack.c.h.bf16 %v17_v9 }
   0x5   :  { %v32_v14 = vmul.f32 %v28_v5, %v18_v3  ;;  %v33_v15 = vmul.f32 %v29_v6, %v19_v4  ;;  %v34_v18 = vmul.f32 %v28_v5, %v20_v12  ;;  %v35_v19 = vmul.f32 %v29_v6, %v21_v13 }
   0x6   :  { %v36_v24 = vmul.f32 %v28_v5, %v22_v16  ;;  %v37_v25 = vmul.f32 %v29_v6, %v23_v17  ;;  %v38_v28 = vmul.f32 %v28_v5, %v24_v20  ;;  %v39_v29 = vmul.f32 %v29_v6, %v25_v21 }
   0x7   :  { %v46_v22 = vadd.f32 %v42_v10, %v32_v14  ;;  %v47_v23 = vadd.f32 %v43_v11, %v33_v15  ;;  %v48_v26 = vadd.f32 %v42_v10, %v34_v18  ;;  %v49_v27 = vadd.f32 %v43_v11, %v35_v19 }
   0x8   :  { %v50_v36 = vadd.f32 %v42_v10, %v36_v24  ;;  %v51_v37 = vadd.f32 %v43_v11, %v37_v25  ;;  %v52_v41 = vadd.f32 %v42_v10, %v38_v28  ;;  %v53_v45 = vadd.f32 %v43_v11, %v39_v29 }
   0x9   :  { %vm54_vm0 = vcmp.gt.f32.partialorder %v46_v22, 0.0  ;;  %vm55_vm1 = vcmp.gt.f32.partialorder %v47_v23, 0.0  ;;  %v62_v30 = vmul.f32 0.2, %v46_v22  ;;  %v63_v31 = vmul.f32 0.2, %v47_v23 }
   0xa   :  { %vm56_vm2 = vcmp.gt.f32.partialorder %v48_v26, 0.0  ;;  %vm57_vm3 = vcmp.gt.f32.partialorder %v49_v27, 0.0  ;;  %v64_v32 = vmul.f32 0.2, %v48_v26  ;;  %v65_v33 = vmul.f32 0.2, %v49_v27 }
   0xb   :  { %v70_v34 = vsel %vm54_vm0, %v46_v22, %v62_v30  ;;  %v71_v35 = vsel %vm55_vm1, %v47_v23, %v63_v31  ;;  %vm58_vm4 = vcmp.gt.f32.partialorder %v50_v36, 0.0  ;;  %vm59_vm5 = vcmp.gt.f32.partialorder %v51_v37, 0.0 }
   0xc   :  { %v78_v38 = vpack.c.bf16 %v71_v35, %v70_v34  ;;  %v72_v39 = vsel %vm56_vm2, %v48_v26, %v64_v32  ;;  %v73_v40 = vsel %vm57_vm3, %v49_v27, %v65_v33  ;;  %v66_v43 = vmul.f32 0.2, %v50_v36 }
   0xd   :  { %v79_v42 = vpack.c.bf16 %v73_v40, %v72_v39  ;;  %v67_v44 = vmul.f32 0.2, %v51_v37  ;;  %vm60_vm6 = vcmp.gt.f32.partialorder %v52_v41, 0.0  ;;  %v68_v46 = vmul.f32 0.2, %v52_v41 }
   0xe   :  { %82 = vst [vmem:[%s143_s3] sm:$0xff] %v78_v38  ;;  %v74_v47 = vsel %vm58_vm4, %v50_v36, %v66_v43  ;;  %vm61_vm7 = vcmp.gt.f32.partialorder %v53_v45, 0.0  ;;  %v69_v49 = vmul.f32 0.2, %v53_v45 }
   0xf   :  { %83 = vst [vmem:[%s143_s3 + $0x8] sm:$0xff] %v79_v42  ;;  %v75_v48 = vsel %vm59_vm5, %v51_v37, %v67_v44  ;;  %v76_v50 = vsel %vm60_vm6, %v52_v41, %v68_v46 }
  0x10   :  { %v80_v51 = vpack.c.bf16 %v75_v48, %v74_v47  ;;  %v77_v52 = vsel %vm61_vm7, %v53_v45, %v69_v49 }
  0x11   :  { %v81_v53 = vpack.c.bf16 %v77_v52, %v76_v50 }
  0x12   :  { %84 = vst [vmem:[%s143_s3 + $0x10] sm:$0xff] %v80_v51 }
  0x13   :  { %85 = vst [vmem:[%s143_s3 + $0x18] sm:$0xff] %v81_v53 }

// kernel: discriminator_forward.11
= control target key start
LH: loop header
LB: loop body
LE: loop exit
PB: predicated region body
PF: predicated region fallthrough
CT: control target
= control target key end

     0   :  { %s2516_s12 = smov 0   ;;  %s2518_s13 = smov 0   ;;  %s2972_s0 = inlined_call_operand.vmem [shape: bf16[32,2048], index: 0, kind: input, shape index: {}]   ;;  %s2973_s1 = inlined_call_operand.vmem [shape: bf16[2048,256], index: 1, kind: input, shape index: {}]   ;;  %s2974_s2 = inlined_call_operand.vmem [shape: bf16[32,256], index: 2, kind: output, shape index: {0}]   ;;  %s2975_s3 = inlined_call_operand.vmem [shape: f32[1,2,256], index: 3, kind: output, shape index: {1}]  }
   0x1   :  { %s2520_s14 = smov 0   ;;  %s2522_s15 = smov 0  }
   0x2   :  { %s2524_s16 = smov 0  }
   0x3 LB: > { %s23_s17 = sadd.s32 1, %s2489_s15  ;;  %p42_p1 = scmp.ne.s32.totalorder %s2481_s13, %s2477_s12  ;;  %s2493_s16 = sphi %s2524_s16, %s14_s16   ;;  %s2489_s15 = sphi %s2522_s15, %s2979_s15   ;;  %s2485_s14 = sphi %s2520_s14, %s2978_s14   ;;  %s2481_s13 = sphi %s2518_s13, %s2977_s13   ;;  %s2477_s12 = sphi %s2516_s12, %s2976_s12  }
   0x4   : > { %p24_p0 = scmp.ge.s32.totalorder %s23_s17, 2  ;;  %p43_p2 = scmp.eq.s32.totalorder %s2493_s16, 0 }
   0x5   : > { %s35_s19 = sadd.s32 1, %s2481_s13  ;;  %p1676_p5 = scmp.ge.s32.totalorder %s2493_s16, 2 }
   0x6   : > { %s2981_s17 = smov (%p24_p0, %s23_s17), 0  ;;  %p44_p3 = por %p43_p2, %p42_p1 }
   0x7   : > { %s31_s18 = ssub.s32 %s2489_s15, %s2981_s17  ;;  %146 = sbr.rel (%p1676_p5) target bundleno = 32 (0x20), region = 16 }
   0x8   : > { %p33_p4 = scmp.eq.s32.totalorder %s31_s18, 0 }
   0xa   : > { %s2551_s20 = scalar_select %p33_p4, %s2481_s13, %s35_s19  }
   0xc   : > { %149 = sbr.rel (!%p44_p3) target bundleno = 32 (0x20), region = 20  ;;  %s151_s21 = sand.u32 (%p44_p3), 1, %s2481_s13  }
   0xd   : > { %s2268_s22 = sshll.u32 (%p44_p3), %s2489_s15, 5  ;;  %s1677_s23 = sshll.u32 (%p44_p3), %s151_s21, 7 }
   0xe   : > { %s2559_s26 = scalar_lea.vmem (%p44_p3), %s2972_s0, %s2268_s22  ;;  %s153_s27 = scalar_lea.vmem (%p44_p3), [#allocation3], %s1677_s23 }
   0xf   : > { %v172_v0 = vld [vmem:[%s2559_s26] sm:$0xff] (%p44_p3)  ;;  %v174_v1 = vld [vmem:[%s2559_s26 + $0x8] sm:$0xff] (%p44_p3)  ;;  %v176_v2 = vld [vmem:[%s2559_s26 + $0x10] sm:$0xff] (%p44_p3) }
  0x10   : > { %173 = vst [vmem:[%s153_s27] sm:$0xff] (%p44_p3), %v172_v0  ;;  %v178_v3 = vld [vmem:[%s2559_s26 + $0x18] sm:$0xff] (%p44_p3)  ;;  %v180_v4 = vld [vmem:[%s2559_s26 + $0x40] sm:$0xff] (%p44_p3)  ;;  %v182_v5 = vld [vmem:[%s2559_s26 + $0x48] sm:$0xff] (%p44_p3) }
  0x11   : > { %175 = vst [vmem:[%s153_s27 + $0x8] sm:$0xff] %v174_v1  ;;  %v184_v6 = vld [vmem:[%s2559_s26 + $0x50] sm:$0xff]  ;;  %v186_v7 = vld [vmem:[%s2559_s26 + $0x58] sm:$0xff]  ;;  %v188_v8 = vld [vmem:[%s2559_s26 + $0x80] sm:$0xff] }
  0x12   : > { %177 = vst [vmem:[%s153_s27 + $0x10] sm:$0xff] %v176_v2  ;;  %v190_v9 = vld [vmem:[%s2559_s26 + $0x88] sm:$0xff]  ;;  %v192_v10 = vld [vmem:[%s2559_s26 + $0x90] sm:$0xff]  ;;  %v194_v11 = vld [vmem:[%s2559_s26 + $0x98] sm:$0xff] }
  0x13   : > { %179 = vst [vmem:[%s153_s27 + $0x18] sm:$0xff] %v178_v3  ;;  %v196_v12 = vld [vmem:[%s2559_s26 + $0xc0] sm:$0xff]  ;;  %v198_v13 = vld [vmem:[%s2559_s26 + $0xc8] sm:$0xff]  ;;  %v200_v14 = vld [vmem:[%s2559_s26 + $0xd0] sm:$0xff] }
  0x14   : > { %181 = vst [vmem:[%s153_s27 + $0x20] sm:$0xff] %v180_v4  ;;  %v202_v15 = vld [vmem:[%s2559_s26 + $0xd8] sm:$0xff] }
  0x15   : > { %183 = vst [vmem:[%s153_s27 + $0x28] sm:$0xff] %v182_v5 }
  0x16   : > { %185 = vst [vmem:[%s153_s27 + $0x30] sm:$0xff] %v184_v6 }
  0x17   : > { %187 = vst [vmem:[%s153_s27 + $0x38] sm:$0xff] %v186_v7 }
  0x18   : > { %189 = vst [vmem:[%s153_s27 + $0x40] sm:$0xff] %v188_v8 }
  0x19   : > { %191 = vst [vmem:[%s153_s27 + $0x48] sm:$0xff] %v190_v9 }
  0x1a   : > { %193 = vst [vmem:[%s153_s27 + $0x50] sm:$0xff] %v192_v10 }
  0x1b   : > { %195 = vst [vmem:[%s153_s27 + $0x58] sm:$0xff] %v194_v11 }
  0x1c   : > { %197 = vst [vmem:[%s153_s27 + $0x60] sm:$0xff] %v196_v12 }
  0x1d   : > { %199 = vst [vmem:[%s153_s27 + $0x68] sm:$0xff] %v198_v13 }
  0x1e   : > { %201 = vst [vmem:[%s153_s27 + $0x70] sm:$0xff] %v200_v14 }
  0x1f   : > { %203 = vst [vmem:[%s153_s27 + $0x78] sm:$0xff] %v202_v15 }
  0x20 PF: > { %p1680_p6 = scmp.ge.s32.totalorder %s2493_s16, 1  ;;  %p218_p7 = scmp.lt.s32.totalorder %s2493_s16, 3 }
  0x22   : > { %p219_p8 = pnand %p1680_p6, %p218_p7 }
  0x23   : > { %s225_s28 = sand.u32 (!%p219_p8), 1, %s2477_s12   ;;  %s1682_s29 = sshll.u32 (!%p219_p8), %s2485_s14, 7 }
  0x24   : > { %222 = sbr.rel (%p219_p8) target bundleno = 378 (0x17a), region = 47  ;;  %s1681_s30 = sshll.u32 (!%p219_p8), %s225_s28, 7 }
  0x25   : > { %p263_p9 = scmp.lt.s32.totalorder (!%p219_p8), %s1682_s29, 255  ;;  %s2586_s8 = scalar_lea.vmem (!%p219_p8), [#allocation3], %s1681_s30 }
  0x26   : > { %p1685_p10 = scmp.ne.s32.totalorder (!%p219_p8), %s2485_s14, 0 }
  0x29   : > { %s2983_s29 = smov (!%p263_p9, %s1682_s29), 255  ;;  %284 = sbr.rel (%p1685_p10) target bundleno = 55 (0x37), region = 55 }
  0x2a   : > { %s2269_s4 = sshll.u32 %s2983_s29, 3 }
  0x2b   : > { %s2584_s7 = scalar_lea.vmem %s2973_s1, %s2269_s4 }
  0x2e   : > { %v2495_v16 = vmov 0.0  }
  0x2f   : > { %285 = vst [vmem:[#allocation2 + $0x30] sm:$0xff] %v2495_v16 }
  0x30   : > { %286 = vst [vmem:[#allocation2] sm:$0xff] %v2495_v16 }
  0x31   : > { %287 = vst [vmem:[#allocation2 + $0x18] sm:$0xff] %v2495_v16 }
  0x32   : > { %288 = vst [vmem:[#allocation2 + $0x10] sm:$0xff] %v2495_v16 }
  0x33   : > { %289 = vst [vmem:[#allocation2 + $0x8] sm:$0xff] %v2495_v16 }
  0x34   : > { %290 = vst [vmem:[#allocation2 + $0x20] sm:$0xff] %v2495_v16 }
  0x35   : > { %291 = vst [vmem:[#allocation2 + $0x28] sm:$0xff] %v2495_v16 }
  0x36   : > { %292 = vst [vmem:[#allocation2 + $0x38] sm:$0xff] %v2495_v16 }
  0x37 PF: > { %v1808_v17 = vld [vmem:[%s2584_s7 + $0x70] sm:$0xf]  ;;  %v2301_v18 = vld [vmem:[%s2584_s7 + $0x74] sm:$0xf0]  ;;  %v1800_v28 = vld [vmem:[%s2584_s7 + $0x60] sm:$0xf] }
  0x38   : > { %v1872_v19 = vld [vmem:[%s2584_s7 + $0xf0] sm:$0xf]  ;;  %v1809_v20 = vor.u32 %v2301_v18, %v1808_v17  ;;  %v2317_v21 = vld [vmem:[%s2584_s7 + $0xf4] sm:$0xf0]  ;;  %v2299_v30 = vld [vmem:[%s2584_s7 + $0x64] sm:$0xf0] }
  0x39   : > { %v1936_v22 = vld [vmem:[%s2584_s7 + $0x170] sm:$0xf]  ;;  %v2333_v23 = vld [vmem:[%s2584_s7 + $0x174] sm:$0xf0]  ;;  %v1873_v24 = vor.u32 %v2317_v21, %v1872_v19  ;;  %v1864_v31 = vld [vmem:[%s2584_s7 + $0xe0] sm:$0xf]  ;;  %v1801_v33 = vor.u32 %v2299_v30, %v1800_v28 }
  0x3a   : > { %v1937_v25 = vor.u32 %v2333_v23, %v1936_v22  ;;  %v2000_v26 = vld [vmem:[%s2584_s7 + $0x1f0] sm:$0xf]  ;;  %v2349_v27 = vld [vmem:[%s2584_s7 + $0x1f4] sm:$0xf0]  ;;  %1165 = vmatpush.bf16.msra.mxu0 %v1809_v20  ;;  %v2315_v32 = vld [vmem:[%s2584_s7 + $0xe4] sm:$0xf0] }
  0x3b   : > { %v2001_v29 = vor.u32 %v2349_v27, %v2000_v26  ;;  %1184 = vmatpush.bf16.msra.mxu1 %v1873_v24  ;;  %v1865_v34 = vor.u32 %v2315_v32, %v1864_v31  ;;  %v1928_v35 = vld [vmem:[%s2584_s7 + $0x160] sm:$0xf]  ;;  %v2331_v36 = vld [vmem:[%s2584_s7 + $0x164] sm:$0xf0]  ;;  %v1792_v40 = vld [vmem:[%s2584_s7 + $0x50] sm:$0xf] }
  0x3c   : > { %1203 = vmatpush.bf16.msra.mxu2 %v1937_v25  ;;  %v1992_v37 = vld [vmem:[%s2584_s7 + $0x1e0] sm:$0xf]  ;;  %v1929_v38 = vor.u32 %v2331_v36, %v1928_v35  ;;  %v2347_v39 = vld [vmem:[%s2584_s7 + $0x1e4] sm:$0xf0]  ;;  %v2297_v41 = vld [vmem:[%s2584_s7 + $0x54] sm:$0xf0] }
  0x3d   : > { %1222 = vmatpush.bf16.msra.mxu3 %v2001_v29  ;;  %v1993_v42 = vor.u32 %v2347_v39, %v1992_v37  ;;  %v1856_v43 = vld [vmem:[%s2584_s7 + $0xd0] sm:$0xf]  ;;  %v2313_v44 = vld [vmem:[%s2584_s7 + $0xd4] sm:$0xf0]  ;;  %v1793_v46 = vor.u32 %v2297_v41, %v1792_v40  ;;  %v1784_v52 = vld [vmem:[%s2584_s7 + $0x40] sm:$0xf] }
  0x3e   : > { %v1920_v45 = vld [vmem:[%s2584_s7 + $0x150] sm:$0xf]  ;;  %1166 = vmatpush.bf16.msra.mxu0 %v1801_v33  ;;  %v2329_v47 = vld [vmem:[%s2584_s7 + $0x154] sm:$0xf0]  ;;  %v1857_v50 = vor.u32 %v2313_v44, %v1856_v43  ;;  %v2295_v53 = vld [vmem:[%s2584_s7 + $0x44] sm:$0xf0] }
  0x3f   : > { %v1984_v48 = vld [vmem:[%s2584_s7 + $0x1d0] sm:$0xf]  ;;  %v2345_v49 = vld [vmem:[%s2584_s7 + $0x1d4] sm:$0xf0]  ;;  %1185 = vmatpush.bf16.msra.mxu1 %v1865_v34  ;;  %v1921_v51 = vor.u32 %v2329_v47, %v1920_v45  ;;  %v1848_v54 = vld [vmem:[%s2584_s7 + $0xc0] sm:$0xf]  ;;  %v1785_v61 = vor.u32 %v2295_v53, %v1784_v52 }
  0x40   : > { %1204 = vmatpush.bf16.msra.mxu2 %v1929_v38  ;;  %v1985_v55 = vor.u32 %v2345_v49, %v1984_v48  ;;  %v2311_v56 = vld [vmem:[%s2584_s7 + $0xc4] sm:$0xf0]  ;;  %v1912_v57 = vld [vmem:[%s2584_s7 + $0x140] sm:$0xf]  ;;  %v1776_v0 = vld [vmem:[%s2584_s7 + $0x30] sm:$0xf] }
  0x41   : > { %1223 = vmatpush.bf16.msra.mxu3 %v1993_v42  ;;  %v2327_v58 = vld [vmem:[%s2584_s7 + $0x144] sm:$0xf0]  ;;  %v1976_v59 = vld [vmem:[%s2584_s7 + $0x1c0] sm:$0xf]  ;;  %v1849_v62 = vor.u32 %v2311_v56, %v1848_v54  ;;  %v2293_v1 = vld [vmem:[%s2584_s7 + $0x34] sm:$0xf0] }
  0x42   : > { %v2343_v60 = vld [vmem:[%s2584_s7 + $0x1c4] sm:$0xf0]  ;;  %1167 = vmatpush.bf16.msra.mxu0 %v1793_v46  ;;  %v1913_v63 = vor.u32 %v2327_v58, %v1912_v57  ;;  %v1840_v2 = vld [vmem:[%s2584_s7 + $0xb0] sm:$0xf]  ;;  %v2309_v4 = vld [vmem:[%s2584_s7 + $0xb4] sm:$0xf0]  ;;  %v1777_v9 = vor.u32 %v2293_v1, %v1776_v0 }
  0x43   : > { %1186 = vmatpush.bf16.msra.mxu1 %v1857_v50  ;;  %v1977_v3 = vor.u32 %v2343_v60, %v1976_v59  ;;  %v1904_v5 = vld [vmem:[%s2584_s7 + $0x130] sm:$0xf]  ;;  %v2325_v6 = vld [vmem:[%s2584_s7 + $0x134] sm:$0xf0]  ;;  %v1841_v10 = vor.u32 %v2309_v4, %v1840_v2  ;;  %v1768_v12 = vld [vmem:[%s2584_s7 + $0x20] sm:$0xf] }
  0x44   : > { %1205 = vmatpush.bf16.msra.mxu2 %v1921_v51  ;;  %v1968_v7 = vld [vmem:[%s2584_s7 + $0x1b0] sm:$0xf]  ;;  %v2341_v8 = vld [vmem:[%s2584_s7 + $0x1b4] sm:$0xf0]  ;;  %v1905_v11 = vor.u32 %v2325_v6, %v1904_v5  ;;  %v2291_v13 = vld [vmem:[%s2584_s7 + $0x24] sm:$0xf0] }
  0x45   : > { %1224 = vmatpush.bf16.msra.mxu3 %v1985_v55  ;;  %v1832_v14 = vld [vmem:[%s2584_s7 + $0xa0] sm:$0xf]  ;;  %v1969_v15 = vor.u32 %v2341_v8, %v1968_v7  ;;  %v2307_v16 = vld [vmem:[%s2584_s7 + $0xa4] sm:$0xf0]  ;;  %v1769_v21 = vor.u32 %v2291_v13, %v1768_v12  ;;  %v1760_v24 = vld [vmem:[%s2584_s7 + $0x10] sm:$0xf] }
  0x46   : > { %1168 = vmatpush.bf16.msra.mxu0 %v1785_v61  ;;  %v1896_v17 = vld [vmem:[%s2584_s7 + $0x120] sm:$0xf]  ;;  %v2323_v18 = vld [vmem:[%s2584_s7 + $0x124] sm:$0xf0]  ;;  %v1833_v22 = vor.u32 %v2307_v16, %v1832_v14  ;;  %v2289_v25 = vld [vmem:[%s2584_s7 + $0x14] sm:$0xf0] }
  0x47   : > { %1187 = vmatpush.bf16.msra.mxu1 %v1849_v62  ;;  %v1960_v19 = vld [vmem:[%s2584_s7 + $0x1a0] sm:$0xf]  ;;  %v2339_v20 = vld [vmem:[%s2584_s7 + $0x1a4] sm:$0xf0]  ;;  %v1897_v23 = vor.u32 %v2323_v18, %v1896_v17  ;;  %v1824_v26 = vld [vmem:[%s2584_s7 + $0x90] sm:$0xf]  ;;  %v1761_v34 = vor.u32 %v2289_v25, %v1760_v24 }
  0x48   : > { %1206 = vmatpush.bf16.msra.mxu2 %v1913_v63  ;;  %v1961_v27 = vor.u32 %v2339_v20, %v1960_v19  ;;  %v2305_v28 = vld [vmem:[%s2584_s7 + $0x94] sm:$0xf0]  ;;  %v1888_v29 = vld [vmem:[%s2584_s7 + $0x110] sm:$0xf]  ;;  %v1752_v33 = vld [vmem:[%s2584_s7] sm:$0xf] }
  0x49   : > { %1225 = vmatpush.bf16.msra.mxu3 %v1977_v3  ;;  %v2321_v30 = vld [vmem:[%s2584_s7 + $0x114] sm:$0xf0]  ;;  %v1952_v31 = vld [vmem:[%s2584_s7 + $0x190] sm:$0xf]  ;;  %v2287_v35 = vld [vmem:[%s2584_s7 + $0x4] sm:$0xf0]  ;;  %v1825_v38 = vor.u32 %v2305_v28, %v1824_v26 }
  0x4a   : > { %1169 = vmatpush.bf16.msra.mxu0 %v1777_v9  ;;  %v2337_v32 = vld [vmem:[%s2584_s7 + $0x194] sm:$0xf0]  ;;  %v1816_v36 = vld [vmem:[%s2584_s7 + $0x80] sm:$0xf]  ;;  %v2303_v37 = vld [vmem:[%s2584_s7 + $0x84] sm:$0xf0]  ;;  %v1889_v39 = vor.u32 %v2321_v30, %v1888_v29  ;;  %v1753_v51 = vor.u32 %v2287_v35, %v1752_v33 }
  0x4b   : > { %1188 = vmatpush.bf16.msra.mxu1 %v1841_v10  ;;  %v1880_v40 = vld [vmem:[%s2584_s7 + $0x100] sm:$0xf]  ;;  %v2319_v41 = vld [vmem:[%s2584_s7 + $0x104] sm:$0xf0]  ;;  %v1953_v43 = vor.u32 %v2337_v32, %v1952_v31  ;;  %v2270_v47 = vld [vmem:[%s2586_s8 + $0x4] sm:$0xf]  ;;  %v1817_v55 = vor.u32 %v2303_v37, %v1816_v36 }
  0x4c   : > { %1207 = vmatpush.bf16.msra.mxu2 %v1905_v11  ;;  %v1944_v42 = vld [vmem:[%s2584_s7 + $0x180] sm:$0xf]  ;;  %v2335_v44 = vld [vmem:[%s2584_s7 + $0x184] sm:$0xf0]  ;;  %v1690_v48 = vld [vmem:[%s2586_s8 + $0x20] sm:$0xf0]  ;;  %v1881_v56 = vor.u32 %v2319_v41, %v1880_v40 }
  0x4d   : > { %1226 = vmatpush.bf16.msra.mxu3 %v1969_v15  ;;  %v1688_v45 = vld [vmem:[%s2586_s8] sm:$0xf]  ;;  %v2192_v49 = vld [vmem:[%s2584_s7 + $0x370] sm:$0xf]  ;;  %v2397_v50 = vld [vmem:[%s2584_s7 + $0x374] sm:$0xf0]  ;;  %v1945_v60 = vor.u32 %v2335_v44, %v1944_v42  ;;  %v2673_v6 = vor.u32 %v2270_v47, %v1690_v48 }
  0x4e   : > { %1170 = vmatpush.bf16.msra.mxu0 %v1769_v21  ;;  %v2274_v46 = vld [vmem:[%s2586_s8 + $0x1c] sm:$0xf0]  ;;  %v1696_v52 = vld [vmem:[%s2586_s8 + $0x8] sm:$0xf]  ;;  %v2128_v53 = vld [vmem:[%s2584_s7 + $0x2f0] sm:$0xf]  ;;  %v2193_v61 = vor.u32 %v2397_v50, %v2192_v49 }
  0x4f   : > { %1189 = vmatpush.bf16.msra.mxu1 %v1833_v22  ;;  %v2381_v54 = vld [vmem:[%s2584_s7 + $0x2f4] sm:$0xf0]  ;;  %v2275_v57 = vld [vmem:[%s2586_s8 + $0x24] sm:$0xf0]  ;;  %v2271_v58 = vld [vmem:[%s2586_s8 + $0xc] sm:$0xf]  ;;  %v2668_v1 = vor.u32 %v2274_v46, %v1688_v45 }
  0x50   : > { %1208 = vmatpush.bf16.msra.mxu2 %v1897_v23  ;;  %v1698_v59 = vld [vmem:[%s2586_s8 + $0x28] sm:$0xf0]  ;;  %v2064_v62 = vld [vmem:[%s2584_s7 + $0x270] sm:$0xf]  ;;  %v2365_v63 = vld [vmem:[%s2584_s7 + $0x274] sm:$0xf0]  ;;  %v2129_v2 = vor.u32 %v2381_v54, %v2128_v53  ;;  %v2675_v7 = vor.u32 %v2275_v57, %v1696_v52 }
  0x51   : > { %1227 = vmatpush.bf16.msra.mxu3 %v1961_v27  ;;  %v2256_v0 = vld [vmem:[%s2584_s7 + $0x3f0] sm:$0xf]  ;;  %v2413_v3 = vld [vmem:[%s2584_s7 + $0x3f4] sm:$0xf0]  ;;  %v2184_v4 = vld [vmem:[%s2584_s7 + $0x360] sm:$0xf]  ;;  %v2679_v10 = vor.u32 %v2271_v58, %v1698_v59  ;;  %v2065_v11 = vor.u32 %v2365_v63, %v2064_v62 }
  0x52   : > { %1171 = vmatpush.bf16.msra.mxu0 %v1761_v34  ;;  %v2395_v5 = vld [vmem:[%s2584_s7 + $0x364] sm:$0xf0]  ;;  %v2120_v8 = vld [vmem:[%s2584_s7 + $0x2e0] sm:$0xf]  ;;  %v2257_v12 = vor.u32 %v2413_v3, %v2256_v0  ;;  %v2176_v19 = vld [vmem:[%s2584_s7 + $0x350] sm:$0xf] }
  0x53   : > { %1190 = vmatpush.bf16.msra.mxu1 %v1825_v38  ;;  %v2379_v9 = vld [vmem:[%s2584_s7 + $0x2e4] sm:$0xf0]  ;;  %v2185_v13 = vor.u32 %v2395_v5, %v2184_v4  ;;  %v2056_v14 = vld [vmem:[%s2584_s7 + $0x260] sm:$0xf]  ;;  %v2393_v20 = vld [vmem:[%s2584_s7 + $0x354] sm:$0xf0] }
  0x54   : > { %1209 = vmatpush.bf16.msra.mxu2 %v1889_v39  ;;  %v2363_v15 = vld [vmem:[%s2584_s7 + $0x264] sm:$0xf0]  ;;  %v2248_v16 = vld [vmem:[%s2584_s7 + $0x3e0] sm:$0xf]  ;;  %v2121_v17 = vor.u32 %v2379_v9, %v2120_v8  ;;  %v2112_v21 = vld [vmem:[%s2584_s7 + $0x2d0] sm:$0xf]  ;;  %v2177_v25 = vor.u32 %v2393_v20, %v2176_v19 }
  0x55   : > { %1228 = vmatpush.bf16.msra.mxu3 %v1953_v43  ;;  %v2411_v18 = vld [vmem:[%s2584_s7 + $0x3e4] sm:$0xf0]  ;;  %v2377_v22 = vld [vmem:[%s2584_s7 + $0x2d4] sm:$0xf0]  ;;  %v2057_v23 = vor.u32 %v2363_v15, %v2056_v14  ;;  %v2048_v26 = vld [vmem:[%s2584_s7 + $0x250] sm:$0xf] }
  0x56   : > { %1172 = vmatpush.bf16.msra.mxu0 %v1753_v51  ;;  %v2249_v24 = vor.u32 %v2411_v18, %v2248_v16  ;;  %v2361_v27 = vld [vmem:[%s2584_s7 + $0x254] sm:$0xf0]  ;;  %v2240_v28 = vld [vmem:[%s2584_s7 + $0x3d0] sm:$0xf]  ;;  %v2113_v29 = vor.u32 %v2377_v22, %v2112_v21  ;;  %v2168_v31 = vld [vmem:[%s2584_s7 + $0x340] sm:$0xf] }
  0x57   : > { %1191 = vmatpush.bf16.msra.mxu1 %v1817_v55  ;;  %v2409_v30 = vld [vmem:[%s2584_s7 + $0x3d4] sm:$0xf0]  ;;  %v2391_v32 = vld [vmem:[%s2584_s7 + $0x344] sm:$0xf0]  ;;  %v2104_v33 = vld [vmem:[%s2584_s7 + $0x2c0] sm:$0xf]  ;;  %v2049_v35 = vor.u32 %v2361_v27, %v2048_v26 }
  0x58   : > { %1210 = vmatpush.bf16.msra.mxu2 %v1881_v56  ;;  %v2375_v34 = vld [vmem:[%s2584_s7 + $0x2c4] sm:$0xf0]  ;;  %v2040_v36 = vld [vmem:[%s2584_s7 + $0x240] sm:$0xf]  ;;  %v2241_v39 = vor.u32 %v2409_v30, %v2240_v28  ;;  %v2169_v40 = vor.u32 %v2391_v32, %v2168_v31  ;;  %v2278_v45 = vld [vmem:[%s2586_s8 + $0x44] sm:$0xf] }
  0x59   : > { %1229 = vmatpush.bf16.msra.mxu3 %v1945_v60  ;;  %1173 = vmatmul.bf16.vlgmr.msra.gmra.mxu0 %v2668_v1  ;;  %v2359_v37 = vld [vmem:[%s2584_s7 + $0x244] sm:$0xf0]  ;;  %v2232_v38 = vld [vmem:[%s2584_s7 + $0x3c0] sm:$0xf]  ;;  %v2105_v44 = vor.u32 %v2375_v34, %v2104_v33  ;;  %v1722_v46 = vld [vmem:[%s2586_s8 + $0x60] sm:$0xf0] }
  0x5a   : > { %1192 = vmatmul.bf16.vlgmr.msra.gmra.mxu1 %v2673_v6  ;;  %1241 = vmatpush.bf16.msrb.mxu0 %v2065_v11  ;;  %v2407_v41 = vld [vmem:[%s2584_s7 + $0x3c4] sm:$0xf0]  ;;  %v1720_v42 = vld [vmem:[%s2586_s8 + $0x40] sm:$0xf]  ;;  %v2160_v47 = vld [vmem:[%s2584_s7 + $0x330] sm:$0xf]  ;;  %v2041_v52 = vor.u32 %v2359_v37, %v2040_v36  ;;  %v2725_v3 = vor.u32 %v2278_v45, %v1722_v46 }
  0x5b   : > { %1260 = vmatpush.bf16.msrb.mxu1 %v2129_v2  ;;  %1211 = vmatmul.bf16.vlgmr.msra.gmra.mxu2 %v2675_v7  ;;  %v2282_v43 = vld [vmem:[%s2586_s8 + $0x5c] sm:$0xf0]  ;;  %v2389_v48 = vld [vmem:[%s2584_s7 + $0x334] sm:$0xf0]  ;;  %v1728_v49 = vld [vmem:[%s2586_s8 + $0x48] sm:$0xf]  ;;  %v2233_v56 = vor.u32 %v2407_v41, %v2232_v38 }
  0x5c   : > { %1279 = vmatpush.bf16.msrb.mxu2 %v2193_v61  ;;  %1230 = vmatmul.bf16.vlgmr.msra.gmra.mxu3 %v2679_v10  ;;  %v2096_v50 = vld [vmem:[%s2584_s7 + $0x2b0] sm:$0xf]  ;;  %v2373_v51 = vld [vmem:[%s2584_s7 + $0x2b4] sm:$0xf0]  ;;  %v2283_v53 = vld [vmem:[%s2586_s8 + $0x64] sm:$0xf0]  ;;  %v2161_v57 = vor.u32 %v2389_v48, %v2160_v47  ;;  %v2720_v61 = vor.u32 %v2282_v43, %v1720_v42 }
  0x5d   : > { %1298 = vmatpush.bf16.msrb.mxu3 %v2257_v12  ;;  %v2279_v54 = vld [vmem:[%s2586_s8 + $0x4c] sm:$0xf]  ;;  %v2032_v58 = vld [vmem:[%s2584_s7 + $0x230] sm:$0xf]  ;;  %v2357_v59 = vld [vmem:[%s2584_s7 + $0x234] sm:$0xf0]  ;;  %v2097_v62 = vor.u32 %v2373_v51, %v2096_v50  ;;  %v2727_v4 = vor.u32 %v2283_v53, %v1728_v49 }
  0x5e   : > { %1242 = vmatpush.bf16.msrb.mxu0 %v2057_v23  ;;  %v1730_v55 = vld [vmem:[%s2586_s8 + $0x68] sm:$0xf0]  ;;  %v2224_v60 = vld [vmem:[%s2584_s7 + $0x3b0] sm:$0xf]  ;;  %v2405_v63 = vld [vmem:[%s2584_s7 + $0x3b4] sm:$0xf0]  ;;  %v2033_v11 = vor.u32 %v2357_v59, %v2032_v58 }
  0x5f   : > { %1261 = vmatpush.bf16.msrb.mxu1 %v2121_v17  ;;  %v2152_v0 = vld [vmem:[%s2584_s7 + $0x320] sm:$0xf]  ;;  %v2387_v2 = vld [vmem:[%s2584_s7 + $0x324] sm:$0xf0]  ;;  %v2731_v9 = vor.u32 %v2279_v54, %v1730_v55  ;;  %v2225_v12 = vor.u32 %v2405_v63, %v2224_v60  ;;  %v2144_v19 = vld [vmem:[%s2584_s7 + $0x310] sm:$0xf] }
  0x60   : > { %1280 = vmatpush.bf16.msrb.mxu2 %v2185_v13  ;;  %v2088_v5 = vld [vmem:[%s2584_s7 + $0x2a0] sm:$0xf]  ;;  %v2371_v8 = vld [vmem:[%s2584_s7 + $0x2a4] sm:$0xf0]  ;;  %v2153_v13 = vor.u32 %v2387_v2, %v2152_v0  ;;  %v2385_v20 = vld [vmem:[%s2584_s7 + $0x314] sm:$0xf0] }
  0x61   : > { %1299 = vmatpush.bf16.msrb.mxu3 %v2249_v24  ;;  %v2024_v14 = vld [vmem:[%s2584_s7 + $0x220] sm:$0xf]  ;;  %v2355_v15 = vld [vmem:[%s2584_s7 + $0x224] sm:$0xf0]  ;;  %v2089_v17 = vor.u32 %v2371_v8, %v2088_v5  ;;  %v2080_v21 = vld [vmem:[%s2584_s7 + $0x290] sm:$0xf]  ;;  %v2145_v26 = vor.u32 %v2385_v20, %v2144_v19 }
  0x62   : > { %1243 = vmatpush.bf16.msrb.mxu0 %v2049_v35  ;;  %v2216_v16 = vld [vmem:[%s2584_s7 + $0x3a0] sm:$0xf]  ;;  %v2403_v18 = vld [vmem:[%s2584_s7 + $0x3a4] sm:$0xf0]  ;;  %v2369_v22 = vld [vmem:[%s2584_s7 + $0x294] sm:$0xf0]  ;;  %v2025_v23 = vor.u32 %v2355_v15, %v2024_v14 }
  0x63   : > { %1262 = vmatpush.bf16.msrb.mxu1 %v2113_v29  ;;  %v2016_v24 = vld [vmem:[%s2584_s7 + $0x210] sm:$0xf]  ;;  %v2353_v27 = vld [vmem:[%s2584_s7 + $0x214] sm:$0xf0]  ;;  %v2081_v30 = vor.u32 %v2369_v22, %v2080_v21  ;;  %v2136_v31 = vld [vmem:[%s2584_s7 + $0x300] sm:$0xf] }
  0x64   : > { %1281 = vmatpush.bf16.msrb.mxu2 %v2177_v25  ;;  %v2217_v25 = vor.u32 %v2403_v18, %v2216_v16  ;;  %v2208_v28 = vld [vmem:[%s2584_s7 + $0x390] sm:$0xf]  ;;  %v2401_v29 = vld [vmem:[%s2584_s7 + $0x394] sm:$0xf0]  ;;  %v2383_v32 = vld [vmem:[%s2584_s7 + $0x304] sm:$0xf0]  ;;  %v2017_v37 = vor.u32 %v2353_v27, %v2016_v24 }
  0x65   : > { %1300 = vmatpush.bf16.msrb.mxu3 %v2241_v39  ;;  %v2072_v33 = vld [vmem:[%s2584_s7 + $0x280] sm:$0xf]  ;;  %v2367_v34 = vld [vmem:[%s2584_s7 + $0x284] sm:$0xf0]  ;;  %v2332_v35 = vld [vmem:[%s2584_s7 + $0x174] sm:$0xf]  ;;  %v2209_v41 = vor.u32 %v2401_v29, %v2208_v28  ;;  %v2137_v42 = vor.u32 %v2383_v32, %v2136_v31 }
  0x66   : > { %1244 = vmatpush.bf16.msrb.mxu0 %v2041_v52  ;;  %v1938_v36 = vld [vmem:[%s2584_s7 + $0x178] sm:$0xf0]  ;;  %v2008_v38 = vld [vmem:[%s2584_s7 + $0x200] sm:$0xf]  ;;  %v2316_v39 = vld [vmem:[%s2584_s7 + $0xf4] sm:$0xf]  ;;  %v2073_v46 = vor.u32 %v2367_v34, %v2072_v33 }
  0x67   : > { %1263 = vmatpush.bf16.msrb.mxu1 %v2105_v44  ;;  %v2351_v43 = vld [vmem:[%s2584_s7 + $0x204] sm:$0xf0]  ;;  %v2200_v44 = vld [vmem:[%s2584_s7 + $0x380] sm:$0xf]  ;;  %v1704_v47 = vld [vmem:[%s2586_s8 + $0x10] sm:$0xf]  ;;  %v1941_v51 = vor.u32 %v2332_v35, %v1938_v36 }
  0x68   : > { %1282 = vmatpush.bf16.msrb.mxu2 %v2169_v40  ;;  %v1874_v40 = vld [vmem:[%s2584_s7 + $0xf8] sm:$0xf0]  ;;  %v2399_v45 = vld [vmem:[%s2584_s7 + $0x384] sm:$0xf0]  ;;  %v2276_v48 = vld [vmem:[%s2586_s8 + $0x2c] sm:$0xf0]  ;;  %v2009_v59 = vor.u32 %v2351_v43, %v2008_v38 }
  0x69   : > { %1301 = vmatpush.bf16.msrb.mxu3 %v2233_v56  ;;  %1178 = vmatmul.bf16.gmra.mxu0 %v2720_v61  ;;  %v2272_v49 = vld [vmem:[%s2586_s8 + $0x14] sm:$0xf]  ;;  %v1810_v53 = vld [vmem:[%s2584_s7 + $0x78] sm:$0xf0]  ;;  %v1877_v55 = vor.u32 %v2316_v39, %v1874_v40  ;;  %v1930_v58 = vld [vmem:[%s2584_s7 + $0x168] sm:$0xf0]  ;;  %v2201_v0 = vor.u32 %v2399_v45, %v2200_v44 }
  0x6a   : > { %1197 = vmatmul.bf16.gmra.mxu1 %v2725_v3  ;;  %1245 = vmatpush.bf16.msrb.mxu0 %v2033_v11  ;;  %v1706_v50 = vld [vmem:[%s2586_s8 + $0x30] sm:$0xf0]  ;;  %v2002_v56 = vld [vmem:[%s2584_s7 + $0x1f8] sm:$0xf0]  ;;  %v1712_v60 = vld [vmem:[%s2586_s8 + $0x18] sm:$0xf] }
  0x6b   : > { %1264 = vmatpush.bf16.msrb.mxu1 %v2097_v62  ;;  %1216 = vmatmul.bf16.gmra.mxu2 %v2727_v4  ;;  %v2300_v52 = vld [vmem:[%s2584_s7 + $0x74] sm:$0xf]  ;;  %v2277_v62 = vld [vmem:[%s2586_s8 + $0x34] sm:$0xf0]  ;;  %v2273_v63 = vld [vmem:[%s2586_s8 + $0x1c] sm:$0xf]  ;;  %v2782_v18 = vor.u32 %v2272_v49, %v1706_v50 }
  0x6c   : > { %1283 = vmatpush.bf16.msrb.mxu2 %v2161_v57  ;;  %1235 = vmatmul.bf16.gmra.mxu3 %v2731_v9  ;;  %v2348_v54 = vld [vmem:[%s2584_s7 + $0x1f4] sm:$0xf]  ;;  %v2330_v57 = vld [vmem:[%s2584_s7 + $0x164] sm:$0xf]  ;;  %v1714_v2 = vld [vmem:[%s2586_s8 + $0x38] sm:$0xf0]  ;;  %v1813_v5 = vor.u32 %v2300_v52, %v1810_v53  ;;  %v2787_v22 = vor.u32 %v2277_v62, %v1712_v60 }
  0x6d   : > { %1302 = vmatpush.bf16.msrb.mxu3 %v2225_v12  ;;  %v2298_v8 = vld [vmem:[%s2584_s7 + $0x64] sm:$0xf]  ;;  %v1802_v11 = vld [vmem:[%s2584_s7 + $0x68] sm:$0xf0]  ;;  %v2005_v12 = vor.u32 %v2348_v54, %v2002_v56  ;;  %v2328_v20 = vld [vmem:[%s2584_s7 + $0x154] sm:$0xf] }
  0x6e   : > { %1246 = vmatpush.bf16.msrb.mxu0 %v2025_v23  ;;  %v2314_v14 = vld [vmem:[%s2584_s7 + $0xe4] sm:$0xf]  ;;  %v1866_v15 = vld [vmem:[%s2584_s7 + $0xe8] sm:$0xf0]  ;;  %v1922_v21 = vld [vmem:[%s2584_s7 + $0x158] sm:$0xf0]  ;;  %v2789_v23 = vor.u32 %v2273_v63, %v1714_v2  ;;  %v1805_v24 = vor.u32 %v2298_v8, %v1802_v11 }
  0x6f   : > { %1265 = vmatpush.bf16.msrb.mxu1 %v2089_v17  ;;  %v2346_v16 = vld [vmem:[%s2584_s7 + $0x1e4] sm:$0xf]  ;;  %v2780_v17 = vor.u32 %v2276_v48, %v1704_v47  ;;  %v1994_v19 = vld [vmem:[%s2584_s7 + $0x1e8] sm:$0xf0]  ;;  %v1794_v27 = vld [vmem:[%s2584_s7 + $0x58] sm:$0xf0]  ;;  %v1925_v29 = vor.u32 %v2328_v20, %v1922_v21 }
  0x70   : > { %1284 = vmatpush.bf16.msrb.mxu2 %v2153_v13  ;;  %v1933_v13 = vor.u32 %v2330_v57, %v1930_v58  ;;  %v1997_v28 = vor.u32 %v2346_v16, %v1994_v19  ;;  %v1858_v31 = vld [vmem:[%s2584_s7 + $0xd8] sm:$0xf0]  ;;  %v2344_v32 = vld [vmem:[%s2584_s7 + $0x1d4] sm:$0xf]  ;;  %v2326_v34 = vld [vmem:[%s2584_s7 + $0x144] sm:$0xf] }
  0x71   : > { %1303 = vmatpush.bf16.msrb.mxu3 %v2217_v25  ;;  %v1869_v25 = vor.u32 %v2314_v14, %v1866_v15  ;;  %v1986_v33 = vld [vmem:[%s2584_s7 + $0x1d8] sm:$0xf0]  ;;  %v1914_v35 = vld [vmem:[%s2584_s7 + $0x148] sm:$0xf0]  ;;  %v2294_v38 = vld [vmem:[%s2584_s7 + $0x44] sm:$0xf] }
  0x72   : > { %1247 = vmatpush.bf16.msrb.mxu0 %v2017_v37  ;;  %v1786_v39 = vld [vmem:[%s2584_s7 + $0x48] sm:$0xf0]  ;;  %v1989_v40 = vor.u32 %v2344_v32, %v1986_v33  ;;  %v2342_v44 = vld [vmem:[%s2584_s7 + $0x1c4] sm:$0xf]  ;;  %v1906_v47 = vld [vmem:[%s2584_s7 + $0x138] sm:$0xf0] }
  0x73   : > { %1266 = vmatpush.bf16.msrb.mxu1 %v2081_v30  ;;  %v2312_v30 = vld [vmem:[%s2584_s7 + $0xd4] sm:$0xf]  ;;  %v1850_v43 = vld [vmem:[%s2584_s7 + $0xc8] sm:$0xf0]  ;;  %v1789_v48 = vor.u32 %v2294_v38, %v1786_v39  ;;  %v1736_v53 = vld [vmem:[%s2586_s8 + $0x50] sm:$0xf] }
  0x74   : > { %1285 = vmatpush.bf16.msrb.mxu2 %v2145_v26  ;;  %v2296_v26 = vld [vmem:[%s2584_s7 + $0x54] sm:$0xf]  ;;  %v1861_v37 = vor.u32 %v2312_v30, %v1858_v31  ;;  %v1978_v45 = vld [vmem:[%s2584_s7 + $0x1c8] sm:$0xf0]  ;;  %v2284_v54 = vld [vmem:[%s2586_s8 + $0x6c] sm:$0xf0] }
  0x75   : > { %1304 = vmatpush.bf16.msrb.mxu3 %v2209_v41  ;;  %v1797_v36 = vor.u32 %v2296_v26, %v1794_v27  ;;  %v1917_v41 = vor.u32 %v2326_v34, %v1914_v35  ;;  %v2292_v50 = vld [vmem:[%s2584_s7 + $0x34] sm:$0xf]  ;;  %v1981_v52 = vor.u32 %v2342_v44, %v1978_v45  ;;  %v1970_v62 = vld [vmem:[%s2584_s7 + $0x1b8] sm:$0xf0]  ;;  %v2322_v63 = vld [vmem:[%s2584_s7 + $0x124] sm:$0xf] }
  0x76   : > { %1248 = vmatpush.bf16.msrb.mxu0 %v2009_v59  ;;  %v1738_v56 = vld [vmem:[%s2586_s8 + $0x70] sm:$0xf0]  ;;  %v1842_v59 = vld [vmem:[%s2584_s7 + $0xb8] sm:$0xf0]  ;;  %v1744_v2 = vld [vmem:[%s2586_s8 + $0x58] sm:$0xf] }
  0x77   : > { %1267 = vmatpush.bf16.msrb.mxu1 %v2073_v46  ;;  %v2324_v46 = vld [vmem:[%s2584_s7 + $0x134] sm:$0xf]  ;;  %v2281_v8 = vld [vmem:[%s2586_s8 + $0x5c] sm:$0xf]  ;;  %v2290_v14 = vld [vmem:[%s2584_s7 + $0x24] sm:$0xf] }
  0x78   : > { %1286 = vmatpush.bf16.msrb.mxu2 %v2137_v42  ;;  %v2310_v42 = vld [vmem:[%s2584_s7 + $0xc4] sm:$0xf]  ;;  %v1909_v57 = vor.u32 %v2324_v46, %v1906_v47  ;;  %v2308_v58 = vld [vmem:[%s2584_s7 + $0xb4] sm:$0xf]  ;;  %v1746_v11 = vld [vmem:[%s2586_s8 + $0x78] sm:$0xf0] }
  0x79   : > { %1305 = vmatpush.bf16.msrb.mxu3 %v2201_v0  ;;  %1249 = vmatmul.bf16.vlgmr.msrb.gmra.mxu0 %v2780_v17  ;;  %v1853_v49 = vor.u32 %v2310_v42, %v1850_v43  ;;  %v2340_v60 = vld [vmem:[%s2584_s7 + $0x1b4] sm:$0xf]  ;;  %v1898_v0 = vld [vmem:[%s2584_s7 + $0x128] sm:$0xf0]  ;;  %v2306_v20 = vld [vmem:[%s2584_s7 + $0xa4] sm:$0xf]  ;;  %v2841_v31 = vor.u32 %v2281_v8, %v1746_v11 }
  0x7a   : > { %1317 = vmatpush.bf16.msra.mxu0 %v1813_v5  ;;  %1268 = vmatmul.bf16.vlgmr.msrb.gmra.mxu1 %v2782_v18  ;;  %v2285_v5 = vld [vmem:[%s2586_s8 + $0x74] sm:$0xf0]  ;;  %v1770_v15 = vld [vmem:[%s2584_s7 + $0x28] sm:$0xf0]  ;;  %v1973_v16 = vor.u32 %v2340_v60, %v1970_v62  ;;  %v1901_v19 = vor.u32 %v2322_v63, %v1898_v0  ;;  %v2288_v34 = vld [vmem:[%s2584_s7 + $0x14] sm:$0xf] }
  0x7b   : > { %1336 = vmatpush.bf16.msra.mxu1 %v1877_v55  ;;  %1287 = vmatmul.bf16.vlgmr.msrb.gmra.mxu2 %v2787_v22  ;;  %v2280_v55 = vld [vmem:[%s2586_s8 + $0x54] sm:$0xf]  ;;  %v1834_v21 = vld [vmem:[%s2584_s7 + $0xa8] sm:$0xf0]  ;;  %v2839_v30 = vor.u32 %v2285_v5, %v1744_v2  ;;  %v1773_v32 = vor.u32 %v2290_v14, %v1770_v15  ;;  %v1762_v35 = vld [vmem:[%s2584_s7 + $0x18] sm:$0xf0] }
  0x7c   : > { %1355 = vmatpush.bf16.msra.mxu2 %v1941_v51  ;;  %1306 = vmatmul.bf16.vlgmr.msrb.gmra.mxu3 %v2789_v23  ;;  %v1778_v51 = vld [vmem:[%s2584_s7 + $0x38] sm:$0xf0]  ;;  %v2834_v26 = vor.u32 %v2280_v55, %v1738_v56  ;;  %v1962_v27 = vld [vmem:[%s2584_s7 + $0x1a8] sm:$0xf0]  ;;  %v1837_v33 = vor.u32 %v2306_v20, %v1834_v21  ;;  %v2304_v38 = vld [vmem:[%s2584_s7 + $0x94] sm:$0xf]  ;;  %v1765_v46 = vor.u32 %v2288_v34, %v1762_v35 }
  0x7d   : > { %1374 = vmatpush.bf16.msra.mxu3 %v2005_v12  ;;  %v1781_v12 = vor.u32 %v2292_v50, %v1778_v51  ;;  %v1826_v39 = vld [vmem:[%s2584_s7 + $0x98] sm:$0xf0]  ;;  %v2318_v42 = vld [vmem:[%s2584_s7 + $0x104] sm:$0xf]  ;;  %v1882_v43 = vld [vmem:[%s2584_s7 + $0x108] sm:$0xf0] }
  0x7e   : > { %1318 = vmatpush.bf16.msra.mxu0 %v1805_v24  ;;  %v2338_v24 = vld [vmem:[%s2584_s7 + $0x1a4] sm:$0xf]  ;;  %v2396_v44 = vld [vmem:[%s2584_s7 + $0x374] sm:$0xf]  ;;  %v2194_v45 = vld [vmem:[%s2584_s7 + $0x378] sm:$0xf0]  ;;  %v1829_v47 = vor.u32 %v2304_v38, %v1826_v39 }
  0x7f   : > { %1337 = vmatpush.bf16.msra.mxu1 %v1869_v25  ;;  %v2832_v25 = vor.u32 %v2284_v54, %v1736_v53  ;;  %v2302_v50 = vld [vmem:[%s2584_s7 + $0x84] sm:$0xf]  ;;  %v1818_v53 = vld [vmem:[%s2584_s7 + $0x88] sm:$0xf0]  ;;  %v2197_v56 = vor.u32 %v2396_v44, %v2194_v45  ;;  %v2130_v60 = vld [vmem:[%s2584_s7 + $0x2f8] sm:$0xf0] }
  0x80   : > { %1356 = vmatpush.bf16.msra.mxu2 %v1933_v13  ;;  %v1845_v13 = vor.u32 %v2308_v58, %v1842_v59  ;;  %v2334_v54 = vld [vmem:[%s2584_s7 + $0x184] sm:$0xf]  ;;  %v1946_v55 = vld [vmem:[%s2584_s7 + $0x188] sm:$0xf0]  ;;  %v2066_v58 = vld [vmem:[%s2584_s7 + $0x278] sm:$0xf0]  ;;  %v1821_v2 = vor.u32 %v2302_v50, %v1818_v53 }
  0x81   : > { %1375 = vmatpush.bf16.msra.mxu3 %v1997_v28  ;;  %v2320_v28 = vld [vmem:[%s2584_s7 + $0x114] sm:$0xf]  ;;  %v2258_v63 = vld [vmem:[%s2584_s7 + $0x3f8] sm:$0xf0]  ;;  %v2394_v5 = vld [vmem:[%s2584_s7 + $0x364] sm:$0xf]  ;;  %v1949_v11 = vor.u32 %v2334_v54, %v1946_v55 }
  0x82   : > { %1319 = vmatpush.bf16.msra.mxu0 %v1797_v36  ;;  %v1965_v36 = vor.u32 %v2338_v24, %v1962_v27  ;;  %v2380_v59 = vld [vmem:[%s2584_s7 + $0x2f4] sm:$0xf]  ;;  %v2186_v8 = vld [vmem:[%s2584_s7 + $0x368] sm:$0xf0]  ;;  %v2362_v15 = vld [vmem:[%s2584_s7 + $0x264] sm:$0xf] }
  0x83   : > { %1338 = vmatpush.bf16.msra.mxu1 %v1861_v37  ;;  %v2412_v62 = vld [vmem:[%s2584_s7 + $0x3f4] sm:$0xf]  ;;  %v2378_v20 = vld [vmem:[%s2584_s7 + $0x2e4] sm:$0xf]  ;;  %v2122_v21 = vld [vmem:[%s2584_s7 + $0x2e8] sm:$0xf0] }
  0x84   : > { %1357 = vmatpush.bf16.msra.mxu2 %v1925_v29  ;;  %v1890_v29 = vld [vmem:[%s2584_s7 + $0x118] sm:$0xf0]  ;;  %v2261_v14 = vor.u32 %v2412_v62, %v2258_v63  ;;  %v2410_v27 = vld [vmem:[%s2584_s7 + $0x3e4] sm:$0xf]  ;;  %v2125_v35 = vor.u32 %v2378_v20, %v2122_v21  ;;  %v2170_v44 = vld [vmem:[%s2584_s7 + $0x348] sm:$0xf0] }
  0x85   : > { %1376 = vmatpush.bf16.msra.mxu3 %v1989_v40  ;;  %v1893_v37 = vor.u32 %v2320_v28, %v1890_v29  ;;  %v2336_v40 = vld [vmem:[%s2584_s7 + $0x194] sm:$0xf]  ;;  %v2250_v28 = vld [vmem:[%s2584_s7 + $0x3e8] sm:$0xf0]  ;;  %v2050_v34 = vld [vmem:[%s2584_s7 + $0x258] sm:$0xf0] }
  0x86   : > { %1320 = vmatpush.bf16.msra.mxu0 %v1789_v48  ;;  %v2286_v48 = vld [vmem:[%s2584_s7 + $0x4] sm:$0xf]  ;;  %v2392_v29 = vld [vmem:[%s2584_s7 + $0x354] sm:$0xf]  ;;  %v2114_v38 = vld [vmem:[%s2584_s7 + $0x2d8] sm:$0xf0] }
  0x87   : > { %1339 = vmatpush.bf16.msra.mxu1 %v1853_v49  ;;  %v1754_v49 = vld [vmem:[%s2584_s7 + $0x8] sm:$0xf0]  ;;  %v2358_v45 = vld [vmem:[%s2584_s7 + $0x244] sm:$0xf]  ;;  %v2356_v53 = vld [vmem:[%s2584_s7 + $0x234] sm:$0xf] }
  0x88   : > { %1358 = vmatpush.bf16.msra.mxu2 %v1917_v41  ;;  %v1954_v41 = vld [vmem:[%s2584_s7 + $0x198] sm:$0xf0]  ;;  %v1757_v0 = vor.u32 %v2286_v48, %v1754_v49  ;;  %v2404_v62 = vld [vmem:[%s2584_s7 + $0x3b4] sm:$0xf]  ;;  %v2218_v20 = vld [vmem:[%s2584_s7 + $0x3a8] sm:$0xf0] }
  0x89   : > { %1377 = vmatpush.bf16.msra.mxu3 %v1981_v52  ;;  %1254 = vmatmul.bf16.gmra.mxu0 %v2832_v25  ;;  %v1957_v51 = vor.u32 %v2336_v40, %v1954_v41  ;;  %v1885_v52 = vor.u32 %v2318_v42, %v1882_v43  ;;  %v2408_v41 = vld [vmem:[%s2584_s7 + $0x3d4] sm:$0xf]  ;;  %v2242_v42 = vld [vmem:[%s2584_s7 + $0x3d8] sm:$0xf0]  ;;  %v2390_v43 = vld [vmem:[%s2584_s7 + $0x344] sm:$0xf] }
  0x8a   : > { %1321 = vmatpush.bf16.msra.mxu0 %v1781_v12  ;;  %1273 = vmatmul.bf16.gmra.mxu1 %v2834_v26  ;;  %v2245_v48 = vor.u32 %v2408_v41, %v2242_v42  ;;  %v2173_v49 = vor.u32 %v2390_v43, %v2170_v44  ;;  %v2034_v54 = vld [vmem:[%s2584_s7 + $0x238] sm:$0xf0]  ;;  %v2384_v21 = vld [vmem:[%s2584_s7 + $0x314] sm:$0xf]  ;;  %v2350_v41 = vld [vmem:[%s2584_s7 + $0x204] sm:$0xf] }
  0x8b   : > { %1340 = vmatpush.bf16.msra.mxu1 %v1845_v13  ;;  %1292 = vmatmul.bf16.gmra.mxu2 %v2839_v30  ;;  %v2133_v13 = vor.u32 %v2380_v59, %v2130_v60  ;;  %v2037_v60 = vor.u32 %v2356_v53, %v2034_v54  ;;  %v2226_v63 = vld [vmem:[%s2584_s7 + $0x3b8] sm:$0xf0]  ;;  %v2010_v42 = vld [vmem:[%s2584_s7 + $0x208] sm:$0xf0]  ;;  %p2262_p11 = scmp.ne.s32.totalorder %s2485_s14, 1 }
  0x8c   : > { %1359 = vmatpush.bf16.msra.mxu2 %v1909_v57  ;;  %1311 = vmatmul.bf16.gmra.mxu3 %v2841_v31  ;;  %v2364_v57 = vld [vmem:[%s2584_s7 + $0x274] sm:$0xf] }
  0x8d   : > { %1378 = vmatpush.bf16.msra.mxu3 %v1973_v16  ;;  %v2069_v12 = vor.u32 %v2364_v57, %v2066_v58  ;;  %v2058_v16 = vld [vmem:[%s2584_s7 + $0x268] sm:$0xf0]  ;;  %v2372_v57 = vld [vmem:[%s2584_s7 + $0x2b4] sm:$0xf]  ;;  %v2098_v58 = vld [vmem:[%s2584_s7 + $0x2b8] sm:$0xf0] }
  0x8e   : > { %1322 = vmatpush.bf16.msra.mxu0 %v1773_v32  ;;  %v2061_v24 = vor.u32 %v2362_v15, %v2058_v16  ;;  %v2178_v32 = vld [vmem:[%s2584_s7 + $0x358] sm:$0xf0] }
  0x8f   : > { %1341 = vmatpush.bf16.msra.mxu1 %v1837_v33  ;;  %v2360_v33 = vld [vmem:[%s2584_s7 + $0x254] sm:$0xf]  ;;  %v2181_v39 = vor.u32 %v2392_v29, %v2178_v32 }
  0x90   : > { %1360 = vmatpush.bf16.msra.mxu2 %v1901_v19  ;;  %v2189_v19 = vor.u32 %v2394_v5, %v2186_v8  ;;  %v2053_v40 = vor.u32 %v2360_v33, %v2050_v34  ;;  %v2354_v5 = vld [vmem:[%s2584_s7 + $0x224] sm:$0xf]  ;;  %v2026_v8 = vld [vmem:[%s2584_s7 + $0x228] sm:$0xf0]  ;;  %v2368_v33 = vld [vmem:[%s2584_s7 + $0x294] sm:$0xf] }
  0x91   : > { %1379 = vmatpush.bf16.msra.mxu3 %v1965_v36  ;;  %v2253_v36 = vor.u32 %v2410_v27, %v2250_v28  ;;  %v2029_v16 = vor.u32 %v2354_v5, %v2026_v8  ;;  %v2352_v27 = vld [vmem:[%s2584_s7 + $0x214] sm:$0xf]  ;;  %v2018_v28 = vld [vmem:[%s2584_s7 + $0x218] sm:$0xf0] }
  0x92   : > { %1323 = vmatpush.bf16.msra.mxu0 %v1765_v46  ;;  %v2042_v46 = vld [vmem:[%s2584_s7 + $0x248] sm:$0xf0]  ;;  %v2082_v34 = vld [vmem:[%s2584_s7 + $0x298] sm:$0xf0] }
  0x93   : > { %1342 = vmatpush.bf16.msra.mxu1 %v1829_v47  ;;  %v2045_v50 = vor.u32 %v2358_v45, %v2042_v46  ;;  %v2085_v43 = vor.u32 %v2368_v33, %v2082_v34  ;;  %v2366_v45 = vld [vmem:[%s2584_s7 + $0x284] sm:$0xf]  ;;  %v2013_v46 = vor.u32 %v2350_v41, %v2010_v42  ;;  %v295_v33 = vld [vmem:[#allocation2 + $0x18] sm:$0xff] }
  0x94   : > { %1361 = vmatpush.bf16.msra.mxu2 %v1893_v37  ;;  %v2376_v37 = vld [vmem:[%s2584_s7 + $0x2d4] sm:$0xf] }
  0x95   : > { %1380 = vmatpush.bf16.msra.mxu3 %v1957_v51  ;;  %v2117_v47 = vor.u32 %v2376_v37, %v2114_v38  ;;  %v2406_v51 = vld [vmem:[%s2584_s7 + $0x3c4] sm:$0xf]  ;;  %v2400_v37 = vld [vmem:[%s2584_s7 + $0x394] sm:$0xf]  ;;  %v2210_v38 = vld [vmem:[%s2584_s7 + $0x398] sm:$0xf0] }
  0x96   : > { %1324 = vmatpush.bf16.msra.mxu0 %v1757_v0  ;;  %v2386_v0 = vld [vmem:[%s2584_s7 + $0x324] sm:$0xf]  ;;  %v2213_v44 = vor.u32 %v2400_v37, %v2210_v38 }
  0x97   : > { %1343 = vmatpush.bf16.msra.mxu1 %v1821_v2  ;;  %v2154_v2 = vld [vmem:[%s2584_s7 + $0x328] sm:$0xf0] }
  0x98   : > { %1362 = vmatpush.bf16.msra.mxu2 %v1885_v52  ;;  %v2234_v52 = vld [vmem:[%s2584_s7 + $0x3c8] sm:$0xf0]  ;;  %v2157_v15 = vor.u32 %v2386_v0, %v2154_v2 }
  0x99   : > { %1381 = vmatpush.bf16.msra.mxu3 %v1949_v11  ;;  %1325 = vmatmul.bf16.vlgmr.msra.gmra.mxu0 %v2668_v1  ;;  %v2374_v1 = vld [vmem:[%s2584_s7 + $0x2c4] sm:$0xf]  ;;  %v2101_v11 = vor.u32 %v2372_v57, %v2098_v58 }
  0x9a   : > { %1393 = vmatpush.bf16.msrb.mxu0 %v2069_v12  ;;  %1344 = vmatmul.bf16.vlgmr.msra.gmra.mxu1 %v2673_v6  ;;  %v2106_v6 = vld [vmem:[%s2584_s7 + $0x2c8] sm:$0xf0]  ;;  %v2229_v12 = vor.u32 %v2404_v62, %v2226_v63 }
  0x9b   : > { %1412 = vmatpush.bf16.msrb.mxu1 %v2133_v13  ;;  %1363 = vmatmul.bf16.vlgmr.msra.gmra.mxu2 %v2675_v7  ;;  %v2388_v7 = vld [vmem:[%s2584_s7 + $0x334] sm:$0xf]  ;;  %v2109_v55 = vor.u32 %v2374_v1, %v2106_v6  ;;  %v2370_v13 = vld [vmem:[%s2584_s7 + $0x2a4] sm:$0xf] }
  0x9c   : > { %1431 = vmatpush.bf16.msrb.mxu2 %v2197_v56  ;;  %1382 = vmatmul.bf16.vlgmr.msra.gmra.mxu3 %v2679_v10  ;;  %v2162_v10 = vld [vmem:[%s2584_s7 + $0x338] sm:$0xf0]  ;;  %v2237_v56 = vor.u32 %v2406_v51, %v2234_v52 }
  0x9d   : > { %1450 = vmatpush.bf16.msrb.mxu3 %v2261_v14  ;;  %v2165_v59 = vor.u32 %v2388_v7, %v2162_v10  ;;  %v2090_v14 = vld [vmem:[%s2584_s7 + $0x2a8] sm:$0xf0] }
  0x9e   : > { %1394 = vmatpush.bf16.msrb.mxu0 %v2061_v24  ;;  %v2146_v24 = vld [vmem:[%s2584_s7 + $0x318] sm:$0xf0]  ;;  %v2093_v29 = vor.u32 %v2370_v13, %v2090_v14 }
  0x9f   : > { %1413 = vmatpush.bf16.msrb.mxu1 %v2125_v35  ;;  %v2149_v35 = vor.u32 %v2384_v21, %v2146_v24 }
  0xa0   : > { %1432 = vmatpush.bf16.msrb.mxu2 %v2189_v19  ;;  %v2402_v19 = vld [vmem:[%s2584_s7 + $0x3a4] sm:$0xf] }
  0xa1   : > { %1451 = vmatpush.bf16.msrb.mxu3 %v2253_v36  ;;  %v2221_v32 = vor.u32 %v2402_v19, %v2218_v20  ;;  %v2021_v36 = vor.u32 %v2352_v27, %v2018_v28 }
  0xa2   : > { %1395 = vmatpush.bf16.msrb.mxu0 %v2053_v40  ;;  %v2138_v40 = vld [vmem:[%s2584_s7 + $0x308] sm:$0xf0] }
  0xa3   : > { %1414 = vmatpush.bf16.msrb.mxu1 %v2117_v47  ;;  %v2074_v47 = vld [vmem:[%s2584_s7 + $0x288] sm:$0xf0] }
  0xa4   : > { %1433 = vmatpush.bf16.msrb.mxu2 %v2181_v39  ;;  %v2382_v39 = vld [vmem:[%s2584_s7 + $0x304] sm:$0xf]  ;;  %v2077_v1 = vor.u32 %v2366_v45, %v2074_v47 }
  0xa5   : > { %1452 = vmatpush.bf16.msrb.mxu3 %v2245_v48  ;;  %v2202_v48 = vld [vmem:[%s2584_s7 + $0x388] sm:$0xf0] }
  0xa6   : > { %1396 = vmatpush.bf16.msrb.mxu0 %v2045_v50 }
  0xa7   : > { %1415 = vmatpush.bf16.msrb.mxu1 %v2109_v55 }
  0xa8   : > { %1434 = vmatpush.bf16.msrb.mxu2 %v2173_v49 }
  0xa9   : > { %1453 = vmatpush.bf16.msrb.mxu3 %v2237_v56  ;;  %1330 = vmatmul.bf16.gmra.mxu0 %v2720_v61  ;;  %v2141_v61 = vor.u32 %v2382_v39, %v2138_v40 }
  0xaa   : > { %1397 = vmatpush.bf16.msrb.mxu0 %v2037_v60  ;;  %1349 = vmatmul.bf16.gmra.mxu1 %v2725_v3  ;;  %v2398_v3 = vld [vmem:[%s2584_s7 + $0x384] sm:$0xf] }
  0xab   : > { %1416 = vmatpush.bf16.msrb.mxu1 %v2101_v11  ;;  %1368 = vmatmul.bf16.gmra.mxu2 %v2727_v4  ;;  %v2205_v6 = vor.u32 %v2398_v3, %v2202_v48 }
  0xac   : > { %1435 = vmatpush.bf16.msrb.mxu2 %v2165_v59  ;;  %1387 = vmatmul.bf16.gmra.mxu3 %v2731_v9 }
  0xad   : > { %1454 = vmatpush.bf16.msrb.mxu3 %v2229_v12  ;;  %v293_v12 = vld [vmem:[#allocation2 + $0x30] sm:$0xff] }
  0xae   : > { %1398 = vmatpush.bf16.msrb.mxu0 %v2029_v16 }
  0xaf   : > { %1417 = vmatpush.bf16.msrb.mxu1 %v2093_v29 }
  0xb0   : > { %1436 = vmatpush.bf16.msrb.mxu2 %v2157_v15 }
  0xb1   : > { %1455 = vmatpush.bf16.msrb.mxu3 %v2221_v32 }
  0xb2   : > { %1399 = vmatpush.bf16.msrb.mxu0 %v2021_v36 }
  0xb3   : > { %1418 = vmatpush.bf16.msrb.mxu1 %v2085_v43 }
  0xb4   : > { %1437 = vmatpush.bf16.msrb.mxu2 %v2149_v35 }
  0xb5   : > { %1456 = vmatpush.bf16.msrb.mxu3 %v2213_v44 }
  0xb6   : > { %1400 = vmatpush.bf16.msrb.mxu0 %v2013_v46 }
  0xb7   : > { %1419 = vmatpush.bf16.msrb.mxu1 %v2077_v1 }
  0xb8   : > { %1438 = vmatpush.bf16.msrb.mxu2 %v2141_v61  ;;  %v297_v61 = vld [vmem:[#allocation2 + $0x8] sm:$0xff] }
  0xb9   : > { %1457 = vmatpush.bf16.msrb.mxu3 %v2205_v6  ;;  %1401 = vmatmul.bf16.vlgmr.msrb.gmra.mxu0 %v2780_v17 }
  0xba   : > { %1420 = vmatmul.bf16.vlgmr.msrb.gmra.mxu1 %v2782_v18 }
  0xbb   : > { %1439 = vmatmul.bf16.vlgmr.msrb.gmra.mxu2 %v2787_v22 }
  0xbc   : > { %1458 = vmatmul.bf16.vlgmr.msrb.gmra.mxu3 %v2789_v23 }
  0xc9   : > { %1406 = vmatmul.bf16.gmra.mxu0 %v2832_v25 }
  0xca   : > { %1425 = vmatmul.bf16.gmra.mxu1 %v2834_v26 }
  0xcb   : > { %1444 = vmatmul.bf16.gmra.mxu2 %v2839_v30 }
  0xcc   : > { %1463 = vmatmul.bf16.gmra.mxu3 %v2841_v31 }
  0xd6   : > { %v1174_v4 = vpop.f32.mrf.mxu0 }
  0xd7   : > { %v1193_v9 = vpop.f32.mrf.mxu1 }
  0xd8   : > { %v1194_v54 = vadd.f32 %v1193_v9, %v1174_v4 }
  0xde   : > { %v1212_v49 = vpop.f32.mrf.mxu2  ;;  %v1176_v51 = vpop.f32.mrf.mxu0 }
  0xdf   : > { %v1231_v50 = vpop.f32.mrf.mxu3  ;;  %v1195_v17 = vpop.f32.mrf.mxu1  ;;  %v1213_v26 = vadd.f32 %v1212_v49, %v1194_v54 }
  0xe0   : > { %v1196_v58 = vadd.f32 %v1195_v17, %v1176_v51 }
  0xe1   : > { %v1232_v56 = vadd.f32 %v1231_v50, %v1213_v26  ;;  %v299_v50 = vld [vmem:[#allocation2 + $0x28] sm:$0xff] }
  0xe6   : > { %v1214_v52 = vpop.f32.mrf.mxu2  ;;  %v1179_v7 = vpop.f32.mrf.mxu0 }
  0xe7   : > { %v1233_v18 = vpop.f32.mrf.mxu3  ;;  %v1198_v22 = vpop.f32.mrf.mxu1  ;;  %v1215_v60 = vadd.f32 %v1214_v52, %v1196_v58 }
  0xe8   : > { %v1199_v13 = vadd.f32 %v1198_v22, %v1179_v7 }
  0xe9   : > { %v1234_v2 = vadd.f32 %v1233_v18, %v1215_v60 }
  0xee   : > { %v1217_v10 = vpop.f32.mrf.mxu2  ;;  %v1181_v53 = vpop.f32.mrf.mxu0 }
  0xef   : > { %v1236_v23 = vpop.f32.mrf.mxu3  ;;  %v1200_v25 = vpop.f32.mrf.mxu1  ;;  %v1218_v16 = vadd.f32 %v1217_v10, %v1199_v13 }
  0xf0   : > { %v1201_v34 = vadd.f32 %v1200_v25, %v1181_v53 }
  0xf1   : > { %v1237_v27 = vadd.f32 %v1236_v23, %v1218_v16 }
  0xf6   : > { %v1219_v55 = vpop.f32.mrf.mxu2  ;;  %v1250_v31 = vpop.f32.mrf.mxu0 }
  0xf7   : > { %v1238_v30 = vpop.f32.mrf.mxu3  ;;  %v1269_v57 = vpop.f32.mrf.mxu1  ;;  %v1251_v59 = vadd.f32 %v1250_v31, %v1232_v56  ;;  %v1220_v37 = vadd.f32 %v1219_v55, %v1201_v34 }
  0xf9   : > { %v1270_v62 = vadd.f32 %v1269_v57, %v1251_v59  ;;  %v1239_v42 = vadd.f32 %v1238_v30, %v1220_v37 }
  0xfe   : > { %v1288_v63 = vpop.f32.mrf.mxu2  ;;  %v1252_v8 = vpop.f32.mrf.mxu0 }
  0xff   : > { %v1307_v0 = vpop.f32.mrf.mxu3  ;;  %v1289_v5 = vadd.f32 %v1288_v63, %v1270_v62  ;;  %v1271_v11 = vpop.f32.mrf.mxu1  ;;  %v1253_v15 = vadd.f32 %v1252_v8, %v1234_v2 }
 0x101   : > { %v1308_v14 = vadd.f32 %v1307_v0, %v1289_v5  ;;  %v1272_v20 = vadd.f32 %v1271_v11, %v1253_v15  ;;  %v294_v15 = vld [vmem:[#allocation2] sm:$0xff] }
 0x103   : > { %v1469_v19 = vadd.f32 %v1308_v14, %v293_v12 }
 0x105   : > { %1477 = vst [vmem:[#allocation2 + $0x30] sm:$0xff] %v1469_v19 }
 0x106   : > { %v1290_v21 = vpop.f32.mrf.mxu2  ;;  %v1255_v29 = vpop.f32.mrf.mxu0 }
 0x107   : > { %v1309_v24 = vpop.f32.mrf.mxu3  ;;  %v1291_v28 = vadd.f32 %v1290_v21, %v1272_v20  ;;  %v1274_v32 = vpop.f32.mrf.mxu1  ;;  %v1256_v36 = vadd.f32 %v1255_v29, %v1237_v27 }
 0x109   : > { %v1310_v35 = vadd.f32 %v1309_v24, %v1291_v28  ;;  %v1275_v39 = vadd.f32 %v1274_v32, %v1256_v36  ;;  %v296_v36 = vld [vmem:[#allocation2 + $0x10] sm:$0xff] }
 0x10b   : > { %v1471_v38 = vadd.f32 %v1310_v35, %v295_v33 }
 0x10d   : > { %1479 = vst [vmem:[#allocation2 + $0x18] sm:$0xff] %v1471_v38 }
 0x10e   : > { %v1293_v40 = vpop.f32.mrf.mxu2  ;;  %v1257_v44 = vpop.f32.mrf.mxu0 }
 0x10f   : > { %v1312_v41 = vpop.f32.mrf.mxu3  ;;  %v1294_v43 = vadd.f32 %v1293_v40, %v1275_v39  ;;  %v1276_v45 = vpop.f32.mrf.mxu1  ;;  %v1258_v47 = vadd.f32 %v1257_v44, %v1239_v42 }
 0x111   : > { %v1313_v46 = vadd.f32 %v1312_v41, %v1294_v43  ;;  %v1277_v48 = vadd.f32 %v1276_v45, %v1258_v47 }
 0x113   : > { %v1473_v3 = vadd.f32 %v1313_v46, %v297_v61 }
 0x115   : > { %1481 = vst [vmem:[#allocation2 + $0x8] sm:$0xff] %v1473_v3  ;;  %v298_v3 = vld [vmem:[#allocation2 + $0x20] sm:$0xff] }
 0x116   : > { %v1295_v1 = vpop.f32.mrf.mxu2  ;;  %v1326_v9 = vpop.f32.mrf.mxu0 }
 0x117   : > { %v1314_v6 = vpop.f32.mrf.mxu3  ;;  %v1296_v4 = vadd.f32 %v1295_v1, %v1277_v48  ;;  %v1345_v49 = vpop.f32.mrf.mxu1 }
 0x118   : > { %v1346_v56 = vadd.f32 %v1345_v49, %v1326_v9 }
 0x119   : > { %v1315_v51 = vadd.f32 %v1314_v6, %v1296_v4 }
 0x11b   : > { %v1475_v17 = vadd.f32 %v1315_v51, %v299_v50  ;;  %v300_v51 = vld [vmem:[#allocation2 + $0x38] sm:$0xff] }
 0x11d   : > { %1483 = vst [vmem:[#allocation2 + $0x28] sm:$0xff] %v1475_v17 }
 0x11e   : > { %v1364_v52 = vpop.f32.mrf.mxu2  ;;  %v1328_v7 = vpop.f32.mrf.mxu0 }
 0x11f   : > { %v1383_v18 = vpop.f32.mrf.mxu3  ;;  %v1347_v22 = vpop.f32.mrf.mxu1  ;;  %v1365_v31 = vadd.f32 %v1364_v52, %v1346_v56 }
 0x120   : > { %v1348_v63 = vadd.f32 %v1347_v22, %v1328_v7 }
 0x121   : > { %v1384_v59 = vadd.f32 %v1383_v18, %v1365_v31 }
 0x126   : > { %v1366_v10 = vpop.f32.mrf.mxu2  ;;  %v1331_v53 = vpop.f32.mrf.mxu0 }
 0x127   : > { %v1385_v23 = vpop.f32.mrf.mxu3  ;;  %v1350_v25 = vpop.f32.mrf.mxu1  ;;  %v1367_v2 = vadd.f32 %v1366_v10, %v1348_v63 }
 0x128   : > { %v1351_v19 = vadd.f32 %v1350_v25, %v1331_v53 }
 0x129   : > { %v1386_v12 = vadd.f32 %v1385_v23, %v1367_v2 }
 0x12e   : > { %v1369_v54 = vpop.f32.mrf.mxu2  ;;  %v1333_v55 = vpop.f32.mrf.mxu0 }
 0x12f   : > { %v1388_v26 = vpop.f32.mrf.mxu3  ;;  %v1352_v30 = vpop.f32.mrf.mxu1  ;;  %v1370_v24 = vadd.f32 %v1369_v54, %v1351_v19 }
 0x130   : > { %v1353_v37 = vadd.f32 %v1352_v30, %v1333_v55 }
 0x131   : > { %v1389_v33 = vadd.f32 %v1388_v26, %v1370_v24 }
 0x136   : > { %v1371_v57 = vpop.f32.mrf.mxu2  ;;  %v1402_v60 = vpop.f32.mrf.mxu0 }
 0x137   : > { %v1390_v58 = vpop.f32.mrf.mxu3  ;;  %v1421_v62 = vpop.f32.mrf.mxu1  ;;  %v1403_v0 = vadd.f32 %v1402_v60, %v1384_v59  ;;  %v1372_v41 = vadd.f32 %v1371_v57, %v1353_v37 }
 0x139   : > { %v1422_v5 = vadd.f32 %v1421_v62, %v1403_v0  ;;  %v1391_v61 = vadd.f32 %v1390_v58, %v1372_v41 }
 0x13e   : > { %v1440_v8 = vpop.f32.mrf.mxu2  ;;  %v1404_v14 = vpop.f32.mrf.mxu0 }
 0x13f   : > { %v1459_v11 = vpop.f32.mrf.mxu3  ;;  %v1441_v13 = vadd.f32 %v1440_v8, %v1422_v5  ;;  %v1423_v16 = vpop.f32.mrf.mxu1  ;;  %v1405_v21 = vadd.f32 %v1404_v14, %v1386_v12 }
 0x141   : > { %v1460_v20 = vadd.f32 %v1459_v11, %v1441_v13  ;;  %v1424_v28 = vadd.f32 %v1423_v16, %v1405_v21 }
 0x143   : > { %v1470_v27 = vadd.f32 %v1460_v20, %v294_v15 }
 0x145   : > { %1478 = vst [vmem:[#allocation2] sm:$0xff] %v1470_v27 }
 0x146   : > { %v1442_v29 = vpop.f32.mrf.mxu2  ;;  %v1407_v35 = vpop.f32.mrf.mxu0 }
 0x147   : > { %v1461_v32 = vpop.f32.mrf.mxu3  ;;  %v1443_v34 = vadd.f32 %v1442_v29, %v1424_v28  ;;  %v1408_v39 = vadd.f32 %v1407_v35, %v1389_v33  ;;  %v1426_v40 = vpop.f32.mrf.mxu1 }
 0x149   : > { %v1462_v38 = vadd.f32 %v1461_v32, %v1443_v34  ;;  %v1427_v43 = vadd.f32 %v1426_v40, %v1408_v39 }
 0x14b   : > { %v1472_v42 = vadd.f32 %v1462_v38, %v296_v36 }
 0x14d   : > { %1480 = vst [vmem:[#allocation2 + $0x10] sm:$0xff] %v1472_v42 }
 0x14e   : > { %v1445_v44 = vpop.f32.mrf.mxu2  ;;  %v1409_v47 = vpop.f32.mrf.mxu0 }
 0x14f   : > { %v1464_v45 = vpop.f32.mrf.mxu3  ;;  %v1446_v46 = vadd.f32 %v1445_v44, %v1427_v43  ;;  %v1410_v1 = vadd.f32 %v1409_v47, %v1391_v61  ;;  %v1428_v4 = vpop.f32.mrf.mxu1 }
 0x151   : > { %v1465_v48 = vadd.f32 %v1464_v45, %v1446_v46  ;;  %v1429_v9 = vadd.f32 %v1428_v4, %v1410_v1 }
 0x153   : > { %v1474_v6 = vadd.f32 %v1465_v48, %v298_v3 }
 0x155   : > { %1482 = vst [vmem:[#allocation2 + $0x20] sm:$0xff] %v1474_v6 }
 0x156   : > { %v1447_v49 = vpop.f32.mrf.mxu2 }
 0x157   : > { %v1448_v50 = vadd.f32 %v1447_v49, %v1429_v9  ;;  %v1466_v17 = vpop.f32.mrf.mxu3 }
 0x159   : > { %v1467_v52 = vadd.f32 %v1466_v17, %v1448_v50  ;;  %1488 = sbr.rel (%p2262_p11) target bundleno = 378 (0x17a), region = 59 }
 0x15b   : > { %v1476_v18 = vadd.f32 %v1467_v52, %v300_v51 }
 0x15d   : > { %1484 = vst [vmem:[#allocation2 + $0x38] sm:$0xff] %v1476_v18 }
 0x15e   : > { %v1489_v7 = vld [vmem:[#allocation2 + $0x30] sm:$0xff]  ;;  %v1490_v22 = vld [vmem:[#allocation2] sm:$0xff]  ;;  %v1491_v10 = vld [vmem:[#allocation2 + $0x18] sm:$0xff]  ;;  %vm1549_vm0 = vcmask 1040384   ;;  %vm1555_vm1 = vcmask 1041408  }
 0x15f   : > { %v1497_v23 = vpack.c.bf16 %v1490_v22, %v1489_v7  ;;  %v1523_v53 = vmul.f32 %v1489_v7, %v1489_v7  ;;  %v1524_v25 = vmul.f32 %v1490_v22, %v1490_v22  ;;  %v1492_v54 = vld [vmem:[#allocation2 + $0x10] sm:$0xff]  ;;  %v1505_v26 = vadd.f32 %v1491_v10, %v1489_v7  ;;  %v1493_v55 = vld [vmem:[#allocation2 + $0x8] sm:$0xff]  ;;  %v1494_v30 = vld [vmem:[#allocation2 + $0x20] sm:$0xff] }
 0x160   : > { %v1498_v56 = vpack.c.bf16 %v1492_v54, %v1491_v10  ;;  %v1514_v31 = vadd.f32 %v1492_v54, %v1490_v22  ;;  %v1525_v57 = vmul.f32 %v1491_v10, %v1491_v10  ;;  %v1526_v58 = vmul.f32 %v1492_v54, %v1492_v54  ;;  %v1495_v59 = vld [vmem:[#allocation2 + $0x28] sm:$0xff] }
 0x161   : > { %1501 = vst [vmem:[%s2974_s2] sm:$0xff] %v1497_v23  ;;  %v1499_v62 = vpack.c.bf16 %v1494_v30, %v1493_v55  ;;  %v1506_v63 = vadd.f32 %v1505_v26, %v1493_v55  ;;  %v1527_v0 = vmul.f32 %v1493_v55, %v1493_v55  ;;  %v1528_v2 = vmul.f32 %v1494_v30, %v1494_v30 }
 0x162   : > { %1502 = vst [vmem:[%s2974_s2 + $0x8] sm:$0xff] %v1498_v56  ;;  %v1531_v5 = vadd.f32 %v1525_v57, %v1523_v53  ;;  %v1540_v8 = vadd.f32 %v1526_v58, %v1524_v25  ;;  %v1515_v11 = vadd.f32 %v1514_v31, %v1494_v30  ;;  %v1529_v14 = vmul.f32 %v1495_v59, %v1495_v59 }
 0x163   : > { %1503 = vst [vmem:[%s2974_s2 + $0x10] sm:$0xff] %v1499_v62  ;;  %v1507_v13 = vadd.f32 %v1506_v63, %v1495_v59 }
 0x164   : > { %v1496_v60 = vld [vmem:[#allocation2 + $0x38] sm:$0xff]  ;;  %v1532_v16 = vadd.f32 %v1531_v5, %v1527_v0  ;;  %v1541_v19 = vadd.f32 %v1540_v8, %v1528_v2 }
 0x165   : > { %v1500_v12 = vpack.c.bf16 %v1496_v60, %v1495_v59  ;;  %v1530_v15 = vmul.f32 %v1496_v60, %v1496_v60  ;;  %v1516_v20 = vadd.f32 %v1515_v11, %v1496_v60  ;;  %v1508_v21 = vrot.slane %v1507_v13, 4 }
 0x166   : > { %v1533_v27 = vadd.f32 %v1532_v16, %v1529_v14 }
 0x167   : > { %1504 = vst [vmem:[%s2974_s2 + $0x18] sm:$0xff] %v1500_v12  ;;  %v1517_v24 = vrot.slane %v1516_v20, 4  ;;  %v1542_v28 = vadd.f32 %v1541_v19, %v1530_v15  ;;  %v1509_v29 = vadd.f32 %v1508_v21, %v1507_v13 }
 0x168   : > { %v1534_v33 = vrot.slane %v1533_v27, 4 }
 0x169   : > { %v1518_v32 = vadd.f32 %v1517_v24, %v1516_v20  ;;  %v1543_v34 = vrot.slane %v1542_v28, 4  ;;  %v1510_v35 = vrot.slane %v1509_v29, 2 }
 0x16a   : > { %v1535_v37 = vadd.f32 %v1534_v33, %v1533_v27 }
 0x16b   : > { %v1519_v36 = vrot.slane %v1518_v32, 2  ;;  %v1544_v38 = vadd.f32 %v1543_v34, %v1542_v28  ;;  %v1511_v39 = vadd.f32 %v1510_v35, %v1509_v29 }
 0x16c   : > { %v1536_v42 = vrot.slane %v1535_v37, 2 }
 0x16d   : > { %v1520_v40 = vadd.f32 %v1519_v36, %v1518_v32  ;;  %v1545_v41 = vrot.slane %v1544_v38, 2  ;;  %v1512_v43 = vrot.slane %v1511_v39, 1 }
 0x16e   : > { %v1537_v61 = vadd.f32 %v1536_v42, %v1535_v37 }
 0x16f   : > { %v1521_v44 = vrot.slane %v1520_v40, 1  ;;  %v1546_v45 = vadd.f32 %v1545_v41, %v1544_v38  ;;  %v1513_v46 = vadd.f32 %v1512_v43, %v1511_v39 }
 0x170   : > { %v1538_v3 = vrot.slane %v1537_v61, 1 }
 0x171   : > { %v1522_v47 = vadd.f32 %v1521_v44, %v1520_v40  ;;  %v1547_v48 = vrot.slane %v1546_v45, 1 }
 0x172   : > { %v1539_v1 = vadd.f32 %v1538_v3, %v1537_v61 }
 0x173   : > { %v1548_v6 = vadd.f32 %v1547_v48, %v1546_v45 }
 0x174   : > { %v1550_v4 = vsel %vm1549_vm0, %v1513_v46, %v1539_v1 }
 0x175   : > { %v1551_v9 = vsel %vm1549_vm0, %v1522_v47, %v1548_v6 }
 0x176   : > { %v1554_v49 = vrot.slane %v1551_v9, 6 }
 0x178   : > { %v1556_v50 = vsel %vm1555_vm1, %v1550_v4, %v1554_v49 }
 0x179   : > { %1558 = vst [vmem:[%s2975_s3] sm:$0xf] %v1556_v50 }
 0x17a PF: > { %s14_s16 = sadd.s32 1, %s2493_s16   ;;  %s2976_s12 = smov %s2481_s13 }
 0x17b   : > { %p11_p12 = scmp.ge.s32.totalorder %s14_s16, 4   ;;  %s2977_s13 = smov %s2551_s20 }
 0x17c   : > { %s2978_s14 = smov %s2489_s15  ;;  %s2979_s15 = smov %s2981_s17 }
 0x17d   :  { %13 = sbr.rel (!%p11_p12) target bundleno = 3 (0x3), region = 109 }

// kernel: discriminator_forward.14
= control target key start
LH: loop header
LB: loop body
LE: loop exit
PB: predicated region body
PF: predicated region fallthrough
CT: control target
= control target key end

     0   :  { %s106_s0 = inlined_call_operand.vmem [shape: bf16[8,512], index: 0, kind: input, shape index: {}]   ;;  %s107_s1 = inlined_call_operand.vmem [shape: f32[1,512], index: 1, kind: input, shape index: {}]   ;;  %s108_s2 = inlined_call_operand.vmem [shape: f32[1,512], index: 2, kind: input, shape index: {}]   ;;  %s109_s3 = inlined_call_operand.vmem [shape: bf16[8,512], index: 3, kind: output, shape index: {}]  }
   0x1   :  { %v14_v0 = vld [vmem:[%s106_s0] sm:$0xff]  ;;  %v15_v7 = vld [vmem:[%s106_s0 + $0x8] sm:$0xff] }
   0x2   :  { %v20_v1 = vld [vmem:[%s107_s1] sm:$0xf]  ;;  %v16_v3 = vunpack.c.l.bf16 %v14_v0  ;;  %v17_v4 = vunpack.c.h.bf16 %v14_v0  ;;  %v18_v10 = vunpack.c.l.bf16 %v15_v7  ;;  %v19_v11 = vunpack.c.h.bf16 %v15_v7 }
   0x3   :  { %v34_v2 = vld [vmem:[%s108_s2] sm:$0xf]  ;;  %v22_v5 = vperm.slane %v20_v1, 0  ;;  %v23_v6 = vperm.slane %v20_v1, 1  ;;  %v24_v14 = vperm.slane %v20_v1, 2  ;;  %v25_v15 = vperm.slane %v20_v1, 3 }
   0x4   :  { %v36_v8 = vperm.slane %v34_v2, 0  ;;  %v37_v9 = vperm.slane %v34_v2, 1  ;;  %v38_v16 = vperm.slane %v34_v2, 2  ;;  %v39_v17 = vperm.slane %v34_v2, 3 }
   0x5   :  { %v30_v12 = vmul.f32 %v22_v5, %v16_v3  ;;  %v31_v13 = vmul.f32 %v23_v6, %v17_v4  ;;  %v32_v20 = vmul.f32 %v24_v14, %v18_v10  ;;  %v33_v21 = vmul.f32 %v25_v15, %v19_v11 }
   0x7   :  { %v44_v18 = vadd.f32 %v36_v8, %v30_v12  ;;  %v45_v19 = vadd.f32 %v37_v9, %v31_v13  ;;  %v46_v24 = vadd.f32 %v38_v16, %v32_v20  ;;  %v47_v25 = vadd.f32 %v39_v17, %v33_v21 }
   0x9   :  { %vm48_vm0 = vcmp.gt.f32.partialorder %v44_v18, 0.0  ;;  %vm49_vm1 = vcmp.gt.f32.partialorder %v45_v19, 0.0  ;;  %v52_v22 = vmul.f32 0.2, %v44_v18  ;;  %v53_v23 = vmul.f32 0.2, %v45_v19 }
   0xa   :  { %vm50_vm2 = vcmp.gt.f32.partialorder %v46_v24, 0.0  ;;  %vm51_vm3 = vcmp.gt.f32.partialorder %v47_v25, 0.0  ;;  %v54_v29 = vmul.f32 0.2, %v46_v24  ;;  %v55_v30 = vmul.f32 0.2, %v47_v25 }
   0xb   :  { %v56_v26 = vsel %vm48_vm0, %v44_v18, %v52_v22  ;;  %v57_v27 = vsel %vm49_vm1, %v45_v19, %v53_v23 }
   0xc   :  { %v60_v28 = vpack.c.bf16 %v57_v27, %v56_v26  ;;  %v58_v31 = vsel %vm50_vm2, %v46_v24, %v54_v29  ;;  %v59_v32 = vsel %vm51_vm3, %v47_v25, %v55_v30 }
   0xd   :  { %v61_v33 = vpack.c.bf16 %v59_v32, %v58_v31 }
   0xe   :  { %62 = vst [vmem:[%s109_s3] sm:$0xff] %v60_v28 }
   0xf   :  { %63 = vst [vmem:[%s109_s3 + $0x8] sm:$0xff] %v61_v33 }

// kernel: discriminator_forward.13
= control target key start
LH: loop header
LB: loop body
LE: loop exit
PB: predicated region body
PF: predicated region fallthrough
CT: control target
= control target key end

     0   :  { %s3800_s12 = smov 0   ;;  %s3802_s13 = smov 0   ;;  %s4428_s0 = inlined_call_operand.vmem [shape: bf16[8,4096], index: 0, kind: input, shape index: {}]   ;;  %s4429_s1 = inlined_call_operand.vmem [shape: bf16[4096,512], index: 1, kind: input, shape index: {}]   ;;  %s4430_s2 = inlined_call_operand.vmem [shape: bf16[8,512], index: 2, kind: output, shape index: {0}]   ;;  %s4431_s3 = inlined_call_operand.vmem [shape: f32[1,2,512], index: 3, kind: output, shape index: {1}]  }
   0x1   :  { %s3804_s14 = smov 0  }
   0x2 LB: > { %s23_s15 = sadd.s32 1, %s3773_s13  ;;  %p2437_p0 = scmp.ge.s32.totalorder %s3777_s14, 1  ;;  %s3777_s14 = sphi %s3804_s14, %s14_s14   ;;  %s3773_s13 = sphi %s3802_s13, %s4433_s13   ;;  %s3769_s12 = sphi %s3800_s12, %s4432_s12  }
   0x3   : > { %p24_p1 = scmp.ge.s32.totalorder %s23_s15, 4  ;;  %p171_p2 = scmp.lt.s32.totalorder %s3777_s14, 5 }
   0x5   : > { %s4435_s15 = smov (%p24_p1, %s23_s15), 0  ;;  %p172_p3 = pnand %p2437_p0, %p171_p2 }
   0x6   : > { %s2438_s16 = sshll.u32 (!%p172_p3), %s3769_s12, 3  ;;  %s2440_s17 = sshll.u32 (!%p172_p3), %s3769_s12, 7 }
   0x7   : > { %175 = sbr.rel (%p172_p3) target bundleno = 452 (0x1c4), region = 28  ;;  %p213_p4 = scmp.lt.s32.totalorder (!%p172_p3), %s2438_s16, 31 }
   0x8   : > { %p221_p5 = scmp.lt.s32.totalorder (!%p172_p3), %s2440_s17, 511  ;;  %p2443_p6 = scmp.ne.s32.totalorder (!%p172_p3), %s3769_s12, 0 }
   0xc   : > { %s4437_s16 = smov (!%p213_p4, %s2438_s16), 31  ;;  %s4439_s17 = smov (!%p221_p5, %s2440_s17), 511 }
   0xd   : > { %s2439_s18 = sshll.u32 %s4437_s16, 2  ;;  %s3473_s22 = sshll.u32 %s4439_s17, 4 }
   0xe   : > { %s3825_s21 = scalar_lea.vmem %s4428_s0, %s2439_s18  ;;  %s3830_s25 = scalar_lea.vmem %s4429_s1, %s3473_s22 }
   0xf   : > { %240 = sbr.rel (%p2443_p6) target bundleno = 25 (0x19), region = 32 }
  0x14   : > { %v3779_v0 = vmov 0.0  }
  0x15   : > { %241 = vst [vmem:[#allocation2 + $0x10] sm:$0xff] %v3779_v0 }
  0x16   : > { %242 = vst [vmem:[#allocation2] sm:$0xff] %v3779_v0 }
  0x17   : > { %243 = vst [vmem:[#allocation2 + $0x18] sm:$0xff] %v3779_v0 }
  0x18   : > { %244 = vst [vmem:[#allocation2 + $0x8] sm:$0xff] %v3779_v0 }
  0x19 PF: > { %v2558_v1 = vld [vmem:[%s3830_s25 + $0xe0] sm:$0xf]  ;;  %v3504_v2 = vld [vmem:[%s3830_s25 + $0xec] sm:$0xf0]  ;;  %p3468_p7 = scmp.ne.s32.totalorder %s3769_s12, 3 }
  0x1a   : > { %v2686_v3 = vld [vmem:[%s3830_s25 + $0x1e0] sm:$0xf]  ;;  %v2559_v4 = vor.u32 %v3504_v2, %v2558_v1  ;;  %v3536_v5 = vld [vmem:[%s3830_s25 + $0x1ec] sm:$0xf0] }
  0x1b   : > { %v2814_v6 = vld [vmem:[%s3830_s25 + $0x2e0] sm:$0xf]  ;;  %v3568_v7 = vld [vmem:[%s3830_s25 + $0x2ec] sm:$0xf0]  ;;  %v2687_v8 = vor.u32 %v3536_v5, %v2686_v3 }
  0x1c   : > { %v2815_v9 = vor.u32 %v3568_v7, %v2814_v6  ;;  %v2942_v10 = vld [vmem:[%s3830_s25 + $0x3e0] sm:$0xf]  ;;  %v3600_v11 = vld [vmem:[%s3830_s25 + $0x3ec] sm:$0xf0]  ;;  %1817 = vmatpush.bf16.msra.mxu0 %v2559_v4 }
  0x1d   : > { %v2542_v12 = vld [vmem:[%s3830_s25 + $0xc0] sm:$0xf]  ;;  %v2943_v13 = vor.u32 %v3600_v11, %v2942_v10  ;;  %v3500_v14 = vld [vmem:[%s3830_s25 + $0xcc] sm:$0xf0]  ;;  %1830 = vmatpush.bf16.msra.mxu1 %v2687_v8 }
  0x1e   : > { %v2670_v15 = vld [vmem:[%s3830_s25 + $0x1c0] sm:$0xf]  ;;  %v3532_v16 = vld [vmem:[%s3830_s25 + $0x1cc] sm:$0xf0]  ;;  %1843 = vmatpush.bf16.msra.mxu2 %v2815_v9  ;;  %v2543_v17 = vor.u32 %v3500_v14, %v2542_v12 }
  0x1f   : > { %v2671_v18 = vor.u32 %v3532_v16, %v2670_v15  ;;  %v2798_v19 = vld [vmem:[%s3830_s25 + $0x2c0] sm:$0xf]  ;;  %v3564_v20 = vld [vmem:[%s3830_s25 + $0x2cc] sm:$0xf0]  ;;  %1856 = vmatpush.bf16.msra.mxu3 %v2943_v13 }
  0x20   : > { %v2926_v21 = vld [vmem:[%s3830_s25 + $0x3c0] sm:$0xf]  ;;  %v2799_v22 = vor.u32 %v3564_v20, %v2798_v19  ;;  %v3596_v23 = vld [vmem:[%s3830_s25 + $0x3cc] sm:$0xf0]  ;;  %1818 = vmatpush.bf16.msra.mxu0 %v2543_v17 }
  0x21   : > { %v2526_v24 = vld [vmem:[%s3830_s25 + $0xa0] sm:$0xf]  ;;  %v3496_v25 = vld [vmem:[%s3830_s25 + $0xac] sm:$0xf0]  ;;  %v2927_v26 = vor.u32 %v3596_v23, %v2926_v21  ;;  %1831 = vmatpush.bf16.msra.mxu1 %v2671_v18 }
  0x22   : > { %v2654_v27 = vld [vmem:[%s3830_s25 + $0x1a0] sm:$0xf]  ;;  %v3528_v28 = vld [vmem:[%s3830_s25 + $0x1ac] sm:$0xf0]  ;;  %v2527_v30 = vor.u32 %v3496_v25, %v2526_v24  ;;  %1844 = vmatpush.bf16.msra.mxu2 %v2799_v22 }
  0x23   : > { %v2782_v29 = vld [vmem:[%s3830_s25 + $0x2a0] sm:$0xf]  ;;  %v3560_v31 = vld [vmem:[%s3830_s25 + $0x2ac] sm:$0xf0]  ;;  %v2655_v34 = vor.u32 %v3528_v28, %v2654_v27  ;;  %1857 = vmatpush.bf16.msra.mxu3 %v2927_v26 }
  0x24   : > { %v2910_v32 = vld [vmem:[%s3830_s25 + $0x3a0] sm:$0xf]  ;;  %v3592_v33 = vld [vmem:[%s3830_s25 + $0x3ac] sm:$0xf0]  ;;  %v2783_v35 = vor.u32 %v3560_v31, %v2782_v29  ;;  %1819 = vmatpush.bf16.msra.mxu0 %v2527_v30 }
  0x25   : > { %v2510_v36 = vld [vmem:[%s3830_s25 + $0x80] sm:$0xf]  ;;  %v3492_v37 = vld [vmem:[%s3830_s25 + $0x8c] sm:$0xf0]  ;;  %v2911_v39 = vor.u32 %v3592_v33, %v2910_v32  ;;  %1832 = vmatpush.bf16.msra.mxu1 %v2655_v34 }
  0x26   : > { %v2638_v38 = vld [vmem:[%s3830_s25 + $0x180] sm:$0xf]  ;;  %v3524_v40 = vld [vmem:[%s3830_s25 + $0x18c] sm:$0xf0]  ;;  %v2511_v45 = vor.u32 %v3492_v37, %v2510_v36  ;;  %1845 = vmatpush.bf16.msra.mxu2 %v2783_v35 }
  0x27   : > { %v2766_v41 = vld [vmem:[%s3830_s25 + $0x280] sm:$0xf]  ;;  %v3556_v42 = vld [vmem:[%s3830_s25 + $0x28c] sm:$0xf0]  ;;  %v2639_v46 = vor.u32 %v3524_v40, %v2638_v38  ;;  %1858 = vmatpush.bf16.msra.mxu3 %v2911_v39 }
  0x28   : > { %v2894_v43 = vld [vmem:[%s3830_s25 + $0x380] sm:$0xf]  ;;  %v3588_v44 = vld [vmem:[%s3830_s25 + $0x38c] sm:$0xf0]  ;;  %v2767_v47 = vor.u32 %v3556_v42, %v2766_v41  ;;  %1820 = vmatpush.bf16.msra.mxu0 %v2511_v45 }
  0x29   : > { %v2494_v48 = vld [vmem:[%s3830_s25 + $0x60] sm:$0xf]  ;;  %v3488_v49 = vld [vmem:[%s3830_s25 + $0x6c] sm:$0xf0]  ;;  %v2895_v51 = vor.u32 %v3588_v44, %v2894_v43  ;;  %1833 = vmatpush.bf16.msra.mxu1 %v2639_v46 }
  0x2a   : > { %v2622_v50 = vld [vmem:[%s3830_s25 + $0x160] sm:$0xf]  ;;  %v3520_v52 = vld [vmem:[%s3830_s25 + $0x16c] sm:$0xf0]  ;;  %v2495_v57 = vor.u32 %v3488_v49, %v2494_v48  ;;  %1846 = vmatpush.bf16.msra.mxu2 %v2767_v47 }
  0x2b   : > { %v2750_v53 = vld [vmem:[%s3830_s25 + $0x260] sm:$0xf]  ;;  %v3552_v54 = vld [vmem:[%s3830_s25 + $0x26c] sm:$0xf0]  ;;  %v2623_v58 = vor.u32 %v3520_v52, %v2622_v50  ;;  %1859 = vmatpush.bf16.msra.mxu3 %v2895_v51 }
  0x2c   : > { %v2878_v55 = vld [vmem:[%s3830_s25 + $0x360] sm:$0xf]  ;;  %v3584_v56 = vld [vmem:[%s3830_s25 + $0x36c] sm:$0xf0]  ;;  %v2751_v59 = vor.u32 %v3552_v54, %v2750_v53  ;;  %1821 = vmatpush.bf16.msra.mxu0 %v2495_v57 }
  0x2d   : > { %v2478_v60 = vld [vmem:[%s3830_s25 + $0x40] sm:$0xf]  ;;  %v3484_v61 = vld [vmem:[%s3830_s25 + $0x4c] sm:$0xf0]  ;;  %v2879_v63 = vor.u32 %v3584_v56, %v2878_v55  ;;  %1834 = vmatpush.bf16.msra.mxu1 %v2623_v58 }
  0x2e   : > { %v2606_v62 = vld [vmem:[%s3830_s25 + $0x140] sm:$0xf]  ;;  %v3516_v0 = vld [vmem:[%s3830_s25 + $0x14c] sm:$0xf0]  ;;  %v2479_v5 = vor.u32 %v3484_v61, %v2478_v60  ;;  %1847 = vmatpush.bf16.msra.mxu2 %v2751_v59  ;;  %v250_v59 = vld [vmem:[%s3825_s21 + $0x8] sm:$0xff] }
  0x2f   : > { %v2734_v1 = vld [vmem:[%s3830_s25 + $0x240] sm:$0xf]  ;;  %v3548_v2 = vld [vmem:[%s3830_s25 + $0x24c] sm:$0xf0]  ;;  %v2607_v6 = vor.u32 %v3516_v0, %v2606_v62  ;;  %1860 = vmatpush.bf16.msra.mxu3 %v2879_v63  ;;  %v515_v0 = vunpack.c.l.b16 %v250_v59 }
  0x30   : > { %v2862_v3 = vld [vmem:[%s3830_s25 + $0x340] sm:$0xf]  ;;  %v3580_v4 = vld [vmem:[%s3830_s25 + $0x34c] sm:$0xf0]  ;;  %v2735_v7 = vor.u32 %v3548_v2, %v2734_v1  ;;  %1822 = vmatpush.bf16.msra.mxu0 %v2479_v5  ;;  %v516_v1 = vunpack.c.h.b16 %v250_v59 }
  0x31   : > { %v2462_v8 = vld [vmem:[%s3830_s25 + $0x20] sm:$0xf]  ;;  %v3480_v9 = vld [vmem:[%s3830_s25 + $0x2c] sm:$0xf0]  ;;  %v2863_v11 = vor.u32 %v3580_v4, %v2862_v3  ;;  %1835 = vmatpush.bf16.msra.mxu1 %v2607_v6  ;;  %v3922_v5 = vpack.c.b16 %v515_v0, %v515_v0 }
  0x32   : > { %v2590_v10 = vld [vmem:[%s3830_s25 + $0x120] sm:$0xf]  ;;  %v3512_v12 = vld [vmem:[%s3830_s25 + $0x12c] sm:$0xf0]  ;;  %v2463_v17 = vor.u32 %v3480_v9, %v2462_v8  ;;  %1848 = vmatpush.bf16.msra.mxu2 %v2735_v7  ;;  %v3925_v7 = vpack.c.b16 %v516_v1, %v516_v1 }
  0x33   : > { %v2718_v13 = vld [vmem:[%s3830_s25 + $0x220] sm:$0xf]  ;;  %v3544_v14 = vld [vmem:[%s3830_s25 + $0x22c] sm:$0xf0]  ;;  %v2591_v20 = vor.u32 %v3512_v12, %v2590_v10  ;;  %1861 = vmatpush.bf16.msra.mxu3 %v2863_v11 }
  0x34   : > { %v2846_v15 = vld [vmem:[%s3830_s25 + $0x320] sm:$0xf]  ;;  %v3576_v16 = vld [vmem:[%s3830_s25 + $0x32c] sm:$0xf0]  ;;  %v2719_v21 = vor.u32 %v3544_v14, %v2718_v13  ;;  %1823 = vmatpush.bf16.msra.mxu0 %v2463_v17 }
  0x35   : > { %v2446_v18 = vld [vmem:[%s3830_s25] sm:$0xf]  ;;  %v3476_v19 = vld [vmem:[%s3830_s25 + $0xc] sm:$0xf0]  ;;  %v2847_v25 = vor.u32 %v3576_v16, %v2846_v15  ;;  %1836 = vmatpush.bf16.msra.mxu1 %v2591_v20 }
  0x36   : > { %v2574_v22 = vld [vmem:[%s3830_s25 + $0x100] sm:$0xf]  ;;  %v3508_v23 = vld [vmem:[%s3830_s25 + $0x10c] sm:$0xf0]  ;;  %v2447_v32 = vor.u32 %v3476_v19, %v2446_v18  ;;  %1849 = vmatpush.bf16.msra.mxu2 %v2719_v21 }
  0x37   : > { %v2702_v24 = vld [vmem:[%s3830_s25 + $0x200] sm:$0xf]  ;;  %v3540_v26 = vld [vmem:[%s3830_s25 + $0x20c] sm:$0xf0]  ;;  %v2575_v36 = vor.u32 %v3508_v23, %v2574_v22  ;;  %1862 = vmatpush.bf16.msra.mxu3 %v2847_v25 }
  0x38   : > { %v2830_v27 = vld [vmem:[%s3830_s25 + $0x300] sm:$0xf]  ;;  %v3572_v28 = vld [vmem:[%s3830_s25 + $0x30c] sm:$0xf0]  ;;  %v2703_v37 = vor.u32 %v3540_v26, %v2702_v24  ;;  %1824 = vmatpush.bf16.msra.mxu0 %v2447_v32 }
  0x39   : > { %v3070_v29 = vld [vmem:[%s3830_s25 + $0x4e0] sm:$0xf]  ;;  %v3632_v30 = vld [vmem:[%s3830_s25 + $0x4ec] sm:$0xf0]  ;;  %v2831_v40 = vor.u32 %v3572_v28, %v2830_v27  ;;  %1837 = vmatpush.bf16.msra.mxu1 %v2575_v36 }
  0x3a   : > { %v3198_v31 = vld [vmem:[%s3830_s25 + $0x5e0] sm:$0xf]  ;;  %v3664_v33 = vld [vmem:[%s3830_s25 + $0x5ec] sm:$0xf0]  ;;  %v3071_v41 = vor.u32 %v3632_v30, %v3070_v29  ;;  %1850 = vmatpush.bf16.msra.mxu2 %v2703_v37 }
  0x3b   : > { %v3326_v34 = vld [vmem:[%s3830_s25 + $0x6e0] sm:$0xf]  ;;  %v3696_v35 = vld [vmem:[%s3830_s25 + $0x6ec] sm:$0xf0]  ;;  %v3199_v42 = vor.u32 %v3664_v33, %v3198_v31  ;;  %1863 = vmatpush.bf16.msra.mxu3 %v2831_v40 }
  0x3c   : > { %v3454_v38 = vld [vmem:[%s3830_s25 + $0x7e0] sm:$0xf]  ;;  %v3728_v39 = vld [vmem:[%s3830_s25 + $0x7ec] sm:$0xf0]  ;;  %v3327_v43 = vor.u32 %v3696_v35, %v3326_v34  ;;  %1869 = vmatpush.bf16.msrb.mxu0 %v3071_v41 }
  0x3d   : > { %v3054_v44 = vld [vmem:[%s3830_s25 + $0x4c0] sm:$0xf]  ;;  %v3628_v45 = vld [vmem:[%s3830_s25 + $0x4cc] sm:$0xf0]  ;;  %v3455_v47 = vor.u32 %v3728_v39, %v3454_v38  ;;  %1882 = vmatpush.bf16.msrb.mxu1 %v3199_v42  ;;  %1851 = vmatmul.bf16.vlgmr.msra.gmra.mxu2 %v3922_v5 }
  0x3e   : > { %v3182_v46 = vld [vmem:[%s3830_s25 + $0x5c0] sm:$0xf]  ;;  %v3660_v48 = vld [vmem:[%s3830_s25 + $0x5cc] sm:$0xf0]  ;;  %v3055_v53 = vor.u32 %v3628_v45, %v3054_v44  ;;  %1895 = vmatpush.bf16.msrb.mxu2 %v3327_v43  ;;  %1864 = vmatmul.bf16.vlgmr.msra.gmra.mxu3 %v3925_v7 }
  0x3f   : > { %v3310_v49 = vld [vmem:[%s3830_s25 + $0x6c0] sm:$0xf]  ;;  %v3692_v50 = vld [vmem:[%s3830_s25 + $0x6cc] sm:$0xf0]  ;;  %v3183_v55 = vor.u32 %v3660_v48, %v3182_v46  ;;  %1908 = vmatpush.bf16.msrb.mxu3 %v3455_v47 }
  0x40   : > { %v3438_v51 = vld [vmem:[%s3830_s25 + $0x7c0] sm:$0xf]  ;;  %v3724_v52 = vld [vmem:[%s3830_s25 + $0x7cc] sm:$0xf0]  ;;  %v3311_v56 = vor.u32 %v3692_v50, %v3310_v49  ;;  %1870 = vmatpush.bf16.msrb.mxu0 %v3055_v53 }
  0x41   : > { %v3038_v54 = vld [vmem:[%s3830_s25 + $0x4a0] sm:$0xf]  ;;  %v3624_v57 = vld [vmem:[%s3830_s25 + $0x4ac] sm:$0xf0]  ;;  %v3439_v60 = vor.u32 %v3724_v52, %v3438_v51  ;;  %1883 = vmatpush.bf16.msrb.mxu1 %v3183_v55 }
  0x42   : > { %v3166_v58 = vld [vmem:[%s3830_s25 + $0x5a0] sm:$0xf]  ;;  %v3656_v61 = vld [vmem:[%s3830_s25 + $0x5ac] sm:$0xf0]  ;;  %v3039_v4 = vor.u32 %v3624_v57, %v3038_v54  ;;  %1896 = vmatpush.bf16.msrb.mxu2 %v3311_v56 }
  0x43   : > { %v3294_v62 = vld [vmem:[%s3830_s25 + $0x6a0] sm:$0xf]  ;;  %v3688_v63 = vld [vmem:[%s3830_s25 + $0x6ac] sm:$0xf0]  ;;  %v3167_v8 = vor.u32 %v3656_v61, %v3166_v58  ;;  %1909 = vmatpush.bf16.msrb.mxu3 %v3439_v60 }
  0x44   : > { %v3422_v2 = vld [vmem:[%s3830_s25 + $0x7a0] sm:$0xf]  ;;  %v3720_v3 = vld [vmem:[%s3830_s25 + $0x7ac] sm:$0xf0]  ;;  %v3295_v9 = vor.u32 %v3688_v63, %v3294_v62  ;;  %1871 = vmatpush.bf16.msrb.mxu0 %v3039_v4  ;;  %v252_v4 = vld [vmem:[%s3825_s21 + $0x18] sm:$0xff] }
  0x45   : > { %v249_v6 = vld [vmem:[%s3825_s21] sm:$0xff]  ;;  %v3620_v11 = vld [vmem:[%s3830_s25 + $0x48c] sm:$0xf0]  ;;  %v3423_v15 = vor.u32 %v3720_v3, %v3422_v2  ;;  %1884 = vmatpush.bf16.msrb.mxu1 %v3167_v8 }
  0x46   : > { %v3022_v10 = vld [vmem:[%s3830_s25 + $0x480] sm:$0xf]  ;;  %v513_v13 = vunpack.c.l.b16 %v249_v6  ;;  %v514_v14 = vunpack.c.h.b16 %v249_v6  ;;  %v3652_v16 = vld [vmem:[%s3830_s25 + $0x58c] sm:$0xf0]  ;;  %1897 = vmatpush.bf16.msrb.mxu2 %v3295_v9 }
  0x47   : > { %v3150_v12 = vld [vmem:[%s3830_s25 + $0x580] sm:$0xf]  ;;  %v3684_v18 = vld [vmem:[%s3830_s25 + $0x68c] sm:$0xf0]  ;;  %v3023_v23 = vor.u32 %v3620_v11, %v3022_v10  ;;  %1910 = vmatpush.bf16.msrb.mxu3 %v3423_v15  ;;  %v3502_v11 = vld [vmem:[%s3830_s25 + $0xe4] sm:$0xf] }
  0x48   : > { %v3278_v17 = vld [vmem:[%s3830_s25 + $0x680] sm:$0xf]  ;;  %v3716_v20 = vld [vmem:[%s3830_s25 + $0x78c] sm:$0xf0]  ;;  %v3936_v21 = vpack.c.b16 %v513_v13, %v513_v13  ;;  %v3939_v22 = vpack.c.b16 %v514_v14, %v514_v14  ;;  %v3151_v24 = vor.u32 %v3652_v16, %v3150_v12  ;;  %v2560_v12 = vld [vmem:[%s3830_s25 + $0xf0] sm:$0xf0] }
  0x49   : > { %v3406_v19 = vld [vmem:[%s3830_s25 + $0x780] sm:$0xf]  ;;  %v3279_v25 = vor.u32 %v3684_v18, %v3278_v17  ;;  %v3616_v27 = vld [vmem:[%s3830_s25 + $0x46c] sm:$0xf0]  ;;  %1872 = vmatpush.bf16.msrb.mxu0 %v3023_v23  ;;  %v3534_v13 = vld [vmem:[%s3830_s25 + $0x1e4] sm:$0xf]  ;;  %v519_v18 = vunpack.c.l.b16 %v252_v4 }
  0x4a   : > { %v3006_v26 = vld [vmem:[%s3830_s25 + $0x460] sm:$0xf]  ;;  %v3407_v29 = vor.u32 %v3716_v20, %v3406_v19  ;;  %v3648_v30 = vld [vmem:[%s3830_s25 + $0x56c] sm:$0xf0]  ;;  %1825 = vmatmul.bf16.vlgmr.msra.gmra.mxu0 %v3936_v21  ;;  %1838 = vmatmul.bf16.vlgmr.msra.gmra.mxu1 %v3939_v22  ;;  %v2688_v15 = vld [vmem:[%s3830_s25 + $0x1f0] sm:$0xf0] }
  0x4b   : > { %v3134_v28 = vld [vmem:[%s3830_s25 + $0x560] sm:$0xf]  ;;  %v3680_v32 = vld [vmem:[%s3830_s25 + $0x66c] sm:$0xf0]  ;;  %v3007_v35 = vor.u32 %v3616_v27, %v3006_v26  ;;  %1885 = vmatpush.bf16.msrb.mxu1 %v3151_v24  ;;  %1898 = vmatpush.bf16.msrb.mxu2 %v3279_v25  ;;  %v3566_v16 = vld [vmem:[%s3830_s25 + $0x2e4] sm:$0xf]  ;;  %v520_v26 = vunpack.c.h.b16 %v252_v4 }
  0x4c   : > { %v3262_v31 = vld [vmem:[%s3830_s25 + $0x660] sm:$0xf]  ;;  %v3712_v34 = vld [vmem:[%s3830_s25 + $0x76c] sm:$0xf0]  ;;  %v3135_v36 = vor.u32 %v3648_v30, %v3134_v28  ;;  %1911 = vmatpush.bf16.msrb.mxu3 %v3407_v29  ;;  %v2816_v17 = vld [vmem:[%s3830_s25 + $0x2f0] sm:$0xf0]  ;;  %v2563_v28 = vor.u32 %v3502_v11, %v2560_v12  ;;  %v2691_v30 = vor.u32 %v3534_v13, %v2688_v15 }
  0x4d   : > { %v3390_v33 = vld [vmem:[%s3830_s25 + $0x760] sm:$0xf]  ;;  %v3263_v37 = vor.u32 %v3680_v32, %v3262_v31  ;;  %v3612_v39 = vld [vmem:[%s3830_s25 + $0x44c] sm:$0xf0]  ;;  %1873 = vmatpush.bf16.msrb.mxu0 %v3007_v35  ;;  %v3598_v23 = vld [vmem:[%s3830_s25 + $0x3e4] sm:$0xf]  ;;  %v2819_v31 = vor.u32 %v3566_v16, %v2816_v17 }
  0x4e   : > { %v2990_v38 = vld [vmem:[%s3830_s25 + $0x440] sm:$0xf]  ;;  %v3391_v41 = vor.u32 %v3712_v34, %v3390_v33  ;;  %v3644_v42 = vld [vmem:[%s3830_s25 + $0x54c] sm:$0xf0]  ;;  %v2944_v24 = vld [vmem:[%s3830_s25 + $0x3f0] sm:$0xf0] }
  0x4f   : > { %v3118_v40 = vld [vmem:[%s3830_s25 + $0x540] sm:$0xf]  ;;  %v3676_v44 = vld [vmem:[%s3830_s25 + $0x64c] sm:$0xf0]  ;;  %v2991_v47 = vor.u32 %v3612_v39, %v2990_v38  ;;  %1886 = vmatpush.bf16.msrb.mxu1 %v3135_v36  ;;  %1899 = vmatpush.bf16.msrb.mxu2 %v3263_v37  ;;  %v3498_v32 = vld [vmem:[%s3830_s25 + $0xc4] sm:$0xf]  ;;  %v2947_v35 = vor.u32 %v3598_v23, %v2944_v24  ;;  %v3991_v39 = vpack.c.b16 %v519_v18, %v519_v18 }
  0x50   : > { %v3246_v43 = vld [vmem:[%s3830_s25 + $0x640] sm:$0xf]  ;;  %v3708_v46 = vld [vmem:[%s3830_s25 + $0x74c] sm:$0xf0]  ;;  %v3119_v48 = vor.u32 %v3644_v42, %v3118_v40  ;;  %1912 = vmatpush.bf16.msrb.mxu3 %v3391_v41  ;;  %v2544_v33 = vld [vmem:[%s3830_s25 + $0xd0] sm:$0xf0] }
  0x51   : > { %v3374_v45 = vld [vmem:[%s3830_s25 + $0x740] sm:$0xf]  ;;  %v3247_v49 = vor.u32 %v3676_v44, %v3246_v43  ;;  %v3608_v51 = vld [vmem:[%s3830_s25 + $0x42c] sm:$0xf0]  ;;  %1874 = vmatpush.bf16.msrb.mxu0 %v2991_v47  ;;  %v3530_v34 = vld [vmem:[%s3830_s25 + $0x1c4] sm:$0xf]  ;;  %v3997_v43 = vpack.c.b16 %v520_v26, %v520_v26  ;;  %v2547_v44 = vor.u32 %v3498_v32, %v2544_v33 }
  0x52   : > { %v2974_v50 = vld [vmem:[%s3830_s25 + $0x420] sm:$0xf]  ;;  %v3375_v53 = vor.u32 %v3708_v46, %v3374_v45  ;;  %v3640_v54 = vld [vmem:[%s3830_s25 + $0x52c] sm:$0xf0]  ;;  %v2672_v36 = vld [vmem:[%s3830_s25 + $0x1d0] sm:$0xf0] }
  0x53   : > { %v3102_v52 = vld [vmem:[%s3830_s25 + $0x520] sm:$0xf]  ;;  %v3672_v56 = vld [vmem:[%s3830_s25 + $0x62c] sm:$0xf0]  ;;  %v2975_v60 = vor.u32 %v3608_v51, %v2974_v50  ;;  %1887 = vmatpush.bf16.msrb.mxu1 %v3119_v48  ;;  %1900 = vmatpush.bf16.msrb.mxu2 %v3247_v49  ;;  %v3562_v37 = vld [vmem:[%s3830_s25 + $0x2c4] sm:$0xf]  ;;  %v2675_v46 = vor.u32 %v3530_v34, %v2672_v36 }
  0x54   : > { %v3230_v55 = vld [vmem:[%s3830_s25 + $0x620] sm:$0xf]  ;;  %v3704_v58 = vld [vmem:[%s3830_s25 + $0x72c] sm:$0xf0]  ;;  %v3103_v0 = vor.u32 %v3640_v54, %v3102_v52  ;;  %1913 = vmatpush.bf16.msrb.mxu3 %v3375_v53  ;;  %v2800_v38 = vld [vmem:[%s3830_s25 + $0x2d0] sm:$0xf0] }
  0x55   : > { %v3358_v57 = vld [vmem:[%s3830_s25 + $0x720] sm:$0xf]  ;;  %v3604_v61 = vld [vmem:[%s3830_s25 + $0x40c] sm:$0xf0]  ;;  %v3231_v1 = vor.u32 %v3672_v56, %v3230_v55  ;;  %1875 = vmatpush.bf16.msrb.mxu0 %v2975_v60  ;;  %v3594_v40 = vld [vmem:[%s3830_s25 + $0x3c4] sm:$0xf]  ;;  %v2803_v47 = vor.u32 %v3562_v37, %v2800_v38 }
  0x56   : > { %v2958_v59 = vld [vmem:[%s3830_s25 + $0x400] sm:$0xf]  ;;  %v3636_v63 = vld [vmem:[%s3830_s25 + $0x50c] sm:$0xf0]  ;;  %v3359_v6 = vor.u32 %v3704_v58, %v3358_v57  ;;  %v2928_v41 = vld [vmem:[%s3830_s25 + $0x3d0] sm:$0xf0] }
  0x57   : > { %v3086_v62 = vld [vmem:[%s3830_s25 + $0x500] sm:$0xf]  ;;  %v3668_v3 = vld [vmem:[%s3830_s25 + $0x60c] sm:$0xf0]  ;;  %v2959_v14 = vor.u32 %v3604_v61, %v2958_v59  ;;  %1888 = vmatpush.bf16.msrb.mxu1 %v3103_v0  ;;  %1901 = vmatpush.bf16.msrb.mxu2 %v3231_v1  ;;  %v3494_v48 = vld [vmem:[%s3830_s25 + $0xa4] sm:$0xf]  ;;  %v2931_v51 = vor.u32 %v3594_v40, %v2928_v41 }
  0x58   : > { %v3214_v2 = vld [vmem:[%s3830_s25 + $0x600] sm:$0xf]  ;;  %v3700_v9 = vld [vmem:[%s3830_s25 + $0x70c] sm:$0xf0]  ;;  %v3087_v19 = vor.u32 %v3636_v63, %v3086_v62  ;;  %1914 = vmatpush.bf16.msrb.mxu3 %v3359_v6  ;;  %v2528_v49 = vld [vmem:[%s3830_s25 + $0xb0] sm:$0xf0] }
  0x59   : > { %v3342_v8 = vld [vmem:[%s3830_s25 + $0x700] sm:$0xf]  ;;  %v251_v10 = vld [vmem:[%s3825_s21 + $0x10] sm:$0xff]  ;;  %v3215_v20 = vor.u32 %v3668_v3, %v3214_v2  ;;  %1876 = vmatpush.bf16.msrb.mxu0 %v2959_v14  ;;  %v3526_v50 = vld [vmem:[%s3830_s25 + $0x1a4] sm:$0xf]  ;;  %v2531_v57 = vor.u32 %v3494_v48, %v2528_v49 }
  0x5a   : > { %v517_v25 = vunpack.c.l.b16 %v251_v10  ;;  %v3343_v27 = vor.u32 %v3700_v9, %v3342_v8  ;;  %v518_v29 = vunpack.c.h.b16 %v251_v10  ;;  %v2656_v52 = vld [vmem:[%s3830_s25 + $0x1b0] sm:$0xf0]  ;;  %v3558_v53 = vld [vmem:[%s3830_s25 + $0x2a4] sm:$0xf] }
  0x5b   : > { %1889 = vmatpush.bf16.msrb.mxu1 %v3087_v19  ;;  %1902 = vmatpush.bf16.msrb.mxu2 %v3215_v20  ;;  %v2784_v54 = vld [vmem:[%s3830_s25 + $0x2b0] sm:$0xf0]  ;;  %v3590_v55 = vld [vmem:[%s3830_s25 + $0x3a4] sm:$0xf]  ;;  %v2659_v58 = vor.u32 %v3526_v50, %v2656_v52 }
  0x5c   : > { %v3995_v42 = vpack.c.b16 %v517_v25, %v517_v25  ;;  %1915 = vmatpush.bf16.msrb.mxu3 %v3343_v27  ;;  %v3999_v45 = vpack.c.b16 %v518_v29, %v518_v29  ;;  %v2912_v56 = vld [vmem:[%s3830_s25 + $0x3b0] sm:$0xf0]  ;;  %v2787_v59 = vor.u32 %v3558_v53, %v2784_v54  ;;  %v3490_v60 = vld [vmem:[%s3830_s25 + $0x84] sm:$0xf] }
  0x5d   : > { %1921 = vmatpush.bf16.msra.mxu0 %v2563_v28  ;;  %v2512_v61 = vld [vmem:[%s3830_s25 + $0x90] sm:$0xf0]  ;;  %v3522_v62 = vld [vmem:[%s3830_s25 + $0x184] sm:$0xf]  ;;  %v2915_v63 = vor.u32 %v3590_v55, %v2912_v56 }
  0x5e   : > { %1903 = vmatmul.bf16.vlgmr.msrb.gmra.mxu2 %v3991_v39  ;;  %1877 = vmatmul.bf16.vlgmr.msrb.gmra.mxu0 %v3995_v42  ;;  %v2640_v0 = vld [vmem:[%s3830_s25 + $0x190] sm:$0xf0]  ;;  %v3554_v1 = vld [vmem:[%s3830_s25 + $0x284] sm:$0xf]  ;;  %v2515_v6 = vor.u32 %v3490_v60, %v2512_v61 }
  0x5f   : > { %1934 = vmatpush.bf16.msra.mxu1 %v2691_v30  ;;  %1947 = vmatpush.bf16.msra.mxu2 %v2819_v31  ;;  %v2768_v2 = vld [vmem:[%s3830_s25 + $0x290] sm:$0xf0]  ;;  %v3586_v3 = vld [vmem:[%s3830_s25 + $0x384] sm:$0xf]  ;;  %v2643_v8 = vor.u32 %v3522_v62, %v2640_v0 }
  0x60   : > { %1960 = vmatpush.bf16.msra.mxu3 %v2947_v35  ;;  %1890 = vmatmul.bf16.vlgmr.msrb.gmra.mxu1 %v3999_v45  ;;  %v2896_v4 = vld [vmem:[%s3830_s25 + $0x390] sm:$0xf0]  ;;  %v2771_v9 = vor.u32 %v3554_v1, %v2768_v2  ;;  %v3486_v10 = vld [vmem:[%s3830_s25 + $0x64] sm:$0xf] }
  0x61   : > { %1916 = vmatmul.bf16.vlgmr.msrb.gmra.mxu3 %v3997_v43  ;;  %1922 = vmatpush.bf16.msra.mxu0 %v2547_v44  ;;  %v2496_v11 = vld [vmem:[%s3830_s25 + $0x70] sm:$0xf0]  ;;  %v3518_v12 = vld [vmem:[%s3830_s25 + $0x164] sm:$0xf]  ;;  %v2899_v13 = vor.u32 %v3586_v3, %v2896_v4 }
  0x62   : > { %v2624_v14 = vld [vmem:[%s3830_s25 + $0x170] sm:$0xf0]  ;;  %v3550_v15 = vld [vmem:[%s3830_s25 + $0x264] sm:$0xf]  ;;  %v2499_v19 = vor.u32 %v3486_v10, %v2496_v11 }
  0x63   : > { %1935 = vmatpush.bf16.msra.mxu1 %v2675_v46  ;;  %1948 = vmatpush.bf16.msra.mxu2 %v2803_v47  ;;  %v2752_v16 = vld [vmem:[%s3830_s25 + $0x270] sm:$0xf0]  ;;  %v3582_v17 = vld [vmem:[%s3830_s25 + $0x364] sm:$0xf]  ;;  %v2627_v20 = vor.u32 %v3518_v12, %v2624_v14 }
  0x64   : > { %1961 = vmatpush.bf16.msra.mxu3 %v2931_v51  ;;  %v2880_v18 = vld [vmem:[%s3830_s25 + $0x370] sm:$0xf0]  ;;  %v2755_v23 = vor.u32 %v3550_v15, %v2752_v16  ;;  %v3482_v24 = vld [vmem:[%s3830_s25 + $0x44] sm:$0xf] }
  0x65   : > { %1923 = vmatpush.bf16.msra.mxu0 %v2531_v57  ;;  %v2480_v25 = vld [vmem:[%s3830_s25 + $0x50] sm:$0xf0]  ;;  %v3514_v26 = vld [vmem:[%s3830_s25 + $0x144] sm:$0xf]  ;;  %v2883_v27 = vor.u32 %v3582_v17, %v2880_v18 }
  0x66   : > { %v2608_v28 = vld [vmem:[%s3830_s25 + $0x150] sm:$0xf0]  ;;  %v3546_v29 = vld [vmem:[%s3830_s25 + $0x244] sm:$0xf]  ;;  %v2483_v33 = vor.u32 %v3482_v24, %v2480_v25 }
  0x67   : > { %1936 = vmatpush.bf16.msra.mxu1 %v2659_v58  ;;  %1949 = vmatpush.bf16.msra.mxu2 %v2787_v59  ;;  %v2736_v30 = vld [vmem:[%s3830_s25 + $0x250] sm:$0xf0]  ;;  %v3578_v31 = vld [vmem:[%s3830_s25 + $0x344] sm:$0xf]  ;;  %v2611_v34 = vor.u32 %v3514_v26, %v2608_v28 }
  0x68   : > { %1962 = vmatpush.bf16.msra.mxu3 %v2915_v63  ;;  %v2864_v32 = vld [vmem:[%s3830_s25 + $0x350] sm:$0xf0]  ;;  %v2739_v35 = vor.u32 %v3546_v29, %v2736_v30  ;;  %v3478_v36 = vld [vmem:[%s3830_s25 + $0x24] sm:$0xf] }
  0x69   : > { %1924 = vmatpush.bf16.msra.mxu0 %v2515_v6  ;;  %v2464_v37 = vld [vmem:[%s3830_s25 + $0x30] sm:$0xf0]  ;;  %v3510_v38 = vld [vmem:[%s3830_s25 + $0x124] sm:$0xf]  ;;  %v2867_v40 = vor.u32 %v3578_v31, %v2864_v32 }
  0x6a   : > { %v2592_v41 = vld [vmem:[%s3830_s25 + $0x130] sm:$0xf0]  ;;  %v3542_v44 = vld [vmem:[%s3830_s25 + $0x224] sm:$0xf]  ;;  %v2467_v49 = vor.u32 %v3478_v36, %v2464_v37 }
  0x6b   : > { %1937 = vmatpush.bf16.msra.mxu1 %v2643_v8  ;;  %1950 = vmatpush.bf16.msra.mxu2 %v2771_v9  ;;  %v2720_v46 = vld [vmem:[%s3830_s25 + $0x230] sm:$0xf0]  ;;  %v3574_v47 = vld [vmem:[%s3830_s25 + $0x324] sm:$0xf]  ;;  %v2595_v52 = vor.u32 %v3510_v38, %v2592_v41 }
  0x6c   : > { %1963 = vmatpush.bf16.msra.mxu3 %v2899_v13  ;;  %v2848_v48 = vld [vmem:[%s3830_s25 + $0x330] sm:$0xf0]  ;;  %v3474_v50 = vld [vmem:[%s3830_s25 + $0x4] sm:$0xf]  ;;  %v2723_v53 = vor.u32 %v3542_v44, %v2720_v46 }
  0x6d   : > { %1925 = vmatpush.bf16.msra.mxu0 %v2499_v19  ;;  %v2448_v51 = vld [vmem:[%s3830_s25 + $0x10] sm:$0xf0]  ;;  %v3506_v54 = vld [vmem:[%s3830_s25 + $0x104] sm:$0xf]  ;;  %v2851_v57 = vor.u32 %v3574_v47, %v2848_v48 }
  0x6e   : > { %v2576_v55 = vld [vmem:[%s3830_s25 + $0x110] sm:$0xf0]  ;;  %v3538_v56 = vld [vmem:[%s3830_s25 + $0x204] sm:$0xf]  ;;  %v2451_v0 = vor.u32 %v3474_v50, %v2448_v51 }
  0x6f   : > { %1938 = vmatpush.bf16.msra.mxu1 %v2627_v20  ;;  %1951 = vmatpush.bf16.msra.mxu2 %v2755_v23  ;;  %v2704_v58 = vld [vmem:[%s3830_s25 + $0x210] sm:$0xf0]  ;;  %v3570_v59 = vld [vmem:[%s3830_s25 + $0x304] sm:$0xf]  ;;  %v2579_v4 = vor.u32 %v3506_v54, %v2576_v55 }
  0x70   : > { %1964 = vmatpush.bf16.msra.mxu3 %v2883_v27  ;;  %v2832_v60 = vld [vmem:[%s3830_s25 + $0x310] sm:$0xf0]  ;;  %v3630_v61 = vld [vmem:[%s3830_s25 + $0x4e4] sm:$0xf]  ;;  %v2707_v6 = vor.u32 %v3538_v56, %v2704_v58 }
  0x71   : > { %1926 = vmatpush.bf16.msra.mxu0 %v2483_v33  ;;  %v3072_v62 = vld [vmem:[%s3830_s25 + $0x4f0] sm:$0xf0]  ;;  %v3662_v63 = vld [vmem:[%s3830_s25 + $0x5e4] sm:$0xf]  ;;  %v2835_v10 = vor.u32 %v3570_v59, %v2832_v60 }
  0x72   : > { %v3200_v1 = vld [vmem:[%s3830_s25 + $0x5f0] sm:$0xf0]  ;;  %v3694_v2 = vld [vmem:[%s3830_s25 + $0x6e4] sm:$0xf]  ;;  %v3075_v11 = vor.u32 %v3630_v61, %v3072_v62 }
  0x73   : > { %1939 = vmatpush.bf16.msra.mxu1 %v2611_v34  ;;  %1952 = vmatpush.bf16.msra.mxu2 %v2739_v35  ;;  %v3328_v3 = vld [vmem:[%s3830_s25 + $0x6f0] sm:$0xf0]  ;;  %v3726_v8 = vld [vmem:[%s3830_s25 + $0x7e4] sm:$0xf]  ;;  %v3203_v12 = vor.u32 %v3662_v63, %v3200_v1 }
  0x74   : > { %1965 = vmatpush.bf16.msra.mxu3 %v2867_v40  ;;  %v3456_v9 = vld [vmem:[%s3830_s25 + $0x7f0] sm:$0xf0]  ;;  %v3331_v13 = vor.u32 %v3694_v2, %v3328_v3  ;;  %v3626_v14 = vld [vmem:[%s3830_s25 + $0x4c4] sm:$0xf] }
  0x75   : > { %1927 = vmatpush.bf16.msra.mxu0 %v2467_v49  ;;  %v3056_v15 = vld [vmem:[%s3830_s25 + $0x4d0] sm:$0xf0]  ;;  %v3658_v16 = vld [vmem:[%s3830_s25 + $0x5c4] sm:$0xf]  ;;  %v3459_v17 = vor.u32 %v3726_v8, %v3456_v9 }
  0x76   : > { %v3184_v18 = vld [vmem:[%s3830_s25 + $0x5d0] sm:$0xf0]  ;;  %v3690_v19 = vld [vmem:[%s3830_s25 + $0x6c4] sm:$0xf]  ;;  %v3059_v25 = vor.u32 %v3626_v14, %v3056_v15 }
  0x77   : > { %1940 = vmatpush.bf16.msra.mxu1 %v2595_v52  ;;  %1953 = vmatpush.bf16.msra.mxu2 %v2723_v53  ;;  %v3312_v20 = vld [vmem:[%s3830_s25 + $0x6d0] sm:$0xf0]  ;;  %v3722_v23 = vld [vmem:[%s3830_s25 + $0x7c4] sm:$0xf]  ;;  %v3187_v26 = vor.u32 %v3658_v16, %v3184_v18 }
  0x78   : > { %1966 = vmatpush.bf16.msra.mxu3 %v2851_v57  ;;  %v3440_v24 = vld [vmem:[%s3830_s25 + $0x7d0] sm:$0xf0]  ;;  %v3315_v27 = vor.u32 %v3690_v19, %v3312_v20  ;;  %v3622_v28 = vld [vmem:[%s3830_s25 + $0x4a4] sm:$0xf] }
  0x79   : > { %1928 = vmatpush.bf16.msra.mxu0 %v2451_v0  ;;  %v3040_v29 = vld [vmem:[%s3830_s25 + $0x4b0] sm:$0xf0]  ;;  %v3654_v30 = vld [vmem:[%s3830_s25 + $0x5a4] sm:$0xf]  ;;  %v3443_v31 = vor.u32 %v3722_v23, %v3440_v24 }
  0x7a   : > { %v3168_v32 = vld [vmem:[%s3830_s25 + $0x5b0] sm:$0xf0]  ;;  %v3686_v33 = vld [vmem:[%s3830_s25 + $0x6a4] sm:$0xf]  ;;  %v3043_v37 = vor.u32 %v3622_v28, %v3040_v29 }
  0x7b   : > { %1941 = vmatpush.bf16.msra.mxu1 %v2579_v4  ;;  %1954 = vmatpush.bf16.msra.mxu2 %v2707_v6  ;;  %v3296_v34 = vld [vmem:[%s3830_s25 + $0x6b0] sm:$0xf0]  ;;  %v3718_v35 = vld [vmem:[%s3830_s25 + $0x7a4] sm:$0xf]  ;;  %v3171_v38 = vor.u32 %v3654_v30, %v3168_v32 }
  0x7c   : > { %1967 = vmatpush.bf16.msra.mxu3 %v2835_v10  ;;  %v3424_v36 = vld [vmem:[%s3830_s25 + $0x7b0] sm:$0xf0]  ;;  %1929 = vmatmul.bf16.vlgmr.msra.gmra.mxu0 %v3936_v21  ;;  %v3299_v40 = vor.u32 %v3686_v33, %v3296_v34  ;;  %v3618_v41 = vld [vmem:[%s3830_s25 + $0x484] sm:$0xf] }
  0x7d   : > { %1973 = vmatpush.bf16.msrb.mxu0 %v3075_v11  ;;  %v3024_v44 = vld [vmem:[%s3830_s25 + $0x490] sm:$0xf0]  ;;  %v3650_v46 = vld [vmem:[%s3830_s25 + $0x584] sm:$0xf]  ;;  %v3427_v47 = vor.u32 %v3718_v35, %v3424_v36 }
  0x7e   : > { %1955 = vmatmul.bf16.vlgmr.msra.gmra.mxu2 %v3922_v5  ;;  %1942 = vmatmul.bf16.vlgmr.msra.gmra.mxu1 %v3939_v22  ;;  %v3152_v48 = vld [vmem:[%s3830_s25 + $0x590] sm:$0xf0]  ;;  %v3682_v49 = vld [vmem:[%s3830_s25 + $0x684] sm:$0xf]  ;;  %v3027_v53 = vor.u32 %v3618_v41, %v3024_v44  ;;  %v2566_v44 = vld [vmem:[%s3830_s25 + $0xe8] sm:$0xf] }
  0x7f   : > { %1986 = vmatpush.bf16.msrb.mxu1 %v3203_v12  ;;  %1999 = vmatpush.bf16.msrb.mxu2 %v3331_v13  ;;  %v3280_v50 = vld [vmem:[%s3830_s25 + $0x690] sm:$0xf0]  ;;  %v3714_v51 = vld [vmem:[%s3830_s25 + $0x784] sm:$0xf]  ;;  %v3155_v54 = vor.u32 %v3650_v46, %v3152_v48  ;;  %v3505_v46 = vld [vmem:[%s3830_s25 + $0xf4] sm:$0xf0] }
  0x80   : > { %2012 = vmatpush.bf16.msrb.mxu3 %v3459_v17  ;;  %v3408_v52 = vld [vmem:[%s3830_s25 + $0x790] sm:$0xf0]  ;;  %v3283_v55 = vor.u32 %v3682_v49, %v3280_v50  ;;  %v3614_v56 = vld [vmem:[%s3830_s25 + $0x464] sm:$0xf]  ;;  %v3537_v49 = vld [vmem:[%s3830_s25 + $0x1f4] sm:$0xf0] }
  0x81   : > { %1968 = vmatmul.bf16.vlgmr.msra.gmra.mxu3 %v3925_v7  ;;  %1974 = vmatpush.bf16.msrb.mxu0 %v3059_v25  ;;  %v3008_v57 = vld [vmem:[%s3830_s25 + $0x470] sm:$0xf0]  ;;  %v3646_v58 = vld [vmem:[%s3830_s25 + $0x564] sm:$0xf]  ;;  %v3411_v59 = vor.u32 %v3714_v51, %v3408_v52  ;;  %v2822_v50 = vld [vmem:[%s3830_s25 + $0x2e8] sm:$0xf] }
  0x82   : > { %v3136_v60 = vld [vmem:[%s3830_s25 + $0x570] sm:$0xf0]  ;;  %v3678_v61 = vld [vmem:[%s3830_s25 + $0x664] sm:$0xf]  ;;  %v3011_v1 = vor.u32 %v3614_v56, %v3008_v57  ;;  %v3569_v51 = vld [vmem:[%s3830_s25 + $0x2f4] sm:$0xf0]  ;;  %v2567_v57 = vor.u32 %v3505_v46, %v2566_v44 }
  0x83   : > { %1987 = vmatpush.bf16.msrb.mxu1 %v3187_v26  ;;  %2000 = vmatpush.bf16.msrb.mxu2 %v3315_v27  ;;  %v3264_v62 = vld [vmem:[%s3830_s25 + $0x670] sm:$0xf0]  ;;  %v3710_v63 = vld [vmem:[%s3830_s25 + $0x764] sm:$0xf]  ;;  %v3139_v2 = vor.u32 %v3646_v58, %v3136_v60  ;;  %v2550_v60 = vld [vmem:[%s3830_s25 + $0xc8] sm:$0xf] }
  0x84   : > { %2013 = vmatpush.bf16.msrb.mxu3 %v3443_v31  ;;  %v3392_v0 = vld [vmem:[%s3830_s25 + $0x770] sm:$0xf0]  ;;  %v3267_v3 = vor.u32 %v3678_v61, %v3264_v62  ;;  %v3610_v4 = vld [vmem:[%s3830_s25 + $0x444] sm:$0xf]  ;;  %v3501_v61 = vld [vmem:[%s3830_s25 + $0xd4] sm:$0xf0] }
  0x85   : > { %1975 = vmatpush.bf16.msrb.mxu0 %v3043_v37  ;;  %v2992_v6 = vld [vmem:[%s3830_s25 + $0x450] sm:$0xf0]  ;;  %v3642_v8 = vld [vmem:[%s3830_s25 + $0x544] sm:$0xf]  ;;  %v3395_v9 = vor.u32 %v3710_v63, %v3392_v0  ;;  %v2678_v62 = vld [vmem:[%s3830_s25 + $0x1c8] sm:$0xf] }
  0x86   : > { %v3120_v10 = vld [vmem:[%s3830_s25 + $0x550] sm:$0xf0]  ;;  %v3674_v11 = vld [vmem:[%s3830_s25 + $0x644] sm:$0xf]  ;;  %v2995_v15 = vor.u32 %v3610_v4, %v2992_v6  ;;  %v3533_v0 = vld [vmem:[%s3830_s25 + $0x1d4] sm:$0xf0]  ;;  %v2551_v6 = vor.u32 %v3501_v61, %v2550_v60 }
  0x87   : > { %1988 = vmatpush.bf16.msrb.mxu1 %v3171_v38  ;;  %2001 = vmatpush.bf16.msrb.mxu2 %v3299_v40  ;;  %v3248_v12 = vld [vmem:[%s3830_s25 + $0x650] sm:$0xf0]  ;;  %v3706_v13 = vld [vmem:[%s3830_s25 + $0x744] sm:$0xf]  ;;  %v3123_v16 = vor.u32 %v3642_v8, %v3120_v10  ;;  %v3597_v4 = vld [vmem:[%s3830_s25 + $0x3d4] sm:$0xf0]  ;;  %v2679_v8 = vor.u32 %v3533_v0, %v2678_v62 }
  0x88   : > { %2014 = vmatpush.bf16.msrb.mxu3 %v3427_v47  ;;  %v3376_v14 = vld [vmem:[%s3830_s25 + $0x750] sm:$0xf0]  ;;  %v3251_v17 = vor.u32 %v3674_v11, %v3248_v12  ;;  %v3606_v18 = vld [vmem:[%s3830_s25 + $0x424] sm:$0xf]  ;;  %v2694_v47 = vld [vmem:[%s3830_s25 + $0x1e8] sm:$0xf] }
  0x89   : > { %1976 = vmatpush.bf16.msrb.mxu0 %v3027_v53  ;;  %v2976_v19 = vld [vmem:[%s3830_s25 + $0x430] sm:$0xf0]  ;;  %v3638_v20 = vld [vmem:[%s3830_s25 + $0x524] sm:$0xf]  ;;  %v3379_v23 = vor.u32 %v3706_v13, %v3376_v14  ;;  %v2695_v58 = vor.u32 %v3537_v49, %v2694_v47  ;;  %v2534_v10 = vld [vmem:[%s3830_s25 + $0xa8] sm:$0xf] }
  0x8a   : > { %v3104_v24 = vld [vmem:[%s3830_s25 + $0x530] sm:$0xf0]  ;;  %v3670_v25 = vld [vmem:[%s3830_s25 + $0x624] sm:$0xf]  ;;  %v2979_v29 = vor.u32 %v3606_v18, %v2976_v19  ;;  %v3497_v11 = vld [vmem:[%s3830_s25 + $0xb4] sm:$0xf0] }
  0x8b   : > { %1989 = vmatpush.bf16.msrb.mxu1 %v3155_v54  ;;  %2002 = vmatpush.bf16.msrb.mxu2 %v3283_v55  ;;  %v3232_v26 = vld [vmem:[%s3830_s25 + $0x630] sm:$0xf0]  ;;  %v3702_v27 = vld [vmem:[%s3830_s25 + $0x724] sm:$0xf]  ;;  %v3107_v32 = vor.u32 %v3638_v20, %v3104_v24  ;;  %v2950_v54 = vld [vmem:[%s3830_s25 + $0x3e8] sm:$0xf]  ;;  %v2535_v19 = vor.u32 %v3497_v11, %v2534_v10 }
  0x8c   : > { %2015 = vmatpush.bf16.msrb.mxu3 %v3411_v59  ;;  %v3360_v28 = vld [vmem:[%s3830_s25 + $0x730] sm:$0xf0]  ;;  %v3602_v30 = vld [vmem:[%s3830_s25 + $0x404] sm:$0xf]  ;;  %v3235_v33 = vor.u32 %v3670_v25, %v3232_v26  ;;  %v3601_v55 = vld [vmem:[%s3830_s25 + $0x3f4] sm:$0xf0]  ;;  %v2823_v59 = vor.u32 %v3569_v51, %v2822_v50 }
  0x8d   : > { %1977 = vmatpush.bf16.msrb.mxu0 %v3011_v1  ;;  %v2960_v31 = vld [vmem:[%s3830_s25 + $0x410] sm:$0xf0]  ;;  %v3634_v34 = vld [vmem:[%s3830_s25 + $0x504] sm:$0xf]  ;;  %v3363_v37 = vor.u32 %v3702_v27, %v3360_v28  ;;  %v2951_v63 = vor.u32 %v3601_v55, %v2950_v54  ;;  %v2806_v1 = vld [vmem:[%s3830_s25 + $0x2c8] sm:$0xf] }
  0x8e   : > { %v3088_v35 = vld [vmem:[%s3830_s25 + $0x510] sm:$0xf0]  ;;  %v3666_v36 = vld [vmem:[%s3830_s25 + $0x604] sm:$0xf]  ;;  %v2963_v48 = vor.u32 %v3602_v30, %v2960_v31  ;;  %v2662_v12 = vld [vmem:[%s3830_s25 + $0x1a8] sm:$0xf] }
  0x8f   : > { %1990 = vmatpush.bf16.msrb.mxu1 %v3139_v2  ;;  %2003 = vmatpush.bf16.msrb.mxu2 %v3267_v3  ;;  %v3216_v38 = vld [vmem:[%s3830_s25 + $0x610] sm:$0xf0]  ;;  %v3698_v40 = vld [vmem:[%s3830_s25 + $0x704] sm:$0xf]  ;;  %v3091_v52 = vor.u32 %v3634_v34, %v3088_v35  ;;  %v3565_v2 = vld [vmem:[%s3830_s25 + $0x2d4] sm:$0xf0] }
  0x90   : > { %2016 = vmatpush.bf16.msrb.mxu3 %v3395_v9  ;;  %v3344_v41 = vld [vmem:[%s3830_s25 + $0x710] sm:$0xf0]  ;;  %v3219_v53 = vor.u32 %v3666_v36, %v3216_v38  ;;  %v2934_v3 = vld [vmem:[%s3830_s25 + $0x3c8] sm:$0xf]  ;;  %v2807_v9 = vor.u32 %v3565_v2, %v2806_v1  ;;  %v3529_v14 = vld [vmem:[%s3830_s25 + $0x1b4] sm:$0xf0] }
  0x91   : > { %1978 = vmatpush.bf16.msrb.mxu0 %v2995_v15  ;;  %v3347_v56 = vor.u32 %v3698_v40, %v3344_v41  ;;  %v2935_v13 = vor.u32 %v3597_v4, %v2934_v3  ;;  %v2790_v15 = vld [vmem:[%s3830_s25 + $0x2a8] sm:$0xf]  ;;  %v3593_v18 = vld [vmem:[%s3830_s25 + $0x3b4] sm:$0xf0]  ;;  %v2663_v20 = vor.u32 %v3529_v14, %v2662_v12 }
  0x92   : > { %v2518_v24 = vld [vmem:[%s3830_s25 + $0x88] sm:$0xf]  ;;  %v3493_v25 = vld [vmem:[%s3830_s25 + $0x94] sm:$0xf0] }
  0x93   : > { %1991 = vmatpush.bf16.msrb.mxu1 %v3123_v16  ;;  %2004 = vmatpush.bf16.msrb.mxu2 %v3251_v17  ;;  %v3561_v16 = vld [vmem:[%s3830_s25 + $0x2b4] sm:$0xf0]  ;;  %v2918_v17 = vld [vmem:[%s3830_s25 + $0x3a8] sm:$0xf] }
  0x94   : > { %2017 = vmatpush.bf16.msrb.mxu3 %v3379_v23  ;;  %v2791_v23 = vor.u32 %v3561_v16, %v2790_v15  ;;  %v2646_v26 = vld [vmem:[%s3830_s25 + $0x188] sm:$0xf]  ;;  %v2919_v27 = vor.u32 %v3593_v18, %v2918_v17  ;;  %v3525_v28 = vld [vmem:[%s3830_s25 + $0x194] sm:$0xf0] }
  0x95   : > { %1979 = vmatpush.bf16.msrb.mxu0 %v2979_v29  ;;  %v2774_v29 = vld [vmem:[%s3830_s25 + $0x288] sm:$0xf]  ;;  %v3557_v30 = vld [vmem:[%s3830_s25 + $0x294] sm:$0xf0]  ;;  %v2647_v34 = vor.u32 %v3525_v28, %v2646_v26 }
  0x96   : > { %v2902_v31 = vld [vmem:[%s3830_s25 + $0x388] sm:$0xf]  ;;  %v2775_v35 = vor.u32 %v3557_v30, %v2774_v29  ;;  %v3521_v41 = vld [vmem:[%s3830_s25 + $0x174] sm:$0xf0] }
  0x97   : > { %1992 = vmatpush.bf16.msrb.mxu1 %v3107_v32  ;;  %2005 = vmatpush.bf16.msrb.mxu2 %v3235_v33  ;;  %v3589_v32 = vld [vmem:[%s3830_s25 + $0x394] sm:$0xf0]  ;;  %v2519_v33 = vor.u32 %v3493_v25, %v2518_v24  ;;  %v2502_v36 = vld [vmem:[%s3830_s25 + $0x68] sm:$0xf] }
  0x98   : > { %2018 = vmatpush.bf16.msrb.mxu3 %v3363_v37  ;;  %v3489_v37 = vld [vmem:[%s3830_s25 + $0x74] sm:$0xf0]  ;;  %v2630_v38 = vld [vmem:[%s3830_s25 + $0x168] sm:$0xf]  ;;  %v2903_v40 = vor.u32 %v3589_v32, %v2902_v31 }
  0x99   : > { %1980 = vmatpush.bf16.msrb.mxu0 %v2963_v48  ;;  %v2758_v44 = vld [vmem:[%s3830_s25 + $0x268] sm:$0xf]  ;;  %v3553_v46 = vld [vmem:[%s3830_s25 + $0x274] sm:$0xf0]  ;;  %v2503_v49 = vor.u32 %v3489_v37, %v2502_v36  ;;  %v2631_v50 = vor.u32 %v3521_v41, %v2630_v38 }
  0x9a   : > { %v2886_v47 = vld [vmem:[%s3830_s25 + $0x368] sm:$0xf]  ;;  %v3585_v48 = vld [vmem:[%s3830_s25 + $0x374] sm:$0xf0]  ;;  %v2759_v51 = vor.u32 %v3553_v46, %v2758_v44 }
  0x9b   : > { %1993 = vmatpush.bf16.msrb.mxu1 %v3091_v52  ;;  %2006 = vmatpush.bf16.msrb.mxu2 %v3219_v53  ;;  %v2486_v52 = vld [vmem:[%s3830_s25 + $0x48] sm:$0xf]  ;;  %v3485_v53 = vld [vmem:[%s3830_s25 + $0x54] sm:$0xf0]  ;;  %v2887_v55 = vor.u32 %v3585_v48, %v2886_v47 }
  0x9c   : > { %2019 = vmatpush.bf16.msrb.mxu3 %v3347_v56  ;;  %1981 = vmatmul.bf16.vlgmr.msrb.gmra.mxu0 %v3995_v42  ;;  %v2614_v54 = vld [vmem:[%s3830_s25 + $0x148] sm:$0xf]  ;;  %v3517_v56 = vld [vmem:[%s3830_s25 + $0x154] sm:$0xf0]  ;;  %v2487_v61 = vor.u32 %v3485_v53, %v2486_v52 }
  0x9d   : > { %2025 = vmatpush.bf16.msra.mxu0 %v2567_v57  ;;  %v2742_v57 = vld [vmem:[%s3830_s25 + $0x248] sm:$0xf]  ;;  %v3581_v60 = vld [vmem:[%s3830_s25 + $0x354] sm:$0xf0]  ;;  %v2615_v62 = vor.u32 %v3517_v56, %v2614_v54 }
  0x9e   : > { %2007 = vmatmul.bf16.vlgmr.msrb.gmra.mxu2 %v3991_v39  ;;  %1994 = vmatmul.bf16.vlgmr.msrb.gmra.mxu1 %v3999_v45  ;;  %v2470_v0 = vld [vmem:[%s3830_s25 + $0x28] sm:$0xf]  ;;  %v3481_v1 = vld [vmem:[%s3830_s25 + $0x34] sm:$0xf0] }
  0x9f   : > { %2038 = vmatpush.bf16.msra.mxu1 %v2695_v58  ;;  %2051 = vmatpush.bf16.msra.mxu2 %v2823_v59  ;;  %v3549_v58 = vld [vmem:[%s3830_s25 + $0x254] sm:$0xf0]  ;;  %v2870_v59 = vld [vmem:[%s3830_s25 + $0x348] sm:$0xf]  ;;  %v2471_v11 = vor.u32 %v3481_v1, %v2470_v0 }
  0xa0   : > { %2064 = vmatpush.bf16.msra.mxu3 %v2951_v63  ;;  %v2743_v63 = vor.u32 %v3549_v58, %v2742_v57  ;;  %v2598_v2 = vld [vmem:[%s3830_s25 + $0x128] sm:$0xf]  ;;  %v2871_v3 = vor.u32 %v3581_v60, %v2870_v59  ;;  %v3513_v4 = vld [vmem:[%s3830_s25 + $0x134] sm:$0xf0] }
  0xa1   : > { %2020 = vmatmul.bf16.vlgmr.msrb.gmra.mxu3 %v3997_v43  ;;  %2026 = vmatpush.bf16.msra.mxu0 %v2551_v6  ;;  %v2726_v6 = vld [vmem:[%s3830_s25 + $0x228] sm:$0xf]  ;;  %v3577_v10 = vld [vmem:[%s3830_s25 + $0x334] sm:$0xf0]  ;;  %v2599_v14 = vor.u32 %v3513_v4, %v2598_v2 }
  0xa2   : > { %v2454_v12 = vld [vmem:[%s3830_s25 + $0x8] sm:$0xf]  ;;  %v3509_v17 = vld [vmem:[%s3830_s25 + $0x114] sm:$0xf0] }
  0xa3   : > { %2039 = vmatpush.bf16.msra.mxu1 %v2679_v8  ;;  %2052 = vmatpush.bf16.msra.mxu2 %v2807_v9  ;;  %v3545_v8 = vld [vmem:[%s3830_s25 + $0x234] sm:$0xf0]  ;;  %v2854_v9 = vld [vmem:[%s3830_s25 + $0x328] sm:$0xf] }
  0xa4   : > { %2065 = vmatpush.bf16.msra.mxu3 %v2935_v13  ;;  %v3477_v13 = vld [vmem:[%s3830_s25 + $0x14] sm:$0xf0]  ;;  %v2727_v15 = vor.u32 %v3545_v8, %v2726_v6  ;;  %v2582_v16 = vld [vmem:[%s3830_s25 + $0x108] sm:$0xf] }
  0xa5   : > { %2027 = vmatpush.bf16.msra.mxu0 %v2535_v19  ;;  %v2710_v18 = vld [vmem:[%s3830_s25 + $0x208] sm:$0xf]  ;;  %v2855_v19 = vor.u32 %v3577_v10, %v2854_v9  ;;  %v3573_v24 = vld [vmem:[%s3830_s25 + $0x314] sm:$0xf0]  ;;  %v2455_v28 = vor.u32 %v3477_v13, %v2454_v12  ;;  %v2583_v32 = vor.u32 %v3509_v17, %v2582_v16 }
  0xa6   : > { %v3078_v25 = vld [vmem:[%s3830_s25 + $0x4e8] sm:$0xf]  ;;  %v3633_v26 = vld [vmem:[%s3830_s25 + $0x4f4] sm:$0xf0] }
  0xa7   : > { %2040 = vmatpush.bf16.msra.mxu1 %v2663_v20  ;;  %2053 = vmatpush.bf16.msra.mxu2 %v2791_v23  ;;  %v3541_v20 = vld [vmem:[%s3830_s25 + $0x214] sm:$0xf0]  ;;  %v2838_v23 = vld [vmem:[%s3830_s25 + $0x308] sm:$0xf]  ;;  %v3079_v37 = vor.u32 %v3633_v26, %v3078_v25 }
  0xa8   : > { %2066 = vmatpush.bf16.msra.mxu3 %v2919_v27  ;;  %v3206_v27 = vld [vmem:[%s3830_s25 + $0x5e8] sm:$0xf]  ;;  %v3665_v29 = vld [vmem:[%s3830_s25 + $0x5f4] sm:$0xf0]  ;;  %v2839_v36 = vor.u32 %v3573_v24, %v2838_v23 }
  0xa9   : > { %2028 = vmatpush.bf16.msra.mxu0 %v2519_v33  ;;  %v3334_v30 = vld [vmem:[%s3830_s25 + $0x6e8] sm:$0xf]  ;;  %v3697_v31 = vld [vmem:[%s3830_s25 + $0x6f4] sm:$0xf0]  ;;  %v2711_v33 = vor.u32 %v3541_v20, %v2710_v18  ;;  %v3207_v38 = vor.u32 %v3665_v29, %v3206_v27 }
  0xaa   : > { %v3062_v41 = vld [vmem:[%s3830_s25 + $0x4c8] sm:$0xf]  ;;  %v3629_v44 = vld [vmem:[%s3830_s25 + $0x4d4] sm:$0xf0] }
  0xab   : > { %2041 = vmatpush.bf16.msra.mxu1 %v2647_v34  ;;  %2054 = vmatpush.bf16.msra.mxu2 %v2775_v35  ;;  %v3462_v34 = vld [vmem:[%s3830_s25 + $0x7e8] sm:$0xf]  ;;  %v3729_v35 = vld [vmem:[%s3830_s25 + $0x7f4] sm:$0xf0]  ;;  %v3063_v53 = vor.u32 %v3629_v44, %v3062_v41 }
  0xac   : > { %2067 = vmatpush.bf16.msra.mxu3 %v2903_v40  ;;  %v3335_v40 = vor.u32 %v3697_v31, %v3334_v30  ;;  %v3190_v46 = vld [vmem:[%s3830_s25 + $0x5c8] sm:$0xf]  ;;  %v3463_v47 = vor.u32 %v3729_v35, %v3462_v34  ;;  %v3661_v48 = vld [vmem:[%s3830_s25 + $0x5d4] sm:$0xf0] }
  0xad   : > { %2029 = vmatpush.bf16.msra.mxu0 %v2503_v49  ;;  %v3318_v49 = vld [vmem:[%s3830_s25 + $0x6c8] sm:$0xf]  ;;  %v3725_v52 = vld [vmem:[%s3830_s25 + $0x7d4] sm:$0xf0]  ;;  %v3191_v54 = vor.u32 %v3661_v48, %v3190_v46 }
  0xae   : > { %v3046_v56 = vld [vmem:[%s3830_s25 + $0x4a8] sm:$0xf]  ;;  %v3625_v57 = vld [vmem:[%s3830_s25 + $0x4b4] sm:$0xf0] }
  0xaf   : > { %2042 = vmatpush.bf16.msra.mxu1 %v2631_v50  ;;  %2055 = vmatpush.bf16.msra.mxu2 %v2759_v51  ;;  %v3693_v50 = vld [vmem:[%s3830_s25 + $0x6d4] sm:$0xf0]  ;;  %v3446_v51 = vld [vmem:[%s3830_s25 + $0x7c8] sm:$0xf]  ;;  %v3047_v1 = vor.u32 %v3625_v57, %v3046_v56 }
  0xb0   : > { %2068 = vmatpush.bf16.msra.mxu3 %v2887_v55  ;;  %v3319_v55 = vor.u32 %v3693_v50, %v3318_v49  ;;  %v3174_v58 = vld [vmem:[%s3830_s25 + $0x5a8] sm:$0xf]  ;;  %v3447_v59 = vor.u32 %v3725_v52, %v3446_v51  ;;  %v3657_v60 = vld [vmem:[%s3830_s25 + $0x5b4] sm:$0xf0] }
  0xb1   : > { %2030 = vmatpush.bf16.msra.mxu0 %v2487_v61  ;;  %v3302_v61 = vld [vmem:[%s3830_s25 + $0x6a8] sm:$0xf]  ;;  %v3721_v0 = vld [vmem:[%s3830_s25 + $0x7b4] sm:$0xf0]  ;;  %v3175_v2 = vor.u32 %v3657_v60, %v3174_v58 }
  0xb2   : > { %v3030_v4 = vld [vmem:[%s3830_s25 + $0x488] sm:$0xf]  ;;  %v3621_v6 = vld [vmem:[%s3830_s25 + $0x494] sm:$0xf0] }
  0xb3   : > { %2043 = vmatpush.bf16.msra.mxu1 %v2615_v62  ;;  %2056 = vmatpush.bf16.msra.mxu2 %v2743_v63  ;;  %v3689_v62 = vld [vmem:[%s3830_s25 + $0x6b4] sm:$0xf0]  ;;  %v3430_v63 = vld [vmem:[%s3830_s25 + $0x7a8] sm:$0xf] }
  0xb4   : > { %2069 = vmatpush.bf16.msra.mxu3 %v2871_v3  ;;  %v3303_v3 = vor.u32 %v3689_v62, %v3302_v61  ;;  %v3158_v8 = vld [vmem:[%s3830_s25 + $0x588] sm:$0xf]  ;;  %v3431_v9 = vor.u32 %v3721_v0, %v3430_v63  ;;  %v3653_v10 = vld [vmem:[%s3830_s25 + $0x594] sm:$0xf0] }
  0xb5   : > { %2031 = vmatpush.bf16.msra.mxu0 %v2471_v11  ;;  %v3286_v11 = vld [vmem:[%s3830_s25 + $0x688] sm:$0xf]  ;;  %v3685_v12 = vld [vmem:[%s3830_s25 + $0x694] sm:$0xf0]  ;;  %v3159_v16 = vor.u32 %v3653_v10, %v3158_v8 }
  0xb6   : > { %v3414_v13 = vld [vmem:[%s3830_s25 + $0x788] sm:$0xf]  ;;  %v3287_v17 = vor.u32 %v3685_v12, %v3286_v11  ;;  %v3649_v24 = vld [vmem:[%s3830_s25 + $0x574] sm:$0xf0]  ;;  %v3503_v11 = vld [vmem:[%s3830_s25 + $0xec] sm:$0xf] }
  0xb7   : > { %2044 = vmatpush.bf16.msra.mxu1 %v2599_v14  ;;  %2057 = vmatpush.bf16.msra.mxu2 %v2727_v15  ;;  %v3717_v14 = vld [vmem:[%s3830_s25 + $0x794] sm:$0xf0]  ;;  %v3031_v15 = vor.u32 %v3621_v6, %v3030_v4  ;;  %v3014_v18 = vld [vmem:[%s3830_s25 + $0x468] sm:$0xf]  ;;  %v2568_v12 = vld [vmem:[%s3830_s25 + $0xf8] sm:$0xf0] }
  0xb8   : > { %2070 = vmatpush.bf16.msra.mxu3 %v2855_v19  ;;  %v3617_v19 = vld [vmem:[%s3830_s25 + $0x474] sm:$0xf0]  ;;  %v3142_v20 = vld [vmem:[%s3830_s25 + $0x568] sm:$0xf]  ;;  %v3415_v23 = vor.u32 %v3717_v14, %v3414_v13  ;;  %v3535_v13 = vld [vmem:[%s3830_s25 + $0x1ec] sm:$0xf] }
  0xb9   : > { %2032 = vmatpush.bf16.msra.mxu0 %v2455_v28  ;;  %v3270_v25 = vld [vmem:[%s3830_s25 + $0x668] sm:$0xf]  ;;  %v3681_v26 = vld [vmem:[%s3830_s25 + $0x674] sm:$0xf0]  ;;  %v3015_v29 = vor.u32 %v3617_v19, %v3014_v18  ;;  %v3143_v30 = vor.u32 %v3649_v24, %v3142_v20  ;;  %v2824_v18 = vld [vmem:[%s3830_s25 + $0x2f8] sm:$0xf0] }
  0xba   : > { %v3398_v27 = vld [vmem:[%s3830_s25 + $0x768] sm:$0xf]  ;;  %v3713_v28 = vld [vmem:[%s3830_s25 + $0x774] sm:$0xf0]  ;;  %v3271_v31 = vor.u32 %v3681_v26, %v3270_v25  ;;  %v3599_v24 = vld [vmem:[%s3830_s25 + $0x3ec] sm:$0xf] }
  0xbb   : > { %2045 = vmatpush.bf16.msra.mxu1 %v2583_v32  ;;  %2058 = vmatpush.bf16.msra.mxu2 %v2711_v33  ;;  %v2998_v32 = vld [vmem:[%s3830_s25 + $0x448] sm:$0xf]  ;;  %v3613_v33 = vld [vmem:[%s3830_s25 + $0x454] sm:$0xf0]  ;;  %v3399_v35 = vor.u32 %v3713_v28, %v3398_v27  ;;  %v2952_v25 = vld [vmem:[%s3830_s25 + $0x3f8] sm:$0xf0]  ;;  %v2571_v28 = vor.u32 %v3503_v11, %v2568_v12 }
  0xbc   : > { %2071 = vmatpush.bf16.msra.mxu3 %v2839_v36  ;;  %2033 = vmatmul.bf16.vlgmr.msra.gmra.mxu0 %v3936_v21  ;;  %v3126_v34 = vld [vmem:[%s3830_s25 + $0x548] sm:$0xf]  ;;  %v3645_v36 = vld [vmem:[%s3830_s25 + $0x554] sm:$0xf0]  ;;  %v2999_v46 = vor.u32 %v3613_v33, %v2998_v32  ;;  %v3499_v33 = vld [vmem:[%s3830_s25 + $0xcc] sm:$0xf] }
  0xbd   : > { %2077 = vmatpush.bf16.msrb.mxu0 %v3079_v37  ;;  %v3254_v37 = vld [vmem:[%s3830_s25 + $0x648] sm:$0xf]  ;;  %v3709_v41 = vld [vmem:[%s3830_s25 + $0x754] sm:$0xf0]  ;;  %v3127_v48 = vor.u32 %v3645_v36, %v3126_v34  ;;  %v2552_v34 = vld [vmem:[%s3830_s25 + $0xd8] sm:$0xf0]  ;;  %v2955_v36 = vor.u32 %v3599_v24, %v2952_v25 }
  0xbe   : > { %2059 = vmatmul.bf16.vlgmr.msra.gmra.mxu2 %v3922_v5  ;;  %2046 = vmatmul.bf16.vlgmr.msra.gmra.mxu1 %v3939_v22  ;;  %v2982_v50 = vld [vmem:[%s3830_s25 + $0x428] sm:$0xf]  ;;  %v3609_v51 = vld [vmem:[%s3830_s25 + $0x434] sm:$0xf0]  ;;  %v2760_v24 = vld [vmem:[%s3830_s25 + $0x278] sm:$0xf0] }
  0xbf   : > { %2090 = vmatpush.bf16.msrb.mxu1 %v3207_v38  ;;  %2103 = vmatpush.bf16.msrb.mxu2 %v3335_v40  ;;  %v3677_v38 = vld [vmem:[%s3830_s25 + $0x654] sm:$0xf0]  ;;  %v3382_v40 = vld [vmem:[%s3830_s25 + $0x748] sm:$0xf]  ;;  %v2983_v61 = vor.u32 %v3609_v51, %v2982_v50  ;;  %v3495_v50 = vld [vmem:[%s3830_s25 + $0xac] sm:$0xf] }
  0xc0   : > { %2116 = vmatpush.bf16.msrb.mxu3 %v3463_v47  ;;  %v3255_v49 = vor.u32 %v3677_v38, %v3254_v37  ;;  %v3110_v52 = vld [vmem:[%s3830_s25 + $0x528] sm:$0xf]  ;;  %v3673_v57 = vld [vmem:[%s3830_s25 + $0x634] sm:$0xf0]  ;;  %v2680_v37 = vld [vmem:[%s3830_s25 + $0x1d8] sm:$0xf0] }
  0xc1   : > { %2072 = vmatmul.bf16.vlgmr.msra.gmra.mxu3 %v3925_v7  ;;  %2078 = vmatpush.bf16.msrb.mxu0 %v3063_v53  ;;  %v4244_v53 = vpop.f32.mrf.mxu2  ;;  %v3238_v56 = vld [vmem:[%s3830_s25 + $0x628] sm:$0xf]  ;;  %v4249_v58 = vpop.f32.mrf.mxu3  ;;  %v3705_v60 = vld [vmem:[%s3830_s25 + $0x734] sm:$0xf0]  ;;  %v3563_v38 = vld [vmem:[%s3830_s25 + $0x2cc] sm:$0xf] }
  0xc2   : > { %v2966_v62 = vld [vmem:[%s3830_s25 + $0x408] sm:$0xf]  ;;  %v3605_v63 = vld [vmem:[%s3830_s25 + $0x414] sm:$0xf0]  ;;  %v2536_v51 = vld [vmem:[%s3830_s25 + $0xb8] sm:$0xf0] }
  0xc3   : > { %2091 = vmatpush.bf16.msrb.mxu1 %v3191_v54  ;;  %2104 = vmatpush.bf16.msrb.mxu2 %v3319_v55  ;;  %v3383_v54 = vor.u32 %v3709_v41, %v3382_v40  ;;  %v3641_v55 = vld [vmem:[%s3830_s25 + $0x534] sm:$0xf0]  ;;  %v3222_v4 = vld [vmem:[%s3830_s25 + $0x608] sm:$0xf]  ;;  %v2808_v40 = vld [vmem:[%s3830_s25 + $0x2d8] sm:$0xf0] }
  0xc4   : > { %2117 = vmatpush.bf16.msrb.mxu3 %v3447_v59  ;;  %v3366_v59 = vld [vmem:[%s3830_s25 + $0x728] sm:$0xf]  ;;  %v3111_v0 = vor.u32 %v3641_v55, %v3110_v52  ;;  %v3669_v8 = vld [vmem:[%s3830_s25 + $0x614] sm:$0xf0]  ;;  %v3595_v41 = vld [vmem:[%s3830_s25 + $0x3cc] sm:$0xf] }
  0xc5   : > { %2079 = vmatpush.bf16.msrb.mxu0 %v3047_v1  ;;  %v3239_v1 = vor.u32 %v3673_v57, %v3238_v56  ;;  %v3367_v6 = vor.u32 %v3705_v60, %v3366_v59  ;;  %v3701_v10 = vld [vmem:[%s3830_s25 + $0x714] sm:$0xf0]  ;;  %v3527_v52 = vld [vmem:[%s3830_s25 + $0x1ac] sm:$0xf]  ;;  %v2664_v55 = vld [vmem:[%s3830_s25 + $0x1b8] sm:$0xf0]  ;;  %v2539_v60 = vor.u32 %v3495_v50, %v2536_v51 }
  0xc6   : > { %v3559_v56 = vld [vmem:[%s3830_s25 + $0x2ac] sm:$0xf]  ;;  %v2792_v57 = vld [vmem:[%s3830_s25 + $0x2b8] sm:$0xf0] }
  0xc7   : > { %2092 = vmatpush.bf16.msrb.mxu1 %v3175_v2  ;;  %2105 = vmatpush.bf16.msrb.mxu2 %v3303_v3  ;;  %v1826_v44 = vpop.f32.mrf.mxu0  ;;  %v1839_v47 = vpop.f32.mrf.mxu1  ;;  %v3094_v2 = vld [vmem:[%s3830_s25 + $0x508] sm:$0xf]  ;;  %v3637_v3 = vld [vmem:[%s3830_s25 + $0x514] sm:$0xf0]  ;;  %v3591_v59 = vld [vmem:[%s3830_s25 + $0x3ac] sm:$0xf] }
  0xc8   : > { %2118 = vmatpush.bf16.msrb.mxu3 %v3431_v9  ;;  %v3350_v9 = vld [vmem:[%s3830_s25 + $0x708] sm:$0xf]  ;;  %v3095_v20 = vor.u32 %v3637_v3, %v3094_v2  ;;  %v1840_v32 = vadd.f32 %v1839_v47, %v1826_v44  ;;  %v2555_v44 = vor.u32 %v3499_v33, %v2552_v34  ;;  %v3523_v2 = vld [vmem:[%s3830_s25 + $0x18c] sm:$0xf] }
  0xc9   : > { %2080 = vmatpush.bf16.msrb.mxu0 %v3031_v15  ;;  %v2967_v15 = vor.u32 %v3605_v63, %v2966_v62  ;;  %v1854_v26 = vpop.f32.mrf.mxu2  ;;  %v3351_v27 = vor.u32 %v3701_v10, %v3350_v9  ;;  %v2667_v62 = vor.u32 %v3527_v52, %v2664_v55  ;;  %v2795_v63 = vor.u32 %v3559_v56, %v2792_v57  ;;  %v3587_v9 = vld [vmem:[%s3830_s25 + $0x38c] sm:$0xf]  ;;  %v2904_v10 = vld [vmem:[%s3830_s25 + $0x398] sm:$0xf0] }
  0xca   : > { %v3583_v25 = vld [vmem:[%s3830_s25 + $0x36c] sm:$0xf]  ;;  %v2888_v26 = vld [vmem:[%s3830_s25 + $0x378] sm:$0xf0] }
  0xcb   : > { %2093 = vmatpush.bf16.msrb.mxu1 %v3159_v16  ;;  %2106 = vmatpush.bf16.msrb.mxu2 %v3287_v17  ;;  %v2696_v16 = vld [vmem:[%s3830_s25 + $0x1f8] sm:$0xf0]  ;;  %v3567_v17 = vld [vmem:[%s3830_s25 + $0x2ec] sm:$0xf] }
  0xcc   : > { %2119 = vmatpush.bf16.msrb.mxu3 %v3415_v23  ;;  %v3223_v23 = vor.u32 %v3669_v8, %v3222_v4  ;;  %v2648_v4 = vld [vmem:[%s3830_s25 + $0x198] sm:$0xf0]  ;;  %v3515_v33 = vld [vmem:[%s3830_s25 + $0x14c] sm:$0xf] }
  0xcd   : > { %2081 = vmatpush.bf16.msrb.mxu0 %v3015_v29  ;;  %v1867_v29 = vpop.f32.mrf.mxu3  ;;  %v2776_v8 = vld [vmem:[%s3830_s25 + $0x298] sm:$0xf0]  ;;  %v2651_v12 = vor.u32 %v3523_v2, %v2648_v4  ;;  %v3511_v56 = vld [vmem:[%s3830_s25 + $0x12c] sm:$0xf] }
  0xce   : > { %v2472_v55 = vld [vmem:[%s3830_s25 + $0x38] sm:$0xf0]  ;;  %v3475_v2 = vld [vmem:[%s3830_s25 + $0xc] sm:$0xf] }
  0xcf   : > { %2094 = vmatpush.bf16.msrb.mxu1 %v3143_v30  ;;  %2107 = vmatpush.bf16.msrb.mxu2 %v3271_v31  ;;  %v1828_v14 = vpop.f32.mrf.mxu0  ;;  %v1841_v19 = vpop.f32.mrf.mxu1  ;;  %v2699_v30 = vor.u32 %v3535_v13, %v2696_v16  ;;  %v2827_v31 = vor.u32 %v3567_v17, %v2824_v18  ;;  %v3519_v16 = vld [vmem:[%s3830_s25 + $0x16c] sm:$0xf] }
  0xd0   : > { %2120 = vmatpush.bf16.msrb.mxu3 %v3399_v35  ;;  %v3531_v35 = vld [vmem:[%s3830_s25 + $0x1cc] sm:$0xf]  ;;  %v2907_v19 = vor.u32 %v3587_v9, %v2904_v10  ;;  %v2584_v9 = vld [vmem:[%s3830_s25 + $0x118] sm:$0xf0] }
  0xd1   : > { %2082 = vmatpush.bf16.msrb.mxu0 %v2999_v46  ;;  %v2936_v46 = vld [vmem:[%s3830_s25 + $0x3d8] sm:$0xf0]  ;;  %v2683_v47 = vor.u32 %v3531_v35, %v2680_v37  ;;  %v3487_v14 = vld [vmem:[%s3830_s25 + $0x6c] sm:$0xf]  ;;  %v2891_v35 = vor.u32 %v3583_v25, %v2888_v26 }
  0xd2   : > { %v3547_v37 = vld [vmem:[%s3830_s25 + $0x24c] sm:$0xf] }
  0xd3   : > { %2095 = vmatpush.bf16.msrb.mxu1 %v3127_v48  ;;  %2108 = vmatpush.bf16.msrb.mxu2 %v3255_v49  ;;  %v2811_v48 = vor.u32 %v3563_v38, %v2808_v40  ;;  %v1853_v49 = vadd.f32 %v4244_v53, %v1840_v32  ;;  %v2920_v53 = vld [vmem:[%s3830_s25 + $0x3b8] sm:$0xf0]  ;;  %v3539_v10 = vld [vmem:[%s3830_s25 + $0x20c] sm:$0xf] }
  0xd4   : > { %2121 = vmatpush.bf16.msrb.mxu3 %v3383_v54  ;;  %v2939_v54 = vor.u32 %v3595_v41, %v2936_v46  ;;  %v2923_v3 = vor.u32 %v3591_v59, %v2920_v53  ;;  %v2488_v32 = vld [vmem:[%s3830_s25 + $0x58] sm:$0xf0]  ;;  %v3579_v46 = vld [vmem:[%s3830_s25 + $0x34c] sm:$0xf] }
  0xd5   : > { %2083 = vmatpush.bf16.msrb.mxu0 %v2983_v61  ;;  %v1866_v61 = vadd.f32 %v4249_v58, %v1853_v49  ;;  %v2744_v38 = vld [vmem:[%s3830_s25 + $0x258] sm:$0xf0] }
  0xd6   : > { %v2747_v52 = vor.u32 %v3547_v37, %v2744_v38  ;;  %v3192_v37 = vld [vmem:[%s3830_s25 + $0x5d8] sm:$0xf0]  ;;  %v3691_v38 = vld [vmem:[%s3830_s25 + $0x6cc] sm:$0xf] }
  0xd7   : > { %2096 = vmatpush.bf16.msrb.mxu1 %v3111_v0  ;;  %2109 = vmatpush.bf16.msrb.mxu2 %v3239_v1  ;;  %v3491_v0 = vld [vmem:[%s3830_s25 + $0x8c] sm:$0xf]  ;;  %v2520_v1 = vld [vmem:[%s3830_s25 + $0x98] sm:$0xf0] }
  0xd8   : > { %2122 = vmatpush.bf16.msrb.mxu3 %v3367_v6  ;;  %v3555_v6 = vld [vmem:[%s3830_s25 + $0x28c] sm:$0xf]  ;;  %v2523_v58 = vor.u32 %v3491_v0, %v2520_v1  ;;  %v2856_v0 = vld [vmem:[%s3830_s25 + $0x338] sm:$0xf0] }
  0xd9   : > { %2084 = vmatpush.bf16.msrb.mxu0 %v2967_v15  ;;  %v2779_v13 = vor.u32 %v3555_v6, %v2776_v8  ;;  %v2504_v15 = vld [vmem:[%s3830_s25 + $0x78] sm:$0xf0]  ;;  %v3507_v8 = vld [vmem:[%s3830_s25 + $0x10c] sm:$0xf] }
  0xda   : > { %v2587_v25 = vor.u32 %v3507_v8, %v2584_v9  ;;  %v3615_v9 = vld [vmem:[%s3830_s25 + $0x46c] sm:$0xf] }
  0xdb   : > { %2097 = vmatpush.bf16.msrb.mxu1 %v3095_v20  ;;  %2110 = vmatpush.bf16.msrb.mxu2 %v3223_v23  ;;  %v1878_v11 = vpop.f32.mrf.mxu0  ;;  %v2632_v20 = vld [vmem:[%s3830_s25 + $0x178] sm:$0xf0]  ;;  %v3551_v23 = vld [vmem:[%s3830_s25 + $0x26c] sm:$0xf] }
  0xdc   : > { %2123 = vmatpush.bf16.msrb.mxu3 %v3351_v27  ;;  %2085 = vmatmul.bf16.vlgmr.msrb.gmra.mxu0 %v3995_v42  ;;  %v1879_v17 = vadd.f32 %v1878_v11, %v1866_v61  ;;  %v2635_v29 = vor.u32 %v3519_v16, %v2632_v20  ;;  %v3543_v61 = vld [vmem:[%s3830_s25 + $0x22c] sm:$0xf]  ;;  %v3208_v20 = vld [vmem:[%s3830_s25 + $0x5f8] sm:$0xf0] }
  0xdd   : > { %2129 = vmatpush.bf16.msra.mxu0 %v2571_v28  ;;  %v1891_v18 = vpop.f32.mrf.mxu1  ;;  %v2507_v28 = vor.u32 %v3487_v14, %v2504_v15  ;;  %v2840_v14 = vld [vmem:[%s3830_s25 + $0x318] sm:$0xf0]  ;;  %v3631_v16 = vld [vmem:[%s3830_s25 + $0x4ec] sm:$0xf] }
  0xde   : > { %2111 = vmatmul.bf16.vlgmr.msrb.gmra.mxu2 %v3991_v39  ;;  %2098 = vmatmul.bf16.vlgmr.msrb.gmra.mxu1 %v3999_v45  ;;  %v1892_v27 = vadd.f32 %v1891_v18, %v1879_v17  ;;  %v3080_v17 = vld [vmem:[%s3830_s25 + $0x4f8] sm:$0xf0]  ;;  %v3663_v18 = vld [vmem:[%s3830_s25 + $0x5ec] sm:$0xf] }
  0xdf   : > { %2142 = vmatpush.bf16.msra.mxu1 %v2699_v30  ;;  %2155 = vmatpush.bf16.msra.mxu2 %v2827_v31  ;;  %v2763_v30 = vor.u32 %v3551_v23, %v2760_v24  ;;  %v3483_v31 = vld [vmem:[%s3830_s25 + $0x4c] sm:$0xf]  ;;  %v3336_v24 = vld [vmem:[%s3830_s25 + $0x6f8] sm:$0xf0] }
  0xe0   : > { %2168 = vmatpush.bf16.msra.mxu3 %v2955_v36  ;;  %v2616_v36 = vld [vmem:[%s3830_s25 + $0x158] sm:$0xf0]  ;;  %v3695_v23 = vld [vmem:[%s3830_s25 + $0x6ec] sm:$0xf] }
  0xe1   : > { %2124 = vmatmul.bf16.vlgmr.msrb.gmra.mxu3 %v3997_v43  ;;  %2130 = vmatpush.bf16.msra.mxu0 %v2555_v44  ;;  %v1904_v34 = vpop.f32.mrf.mxu2  ;;  %v2872_v44 = vld [vmem:[%s3830_s25 + $0x358] sm:$0xf0]  ;;  %v2619_v51 = vor.u32 %v3515_v33, %v2616_v36  ;;  %v3627_v33 = vld [vmem:[%s3830_s25 + $0x4cc] sm:$0xf] }
  0xe2   : > { %v1905_v40 = vadd.f32 %v1904_v34, %v1892_v27  ;;  %v2875_v59 = vor.u32 %v3579_v46, %v2872_v44  ;;  %v3727_v27 = vld [vmem:[%s3830_s25 + $0x7ec] sm:$0xf]  ;;  %v3064_v34 = vld [vmem:[%s3830_s25 + $0x4d8] sm:$0xf0] }
  0xe3   : > { %2143 = vmatpush.bf16.msra.mxu1 %v2683_v47  ;;  %2156 = vmatpush.bf16.msra.mxu2 %v2811_v48  ;;  %v245_v47 = vld [vmem:[#allocation2 + $0x10] sm:$0xff]  ;;  %v2491_v48 = vor.u32 %v3483_v31, %v2488_v32  ;;  %v1880_v50 = vpop.f32.mrf.mxu0  ;;  %v3211_v31 = vor.u32 %v3663_v18, %v3208_v20  ;;  %v3339_v32 = vor.u32 %v3695_v23, %v3336_v24  ;;  %v3448_v46 = vld [vmem:[%s3830_s25 + $0x7d8] sm:$0xf0]  ;;  %v3611_v23 = vld [vmem:[%s3830_s25 + $0x44c] sm:$0xf] }
  0xe4   : > { %2169 = vmatpush.bf16.msra.mxu3 %v2939_v54  ;;  %v1917_v41 = vpop.f32.mrf.mxu3  ;;  %v3479_v54 = vld [vmem:[%s3830_s25 + $0x2c] sm:$0xf]  ;;  %v3067_v44 = vor.u32 %v3627_v33, %v3064_v34  ;;  %v3048_v50 = vld [vmem:[%s3830_s25 + $0x4b8] sm:$0xf0] }
  0xe5   : > { %2131 = vmatpush.bf16.msra.mxu0 %v2539_v60  ;;  %v1918_v49 = vadd.f32 %v1917_v41, %v1905_v40  ;;  %v1893_v57 = vpop.f32.mrf.mxu1  ;;  %v2600_v60 = vld [vmem:[%s3830_s25 + $0x138] sm:$0xf0]  ;;  %v2475_v1 = vor.u32 %v3479_v54, %v2472_v55  ;;  %v3723_v41 = vld [vmem:[%s3830_s25 + $0x7cc] sm:$0xf] }
  0xe6   : > { %v2603_v4 = vor.u32 %v3511_v56, %v2600_v60  ;;  %v3320_v40 = vld [vmem:[%s3830_s25 + $0x6d8] sm:$0xf0]  ;;  %v3687_v55 = vld [vmem:[%s3830_s25 + $0x6ac] sm:$0xf] }
  0xe7   : > { %2144 = vmatpush.bf16.msra.mxu1 %v2667_v62  ;;  %2157 = vmatpush.bf16.msra.mxu2 %v2795_v63  ;;  %v2233_v53 = vadd.f32 %v1918_v49, %v245_v47  ;;  %v2728_v62 = vld [vmem:[%s3830_s25 + $0x238] sm:$0xf0]  ;;  %v3575_v63 = vld [vmem:[%s3830_s25 + $0x32c] sm:$0xf] }
  0xe8   : > { %2170 = vmatpush.bf16.msra.mxu3 %v2923_v3  ;;  %v2456_v3 = vld [vmem:[%s3830_s25 + $0x18] sm:$0xf0]  ;;  %v2731_v6 = vor.u32 %v3543_v61, %v2728_v62  ;;  %v2859_v11 = vor.u32 %v3575_v63, %v2856_v0  ;;  %v3623_v49 = vld [vmem:[%s3830_s25 + $0x4ac] sm:$0xf] }
  0xe9   : > { %2132 = vmatpush.bf16.msra.mxu0 %v2523_v58  ;;  %2237 = vst [vmem:[#allocation2 + $0x10] sm:$0xff] %v2233_v53  ;;  %v1906_v58 = vpop.f32.mrf.mxu2  ;;  %v3176_v54 = vld [vmem:[%s3830_s25 + $0x5b8] sm:$0xf0]  ;;  %v3719_v57 = vld [vmem:[%s3830_s25 + $0x7ac] sm:$0xf]  ;;  %v3051_v53 = vor.u32 %v3623_v49, %v3048_v50 }
  0xea   : > { %v3304_v56 = vld [vmem:[%s3830_s25 + $0x6b8] sm:$0xf0]  ;;  %v3619_v61 = vld [vmem:[%s3830_s25 + $0x48c] sm:$0xf] }
  0xeb   : > { %2145 = vmatpush.bf16.msra.mxu1 %v2651_v12  ;;  %2158 = vmatpush.bf16.msra.mxu2 %v2779_v13  ;;  %v2712_v12 = vld [vmem:[%s3830_s25 + $0x218] sm:$0xf0]  ;;  %v3571_v13 = vld [vmem:[%s3830_s25 + $0x30c] sm:$0xf]  ;;  %v3307_v60 = vor.u32 %v3687_v55, %v3304_v56 }
  0xec   : > { %2171 = vmatpush.bf16.msra.mxu3 %v2907_v19  ;;  %v1919_v15 = vpop.f32.mrf.mxu3  ;;  %v2459_v19 = vor.u32 %v3475_v2, %v2456_v3  ;;  %v2715_v26 = vor.u32 %v3539_v10, %v2712_v12  ;;  %v3032_v62 = vld [vmem:[%s3830_s25 + $0x498] sm:$0xf0]  ;;  %v3715_v2 = vld [vmem:[%s3830_s25 + $0x78c] sm:$0xf] }
  0xed   : > { %2133 = vmatpush.bf16.msra.mxu0 %v2507_v28  ;;  %v3464_v28 = vld [vmem:[%s3830_s25 + $0x7f8] sm:$0xf0]  ;;  %v3647_v58 = vld [vmem:[%s3830_s25 + $0x56c] sm:$0xf] }
  0xee   : > { %v3467_v36 = vor.u32 %v3727_v27, %v3464_v28  ;;  %v3160_v0 = vld [vmem:[%s3830_s25 + $0x598] sm:$0xf0]  ;;  %v3703_v50 = vld [vmem:[%s3830_s25 + $0x72c] sm:$0xf] }
  0xef   : > { %2146 = vmatpush.bf16.msra.mxu1 %v2635_v29  ;;  %2159 = vmatpush.bf16.msra.mxu2 %v2763_v30  ;;  %v2843_v29 = vor.u32 %v3571_v13, %v2840_v14  ;;  %v3083_v30 = vor.u32 %v3631_v16, %v3080_v17  ;;  %v3416_v3 = vld [vmem:[%s3830_s25 + $0x798] sm:$0xf0]  ;;  %v3679_v14 = vld [vmem:[%s3830_s25 + $0x66c] sm:$0xf] }
  0xf0   : > { %2172 = vmatpush.bf16.msra.mxu3 %v2891_v35  ;;  %v3659_v35 = vld [vmem:[%s3830_s25 + $0x5cc] sm:$0xf]  ;;  %v3016_v10 = vld [vmem:[%s3830_s25 + $0x478] sm:$0xf0]  ;;  %v3419_v12 = vor.u32 %v3715_v2, %v3416_v3 }
  0xf1   : > { %2134 = vmatpush.bf16.msra.mxu0 %v2491_v48  ;;  %v3195_v47 = vor.u32 %v3659_v35, %v3192_v37  ;;  %v3323_v48 = vor.u32 %v3691_v38, %v3320_v40  ;;  %v3144_v13 = vld [vmem:[%s3830_s25 + $0x578] sm:$0xf0]  ;;  %v3711_v16 = vld [vmem:[%s3830_s25 + $0x76c] sm:$0xf]  ;;  %v3019_v18 = vor.u32 %v3615_v9, %v3016_v10 }
  0xf2   : > { %v3272_v15 = vld [vmem:[%s3830_s25 + $0x678] sm:$0xf0]  ;;  %v3607_v38 = vld [vmem:[%s3830_s25 + $0x42c] sm:$0xf] }
  0xf3   : > { %2147 = vmatpush.bf16.msra.mxu1 %v2619_v51  ;;  %2160 = vmatpush.bf16.msra.mxu2 %v2747_v52  ;;  %v3655_v51 = vld [vmem:[%s3830_s25 + $0x5ac] sm:$0xf]  ;;  %v3451_v52 = vor.u32 %v3723_v41, %v3448_v46  ;;  %v3400_v17 = vld [vmem:[%s3830_s25 + $0x778] sm:$0xf0]  ;;  %v3275_v20 = vor.u32 %v3679_v14, %v3272_v15  ;;  %v246_v14 = vld [vmem:[#allocation2] sm:$0xff] }
  0xf4   : > { %2173 = vmatpush.bf16.msra.mxu3 %v2875_v59  ;;  %v3432_v59 = vld [vmem:[%s3830_s25 + $0x7b8] sm:$0xf0]  ;;  %v3403_v27 = vor.u32 %v3711_v16, %v3400_v17  ;;  %v3639_v41 = vld [vmem:[%s3830_s25 + $0x52c] sm:$0xf] }
  0xf5   : > { %2135 = vmatpush.bf16.msra.mxu0 %v2475_v1  ;;  %v3435_v63 = vor.u32 %v3719_v57, %v3432_v59  ;;  %v3288_v1 = vld [vmem:[%s3830_s25 + $0x698] sm:$0xf0]  ;;  %v3603_v56 = vld [vmem:[%s3830_s25 + $0x40c] sm:$0xf] }
  0xf6   : > { %v3000_v24 = vld [vmem:[%s3830_s25 + $0x458] sm:$0xf0]  ;;  %v3635_v59 = vld [vmem:[%s3830_s25 + $0x50c] sm:$0xf] }
  0xf7   : > { %2148 = vmatpush.bf16.msra.mxu1 %v2603_v4  ;;  %2161 = vmatpush.bf16.msra.mxu2 %v2731_v6  ;;  %v3128_v28 = vld [vmem:[%s3830_s25 + $0x558] sm:$0xf0]  ;;  %v3003_v34 = vor.u32 %v3611_v23, %v3000_v24 }
  0xf8   : > { %2174 = vmatpush.bf16.msra.mxu3 %v2859_v11  ;;  %v3384_v33 = vld [vmem:[%s3830_s25 + $0x758] sm:$0xf0] }
  0xf9   : > { %2136 = vmatpush.bf16.msra.mxu0 %v2459_v19  ;;  %v4367_v4 = vpop.f32.mrf.mxu0  ;;  %v3147_v19 = vor.u32 %v3647_v58, %v3144_v13  ;;  %v2984_v40 = vld [vmem:[%s3830_s25 + $0x438] sm:$0xf0] }
  0xfa   : > { %v3240_v49 = vld [vmem:[%s3830_s25 + $0x638] sm:$0xf0] }
  0xfb   : > { %2149 = vmatpush.bf16.msra.mxu1 %v2587_v25  ;;  %2162 = vmatpush.bf16.msra.mxu2 %v2715_v26  ;;  %v4372_v11 = vpop.f32.mrf.mxu1  ;;  %v3643_v25 = vld [vmem:[%s3830_s25 + $0x54c] sm:$0xf]  ;;  %v2968_v57 = vld [vmem:[%s3830_s25 + $0x418] sm:$0xf0] }
  0xfc   : > { %2175 = vmatpush.bf16.msra.mxu3 %v2843_v29  ;;  %2137 = vmatmul.bf16.vlgmr.msra.gmra.mxu0 %v3936_v21  ;;  %v3683_v21 = vld [vmem:[%s3830_s25 + $0x68c] sm:$0xf] }
  0xfd   : > { %2181 = vmatpush.bf16.msrb.mxu0 %v3083_v30  ;;  %v3291_v8 = vor.u32 %v3683_v21, %v3288_v1  ;;  %v3675_v29 = vld [vmem:[%s3830_s25 + $0x64c] sm:$0xf]  ;;  %v3256_v30 = vld [vmem:[%s3830_s25 + $0x658] sm:$0xf0]  ;;  %v2971_v21 = vor.u32 %v3603_v56, %v2968_v57 }
  0xfe   : > { %2163 = vmatmul.bf16.vlgmr.msra.gmra.mxu2 %v3922_v5  ;;  %2150 = vmatmul.bf16.vlgmr.msra.gmra.mxu1 %v3939_v22  ;;  %v3179_v5 = vor.u32 %v3655_v51, %v3176_v54  ;;  %v3035_v22 = vor.u32 %v3619_v61, %v3032_v62  ;;  %v3259_v37 = vor.u32 %v3675_v29, %v3256_v30  ;;  %v3368_v51 = vld [vmem:[%s3830_s25 + $0x738] sm:$0xf0]  ;;  %v3667_v61 = vld [vmem:[%s3830_s25 + $0x60c] sm:$0xf] }
  0xff   : > { %2194 = vmatpush.bf16.msrb.mxu1 %v3211_v31  ;;  %2207 = vmatpush.bf16.msrb.mxu2 %v3339_v32  ;;  %v3707_v32 = vld [vmem:[%s3830_s25 + $0x74c] sm:$0xf]  ;;  %v3224_v62 = vld [vmem:[%s3830_s25 + $0x618] sm:$0xf0] }
 0x100   : > { %2220 = vmatpush.bf16.msrb.mxu3 %v3467_v36  ;;  %v3131_v36 = vor.u32 %v3643_v25, %v3128_v28  ;;  %v3227_v2 = vor.u32 %v3667_v61, %v3224_v62 }
 0x101   : > { %2176 = vmatmul.bf16.vlgmr.msra.gmra.mxu3 %v3925_v7  ;;  %2182 = vmatpush.bf16.msrb.mxu0 %v3067_v44  ;;  %v3651_v7 = vld [vmem:[%s3830_s25 + $0x58c] sm:$0xf]  ;;  %v1956_v26 = vpop.f32.mrf.mxu2  ;;  %v1932_v35 = vpop.f32.mrf.mxu0  ;;  %v3387_v44 = vor.u32 %v3707_v32, %v3384_v33 }
 0x102   : > { %v3163_v6 = vor.u32 %v3651_v7, %v3160_v0  ;;  %v3352_v0 = vld [vmem:[%s3830_s25 + $0x718] sm:$0xf0] }
 0x103   : > { %2195 = vmatpush.bf16.msrb.mxu1 %v3195_v47  ;;  %2208 = vmatpush.bf16.msrb.mxu2 %v3323_v48  ;;  %v1945_v46 = vpop.f32.mrf.mxu1  ;;  %v3112_v47 = vld [vmem:[%s3830_s25 + $0x538] sm:$0xf0]  ;;  %v3671_v48 = vld [vmem:[%s3830_s25 + $0x62c] sm:$0xf] }
 0x104   : > { %2221 = vmatpush.bf16.msrb.mxu3 %v3451_v52  ;;  %v1969_v31 = vpop.f32.mrf.mxu3  ;;  %v2987_v52 = vor.u32 %v3607_v38, %v2984_v40  ;;  %v3115_v54 = vor.u32 %v3639_v41, %v3112_v47  ;;  %v3243_v55 = vor.u32 %v3671_v48, %v3240_v49 }
 0x105   : > { %2183 = vmatpush.bf16.msrb.mxu0 %v3051_v53 }
 0x107   : > { %2196 = vmatpush.bf16.msrb.mxu1 %v3179_v5  ;;  %2209 = vmatpush.bf16.msrb.mxu2 %v3307_v60  ;;  %v3371_v5 = vor.u32 %v3703_v50, %v3368_v51  ;;  %v3096_v60 = vld [vmem:[%s3830_s25 + $0x518] sm:$0xf0] }
 0x108   : > { %2222 = vmatpush.bf16.msrb.mxu3 %v3435_v63  ;;  %v3699_v63 = vld [vmem:[%s3830_s25 + $0x70c] sm:$0xf]  ;;  %v3099_v1 = vor.u32 %v3635_v59, %v3096_v60 }
 0x109   : > { %2184 = vmatpush.bf16.msrb.mxu0 %v3035_v22  ;;  %v1958_v53 = vpop.f32.mrf.mxu2  ;;  %v3355_v3 = vor.u32 %v3699_v63, %v3352_v0  ;;  %v1944_v22 = vadd.f32 %v4372_v11, %v4367_v4 }
 0x10b   : > { %2197 = vmatpush.bf16.msrb.mxu1 %v3163_v6  ;;  %2210 = vmatpush.bf16.msrb.mxu2 %v3291_v8  ;;  %v1957_v6 = vadd.f32 %v1956_v26, %v1944_v22 }
 0x10c   : > { %2223 = vmatpush.bf16.msrb.mxu3 %v3419_v12  ;;  %v1971_v7 = vpop.f32.mrf.mxu3 }
 0x10d   : > { %2185 = vmatpush.bf16.msrb.mxu0 %v3019_v18  ;;  %v1970_v8 = vadd.f32 %v1969_v31, %v1957_v6 }
 0x10f   : > { %2198 = vmatpush.bf16.msrb.mxu1 %v3147_v19  ;;  %2211 = vmatpush.bf16.msrb.mxu2 %v3275_v20 }
 0x110   : > { %2224 = vmatpush.bf16.msrb.mxu3 %v3403_v27 }
 0x111   : > { %2186 = vmatpush.bf16.msrb.mxu0 %v3003_v34 }
 0x113   : > { %2199 = vmatpush.bf16.msrb.mxu1 %v3131_v36  ;;  %2212 = vmatpush.bf16.msrb.mxu2 %v3259_v37  ;;  %v247_v37 = vld [vmem:[#allocation2 + $0x18] sm:$0xff] }
 0x114   : > { %2225 = vmatpush.bf16.msrb.mxu3 %v3387_v44 }
 0x115   : > { %2187 = vmatpush.bf16.msrb.mxu0 %v2987_v52 }
 0x117   : > { %2200 = vmatpush.bf16.msrb.mxu1 %v3115_v54  ;;  %2213 = vmatpush.bf16.msrb.mxu2 %v3243_v55 }
 0x118   : > { %2226 = vmatpush.bf16.msrb.mxu3 %v3371_v5 }
 0x119   : > { %2188 = vmatpush.bf16.msrb.mxu0 %v2971_v21  ;;  %v1982_v9 = vpop.f32.mrf.mxu0 }
 0x11a   : > { %v1983_v10 = vadd.f32 %v1982_v9, %v1970_v8 }
 0x11b   : > { %2201 = vmatpush.bf16.msrb.mxu1 %v3099_v1  ;;  %2214 = vmatpush.bf16.msrb.mxu2 %v3227_v2  ;;  %v1995_v58 = vpop.f32.mrf.mxu1  ;;  %v248_v1 = vld [vmem:[#allocation2 + $0x8] sm:$0xff] }
 0x11c   : > { %2227 = vmatpush.bf16.msrb.mxu3 %v3355_v3  ;;  %2189 = vmatmul.bf16.vlgmr.msrb.gmra.mxu0 %v3995_v42  ;;  %v1996_v12 = vadd.f32 %v1995_v58, %v1983_v10 }
 0x11e   : > { %2202 = vmatmul.bf16.vlgmr.msrb.gmra.mxu1 %v3999_v45  ;;  %2215 = vmatmul.bf16.vlgmr.msrb.gmra.mxu2 %v3991_v39 }
 0x11f   : > { %2228 = vmatmul.bf16.vlgmr.msrb.gmra.mxu3 %v3997_v43 }
 0x121   : > { %v2008_v13 = vpop.f32.mrf.mxu2  ;;  %v1984_v16 = vpop.f32.mrf.mxu0 }
 0x122   : > { %v2009_v4 = vadd.f32 %v2008_v13, %v1996_v12 }
 0x123   : > { %v1997_v17 = vpop.f32.mrf.mxu1 }
 0x124   : > { %v2021_v11 = vpop.f32.mrf.mxu3 }
 0x125   : > { %v2022_v15 = vadd.f32 %v2021_v11, %v2009_v4 }
 0x127   : > { %v2234_v42 = vadd.f32 %v2022_v15, %v246_v14 }
 0x129   : > { %2238 = vst [vmem:[#allocation2] sm:$0xff] %v2234_v42  ;;  %v2010_v18 = vpop.f32.mrf.mxu2 }
 0x12c   : > { %v2023_v45 = vpop.f32.mrf.mxu3 }
 0x139   : > { %v2034_v19 = vpop.f32.mrf.mxu0 }
 0x13b   : > { %v2047_v39 = vpop.f32.mrf.mxu1 }
 0x13c   : > { %v2048_v27 = vadd.f32 %v2047_v39, %v2034_v19 }
 0x141   : > { %v2060_v20 = vpop.f32.mrf.mxu2  ;;  %v2036_v23 = vpop.f32.mrf.mxu0 }
 0x142   : > { %v2061_v28 = vadd.f32 %v2060_v20, %v2048_v27 }
 0x143   : > { %v2049_v24 = vpop.f32.mrf.mxu1 }
 0x144   : > { %v2073_v43 = vpop.f32.mrf.mxu3 }
 0x145   : > { %v2074_v29 = vadd.f32 %v2073_v43, %v2061_v28 }
 0x149   : > { %v2062_v25 = vpop.f32.mrf.mxu2 }
 0x14c   : > { %v2075_v26 = vpop.f32.mrf.mxu3 }
 0x159   : > { %v2086_v30 = vpop.f32.mrf.mxu0 }
 0x15a   : > { %v2087_v31 = vadd.f32 %v2086_v30, %v2074_v29 }
 0x15b   : > { %v2099_v32 = vpop.f32.mrf.mxu1 }
 0x15c   : > { %v2100_v33 = vadd.f32 %v2099_v32, %v2087_v31 }
 0x161   : > { %v2112_v34 = vpop.f32.mrf.mxu2  ;;  %v2088_v40 = vpop.f32.mrf.mxu0 }
 0x162   : > { %v2113_v35 = vadd.f32 %v2112_v34, %v2100_v33 }
 0x163   : > { %v2101_v41 = vpop.f32.mrf.mxu1 }
 0x164   : > { %v2125_v36 = vpop.f32.mrf.mxu3 }
 0x165   : > { %v2126_v38 = vadd.f32 %v2125_v36, %v2113_v35 }
 0x167   : > { %v2235_v46 = vadd.f32 %v2126_v38, %v247_v37 }
 0x169   : > { %2239 = vst [vmem:[#allocation2 + $0x18] sm:$0xff] %v2235_v46  ;;  %v2114_v44 = vpop.f32.mrf.mxu2 }
 0x16c   : > { %v2127_v47 = vpop.f32.mrf.mxu3 }
 0x179   : > { %v2138_v48 = vpop.f32.mrf.mxu0 }
 0x17b   : > { %v2151_v49 = vpop.f32.mrf.mxu1 }
 0x17c   : > { %v2152_v57 = vadd.f32 %v2151_v49, %v2138_v48 }
 0x181   : > { %v2164_v50 = vpop.f32.mrf.mxu2  ;;  %v2140_v52 = vpop.f32.mrf.mxu0 }
 0x182   : > { %v2165_v59 = vadd.f32 %v2164_v50, %v2152_v57 }
 0x183   : > { %v2153_v54 = vpop.f32.mrf.mxu1 }
 0x184   : > { %v2177_v51 = vpop.f32.mrf.mxu3 }
 0x185   : > { %v2178_v53 = vadd.f32 %v2177_v51, %v2165_v59 }
 0x189   : > { %v2166_v55 = vpop.f32.mrf.mxu2 }
 0x18c   : > { %v2179_v56 = vpop.f32.mrf.mxu3 }
 0x199   : > { %v2190_v5 = vpop.f32.mrf.mxu0 }
 0x19a   : > { %v2191_v61 = vadd.f32 %v2190_v5, %v2178_v53 }
 0x19b   : > { %v2203_v60 = vpop.f32.mrf.mxu1 }
 0x19c   : > { %v2204_v62 = vadd.f32 %v2203_v60, %v2191_v61 }
 0x1a1   : > { %v2216_v7 = vpop.f32.mrf.mxu2  ;;  %v2192_v21 = vpop.f32.mrf.mxu0 }
 0x1a2   : > { %v2217_v63 = vadd.f32 %v2216_v7, %v2204_v62  ;;  %v2229_v0 = vpop.f32.mrf.mxu3 }
 0x1a3   : > { %v2205_v2 = vpop.f32.mrf.mxu1 }
 0x1a4   : > { %v2230_v3 = vadd.f32 %v2229_v0, %v2217_v63 }
 0x1a6   : > { %v2236_v22 = vadd.f32 %v2230_v3, %v248_v1  ;;  %2244 = sbr.rel (%p3468_p7) target bundleno = 452 (0x1c4), region = 36 }
 0x1a8   : > { %2240 = vst [vmem:[#allocation2 + $0x8] sm:$0xff] %v2236_v22 }
 0x1a9   : > { %v2218_v6 = vpop.f32.mrf.mxu2 }
 0x1aa   : > { %v2231_v8 = vpop.f32.mrf.mxu3 }
 0x1ab   : > { %v2245_v9 = vld [vmem:[#allocation2 + $0x10] sm:$0xff]  ;;  %v2246_v10 = vld [vmem:[#allocation2] sm:$0xff]  ;;  %v2247_v58 = vld [vmem:[#allocation2 + $0x18] sm:$0xff]  ;;  %vm2305_vm0 = vcmask 1040384   ;;  %vm2317_vm1 = vcmask 1041408   ;;  %vm2319_vm2 = vcmask 1045508  }
 0x1ac   : > { %v2249_v12 = vpack.c.bf16 %v2246_v10, %v2245_v9  ;;  %v2253_v13 = vrot.slane %v2245_v9, 4  ;;  %v2259_v4 = vrot.slane %v2246_v10, 4  ;;  %v2277_v11 = vmul.f32 %v2245_v9, %v2245_v9 }
 0x1ad   : > { %v2278_v15 = vmul.f32 %v2246_v10, %v2246_v10  ;;  %v2265_v17 = vrot.slane %v2247_v58, 4  ;;  %v2279_v39 = vmul.f32 %v2247_v58, %v2247_v58  ;;  %vm2321_vm3 = vcmask 1043456  }
 0x1ae   : > { %2251 = vst [vmem:[%s4430_s2] sm:$0xff] %v2249_v12  ;;  %v2254_v18 = vadd.f32 %v2253_v13, %v2245_v9  ;;  %v2260_v45 = vadd.f32 %v2259_v4, %v2246_v10  ;;  %v2281_v19 = vrot.slane %v2277_v11, 4 }
 0x1af   : > { %v2248_v14 = vld [vmem:[#allocation2 + $0x8] sm:$0xff]  ;;  %v2287_v20 = vrot.slane %v2278_v15, 4  ;;  %v2266_v43 = vadd.f32 %v2265_v17, %v2247_v58  ;;  %v2293_v28 = vrot.slane %v2279_v39, 4 }
 0x1b0   : > { %v2250_v16 = vpack.c.bf16 %v2248_v14, %v2247_v58  ;;  %v2271_v42 = vrot.slane %v2248_v14, 4  ;;  %v2280_v24 = vmul.f32 %v2248_v14, %v2248_v14  ;;  %v2255_v25 = vrot.slane %v2254_v18, 2 }
 0x1b1   : > { %v2261_v26 = vrot.slane %v2260_v45, 2  ;;  %v2282_v27 = vadd.f32 %v2281_v19, %v2277_v11  ;;  %v2288_v29 = vadd.f32 %v2287_v20, %v2278_v15  ;;  %v2267_v30 = vrot.slane %v2266_v43, 2 }
 0x1b2   : > { %2252 = vst [vmem:[%s4430_s2 + $0x8] sm:$0xff] %v2250_v16  ;;  %v2272_v23 = vadd.f32 %v2271_v42, %v2248_v14  ;;  %v2299_v32 = vrot.slane %v2280_v24, 4  ;;  %v2256_v33 = vadd.f32 %v2255_v25, %v2254_v18  ;;  %v2294_v36 = vadd.f32 %v2293_v28, %v2279_v39 }
 0x1b3   : > { %v2262_v34 = vadd.f32 %v2261_v26, %v2260_v45  ;;  %v2283_v35 = vrot.slane %v2282_v27, 2  ;;  %v2289_v37 = vrot.slane %v2288_v29, 2  ;;  %v2268_v38 = vadd.f32 %v2267_v30, %v2266_v43 }
 0x1b4   : > { %v2273_v31 = vrot.slane %v2272_v23, 2  ;;  %v2300_v41 = vadd.f32 %v2299_v32, %v2280_v24  ;;  %v2295_v44 = vrot.slane %v2294_v36, 2  ;;  %v2257_v47 = vrot.slane %v2256_v33, 1 }
 0x1b5   : > { %v2263_v46 = vrot.slane %v2262_v34, 1  ;;  %v2284_v48 = vadd.f32 %v2283_v35, %v2282_v27  ;;  %v2290_v49 = vadd.f32 %v2289_v37, %v2288_v29  ;;  %v2269_v50 = vrot.slane %v2268_v38, 1 }
 0x1b6   : > { %v2274_v40 = vadd.f32 %v2273_v31, %v2272_v23  ;;  %v2301_v52 = vrot.slane %v2300_v41, 2  ;;  %v2296_v54 = vadd.f32 %v2295_v44, %v2294_v36  ;;  %v2258_v57 = vadd.f32 %v2257_v47, %v2256_v33 }
 0x1b7   : > { %v2285_v55 = vrot.slane %v2284_v48, 1  ;;  %v2264_v59 = vadd.f32 %v2263_v46, %v2262_v34  ;;  %v2291_v53 = vrot.slane %v2290_v49, 1  ;;  %v2270_v5 = vadd.f32 %v2269_v50, %v2268_v38 }
 0x1b8   : > { %v2275_v51 = vrot.slane %v2274_v40, 1  ;;  %v2302_v56 = vadd.f32 %v2301_v52, %v2300_v41  ;;  %v2297_v61 = vrot.slane %v2296_v54, 1 }
 0x1b9   : > { %v2286_v60 = vadd.f32 %v2285_v55, %v2284_v48  ;;  %v2292_v7 = vadd.f32 %v2291_v53, %v2290_v49 }
 0x1ba   : > { %v2276_v62 = vadd.f32 %v2275_v51, %v2274_v40  ;;  %v2303_v63 = vrot.slane %v2302_v56, 1  ;;  %v2298_v0 = vadd.f32 %v2297_v61, %v2296_v54 }
 0x1bb   : > { %v2306_v1 = vsel %vm2305_vm0, %v2258_v57, %v2286_v60  ;;  %v2307_v2 = vsel %vm2305_vm0, %v2264_v59, %v2292_v7 }
 0x1bc   : > { %v2304_v21 = vadd.f32 %v2303_v63, %v2302_v56  ;;  %v2308_v3 = vsel %vm2305_vm0, %v2270_v5, %v2298_v0  ;;  %v2314_v22 = vrot.slane %v2307_v2, 6 }
 0x1bd   : > { %v2315_v8 = vrot.slane %v2308_v3, 4 }
 0x1be   : > { %v2309_v6 = vsel %vm2305_vm0, %v2276_v62, %v2304_v21  ;;  %v2318_v10 = vsel %vm2317_vm1, %v2306_v1, %v2314_v22 }
 0x1bf   : > { %v2316_v9 = vrot.slane %v2309_v6, 2 }
 0x1c1   : > { %v2320_v58 = vsel %vm2319_vm2, %v2315_v8, %v2316_v9 }
 0x1c2   : > { %v2322_v12 = vsel %vm2321_vm3, %v2318_v10, %v2320_v58 }
 0x1c3   : > { %2324 = vst [vmem:[%s4431_s3] sm:$0xff] %v2322_v12 }
 0x1c4 PF: > { %s14_s14 = sadd.s32 1, %s3777_s14   ;;  %s4432_s12 = smov %s3773_s13 }
 0x1c5   : > { %p11_p8 = scmp.ge.s32.totalorder %s14_s14, 6   ;;  %s4433_s13 = smov %s4435_s15 }
 0x1c7   :  { %13 = sbr.rel (!%p11_p8) target bundleno = 2 (0x2), region = 81 }

// kernel: discriminator_forward.15
= control target key start
LH: loop header
LB: loop body
LE: loop exit
PB: predicated region body
PF: predicated region fallthrough
CT: control target
= control target key end

     0   :  { %10 = vsyncpa [#allocation4], 0  ;;  %s2377_s18 = smov 0   ;;  %s2592_s0 = inlined_call_operand.vmem [shape: bf16[1,4096], index: 0, kind: input, shape index: {}]   ;;  %s2593_s1 = inlined_call_operand.vmem [shape: bf16[4096,128], index: 1, kind: input, shape index: {}]   ;;  %s2594_s2 = inlined_call_operand.vmem [shape: f32[1,128], index: 2, kind: input, shape index: {}]   ;;  %s2595_s3 = inlined_call_operand.vmem [shape: f32[128,128], index: 3, kind: input, shape index: {}]   ;;  %s2596_s4 = inlined_call_operand.vmem [shape: f32[1,128], index: 4, kind: input, shape index: {}]   ;;  %s2597_s5 = inlined_call_operand.hbm [shape: f32[1,128], index: 5, kind: output, shape index: {}]  }
   0x1 LB: > { %s2383_s19 = sadd.s32 4294967295, %s2343_s18   ;;  %p1634_p0 = scmp.ge.s32.totalorder %s2343_s18, 1  ;;  %s2343_s18 = sphi %s2377_s18, %s16_s18  }
   0x2   : > { %p194_p1 = scmp.lt.s32.totalorder %s2343_s18, 3 }
   0x4   : > { %p195_p2 = pnand %p1634_p0, %p194_p1 }
   0x5   : > { %s1635_s20 = sshll.u32 (!%p195_p2), %s2383_s19, 4  ;;  %s1636_s21 = sshll.u32 (!%p195_p2), %s2383_s19, 8 }
   0x6   : > { %198 = sbr.rel (%p195_p2) target bundleno = 485 (0x1e5), region = 40  ;;  %p222_p3 = scmp.lt.s32.totalorder (!%p195_p2), %s1635_s20, 31 }
   0x7   : > { %p227_p4 = scmp.lt.s32.totalorder (!%p195_p2), %s1636_s21, 511  ;;  %p1638_p5 = scmp.ne.s32.totalorder (!%p195_p2), %s2383_s19, 0 }
   0xb   : > { %s2599_s20 = smov (!%p222_p3, %s1635_s20), 31  ;;  %s2601_s21 = smov (!%p227_p4, %s1636_s21), 511 }
   0xc   : > { %s2392_s24 = scalar_lea.vmem %s2592_s0, %s2599_s20  ;;  %s1637_s25 = sshll.u32 %s2601_s21, 2 }
   0xd   : > { %s2397_s28 = scalar_lea.vmem %s2593_s1, %s1637_s25  ;;  %235 = sbr.rel (%p1638_p5) target bundleno = 20 (0x14), region = 44 }
  0x12   : > { %v2345_v0 = vmov 0.0  }
  0x13   : > { %236 = vst [vmem:[#allocation2] sm:$0x1] %v2345_v0 }
  0x14 PF: > { %v2164_v1 = vld [vmem:[%s2397_s28 + $0x38] sm:$0xff]  ;;  %v2163_v5 = vld [vmem:[%s2397_s28 + $0x30] sm:$0xff]  ;;  %v2162_v9 = vld [vmem:[%s2397_s28 + $0x28] sm:$0xff]  ;;  %p2151_p6 = scmp.ne.s32.totalorder %s2383_s19, 1 }
  0x15   : > { %v2172_v2 = vld [vmem:[%s2397_s28 + $0x78] sm:$0xff]  ;;  %1300 = vmatpush.bf16.msra.mxu0 %v2164_v1  ;;  %v2171_v6 = vld [vmem:[%s2397_s28 + $0x70] sm:$0xff]  ;;  %v2170_v10 = vld [vmem:[%s2397_s28 + $0x68] sm:$0xff] }
  0x16   : > { %v2180_v3 = vld [vmem:[%s2397_s28 + $0xb8] sm:$0xff]  ;;  %1313 = vmatpush.bf16.msra.mxu1 %v2172_v2  ;;  %v2179_v7 = vld [vmem:[%s2397_s28 + $0xb0] sm:$0xff]  ;;  %v2178_v11 = vld [vmem:[%s2397_s28 + $0xa8] sm:$0xff] }
  0x17   : > { %v2188_v4 = vld [vmem:[%s2397_s28 + $0xf8] sm:$0xff]  ;;  %1326 = vmatpush.bf16.msra.mxu2 %v2180_v3  ;;  %v2187_v8 = vld [vmem:[%s2397_s28 + $0xf0] sm:$0xff]  ;;  %v2186_v12 = vld [vmem:[%s2397_s28 + $0xe8] sm:$0xff] }
  0x18   : > { %1339 = vmatpush.bf16.msra.mxu3 %v2188_v4  ;;  %v2161_v13 = vld [vmem:[%s2397_s28 + $0x20] sm:$0xff]  ;;  %v2160_v17 = vld [vmem:[%s2397_s28 + $0x18] sm:$0xff]  ;;  %v2159_v22 = vld [vmem:[%s2397_s28 + $0x10] sm:$0xff] }
  0x19   : > { %1301 = vmatpush.bf16.msra.mxu0 %v2163_v5  ;;  %v2169_v14 = vld [vmem:[%s2397_s28 + $0x60] sm:$0xff]  ;;  %v2168_v18 = vld [vmem:[%s2397_s28 + $0x58] sm:$0xff]  ;;  %v2167_v23 = vld [vmem:[%s2397_s28 + $0x50] sm:$0xff] }
  0x1a   : > { %1314 = vmatpush.bf16.msra.mxu1 %v2171_v6  ;;  %v2177_v15 = vld [vmem:[%s2397_s28 + $0xa0] sm:$0xff]  ;;  %v2176_v19 = vld [vmem:[%s2397_s28 + $0x98] sm:$0xff]  ;;  %v2175_v24 = vld [vmem:[%s2397_s28 + $0x90] sm:$0xff] }
  0x1b   : > { %1327 = vmatpush.bf16.msra.mxu2 %v2179_v7  ;;  %v2185_v16 = vld [vmem:[%s2397_s28 + $0xe0] sm:$0xff]  ;;  %v2184_v20 = vld [vmem:[%s2397_s28 + $0xd8] sm:$0xff]  ;;  %v2183_v25 = vld [vmem:[%s2397_s28 + $0xd0] sm:$0xff] }
  0x1c   : > { %1340 = vmatpush.bf16.msra.mxu3 %v2187_v8  ;;  %v238_v21 = vld [vmem:[%s2392_s24] sm:$0xff]  ;;  %v2158_v26 = vld [vmem:[%s2397_s28 + $0x8] sm:$0xff]  ;;  %v2196_v34 = vld [vmem:[%s2397_s28 + $0x138] sm:$0xff] }
  0x1d   : > { %1302 = vmatpush.bf16.msra.mxu0 %v2162_v9  ;;  %497 = vst [vmem:[#allocation1] ss:$9 sm:$0xff] %v238_v21  ;;  %v2166_v27 = vld [vmem:[%s2397_s28 + $0x48] sm:$0xff]  ;;  %v2157_v30 = vld [vmem:[%s2397_s28] sm:$0xff]  ;;  %v2204_v35 = vld [vmem:[%s2397_s28 + $0x178] sm:$0xff] }
  0x1e   : > { %1315 = vmatpush.bf16.msra.mxu1 %v2170_v10  ;;  %v2174_v28 = vld [vmem:[%s2397_s28 + $0x88] sm:$0xff]  ;;  %v2165_v31 = vld [vmem:[%s2397_s28 + $0x40] sm:$0xff]  ;;  %v2212_v36 = vld [vmem:[%s2397_s28 + $0x1b8] sm:$0xff] }
  0x1f   : > { %1328 = vmatpush.bf16.msra.mxu2 %v2178_v11  ;;  %v2182_v29 = vld [vmem:[%s2397_s28 + $0xc8] sm:$0xff]  ;;  %v2173_v32 = vld [vmem:[%s2397_s28 + $0x80] sm:$0xff]  ;;  %v2220_v37 = vld [vmem:[%s2397_s28 + $0x1f8] sm:$0xff] }
  0x20   : > { %1341 = vmatpush.bf16.msra.mxu3 %v2186_v12  ;;  %v2181_v33 = vld [vmem:[%s2397_s28 + $0xc0] sm:$0xff]  ;;  %v2195_v38 = vld [vmem:[%s2397_s28 + $0x130] sm:$0xff]  ;;  %v2194_v46 = vld [vmem:[%s2397_s28 + $0x128] sm:$0xff] }
  0x21   : > { %1303 = vmatpush.bf16.msra.mxu0 %v2161_v13  ;;  %v2203_v41 = vld [vmem:[%s2397_s28 + $0x170] sm:$0xff]  ;;  %v2202_v47 = vld [vmem:[%s2397_s28 + $0x168] sm:$0xff]  ;;  %v2193_v55 = vld [vmem:[%s2397_s28 + $0x120] sm:$0xff] }
  0x22   : > { %1316 = vmatpush.bf16.msra.mxu1 %v2169_v14  ;;  %v2211_v44 = vld [vmem:[%s2397_s28 + $0x1b0] sm:$0xff]  ;;  %v2210_v48 = vld [vmem:[%s2397_s28 + $0x1a8] sm:$0xff]  ;;  %v2201_v56 = vld [vmem:[%s2397_s28 + $0x160] sm:$0xff] }
  0x23   : > { %1329 = vmatpush.bf16.msra.mxu2 %v2177_v15  ;;  %v2219_v45 = vld [vmem:[%s2397_s28 + $0x1f0] sm:$0xff]  ;;  %v2218_v49 = vld [vmem:[%s2397_s28 + $0x1e8] sm:$0xff]  ;;  %v2209_v57 = vld [vmem:[%s2397_s28 + $0x1a0] sm:$0xff] }
  0x24   : > { %1342 = vmatpush.bf16.msra.mxu3 %v2185_v16  ;;  %v500_v39 = vld [vmem:[#allocation1 + $0x12] sm:$0xff]  ;;  %v498_v40 = vld [vmem:[#allocation1] sm:$0xff]  ;;  %v499_v43 = vld [vmem:[#allocation1 + $0x9] sm:$0xff] }
  0x25   : > { %1304 = vmatpush.bf16.msra.mxu0 %v2160_v17  ;;  %v501_v42 = vld [vmem:[#allocation1 + $0x1b] sm:$0xff]  ;;  %v502_v51 = vld [vmem:[#allocation1 + $0x24] sm:$0xff]  ;;  %v503_v54 = vld [vmem:[#allocation1 + $0x2d] sm:$0xff] }
  0x26   : > { %1317 = vmatpush.bf16.msra.mxu1 %v2168_v18  ;;  %v504_v50 = vld [vmem:[#allocation1 + $0x36] sm:$0xff]  ;;  %v505_v52 = vld [vmem:[#allocation1 + $0x3f] sm:$0xff]  ;;  %v239_v53 = vld [vmem:[%s2392_s24 + $0x8] sm:$0xff] }
  0x27   : > { %1330 = vmatpush.bf16.msra.mxu2 %v2176_v19  ;;  %507 = vst [vmem:[#allocation1] ss:$9 sm:$0xff] %v239_v53  ;;  %v2217_v58 = vld [vmem:[%s2397_s28 + $0x1e0] sm:$0xff]  ;;  %v2192_v59 = vld [vmem:[%s2397_s28 + $0x118] sm:$0xff]  ;;  %v2191_v63 = vld [vmem:[%s2397_s28 + $0x110] sm:$0xff] }
  0x28   : > { %1343 = vmatpush.bf16.msra.mxu3 %v2184_v20  ;;  %v2200_v60 = vld [vmem:[%s2397_s28 + $0x158] sm:$0xff]  ;;  %v2199_v0 = vld [vmem:[%s2397_s28 + $0x150] sm:$0xff]  ;;  %v2190_v3 = vld [vmem:[%s2397_s28 + $0x108] sm:$0xff] }
  0x29   : > { %1305 = vmatpush.bf16.msra.mxu0 %v2159_v22  ;;  %v2208_v61 = vld [vmem:[%s2397_s28 + $0x198] sm:$0xff]  ;;  %v2207_v1 = vld [vmem:[%s2397_s28 + $0x190] sm:$0xff]  ;;  %v2198_v4 = vld [vmem:[%s2397_s28 + $0x148] sm:$0xff] }
  0x2a   : > { %1318 = vmatpush.bf16.msra.mxu1 %v2167_v23  ;;  %v2216_v62 = vld [vmem:[%s2397_s28 + $0x1d8] sm:$0xff]  ;;  %v2215_v2 = vld [vmem:[%s2397_s28 + $0x1d0] sm:$0xff]  ;;  %v2206_v5 = vld [vmem:[%s2397_s28 + $0x188] sm:$0xff] }
  0x2b   : > { %1331 = vmatpush.bf16.msra.mxu2 %v2175_v24  ;;  %v2214_v6 = vld [vmem:[%s2397_s28 + $0x1c8] sm:$0xff]  ;;  %v2189_v7 = vld [vmem:[%s2397_s28 + $0x100] sm:$0xff]  ;;  %v2228_v11 = vld [vmem:[%s2397_s28 + $0x238] sm:$0xff] }
  0x2c   : > { %1344 = vmatpush.bf16.msra.mxu3 %v2183_v25  ;;  %v2197_v8 = vld [vmem:[%s2397_s28 + $0x140] sm:$0xff]  ;;  %v2236_v12 = vld [vmem:[%s2397_s28 + $0x278] sm:$0xff]  ;;  %v2227_v15 = vld [vmem:[%s2397_s28 + $0x230] sm:$0xff] }
  0x2d   : > { %1306 = vmatpush.bf16.msra.mxu0 %v2158_v26  ;;  %v2205_v9 = vld [vmem:[%s2397_s28 + $0x180] sm:$0xff]  ;;  %v2244_v13 = vld [vmem:[%s2397_s28 + $0x2b8] sm:$0xff]  ;;  %v2235_v16 = vld [vmem:[%s2397_s28 + $0x270] sm:$0xff] }
  0x2e   : > { %1319 = vmatpush.bf16.msra.mxu1 %v2166_v27  ;;  %v2213_v10 = vld [vmem:[%s2397_s28 + $0x1c0] sm:$0xff]  ;;  %v2252_v14 = vld [vmem:[%s2397_s28 + $0x2f8] sm:$0xff]  ;;  %v2243_v17 = vld [vmem:[%s2397_s28 + $0x2b0] sm:$0xff] }
  0x2f   : > { %1332 = vmatpush.bf16.msra.mxu2 %v2174_v28  ;;  %v2251_v18 = vld [vmem:[%s2397_s28 + $0x2f0] sm:$0xff]  ;;  %v2226_v19 = vld [vmem:[%s2397_s28 + $0x228] sm:$0xff]  ;;  %v2225_v23 = vld [vmem:[%s2397_s28 + $0x220] sm:$0xff] }
  0x30   : > { %1345 = vmatpush.bf16.msra.mxu3 %v2182_v29  ;;  %v2234_v20 = vld [vmem:[%s2397_s28 + $0x268] sm:$0xff]  ;;  %v2233_v24 = vld [vmem:[%s2397_s28 + $0x260] sm:$0xff]  ;;  %v2224_v27 = vld [vmem:[%s2397_s28 + $0x218] sm:$0xff] }
  0x31   : > { %1307 = vmatpush.bf16.msra.mxu0 %v2157_v30  ;;  %v2242_v21 = vld [vmem:[%s2397_s28 + $0x2a8] sm:$0xff]  ;;  %v2241_v25 = vld [vmem:[%s2397_s28 + $0x2a0] sm:$0xff]  ;;  %v2232_v28 = vld [vmem:[%s2397_s28 + $0x258] sm:$0xff] }
  0x32   : > { %1320 = vmatpush.bf16.msra.mxu1 %v2165_v31  ;;  %v2250_v22 = vld [vmem:[%s2397_s28 + $0x2e8] sm:$0xff]  ;;  %v2249_v26 = vld [vmem:[%s2397_s28 + $0x2e0] sm:$0xff]  ;;  %v2240_v29 = vld [vmem:[%s2397_s28 + $0x298] sm:$0xff] }
  0x33   : > { %1333 = vmatpush.bf16.msra.mxu2 %v2173_v32  ;;  %v2248_v30 = vld [vmem:[%s2397_s28 + $0x2d8] sm:$0xff]  ;;  %v2223_v31 = vld [vmem:[%s2397_s28 + $0x210] sm:$0xff] }
  0x34   : > { %1346 = vmatpush.bf16.msra.mxu3 %v2181_v33  ;;  %1308 = vmatmul.bf16.vlgmr.msra.gmra.mxu0 %v498_v40  ;;  %v2231_v32 = vld [vmem:[%s2397_s28 + $0x250] sm:$0xff]  ;;  %v2229_v40 = vld [vmem:[%s2397_s28 + $0x240] sm:$0xff] }
  0x35   : > { %1352 = vmatpush.bf16.msrb.mxu0 %v2196_v34  ;;  %1321 = vmatmul.bf16.vlgmr.msra.gmra.mxu1 %v499_v43  ;;  %v2239_v33 = vld [vmem:[%s2397_s28 + $0x290] sm:$0xff]  ;;  %v2260_v43 = vld [vmem:[%s2397_s28 + $0x338] sm:$0xff] }
  0x36   : > { %1365 = vmatpush.bf16.msrb.mxu1 %v2204_v35  ;;  %1334 = vmatmul.bf16.vlgmr.msra.gmra.mxu2 %v500_v39  ;;  %v2247_v34 = vld [vmem:[%s2397_s28 + $0x2d0] sm:$0xff]  ;;  %v2222_v35 = vld [vmem:[%s2397_s28 + $0x208] sm:$0xff]  ;;  %v2221_v39 = vld [vmem:[%s2397_s28 + $0x200] sm:$0xff] }
  0x37   : > { %1378 = vmatpush.bf16.msrb.mxu2 %v2212_v36  ;;  %1347 = vmatmul.bf16.vlgmr.msra.gmra.mxu3 %v501_v42  ;;  %v2230_v36 = vld [vmem:[%s2397_s28 + $0x248] sm:$0xff]  ;;  %v2245_v42 = vld [vmem:[%s2397_s28 + $0x2c0] sm:$0xff]  ;;  %v2275_v53 = vld [vmem:[%s2397_s28 + $0x3b0] sm:$0xff] }
  0x38   : > { %1391 = vmatpush.bf16.msrb.mxu3 %v2220_v37  ;;  %v2238_v37 = vld [vmem:[%s2397_s28 + $0x288] sm:$0xff] }
  0x39   : > { %1353 = vmatpush.bf16.msrb.mxu0 %v2195_v38  ;;  %v2246_v38 = vld [vmem:[%s2397_s28 + $0x2c8] sm:$0xff] }
  0x3a   : > { %1366 = vmatpush.bf16.msrb.mxu1 %v2203_v41  ;;  %v2237_v41 = vld [vmem:[%s2397_s28 + $0x280] sm:$0xff] }
  0x3b   : > { %1379 = vmatpush.bf16.msrb.mxu2 %v2211_v44  ;;  %v2268_v44 = vld [vmem:[%s2397_s28 + $0x378] sm:$0xff] }
  0x3c   : > { %1392 = vmatpush.bf16.msrb.mxu3 %v2219_v45  ;;  %v2276_v45 = vld [vmem:[%s2397_s28 + $0x3b8] sm:$0xff] }
  0x3d   : > { %1354 = vmatpush.bf16.msrb.mxu0 %v2194_v46  ;;  %v2284_v46 = vld [vmem:[%s2397_s28 + $0x3f8] sm:$0xff] }
  0x3e   : > { %1367 = vmatpush.bf16.msrb.mxu1 %v2202_v47  ;;  %v508_v47 = vld [vmem:[#allocation1] sm:$0xff] }
  0x3f   : > { %1380 = vmatpush.bf16.msrb.mxu2 %v2210_v48  ;;  %v510_v48 = vld [vmem:[#allocation1 + $0x12] sm:$0xff] }
  0x40   : > { %1393 = vmatpush.bf16.msrb.mxu3 %v2218_v49  ;;  %v509_v49 = vld [vmem:[#allocation1 + $0x9] sm:$0xff] }
  0x41   : > { %1355 = vmatpush.bf16.msrb.mxu0 %v2193_v55  ;;  %v2258_v55 = vld [vmem:[%s2397_s28 + $0x328] sm:$0xff] }
  0x42   : > { %1368 = vmatpush.bf16.msrb.mxu1 %v2201_v56  ;;  %v2266_v56 = vld [vmem:[%s2397_s28 + $0x368] sm:$0xff] }
  0x43   : > { %1381 = vmatpush.bf16.msrb.mxu2 %v2209_v57  ;;  %v2274_v57 = vld [vmem:[%s2397_s28 + $0x3a8] sm:$0xff] }
  0x44   : > { %1394 = vmatpush.bf16.msrb.mxu3 %v2217_v58  ;;  %v2282_v58 = vld [vmem:[%s2397_s28 + $0x3e8] sm:$0xff] }
  0x45   : > { %1356 = vmatpush.bf16.msrb.mxu0 %v2192_v59  ;;  %v2257_v59 = vld [vmem:[%s2397_s28 + $0x320] sm:$0xff] }
  0x46   : > { %1369 = vmatpush.bf16.msrb.mxu1 %v2200_v60  ;;  %v2265_v60 = vld [vmem:[%s2397_s28 + $0x360] sm:$0xff] }
  0x47   : > { %1382 = vmatpush.bf16.msrb.mxu2 %v2208_v61  ;;  %v2273_v61 = vld [vmem:[%s2397_s28 + $0x3a0] sm:$0xff] }
  0x48   : > { %1395 = vmatpush.bf16.msrb.mxu3 %v2216_v62  ;;  %v2281_v62 = vld [vmem:[%s2397_s28 + $0x3e0] sm:$0xff] }
  0x49   : > { %1357 = vmatpush.bf16.msrb.mxu0 %v2191_v63  ;;  %v2256_v63 = vld [vmem:[%s2397_s28 + $0x318] sm:$0xff] }
  0x4a   : > { %1370 = vmatpush.bf16.msrb.mxu1 %v2199_v0  ;;  %v2264_v0 = vld [vmem:[%s2397_s28 + $0x358] sm:$0xff] }
  0x4b   : > { %1383 = vmatpush.bf16.msrb.mxu2 %v2207_v1  ;;  %v2272_v1 = vld [vmem:[%s2397_s28 + $0x398] sm:$0xff] }
  0x4c   : > { %1396 = vmatpush.bf16.msrb.mxu3 %v2215_v2  ;;  %v2280_v2 = vld [vmem:[%s2397_s28 + $0x3d8] sm:$0xff] }
  0x4d   : > { %1358 = vmatpush.bf16.msrb.mxu0 %v2190_v3  ;;  %v2255_v3 = vld [vmem:[%s2397_s28 + $0x310] sm:$0xff] }
  0x4e   : > { %1371 = vmatpush.bf16.msrb.mxu1 %v2198_v4  ;;  %v2263_v4 = vld [vmem:[%s2397_s28 + $0x350] sm:$0xff] }
  0x4f   : > { %1384 = vmatpush.bf16.msrb.mxu2 %v2206_v5  ;;  %v2271_v5 = vld [vmem:[%s2397_s28 + $0x390] sm:$0xff] }
  0x50   : > { %1397 = vmatpush.bf16.msrb.mxu3 %v2214_v6  ;;  %v2279_v6 = vld [vmem:[%s2397_s28 + $0x3d0] sm:$0xff] }
  0x51   : > { %1359 = vmatpush.bf16.msrb.mxu0 %v2189_v7  ;;  %v2254_v7 = vld [vmem:[%s2397_s28 + $0x308] sm:$0xff] }
  0x52   : > { %1372 = vmatpush.bf16.msrb.mxu1 %v2197_v8  ;;  %v2262_v8 = vld [vmem:[%s2397_s28 + $0x348] sm:$0xff] }
  0x53   : > { %1385 = vmatpush.bf16.msrb.mxu2 %v2205_v9  ;;  %v2270_v9 = vld [vmem:[%s2397_s28 + $0x388] sm:$0xff] }
  0x54   : > { %1398 = vmatpush.bf16.msrb.mxu3 %v2213_v10  ;;  %1360 = vmatmul.bf16.vlgmr.msrb.gmra.mxu0 %v502_v51  ;;  %v2259_v51 = vld [vmem:[%s2397_s28 + $0x330] sm:$0xff]  ;;  %v2278_v10 = vld [vmem:[%s2397_s28 + $0x3c8] sm:$0xff] }
  0x55   : > { %1404 = vmatpush.bf16.msra.mxu0 %v2228_v11  ;;  %1373 = vmatmul.bf16.vlgmr.msrb.gmra.mxu1 %v503_v54  ;;  %v2283_v54 = vld [vmem:[%s2397_s28 + $0x3f0] sm:$0xff]  ;;  %v2253_v11 = vld [vmem:[%s2397_s28 + $0x300] sm:$0xff] }
  0x56   : > { %1417 = vmatpush.bf16.msra.mxu1 %v2236_v12  ;;  %1386 = vmatmul.bf16.vlgmr.msrb.gmra.mxu2 %v504_v50  ;;  %v511_v50 = vld [vmem:[#allocation1 + $0x1b] sm:$0xff] }
  0x57   : > { %1430 = vmatpush.bf16.msra.mxu2 %v2244_v13  ;;  %1399 = vmatmul.bf16.vlgmr.msrb.gmra.mxu3 %v505_v52  ;;  %v2267_v52 = vld [vmem:[%s2397_s28 + $0x370] sm:$0xff]  ;;  %v2261_v12 = vld [vmem:[%s2397_s28 + $0x340] sm:$0xff] }
  0x58   : > { %1443 = vmatpush.bf16.msra.mxu3 %v2252_v14  ;;  %v2269_v13 = vld [vmem:[%s2397_s28 + $0x380] sm:$0xff] }
  0x59   : > { %1405 = vmatpush.bf16.msra.mxu0 %v2227_v15  ;;  %v2277_v14 = vld [vmem:[%s2397_s28 + $0x3c0] sm:$0xff] }
  0x5a   : > { %1418 = vmatpush.bf16.msra.mxu1 %v2235_v16  ;;  %v512_v15 = vld [vmem:[#allocation1 + $0x24] sm:$0xff]  ;;  %v513_v16 = vld [vmem:[#allocation1 + $0x2d] sm:$0xff] }
  0x5b   : > { %1431 = vmatpush.bf16.msra.mxu2 %v2243_v17  ;;  %v514_v17 = vld [vmem:[#allocation1 + $0x36] sm:$0xff] }
  0x5c   : > { %1444 = vmatpush.bf16.msra.mxu3 %v2251_v18  ;;  %v515_v18 = vld [vmem:[#allocation1 + $0x3f] sm:$0xff] }
  0x5d   : > { %1406 = vmatpush.bf16.msra.mxu0 %v2226_v19 }
  0x5e   : > { %1419 = vmatpush.bf16.msra.mxu1 %v2234_v20 }
  0x5f   : > { %1432 = vmatpush.bf16.msra.mxu2 %v2242_v21 }
  0x60   : > { %1445 = vmatpush.bf16.msra.mxu3 %v2250_v22 }
  0x61   : > { %1407 = vmatpush.bf16.msra.mxu0 %v2225_v23 }
  0x62   : > { %1420 = vmatpush.bf16.msra.mxu1 %v2233_v24 }
  0x63   : > { %1433 = vmatpush.bf16.msra.mxu2 %v2241_v25 }
  0x64   : > { %1446 = vmatpush.bf16.msra.mxu3 %v2249_v26 }
  0x65   : > { %1408 = vmatpush.bf16.msra.mxu0 %v2224_v27 }
  0x66   : > { %1421 = vmatpush.bf16.msra.mxu1 %v2232_v28 }
  0x67   : > { %1434 = vmatpush.bf16.msra.mxu2 %v2240_v29 }
  0x68   : > { %1447 = vmatpush.bf16.msra.mxu3 %v2248_v30 }
  0x69   : > { %1409 = vmatpush.bf16.msra.mxu0 %v2223_v31 }
  0x6a   : > { %1422 = vmatpush.bf16.msra.mxu1 %v2231_v32 }
  0x6b   : > { %1435 = vmatpush.bf16.msra.mxu2 %v2239_v33 }
  0x6c   : > { %1448 = vmatpush.bf16.msra.mxu3 %v2247_v34 }
  0x6d   : > { %1410 = vmatpush.bf16.msra.mxu0 %v2222_v35 }
  0x6e   : > { %1423 = vmatpush.bf16.msra.mxu1 %v2230_v36 }
  0x6f   : > { %1436 = vmatpush.bf16.msra.mxu2 %v2238_v37 }
  0x70   : > { %1449 = vmatpush.bf16.msra.mxu3 %v2246_v38 }
  0x71   : > { %1411 = vmatpush.bf16.msra.mxu0 %v2221_v39 }
  0x72   : > { %1424 = vmatpush.bf16.msra.mxu1 %v2229_v40 }
  0x73   : > { %1437 = vmatpush.bf16.msra.mxu2 %v2237_v41 }
  0x74   : > { %1450 = vmatpush.bf16.msra.mxu3 %v2245_v42  ;;  %1412 = vmatmul.bf16.vlgmr.msra.gmra.mxu0 %v508_v47 }
  0x75   : > { %1456 = vmatpush.bf16.msrb.mxu0 %v2260_v43  ;;  %1425 = vmatmul.bf16.vlgmr.msra.gmra.mxu1 %v509_v49 }
  0x76   : > { %1469 = vmatpush.bf16.msrb.mxu1 %v2268_v44  ;;  %1438 = vmatmul.bf16.vlgmr.msra.gmra.mxu2 %v510_v48 }
  0x77   : > { %1482 = vmatpush.bf16.msrb.mxu2 %v2276_v45  ;;  %1451 = vmatmul.bf16.vlgmr.msra.gmra.mxu3 %v511_v50 }
  0x78   : > { %1495 = vmatpush.bf16.msrb.mxu3 %v2284_v46 }
  0x79   : > { %1457 = vmatpush.bf16.msrb.mxu0 %v2259_v51 }
  0x7a   : > { %1470 = vmatpush.bf16.msrb.mxu1 %v2267_v52 }
  0x7b   : > { %1483 = vmatpush.bf16.msrb.mxu2 %v2275_v53 }
  0x7c   : > { %1496 = vmatpush.bf16.msrb.mxu3 %v2283_v54 }
  0x7d   : > { %1458 = vmatpush.bf16.msrb.mxu0 %v2258_v55 }
  0x7e   : > { %1471 = vmatpush.bf16.msrb.mxu1 %v2266_v56 }
  0x7f   : > { %1484 = vmatpush.bf16.msrb.mxu2 %v2274_v57 }
  0x80   : > { %1497 = vmatpush.bf16.msrb.mxu3 %v2282_v58 }
  0x81   : > { %1459 = vmatpush.bf16.msrb.mxu0 %v2257_v59 }
  0x82   : > { %1472 = vmatpush.bf16.msrb.mxu1 %v2265_v60 }
  0x83   : > { %1485 = vmatpush.bf16.msrb.mxu2 %v2273_v61 }
  0x84   : > { %1498 = vmatpush.bf16.msrb.mxu3 %v2281_v62 }
  0x85   : > { %1460 = vmatpush.bf16.msrb.mxu0 %v2256_v63  ;;  %v237_v63 = vld [vmem:[#allocation2] sm:$0x1] }
  0x86   : > { %1473 = vmatpush.bf16.msrb.mxu1 %v2264_v0 }
  0x87   : > { %1486 = vmatpush.bf16.msrb.mxu2 %v2272_v1 }
  0x88   : > { %1499 = vmatpush.bf16.msrb.mxu3 %v2280_v2 }
  0x89   : > { %1461 = vmatpush.bf16.msrb.mxu0 %v2255_v3 }
  0x8a   : > { %1474 = vmatpush.bf16.msrb.mxu1 %v2263_v4 }
  0x8b   : > { %1487 = vmatpush.bf16.msrb.mxu2 %v2271_v5 }
  0x8c   : > { %1500 = vmatpush.bf16.msrb.mxu3 %v2279_v6 }
  0x8d   : > { %1462 = vmatpush.bf16.msrb.mxu0 %v2254_v7 }
  0x8e   : > { %1475 = vmatpush.bf16.msrb.mxu1 %v2262_v8 }
  0x8f   : > { %1488 = vmatpush.bf16.msrb.mxu2 %v2270_v9 }
  0x90   : > { %1501 = vmatpush.bf16.msrb.mxu3 %v2278_v10 }
  0x91   : > { %1463 = vmatpush.bf16.msrb.mxu0 %v2253_v11 }
  0x92   : > { %1476 = vmatpush.bf16.msrb.mxu1 %v2261_v12 }
  0x93   : > { %1489 = vmatpush.bf16.msrb.mxu2 %v2269_v13 }
  0x94   : > { %1502 = vmatpush.bf16.msrb.mxu3 %v2277_v14  ;;  %1464 = vmatmul.bf16.vlgmr.msrb.gmra.mxu0 %v512_v15 }
  0x95   : > { %1477 = vmatmul.bf16.vlgmr.msrb.gmra.mxu1 %v513_v16 }
  0x96   : > { %1490 = vmatmul.bf16.vlgmr.msrb.gmra.mxu2 %v514_v17 }
  0x97   : > { %1503 = vmatmul.bf16.vlgmr.msrb.gmra.mxu3 %v515_v18 }
  0xb1   : > { %v1309_v19 = vpop.f32.mrf.mxu0 }
  0xb2   : > { %v1322_v20 = vpop.f32.mrf.mxu1 }
  0xb3   : > { %v1323_v21 = vadd.f32 %v1322_v20, %v1309_v19 }
  0xb9   : > { %v1335_v22 = vpop.f32.mrf.mxu2  ;;  %v1311_v25 = vpop.f32.mrf.mxu0 }
  0xba   : > { %v1336_v23 = vadd.f32 %v1335_v22, %v1323_v21  ;;  %v1348_v24 = vpop.f32.mrf.mxu3  ;;  %v1324_v27 = vpop.f32.mrf.mxu1 }
  0xbc   : > { %v1349_v26 = vadd.f32 %v1348_v24, %v1336_v23 }
  0xc1   : > { %v1337_v28 = vpop.f32.mrf.mxu2 }
  0xc2   : > { %v1350_v29 = vpop.f32.mrf.mxu3 }
  0xd1   : > { %v1361_v30 = vpop.f32.mrf.mxu0 }
  0xd2   : > { %v1374_v31 = vpop.f32.mrf.mxu1  ;;  %v1362_v40 = vadd.f32 %v1361_v30, %v1349_v26 }
  0xd4   : > { %v1375_v44 = vadd.f32 %v1374_v31, %v1362_v40 }
  0xd9   : > { %v1387_v32 = vpop.f32.mrf.mxu2  ;;  %v1363_v34 = vpop.f32.mrf.mxu0 }
  0xda   : > { %v1400_v33 = vpop.f32.mrf.mxu3  ;;  %v1376_v35 = vpop.f32.mrf.mxu1  ;;  %v1388_v46 = vadd.f32 %v1387_v32, %v1375_v44 }
  0xdc   : > { %v1401_v49 = vadd.f32 %v1400_v33, %v1388_v46 }
  0xe1   : > { %v1389_v36 = vpop.f32.mrf.mxu2 }
  0xe2   : > { %v1402_v37 = vpop.f32.mrf.mxu3 }
  0xf1   : > { %v1413_v38 = vpop.f32.mrf.mxu0 }
  0xf2   : > { %v1426_v39 = vpop.f32.mrf.mxu1  ;;  %v1414_v50 = vadd.f32 %v1413_v38, %v1401_v49 }
  0xf4   : > { %v1427_v51 = vadd.f32 %v1426_v39, %v1414_v50 }
  0xf9   : > { %v1439_v41 = vpop.f32.mrf.mxu2  ;;  %v1415_v43 = vpop.f32.mrf.mxu0 }
  0xfa   : > { %v1452_v42 = vpop.f32.mrf.mxu3  ;;  %v1428_v45 = vpop.f32.mrf.mxu1  ;;  %v1440_v52 = vadd.f32 %v1439_v41, %v1427_v51 }
  0xfc   : > { %v1453_v53 = vadd.f32 %v1452_v42, %v1440_v52 }
 0x101   : > { %v1441_v47 = vpop.f32.mrf.mxu2 }
 0x102   : > { %v1454_v48 = vpop.f32.mrf.mxu3 }
 0x111   : > { %v1465_v54 = vpop.f32.mrf.mxu0 }
 0x112   : > { %v1478_v55 = vpop.f32.mrf.mxu1  ;;  %v1466_v56 = vadd.f32 %v1465_v54, %v1453_v53 }
 0x114   : > { %v1479_v57 = vadd.f32 %v1478_v55, %v1466_v56 }
 0x119   : > { %v1491_v58 = vpop.f32.mrf.mxu2  ;;  %v1467_v61 = vpop.f32.mrf.mxu0 }
 0x11a   : > { %v1504_v59 = vpop.f32.mrf.mxu3  ;;  %v1492_v60 = vadd.f32 %v1491_v58, %v1479_v57  ;;  %v1480_v62 = vpop.f32.mrf.mxu1 }
 0x11c   : > { %v1505_v0 = vadd.f32 %v1504_v59, %v1492_v60 }
 0x11e   : > { %v1508_v1 = vadd.f32 %v1505_v0, %v237_v63  ;;  %1513 = sbr.rel (%p2151_p6) target bundleno = 480 (0x1e0), region = 48 }
 0x120   : > { %1509 = vst [vmem:[#allocation2] sm:$0x1] %v1508_v1 }
 0x121   : > { %v1493_v2 = vpop.f32.mrf.mxu2 }
 0x122   : > { %v1506_v3 = vpop.f32.mrf.mxu3 }
 0x123   : > { %v1532_v4 = vld [vmem:[%s2595_s3 + $0x78] sm:$0xff]  ;;  %v1531_v5 = vld [vmem:[%s2595_s3 + $0x70] sm:$0xff]  ;;  %v1530_v6 = vld [vmem:[%s2595_s3 + $0x68] sm:$0xff] }
 0x124   : > { %1534 = vmatpush.msra.mxu0 %v1532_v4  ;;  %v1529_v7 = vld [vmem:[%s2595_s3 + $0x60] sm:$0xff]  ;;  %v1528_v8 = vld [vmem:[%s2595_s3 + $0x58] sm:$0xff]  ;;  %v1527_v9 = vld [vmem:[%s2595_s3 + $0x50] sm:$0xff] }
 0x125   : > { %v1526_v10 = vld [vmem:[%s2595_s3 + $0x48] sm:$0xff]  ;;  %v1525_v11 = vld [vmem:[%s2595_s3 + $0x40] sm:$0xff]  ;;  %v1524_v12 = vld [vmem:[%s2595_s3 + $0x38] sm:$0xff] }
 0x126   : > { %1535 = vmatpush.msra.mxu0 %v1531_v5  ;;  %v1523_v13 = vld [vmem:[%s2595_s3 + $0x30] sm:$0xff]  ;;  %v1522_v14 = vld [vmem:[%s2595_s3 + $0x28] sm:$0xff]  ;;  %v1521_v15 = vld [vmem:[%s2595_s3 + $0x20] sm:$0xff] }
 0x127   : > { %v1520_v16 = vld [vmem:[%s2595_s3 + $0x18] sm:$0xff]  ;;  %v1519_v17 = vld [vmem:[%s2595_s3 + $0x10] sm:$0xff]  ;;  %v1514_v18 = vld [vmem:[#allocation2] sm:$0x1] }
 0x128   : > { %1536 = vmatpush.msra.mxu0 %v1530_v6  ;;  %v1515_v19 = vld [vmem:[%s2594_s2] sm:$0x1]  ;;  %v1518_v20 = vld [vmem:[%s2595_s3 + $0x8] sm:$0xff] }
 0x129   : > { %v1517_v21 = vld [vmem:[%s2595_s3] sm:$0xff]  ;;  %v1516_v22 = vadd.f32 %v1515_v19, %v1514_v18 }
 0x12a   : > { %1537 = vmatpush.msra.mxu0 %v1529_v7  ;;  %v1533_v23 = vld [vmem:[%s2596_s4] sm:$0x1] }
 0x12c   : > { %1538 = vmatpush.msra.mxu0 %v1528_v8 }
 0x12e   : > { %1539 = vmatpush.msra.mxu0 %v1527_v9 }
 0x130   : > { %1540 = vmatpush.msra.mxu0 %v1526_v10 }
 0x132   : > { %1541 = vmatpush.msra.mxu0 %v1525_v11 }
 0x134   : > { %1542 = vmatpush.msra.mxu0 %v1524_v12 }
 0x136   : > { %1543 = vmatpush.msra.mxu0 %v1523_v13 }
 0x138   : > { %1544 = vmatpush.msra.mxu0 %v1522_v14 }
 0x13a   : > { %1545 = vmatpush.msra.mxu0 %v1521_v15 }
 0x13c   : > { %1546 = vmatpush.msra.mxu0 %v1520_v16 }
 0x13e   : > { %1547 = vmatpush.msra.mxu0 %v1519_v17 }
 0x140   : > { %1548 = vmatpush.msra.mxu0 %v1518_v20 }
 0x142   : > { %1549 = vmatpush.msra.mxu0 %v1517_v21 }
 0x143   : > { %1550 = vmatmul.f32.vlgmr.msra.gmra.mxu0 %v1516_v22 }
 0x1c0   : > { %v1551_v24 = vpop.f32.mrf.mxu0 }
 0x1c1   : > { %v1552_v25 = vadd.f32 %v1551_v24, %v1533_v23 }
 0x1c3   : > { %v2152_v26 = vmul.f32 -1.442695, %v1552_v25 }
 0x1c5   : > { %2301 = vpow2.f32 %v2152_v26 }
 0x1cb   : > { %v2302_v27 = vpop.eup %2301 }
 0x1cc   : > { %v1557_v28 = vadd.f32 1.0, %v2302_v27 }
 0x1ce   : > { %2303 = vrcp.f32 %v1557_v28  ;;  %v1569_v32 = vand.u32 2147483648, %v1557_v28  ;;  %v1567_v34 = vand.u32 2147483647, %v1557_v28  ;;  %vm1563_vm1 = vweird.f32 %v1557_v28 }
 0x1d0   : > { %v1570_v36 = vor.u32 1.1754944e-38, %v1569_v32  ;;  %vm1568_vm3 = vcmp.eq.f32.partialorder %v1567_v34, 8.507059e+37 }
 0x1d4   : > { %v2304_v29 = vpop.eup %2303 }
 0x1d5   : > { %v1559_v30 = vmul.f32 %v2304_v29, %v1557_v28  ;;  %vm1564_vm0 = vweird.f32 %v2304_v29 }
 0x1d6   : > { %vm1565_vm2 = vmor %vm1563_vm1, %vm1564_vm0 }
 0x1d7   : > { %v1560_v31 = vsub.f32 1.0, %v1559_v30 }
 0x1d9   : > { %v1561_v33 = vmul.f32 %v2304_v29, %v1560_v31 }
 0x1db   : > { %v1562_v35 = vadd.f32 %v2304_v29, %v1561_v33 }
 0x1dd   : > { %v1566_v37 = vsel %vm1565_vm2, %v2304_v29, %v1562_v35 }
 0x1de   : > { %v1571_v38 = vsel %vm1568_vm3, %v1570_v36, %v1566_v37 }
 0x1df   : > { %1573 = vst [vmem:[#allocation3] sm:$0x1] %v1571_v38 }
 0x1e0 PF: > { %p2289_p7 = scmp.eq.s32.totalorder %s2383_s19, 1  ;;  %s2346_s17 = smov [#allocation3]  }
 0x1e1   : > { %s1580_s20 = sshll.u32 %s2346_s17, 4  ;;  %s1582_s23 = sshll.u32 %s2597_s5, 4  ;;  %s1581_s20 = int_to_ptr.vmem [resolvable:$true] %s1580_s20  ;;  %s1583_s23 = int_to_ptr.hbm [resolvable:$true] %s1582_s23 }
 0x1e2   : > { %2286 = dma.vmem_to_hbm [thread:$0]  (%p2289_p7), %s1581_s20, 16, %s1583_s23, [#allocation4]  }
 0x1e3   : > { %2338 = dma.done.wait (%p2289_p7), [#allocation4], 16  }
 0x1e4   : > { %2340 = vsyncadd (%p2289_p7), [#allocation4], 4294967280 }
 0x1e5 PF: > { %s16_s18 = sadd.s32 1, %s2343_s18  }
 0x1e6   : > { %p13_p8 = scmp.ge.s32.totalorder %s16_s18, 4  }
 0x1e8   :  { %15 = sbr.rel (!%p13_p8) target bundleno = 1 (0x1), region = 78 }
 0x1ed   :  { %1596 = vsyncpa [#allocation4], 1 }
 0x1ee   :  { %1598 = vsyncpa [#allocation4 + $0x1], 1 }

</bundles_post_ra>
